<compile_context>
chip_gen: v5e
topology: v5e:2x2
jax: 0.10.0
libtpu: 0.0.40
codegen_flags: <defaults>
</compile_context>

<pallas_src>
import math

import jax
import jax.numpy as jnp
from jax.experimental import pallas as pl
from jax.experimental.pallas import tpu as pltpu

F32 = jnp.float32
CPAD = 128           # channel axis padded to one full lane register
METAIN_TYPE = 1      # cfg.metain_type -- type 1: mask is NOT concatenated

# ----------------------------------------------------------------------------
# Network configs (stand-ins for parse_cfg(darknet_file) / parse_cfg(learnet_file))
# ----------------------------------------------------------------------------
DETECT_BLOCKS = [
    {'type': 'net', 'width': '16', 'height': '16', 'channels': '3'},
    {'type': 'convolutional', 'batch_normalize': '1', 'filters': '8',
     'size': '3', 'stride': '1', 'pad': '1', 'activation': 'leaky'},
    {'type': 'maxpool', 'size': '2', 'stride': '2'},
    {'type': 'convolutional', 'batch_normalize': '1', 'filters': '16',
     'size': '3', 'stride': '1', 'pad': '1', 'activation': 'leaky',
     'output_layer': '1'},
    {'type': 'route', 'layers': '-2'},
    {'type': 'convolutional', 'batch_normalize': '1', 'filters': '16',
     'size': '1', 'stride': '1', 'pad': '1', 'activation': 'leaky'},
    {'type': 'shortcut', 'from': '-3', 'activation': 'linear'},
    {'type': 'convolutional', 'batch_normalize': '0', 'filters': '16',
     'size': '1', 'stride': '1', 'pad': '1', 'activation': 'swish',
     'output_layer': '1'},
]

LEARNET_BLOCKS = [
    {'type': 'learnet', 'channels': '8', 'feat_layer': '2',
     'width': '16', 'height': '16'},
    {'type': 'convolutional', 'batch_normalize': '1', 'filters': '16',
     'size': '3', 'stride': '1', 'pad': '1', 'activation': 'leaky'},
    {'type': 'maxpool', 'size': '2', 'stride': '2'},
    {'type': 'globalmax'},
]


# ----------------------------------------------------------------------------
# Small helpers
# ----------------------------------------------------------------------------
def _full_spec(shape):
    """Whole-array block (block == full dims waives the (8,128) rule)."""
    nd = len(shape)
    return pl.BlockSpec(shape, lambda i, _nd=nd: (0,) * _nd)


def to_nhwc_padded(x_nchw):
    """NCHW -> NHWC with the channel axis zero-padded to CPAD lanes (done once)."""
    n, c, h, w = x_nchw.shape
    x = jnp.transpose(x_nchw, (0, 2, 3, 1))
    if c < CPAD:
        x = jnp.pad(x, ((0, 0), (0, 0), (0, 0), (0, CPAD - c)))
    return x


def pad_channels(x, c):
    if c < CPAD:
        return jnp.pad(x, ((0, 0), (0, 0), (0, 0), (0, CPAD - c)))
    return x


# ----------------------------------------------------------------------------
# Pallas kernels
# ----------------------------------------------------------------------------
def _make_conv_kernel(size, N, OH, OW, Cp, Fp, act):
    """Fused conv: sum over KHxKW taps of (M, Cp) @ (Cp, Fp) MXU matmuls,
    plus folded-BN shift and activation, in a single grid=(1,) block."""
    M = N * OH * OW

    def kernel(x_ref, w_ref, b_ref, o_ref):
        acc = None
        for di in range(size):
            for dj in range(size):
                # H window sliced on the ref (untiled dims); W window sliced on
                # the loaded value (static offset on the sublane dim); channel
                # (lane) axis kept whole -> lane-dense im2col built in VMEM.
                xt = x_ref[:, di:di + OH, :, :]
                if size > 1:
                    xt = xt[:, :, dj:dj + OW, :]
                xt = xt.reshape(M, Cp)
                # Default MXU precision (bf16 passes); acceptable drift vs the
                # PyTorch f32 conv.  Use precision=HIGHEST if parity matters.
                part = jnp.dot(xt, w_ref[di * size + dj],
                               preferred_element_type=jnp.float32)
                acc = part if acc is None else acc + part
        y = acc + b_ref[...]
        if act == 'leaky':
            y = jnp.where(y > 0, y, 0.1 * y)
        elif act == 'swish':
            y = y * jax.nn.sigmoid(y)
        o_ref[...] = y

    return kernel


def pallas_conv(xpad, wstack, shift, size, act):
    """xpad: (N, Hp, Wp, CPAD) spatially padded NHWC; wstack: (KH*KW, CPAD, CPAD)."""
    N, Hp, Wp, Cp = xpad.shape
    _, _, Fp = wstack.shape
    OH, OW = Hp - size + 1, Wp - size + 1
    M = N * OH * OW
    kernel = _make_conv_kernel(size, N, OH, OW, Cp, Fp, act)
    out = pl.pallas_call(
        kernel,
        out_shape=jax.ShapeDtypeStruct((M, Fp), F32),
        grid=(1,),
        in_specs=[_full_spec(xpad.shape), _full_spec(wstack.shape),
                  _full_spec(shift.shape)],
        out_specs=_full_spec((M, Fp)),
        compiler_params=pltpu.CompilerParams(dimension_semantics=("arbitrary",)),
    )(xpad, wstack, shift)
    return out.reshape(N, OH, OW, Fp)


def _max4_kernel(a_ref, b_ref, c_ref, d_ref, o_ref):
    o_ref[...] = jnp.maximum(jnp.maximum(a_ref[...], b_ref[...]),
                             jnp.maximum(c_ref[...], d_ref[...]))


def _add_kernel(a_ref, b_ref, o_ref):
    o_ref[...] = a_ref[...] + b_ref[...]


def _gmax_kernel(x_ref, o_ref):
    o_ref[...] = jnp.max(x_ref[...], axis=1)


def pallas_add(a, b):
    return pl.pallas_call(
        _add_kernel,
        out_shape=jax.ShapeDtypeStruct(a.shape, F32),
        grid=(1,),
        in_specs=[_full_spec(a.shape), _full_spec(b.shape)],
        out_specs=_full_spec(a.shape),
        compiler_params=pltpu.CompilerParams(dimension_semantics=("arbitrary",)),
    )(a, b)


# ----------------------------------------------------------------------------
# Layer forwards (activations stay channel-padded NHWC between layers)
# ----------------------------------------------------------------------------
def conv_forward(x, m):
    assert m['stride'] == 1  # TODO(synk): strided convs not needed by this config
    p = m['pad']
    if p:
        x = jnp.pad(x, ((0, 0), (p, p), (p, p), (0, 0)))
    return pallas_conv(x, m['wstack'], m['shift'], m['size'], m['act'])


def maxpool_forward(x, m):
    assert m['size'] == 2 and m['stride'] == 2
    a = x[:, 0::2, 0::2, :]
    b = x[:, 0::2, 1::2, :]
    c = x[:, 1::2, 0::2, :]
    d = x[:, 1::2, 1::2, :]
    return pl.pallas_call(
        _max4_kernel,
        out_shape=jax.ShapeDtypeStruct(a.shape, F32),
        grid=(1,),
        in_specs=[_full_spec(a.shape)] * 4,
        out_specs=_full_spec(a.shape),
        compiler_params=pltpu.CompilerParams(dimension_semantics=("arbitrary",)),
    )(a, b, c, d)


def globalmax_forward(x, channels):
    """GlobalMaxPool2d on padded NHWC -> NCHW (N, C, 1, 1) like the original."""
    N, H, W, Cp = x.shape
    r = x.reshape(N, H * W, Cp)
    out = pl.pallas_call(
        _gmax_kernel,
        out_shape=jax.ShapeDtypeStruct((N, Cp), F32),
        grid=(1,),
        in_specs=[_full_spec(r.shape)],
        out_specs=_full_spec((N, Cp)),
        compiler_params=pltpu.CompilerParams(dimension_semantics=("arbitrary",)),
    )(r)
    return out[:, :channels].reshape(N, channels, 1, 1)


def run_module(m, x):
    if m['type'] == 'conv':
        return conv_forward(x, m)
    if m['type'] == 'maxpool':
        return maxpool_forward(x, m)
    if m['type'] == 'globalmax':
        return globalmax_forward(x, m['channels'])
    raise ValueError('unknown module type %s' % m['type'])


# ----------------------------------------------------------------------------
# Network construction (mirrors Darknet.create_network); BN folded into weights
# ----------------------------------------------------------------------------
def create_network(blocks, key):
    output_filters = [int(blocks[0]['channels'])]
    modules, routs = [], []
    ind = -2
    filters = -1
    eps = 1e-5
    for mdef in blocks:
        ind += 1
        if mdef['type'] in ('net', 'learnet'):
            continue
        if mdef['type'] == 'convolutional':
            bn = int(mdef['batch_normalize'])
            filters = int(mdef['filters'])
            size = int(mdef['size'])
            stride = int(mdef['stride'])
            # Darknet semantics: pad = (size-1)//2 when 'pad' is set, so a 1x1
            # conv with cfg pad=1 still gets zero spatial padding (intentional).
            pad = (size - 1) // 2 if int(mdef['pad']) else 0
            in_ch = output_filters[-1]
            key, k_w, k1, k2, k3, k4, kb = jax.random.split(key, 7)
            w = jax.random.normal(k_w, (filters, in_ch, size, size), F32)
            w = w / math.sqrt(in_ch * size * size)
            if bn:
                gamma = 1.0 + 0.1 * jax.random.normal(k1, (filters,), F32)
                beta = 0.1 * jax.random.normal(k2, (filters,), F32)
                mean = 0.1 * jax.random.normal(k3, (filters,), F32)
                var = jax.random.uniform(k4, (filters,), F32, 0.5, 1.5)
                # inference-mode (running-stats) BatchNorm folded into scale/shift
                s = gamma / jnp.sqrt(var + eps)
                shift = beta - mean * s
            else:
                s = jnp.ones((filters,), F32)
                shift = 0.1 * jax.random.normal(kb, (filters,), F32)
            # Per-tap weights, BN scale folded in, padded once to (CPAD, CPAD).
            wstack = jnp.zeros((size * size, CPAD, CPAD), F32)
            for i in range(size):
                for j in range(size):
                    tap = w[:, :, i, j].T * s[None, :]        # (in_ch, filters)
                    wstack = wstack.at[i * size + j, :in_ch, :filters].set(tap)
            shift_p = jnp.zeros((1, CPAD), F32).at[0, :filters].set(shift)
            modules.append({'type': 'conv', 'wstack': wstack, 'shift': shift_p,
                            'size': size, 'stride': stride, 'pad': pad,
                            'act': mdef['activation'], 'filters': filters})
        elif mdef['type'] == 'maxpool':
            modules.append({'type': 'maxpool', 'size': int(mdef['size']),
                            'stride': int(mdef['stride'])})
        elif mdef['type'] == 'route':
            layers = [int(v) for v in mdef['layers'].split(',')]
            filters = sum(output_filters[i + 1 if i > 0 else i] for i in layers)
            routs.extend([l if l > 0 else l + ind for l in layers])
            modules.append({'type': 'route', 'layers': layers})
        elif mdef['type'] == 'shortcut':
            layer = int(mdef['from'])
            filters = output_filters[layer]
            routs.extend([ind + layer if layer < 0 else layer])
            modules.append({'type': 'shortcut', 'from': layer})
        elif mdef['type'] == 'globalmax':
            modules.append({'type': 'globalmax', 'channels': filters})
        else:
            modules.append({'type': 'empty'})
        output_filters.append(filters)
    out_channels = output_filters[1:]   # logical channels after module `ind`
    return modules, set(routs), out_channels, key


# ----------------------------------------------------------------------------
# meta_forward / detect_forward / forward (mirror Darknet)
# ----------------------------------------------------------------------------
def meta_forward(detect_modules, detect_out_channels,
                 learnet_blocks, learnet_modules, learnet_routs,
                 learnet_out_channels, metax_nchw, mask_nchw):
    feat_layer = int(learnet_blocks[0]['feat_layer'])
    done_split = False
    x_nchw = metax_nchw
    if feat_layer > 0 and x_nchw.shape[1] == 6:
        done_split = True
        x_nchw = jnp.concatenate(jnp.split(x_nchw, 2, axis=1), axis=0)
    metax = to_nhwc_padded(x_nchw)
    meta_c = x_nchw.shape[1]
    for i in range(feat_layer):
        metax = run_module(detect_modules[i], metax)
        meta_c = detect_out_channels[i]
    if done_split:
        half = metax.shape[0] // 2
        cat = jnp.concatenate(
            [metax[:half, ..., :meta_c], metax[half:, ..., :meta_c]], axis=-1)
        meta_c *= 2
        metax = pad_channels(cat, meta_c)
    if METAIN_TYPE in (2, 3):
        mask_nhwc = jnp.transpose(mask_nchw, (0, 2, 3, 1))
        cat = jnp.concatenate([metax[..., :meta_c], mask_nhwc], axis=-1)
        meta_c += mask_nchw.shape[1]
        metax = pad_channels(cat, meta_c)

    dynamic_weights = []
    ind = -2
    layer_outputs = []
    for block in learnet_blocks:
        ind += 1
        if block['type'] == 'learnet':
            continue
        elif block['type'] in ('convolutional', 'maxpool'):
            metax = run_module(learnet_modules[ind], metax)
        elif block['type'] == 'globalmax':
            metax = run_module(learnet_modules[ind], metax)
            dynamic_weights.append(metax)
        elif block['type'] == 'route':
            layers = [int(v) for v in block['layers'].split(',')]
            if len(layers) == 1:
                metax = layer_outputs[layers[0]][0]
            else:
                # TODO(synk): F.interpolate fallback on shape-mismatch concat not implemented.
                parts = [layer_outputs[i] for i in layers]
                cat = jnp.concatenate([p[0][..., :p[1]] for p in parts], axis=-1)
                metax = pad_channels(cat, cat.shape[-1])
        layer_outputs.append(
            (metax, learnet_out_channels[ind]) if ind in learnet_routs else None)
    return dynamic_weights


def detect_forward(blocks, modules, routs, out_channels, x_nchw, dynamic_weights):
    x = to_nhwc_padded(x_nchw)
    ind = -2
    layer_outputs = []
    output = []
    for block in blocks:
        ind += 1
        if block['type'] == 'net':
            continue
        elif block['type'] in ('convolutional', 'maxpool', 'upsample'):
            # TODO(synk): dynamic_conv2d (dynamic-weight convs) depends on an
            # undefined helper in the original; this config has no dynamic layers.
            x = run_module(modules[ind], x)
            if 'output_layer' in block and int(block['output_layer']) == 1:
                n, h, w, _ = x.shape
                c = out_channels[ind]
                output.append(
                    x[..., :c].transpose(0, 3, 1, 2).reshape(n, c, h * w))
        elif block['type'] == 'route':
            layers = [int(v) for v in block['layers'].split(',')]
            if len(layers) == 1:
                x = layer_outputs[layers[0]][0]
            else:
                # TODO(synk): F.interpolate fallback on shape-mismatch concat not implemented.
                parts = [layer_outputs[i] for i in layers]
                cat = jnp.concatenate([p[0][..., :p[1]] for p in parts], axis=-1)
                x = pad_channels(cat, cat.shape[-1])
        elif block['type'] == 'shortcut':
            x = pallas_add(x, layer_outputs[int(block['from'])][0])
        elif block['type'] == 'region':
            continue
        layer_outputs.append((x, out_channels[ind]) if ind in routs else None)
    return jnp.concatenate(output, axis=2)


def darknet_forward(blocks, modules, routs, out_channels,
                    learnet_blocks, learnet_modules, learnet_routs,
                    learnet_out_channels, x, metax, mask):
    dynamic_weights = meta_forward(modules, out_channels, learnet_blocks,
                                   learnet_modules, learnet_routs,
                                   learnet_out_channels, metax, mask)
    return detect_forward(blocks, modules, routs, out_channels, x,
                          dynamic_weights)


# ----------------------------------------------------------------------------
if __name__ == "__main__":
    key = jax.random.PRNGKey(0)
    key, kx, km, kmask, kparams = jax.random.split(key, 5)

    x = jax.random.normal(kx, (2, 3, 16, 16), F32)        # detection input (NCHW)
    metax = jax.random.normal(km, (2, 3, 16, 16), F32)    # meta input
    mask = jax.random.normal(kmask, (2, 1, 16, 16), F32)  # unused (metain_type=1)

    models, routs, out_ch, kparams = create_network(DETECT_BLOCKS, kparams)
    lmodels, lrouts, lout_ch, kparams = create_network(LEARNET_BLOCKS, kparams)

    @jax.jit
    def forward(x, metax, mask):
        return darknet_forward(DETECT_BLOCKS, models, routs, out_ch,
                               LEARNET_BLOCKS, lmodels, lrouts, lout_ch,
                               x, metax, mask)

    out = jax.block_until_ready(forward(x, metax, mask))
    assert out.shape == (2, 16, 128), out.shape
    assert out.dtype == jnp.float32
    print("KERNEL_OK")
</pallas_src>

<mosaic_0001>
module attributes {stable_mosaic.version = 11 : i64} {
  func.func @kernel(%arg0: i32, %arg1: memref<2x18x18x128xf32, #tpu.memory_space<vmem>>, %arg2: memref<9x128x128xf32, #tpu.memory_space<vmem>>, %arg3: memref<1x128xf32, #tpu.memory_space<vmem>>, %arg4: memref<512x128xf32, #tpu.memory_space<vmem>>) attributes {dimension_semantics = [#tpu.dimension_semantics<arbitrary>], iteration_bounds = array<i64: 1>, scalar_prefetch = 0 : i64, scratch_operands = 0 : i64, tpu.core_type = #tpu.core_type<tc>, window_params = [{pipeline_mode = #tpu.pipeline_mode<synchronous>, transform_indices = @transform_0, window_bounds = array<i64: 2, 18, 18, 128>}, {pipeline_mode = #tpu.pipeline_mode<synchronous>, transform_indices = @transform_1, window_bounds = array<i64: 9, 128, 128>}, {pipeline_mode = #tpu.pipeline_mode<synchronous>, transform_indices = @transform_2, window_bounds = array<i64: 1, 128>}, {pipeline_mode = #tpu.pipeline_mode<synchronous>, transform_indices = @transform_3, window_bounds = array<i64: 512, 128>}]} {
    %c0 = arith.constant 0 : index
    %c0_0 = arith.constant 0 : index
    %c0_1 = arith.constant 0 : index
    %c0_2 = arith.constant 0 : index
    %0 = vector.load %arg1[%c0, %c0_0, %c0_1, %c0_2] : memref<2x18x18x128xf32, #tpu.memory_space<vmem>>, vector<2x16x18x128xf32>
    %1 = vector.extract_strided_slice %0 {offsets = [0, 0, 0, 0], sizes = [2, 16, 16, 128], strides = [1, 1, 1, 1]} : vector<2x16x18x128xf32> to vector<2x16x16x128xf32>
    %2 = vector.shape_cast %1 : vector<2x16x16x128xf32> to vector<512x128xf32>
    %c0_3 = arith.constant 0 : index
    %c0_4 = arith.constant 0 : index
    %c0_5 = arith.constant 0 : index
    %3 = vector.load %arg2[%c0_3, %c0_4, %c0_5] : memref<9x128x128xf32, #tpu.memory_space<vmem>>, vector<1x128x128xf32>
    %4 = vector.shape_cast %3 : vector<1x128x128xf32> to vector<128x128xf32>
    %cst = arith.constant dense<0.000000e+00> : vector<512x128xf32>
    %5 = tpu.matmul %2, %4, %cst {dimension_numbers = #tpu.dot_dimension_numbers<[1], [0], [0], [1], [0, 0, 1, 1], [], []>} : vector<512x128xf32>, vector<128x128xf32>, vector<512x128xf32> -> vector<512x128xf32>
    %c0_6 = arith.constant 0 : index
    %c0_7 = arith.constant 0 : index
    %c0_8 = arith.constant 0 : index
    %c0_9 = arith.constant 0 : index
    %6 = vector.load %arg1[%c0_6, %c0_7, %c0_8, %c0_9] : memref<2x18x18x128xf32, #tpu.memory_space<vmem>>, vector<2x16x18x128xf32>
    %7 = vector.extract_strided_slice %6 {offsets = [0, 0, 1, 0], sizes = [2, 16, 16, 128], strides = [1, 1, 1, 1]} : vector<2x16x18x128xf32> to vector<2x16x16x128xf32>
    %8 = vector.shape_cast %7 : vector<2x16x16x128xf32> to vector<512x128xf32>
    %c1 = arith.constant 1 : index
    %c0_10 = arith.constant 0 : index
    %c0_11 = arith.constant 0 : index
    %9 = vector.load %arg2[%c1, %c0_10, %c0_11] : memref<9x128x128xf32, #tpu.memory_space<vmem>>, vector<1x128x128xf32>
    %10 = vector.shape_cast %9 : vector<1x128x128xf32> to vector<128x128xf32>
    %cst_12 = arith.constant dense<0.000000e+00> : vector<512x128xf32>
    %11 = tpu.matmul %8, %10, %cst_12 {dimension_numbers = #tpu.dot_dimension_numbers<[1], [0], [0], [1], [0, 0, 1, 1], [], []>} : vector<512x128xf32>, vector<128x128xf32>, vector<512x128xf32> -> vector<512x128xf32>
    %12 = arith.addf %5, %11 : vector<512x128xf32>
    %c0_13 = arith.constant 0 : index
    %c0_14 = arith.constant 0 : index
    %c0_15 = arith.constant 0 : index
    %c0_16 = arith.constant 0 : index
    %13 = vector.load %arg1[%c0_13, %c0_14, %c0_15, %c0_16] : memref<2x18x18x128xf32, #tpu.memory_space<vmem>>, vector<2x16x18x128xf32>
    %14 = vector.extract_strided_slice %13 {offsets = [0, 0, 2, 0], sizes = [2, 16, 16, 128], strides = [1, 1, 1, 1]} : vector<2x16x18x128xf32> to vector<2x16x16x128xf32>
    %15 = vector.shape_cast %14 : vector<2x16x16x128xf32> to vector<512x128xf32>
    %c2 = arith.constant 2 : index
    %c0_17 = arith.constant 0 : index
    %c0_18 = arith.constant 0 : index
    %16 = vector.load %arg2[%c2, %c0_17, %c0_18] : memref<9x128x128xf32, #tpu.memory_space<vmem>>, vector<1x128x128xf32>
    %17 = vector.shape_cast %16 : vector<1x128x128xf32> to vector<128x128xf32>
    %cst_19 = arith.constant dense<0.000000e+00> : vector<512x128xf32>
    %18 = tpu.matmul %15, %17, %cst_19 {dimension_numbers = #tpu.dot_dimension_numbers<[1], [0], [0], [1], [0, 0, 1, 1], [], []>} : vector<512x128xf32>, vector<128x128xf32>, vector<512x128xf32> -> vector<512x128xf32>
    %19 = arith.addf %12, %18 : vector<512x128xf32>
    %c0_20 = arith.constant 0 : index
    %c1_21 = arith.constant 1 : index
    %c0_22 = arith.constant 0 : index
    %c0_23 = arith.constant 0 : index
    %20 = vector.load %arg1[%c0_20, %c1_21, %c0_22, %c0_23] : memref<2x18x18x128xf32, #tpu.memory_space<vmem>>, vector<2x16x18x128xf32>
    %21 = vector.extract_strided_slice %20 {offsets = [0, 0, 0, 0], sizes = [2, 16, 16, 128], strides = [1, 1, 1, 1]} : vector<2x16x18x128xf32> to vector<2x16x16x128xf32>
    %22 = vector.shape_cast %21 : vector<2x16x16x128xf32> to vector<512x128xf32>
    %c3 = arith.constant 3 : index
    %c0_24 = arith.constant 0 : index
    %c0_25 = arith.constant 0 : index
    %23 = vector.load %arg2[%c3, %c0_24, %c0_25] : memref<9x128x128xf32, #tpu.memory_space<vmem>>, vector<1x128x128xf32>
    %24 = vector.shape_cast %23 : vector<1x128x128xf32> to vector<128x128xf32>
    %cst_26 = arith.constant dense<0.000000e+00> : vector<512x128xf32>
    %25 = tpu.matmul %22, %24, %cst_26 {dimension_numbers = #tpu.dot_dimension_numbers<[1], [0], [0], [1], [0, 0, 1, 1], [], []>} : vector<512x128xf32>, vector<128x128xf32>, vector<512x128xf32> -> vector<512x128xf32>
    %26 = arith.addf %19, %25 : vector<512x128xf32>
    %c0_27 = arith.constant 0 : index
    %c1_28 = arith.constant 1 : index
    %c0_29 = arith.constant 0 : index
    %c0_30 = arith.constant 0 : index
    %27 = vector.load %arg1[%c0_27, %c1_28, %c0_29, %c0_30] : memref<2x18x18x128xf32, #tpu.memory_space<vmem>>, vector<2x16x18x128xf32>
    %28 = vector.extract_strided_slice %27 {offsets = [0, 0, 1, 0], sizes = [2, 16, 16, 128], strides = [1, 1, 1, 1]} : vector<2x16x18x128xf32> to vector<2x16x16x128xf32>
    %29 = vector.shape_cast %28 : vector<2x16x16x128xf32> to vector<512x128xf32>
    %c4 = arith.constant 4 : index
    %c0_31 = arith.constant 0 : index
    %c0_32 = arith.constant 0 : index
    %30 = vector.load %arg2[%c4, %c0_31, %c0_32] : memref<9x128x128xf32, #tpu.memory_space<vmem>>, vector<1x128x128xf32>
    %31 = vector.shape_cast %30 : vector<1x128x128xf32> to vector<128x128xf32>
    %cst_33 = arith.constant dense<0.000000e+00> : vector<512x128xf32>
    %32 = tpu.matmul %29, %31, %cst_33 {dimension_numbers = #tpu.dot_dimension_numbers<[1], [0], [0], [1], [0, 0, 1, 1], [], []>} : vector<512x128xf32>, vector<128x128xf32>, vector<512x128xf32> -> vector<512x128xf32>
    %33 = arith.addf %26, %32 : vector<512x128xf32>
    %c0_34 = arith.constant 0 : index
    %c1_35 = arith.constant 1 : index
    %c0_36 = arith.constant 0 : index
    %c0_37 = arith.constant 0 : index
    %34 = vector.load %arg1[%c0_34, %c1_35, %c0_36, %c0_37] : memref<2x18x18x128xf32, #tpu.memory_space<vmem>>, vector<2x16x18x128xf32>
    %35 = vector.extract_strided_slice %34 {offsets = [0, 0, 2, 0], sizes = [2, 16, 16, 128], strides = [1, 1, 1, 1]} : vector<2x16x18x128xf32> to vector<2x16x16x128xf32>
    %36 = vector.shape_cast %35 : vector<2x16x16x128xf32> to vector<512x128xf32>
    %c5 = arith.constant 5 : index
    %c0_38 = arith.constant 0 : index
    %c0_39 = arith.constant 0 : index
    %37 = vector.load %arg2[%c5, %c0_38, %c0_39] : memref<9x128x128xf32, #tpu.memory_space<vmem>>, vector<1x128x128xf32>
    %38 = vector.shape_cast %37 : vector<1x128x128xf32> to vector<128x128xf32>
    %cst_40 = arith.constant dense<0.000000e+00> : vector<512x128xf32>
    %39 = tpu.matmul %36, %38, %cst_40 {dimension_numbers = #tpu.dot_dimension_numbers<[1], [0], [0], [1], [0, 0, 1, 1], [], []>} : vector<512x128xf32>, vector<128x128xf32>, vector<512x128xf32> -> vector<512x128xf32>
    %40 = arith.addf %33, %39 : vector<512x128xf32>
    %c0_41 = arith.constant 0 : index
    %c2_42 = arith.constant 2 : index
    %c0_43 = arith.constant 0 : index
    %c0_44 = arith.constant 0 : index
    %41 = vector.load %arg1[%c0_41, %c2_42, %c0_43, %c0_44] : memref<2x18x18x128xf32, #tpu.memory_space<vmem>>, vector<2x16x18x128xf32>
    %42 = vector.extract_strided_slice %41 {offsets = [0, 0, 0, 0], sizes = [2, 16, 16, 128], strides = [1, 1, 1, 1]} : vector<2x16x18x128xf32> to vector<2x16x16x128xf32>
    %43 = vector.shape_cast %42 : vector<2x16x16x128xf32> to vector<512x128xf32>
    %c6 = arith.constant 6 : index
    %c0_45 = arith.constant 0 : index
    %c0_46 = arith.constant 0 : index
    %44 = vector.load %arg2[%c6, %c0_45, %c0_46] : memref<9x128x128xf32, #tpu.memory_space<vmem>>, vector<1x128x128xf32>
    %45 = vector.shape_cast %44 : vector<1x128x128xf32> to vector<128x128xf32>
    %cst_47 = arith.constant dense<0.000000e+00> : vector<512x128xf32>
    %46 = tpu.matmul %43, %45, %cst_47 {dimension_numbers = #tpu.dot_dimension_numbers<[1], [0], [0], [1], [0, 0, 1, 1], [], []>} : vector<512x128xf32>, vector<128x128xf32>, vector<512x128xf32> -> vector<512x128xf32>
    %47 = arith.addf %40, %46 : vector<512x128xf32>
    %c0_48 = arith.constant 0 : index
    %c2_49 = arith.constant 2 : index
    %c0_50 = arith.constant 0 : index
    %c0_51 = arith.constant 0 : index
    %48 = vector.load %arg1[%c0_48, %c2_49, %c0_50, %c0_51] : memref<2x18x18x128xf32, #tpu.memory_space<vmem>>, vector<2x16x18x128xf32>
    %49 = vector.extract_strided_slice %48 {offsets = [0, 0, 1, 0], sizes = [2, 16, 16, 128], strides = [1, 1, 1, 1]} : vector<2x16x18x128xf32> to vector<2x16x16x128xf32>
    %50 = vector.shape_cast %49 : vector<2x16x16x128xf32> to vector<512x128xf32>
    %c7 = arith.constant 7 : index
    %c0_52 = arith.constant 0 : index
    %c0_53 = arith.constant 0 : index
    %51 = vector.load %arg2[%c7, %c0_52, %c0_53] : memref<9x128x128xf32, #tpu.memory_space<vmem>>, vector<1x128x128xf32>
    %52 = vector.shape_cast %51 : vector<1x128x128xf32> to vector<128x128xf32>
    %cst_54 = arith.constant dense<0.000000e+00> : vector<512x128xf32>
    %53 = tpu.matmul %50, %52, %cst_54 {dimension_numbers = #tpu.dot_dimension_numbers<[1], [0], [0], [1], [0, 0, 1, 1], [], []>} : vector<512x128xf32>, vector<128x128xf32>, vector<512x128xf32> -> vector<512x128xf32>
    %54 = arith.addf %47, %53 : vector<512x128xf32>
    %c0_55 = arith.constant 0 : index
    %c2_56 = arith.constant 2 : index
    %c0_57 = arith.constant 0 : index
    %c0_58 = arith.constant 0 : index
    %55 = vector.load %arg1[%c0_55, %c2_56, %c0_57, %c0_58] : memref<2x18x18x128xf32, #tpu.memory_space<vmem>>, vector<2x16x18x128xf32>
    %56 = vector.extract_strided_slice %55 {offsets = [0, 0, 2, 0], sizes = [2, 16, 16, 128], strides = [1, 1, 1, 1]} : vector<2x16x18x128xf32> to vector<2x16x16x128xf32>
    %57 = vector.shape_cast %56 : vector<2x16x16x128xf32> to vector<512x128xf32>
    %c8 = arith.constant 8 : index
    %c0_59 = arith.constant 0 : index
    %c0_60 = arith.constant 0 : index
    %58 = vector.load %arg2[%c8, %c0_59, %c0_60] : memref<9x128x128xf32, #tpu.memory_space<vmem>>, vector<1x128x128xf32>
    %59 = vector.shape_cast %58 : vector<1x128x128xf32> to vector<128x128xf32>
    %cst_61 = arith.constant dense<0.000000e+00> : vector<512x128xf32>
    %60 = tpu.matmul %57, %59, %cst_61 {dimension_numbers = #tpu.dot_dimension_numbers<[1], [0], [0], [1], [0, 0, 1, 1], [], []>} : vector<512x128xf32>, vector<128x128xf32>, vector<512x128xf32> -> vector<512x128xf32>
    %61 = arith.addf %54, %60 : vector<512x128xf32>
    %c0_62 = arith.constant 0 : index
    %c0_63 = arith.constant 0 : index
    %62 = vector.load %arg3[%c0_62, %c0_63] : memref<1x128xf32, #tpu.memory_space<vmem>>, vector<1x128xf32>
    %63 = vector.broadcast %62 : vector<1x128xf32> to vector<512x128xf32>
    %64 = arith.addf %61, %63 : vector<512x128xf32>
    %cst_64 = arith.constant 0.000000e+00 : f32
    %65 = vector.broadcast %cst_64 : f32 to vector<512x128xf32>
    %66 = arith.cmpf ogt, %64, %65 : vector<512x128xf32>
    %cst_65 = arith.constant 1.000000e-01 : f32
    %67 = vector.broadcast %cst_65 : f32 to vector<512x128xf32>
    %68 = arith.mulf %67, %64 : vector<512x128xf32>
    %69 = arith.select %66, %64, %68 : vector<512x128xi1>, vector<512x128xf32>
    %c0_66 = arith.constant 0 : index
    %c0_67 = arith.constant 0 : index
    %70 = vector.load %arg4[%c0_66, %c0_67] : memref<512x128xf32, #tpu.memory_space<vmem>>, vector<512x128xf32>
    tpu.vector_store %arg4[%c0_66, %c0_67], %69 {strides = array<i32>} : memref<512x128xf32, #tpu.memory_space<vmem>>, vector<512x128xf32>,
    return
  }
  func.func @transform_0(%arg0: i32) -> (i32, i32, i32, i32) {
    %c0_i32 = arith.constant 0 : i32
    %c0_i32_0 = arith.constant 0 : i32
    %c0_i32_1 = arith.constant 0 : i32
    %c0_i32_2 = arith.constant 0 : i32
    %c0_i32_3 = arith.constant 0 : i32
    return %c0_i32, %c0_i32_0, %c0_i32_1, %c0_i32_2 : i32, i32, i32, i32
  }
  func.func @transform_1(%arg0: i32) -> (i32, i32, i32) {
    %c0_i32 = arith.constant 0 : i32
    %c0_i32_0 = arith.constant 0 : i32
    %c0_i32_1 = arith.constant 0 : i32
    %c0_i32_2 = arith.constant 0 : i32
    return %c0_i32, %c0_i32_0, %c0_i32_1 : i32, i32, i32
  }
  func.func @transform_2(%arg0: i32) -> (i32, i32) {
    %c0_i32 = arith.constant 0 : i32
    %c0_i32_0 = arith.constant 0 : i32
    %c0_i32_1 = arith.constant 0 : i32
    return %c0_i32, %c0_i32_0 : i32, i32
  }
  func.func @transform_3(%arg0: i32) -> (i32, i32) {
    %c0_i32 = arith.constant 0 : i32
    %c0_i32_0 = arith.constant 0 : i32
    %c0_i32_1 = arith.constant 0 : i32
    return %c0_i32, %c0_i32_0 : i32, i32
  }
}

module attributes {stable_mosaic.version = 11 : i64} {
  func.func @kernel(%arg0: i32, %arg1: memref<2x8x8x128xf32, #tpu.memory_space<vmem>>, %arg2: memref<1x128x128xf32, #tpu.memory_space<vmem>>, %arg3: memref<1x128xf32, #tpu.memory_space<vmem>>, %arg4: memref<128x128xf32, #tpu.memory_space<vmem>>) attributes {dimension_semantics = [#tpu.dimension_semantics<arbitrary>], iteration_bounds = array<i64: 1>, scalar_prefetch = 0 : i64, scratch_operands = 0 : i64, tpu.core_type = #tpu.core_type<tc>, window_params = [{pipeline_mode = #tpu.pipeline_mode<synchronous>, transform_indices = @transform_0, window_bounds = array<i64: 2, 8, 8, 128>}, {pipeline_mode = #tpu.pipeline_mode<synchronous>, transform_indices = @transform_1, window_bounds = array<i64: 1, 128, 128>}, {pipeline_mode = #tpu.pipeline_mode<synchronous>, transform_indices = @transform_2, window_bounds = array<i64: 1, 128>}, {pipeline_mode = #tpu.pipeline_mode<synchronous>, transform_indices = @transform_3, window_bounds = array<i64: 128, 128>}]} {
    %c0 = arith.constant 0 : index
    %c0_0 = arith.constant 0 : index
    %c0_1 = arith.constant 0 : index
    %c0_2 = arith.constant 0 : index
    %0 = vector.load %arg1[%c0, %c0_0, %c0_1, %c0_2] : memref<2x8x8x128xf32, #tpu.memory_space<vmem>>, vector<2x8x8x128xf32>
    %1 = vector.shape_cast %0 : vector<2x8x8x128xf32> to vector<128x128xf32>
    %c0_3 = arith.constant 0 : index
    %c0_4 = arith.constant 0 : index
    %c0_5 = arith.constant 0 : index
    %2 = vector.load %arg2[%c0_3, %c0_4, %c0_5] : memref<1x128x128xf32, #tpu.memory_space<vmem>>, vector<1x128x128xf32>
    %3 = vector.shape_cast %2 : vector<1x128x128xf32> to vector<128x128xf32>
    %cst = arith.constant dense<0.000000e+00> : vector<128x128xf32>
    %4 = tpu.matmul %1, %3, %cst {dimension_numbers = #tpu.dot_dimension_numbers<[1], [0], [0], [1], [0, 0, 1, 1], [], []>} : vector<128x128xf32>, vector<128x128xf32>, vector<128x128xf32> -> vector<128x128xf32>
    %c0_6 = arith.constant 0 : index
    %c0_7 = arith.constant 0 : index
    %5 = vector.load %arg3[%c0_6, %c0_7] : memref<1x128xf32, #tpu.memory_space<vmem>>, vector<1x128xf32>
    %6 = vector.broadcast %5 : vector<1x128xf32> to vector<128x128xf32>
    %7 = arith.addf %4, %6 : vector<128x128xf32>
    %cst_8 = arith.constant 0.000000e+00 : f32
    %8 = vector.broadcast %cst_8 : f32 to vector<128x128xf32>
    %9 = arith.cmpf ogt, %7, %8 : vector<128x128xf32>
    %cst_9 = arith.constant 1.000000e-01 : f32
    %10 = vector.broadcast %cst_9 : f32 to vector<128x128xf32>
    %11 = arith.mulf %10, %7 : vector<128x128xf32>
    %12 = arith.select %9, %7, %11 : vector<128x128xi1>, vector<128x128xf32>
    %c0_10 = arith.constant 0 : index
    %c0_11 = arith.constant 0 : index
    %13 = vector.load %arg4[%c0_10, %c0_11] : memref<128x128xf32, #tpu.memory_space<vmem>>, vector<128x128xf32>
    tpu.vector_store %arg4[%c0_10, %c0_11], %12 {strides = array<i32>} : memref<128x128xf32, #tpu.memory_space<vmem>>, vector<128x128xf32>,
    return
  }
  func.func @transform_0(%arg0: i32) -> (i32, i32, i32, i32) {
    %c0_i32 = arith.constant 0 : i32
    %c0_i32_0 = arith.constant 0 : i32
    %c0_i32_1 = arith.constant 0 : i32
    %c0_i32_2 = arith.constant 0 : i32
    %c0_i32_3 = arith.constant 0 : i32
    return %c0_i32, %c0_i32_0, %c0_i32_1, %c0_i32_2 : i32, i32, i32, i32
  }
  func.func @transform_1(%arg0: i32) -> (i32, i32, i32) {
    %c0_i32 = arith.constant 0 : i32
    %c0_i32_0 = arith.constant 0 : i32
    %c0_i32_1 = arith.constant 0 : i32
    %c0_i32_2 = arith.constant 0 : i32
    return %c0_i32, %c0_i32_0, %c0_i32_1 : i32, i32, i32
  }
  func.func @transform_2(%arg0: i32) -> (i32, i32) {
    %c0_i32 = arith.constant 0 : i32
    %c0_i32_0 = arith.constant 0 : i32
    %c0_i32_1 = arith.constant 0 : i32
    return %c0_i32, %c0_i32_0 : i32, i32
  }
  func.func @transform_3(%arg0: i32) -> (i32, i32) {
    %c0_i32 = arith.constant 0 : i32
    %c0_i32_0 = arith.constant 0 : i32
    %c0_i32_1 = arith.constant 0 : i32
    return %c0_i32, %c0_i32_0 : i32, i32
  }
}

module attributes {stable_mosaic.version = 11 : i64} {
  func.func @_max4_kernel(%arg0: i32, %arg1: memref<2x8x8x128xf32, #tpu.memory_space<vmem>>, %arg2: memref<2x8x8x128xf32, #tpu.memory_space<vmem>>, %arg3: memref<2x8x8x128xf32, #tpu.memory_space<vmem>>, %arg4: memref<2x8x8x128xf32, #tpu.memory_space<vmem>>, %arg5: memref<2x8x8x128xf32, #tpu.memory_space<vmem>>) attributes {dimension_semantics = [#tpu.dimension_semantics<arbitrary>], iteration_bounds = array<i64: 1>, scalar_prefetch = 0 : i64, scratch_operands = 0 : i64, tpu.core_type = #tpu.core_type<tc>, window_params = [{pipeline_mode = #tpu.pipeline_mode<synchronous>, transform_indices = @transform_0, window_bounds = array<i64: 2, 8, 8, 128>}, {pipeline_mode = #tpu.pipeline_mode<synchronous>, transform_indices = @transform_1, window_bounds = array<i64: 2, 8, 8, 128>}, {pipeline_mode = #tpu.pipeline_mode<synchronous>, transform_indices = @transform_2, window_bounds = array<i64: 2, 8, 8, 128>}, {pipeline_mode = #tpu.pipeline_mode<synchronous>, transform_indices = @transform_3, window_bounds = array<i64: 2, 8, 8, 128>}, {pipeline_mode = #tpu.pipeline_mode<synchronous>, transform_indices = @transform_4, window_bounds = array<i64: 2, 8, 8, 128>}]} {
    %c0 = arith.constant 0 : index
    %c0_0 = arith.constant 0 : index
    %c0_1 = arith.constant 0 : index
    %c0_2 = arith.constant 0 : index
    %0 = vector.load %arg1[%c0, %c0_0, %c0_1, %c0_2] : memref<2x8x8x128xf32, #tpu.memory_space<vmem>>, vector<2x8x8x128xf32>
    %c0_3 = arith.constant 0 : index
    %c0_4 = arith.constant 0 : index
    %c0_5 = arith.constant 0 : index
    %c0_6 = arith.constant 0 : index
    %1 = vector.load %arg2[%c0_3, %c0_4, %c0_5, %c0_6] : memref<2x8x8x128xf32, #tpu.memory_space<vmem>>, vector<2x8x8x128xf32>
    %2 = arith.maximumf %0, %1 : vector<2x8x8x128xf32>
    %c0_7 = arith.constant 0 : index
    %c0_8 = arith.constant 0 : index
    %c0_9 = arith.constant 0 : index
    %c0_10 = arith.constant 0 : index
    %3 = vector.load %arg3[%c0_7, %c0_8, %c0_9, %c0_10] : memref<2x8x8x128xf32, #tpu.memory_space<vmem>>, vector<2x8x8x128xf32>
    %c0_11 = arith.constant 0 : index
    %c0_12 = arith.constant 0 : index
    %c0_13 = arith.constant 0 : index
    %c0_14 = arith.constant 0 : index
    %4 = vector.load %arg4[%c0_11, %c0_12, %c0_13, %c0_14] : memref<2x8x8x128xf32, #tpu.memory_space<vmem>>, vector<2x8x8x128xf32>
    %5 = arith.maximumf %3, %4 : vector<2x8x8x128xf32>
    %6 = arith.maximumf %2, %5 : vector<2x8x8x128xf32>
    %c0_15 = arith.constant 0 : index
    %c0_16 = arith.constant 0 : index
    %c0_17 = arith.constant 0 : index
    %c0_18 = arith.constant 0 : index
    %7 = vector.load %arg5[%c0_15, %c0_16, %c0_17, %c0_18] : memref<2x8x8x128xf32, #tpu.memory_space<vmem>>, vector<2x8x8x128xf32>
    tpu.vector_store %arg5[%c0_15, %c0_16, %c0_17, %c0_18], %6 {strides = array<i32>} : memref<2x8x8x128xf32, #tpu.memory_space<vmem>>, vector<2x8x8x128xf32>,
    return
  }
  func.func @transform_0(%arg0: i32) -> (i32, i32, i32, i32) {
    %c0_i32 = arith.constant 0 : i32
    %c0_i32_0 = arith.constant 0 : i32
    %c0_i32_1 = arith.constant 0 : i32
    %c0_i32_2 = arith.constant 0 : i32
    %c0_i32_3 = arith.constant 0 : i32
    return %c0_i32, %c0_i32_0, %c0_i32_1, %c0_i32_2 : i32, i32, i32, i32
  }
  func.func @transform_1(%arg0: i32) -> (i32, i32, i32, i32) {
    %c0_i32 = arith.constant 0 : i32
    %c0_i32_0 = arith.constant 0 : i32
    %c0_i32_1 = arith.constant 0 : i32
    %c0_i32_2 = arith.constant 0 : i32
    %c0_i32_3 = arith.constant 0 : i32
    return %c0_i32, %c0_i32_0, %c0_i32_1, %c0_i32_2 : i32, i32, i32, i32
  }
  func.func @transform_2(%arg0: i32) -> (i32, i32, i32, i32) {
    %c0_i32 = arith.constant 0 : i32
    %c0_i32_0 = arith.constant 0 : i32
    %c0_i32_1 = arith.constant 0 : i32
    %c0_i32_2 = arith.constant 0 : i32
    %c0_i32_3 = arith.constant 0 : i32
    return %c0_i32, %c0_i32_0, %c0_i32_1, %c0_i32_2 : i32, i32, i32, i32
  }
  func.func @transform_3(%arg0: i32) -> (i32, i32, i32, i32) {
    %c0_i32 = arith.constant 0 : i32
    %c0_i32_0 = arith.constant 0 : i32
    %c0_i32_1 = arith.constant 0 : i32
    %c0_i32_2 = arith.constant 0 : i32
    %c0_i32_3 = arith.constant 0 : i32
    return %c0_i32, %c0_i32_0, %c0_i32_1, %c0_i32_2 : i32, i32, i32, i32
  }
  func.func @transform_4(%arg0: i32) -> (i32, i32, i32, i32) {
    %c0_i32 = arith.constant 0 : i32
    %c0_i32_0 = arith.constant 0 : i32
    %c0_i32_1 = arith.constant 0 : i32
    %c0_i32_2 = arith.constant 0 : i32
    %c0_i32_3 = arith.constant 0 : i32
    return %c0_i32, %c0_i32_0, %c0_i32_1, %c0_i32_2 : i32, i32, i32, i32
  }
}

module attributes {stable_mosaic.version = 11 : i64} {
  func.func @kernel(%arg0: i32, %arg1: memref<2x10x10x128xf32, #tpu.memory_space<vmem>>, %arg2: memref<9x128x128xf32, #tpu.memory_space<vmem>>, %arg3: memref<1x128xf32, #tpu.memory_space<vmem>>, %arg4: memref<128x128xf32, #tpu.memory_space<vmem>>) attributes {dimension_semantics = [#tpu.dimension_semantics<arbitrary>], iteration_bounds = array<i64: 1>, scalar_prefetch = 0 : i64, scratch_operands = 0 : i64, tpu.core_type = #tpu.core_type<tc>, window_params = [{pipeline_mode = #tpu.pipeline_mode<synchronous>, transform_indices = @transform_0, window_bounds = array<i64: 2, 10, 10, 128>}, {pipeline_mode = #tpu.pipeline_mode<synchronous>, transform_indices = @transform_1, window_bounds = array<i64: 9, 128, 128>}, {pipeline_mode = #tpu.pipeline_mode<synchronous>, transform_indices = @transform_2, window_bounds = array<i64: 1, 128>}, {pipeline_mode = #tpu.pipeline_mode<synchronous>, transform_indices = @transform_3, window_bounds = array<i64: 128, 128>}]} {
    %c0 = arith.constant 0 : index
    %c0_0 = arith.constant 0 : index
    %c0_1 = arith.constant 0 : index
    %c0_2 = arith.constant 0 : index
    %0 = vector.load %arg1[%c0, %c0_0, %c0_1, %c0_2] : memref<2x10x10x128xf32, #tpu.memory_space<vmem>>, vector<2x8x10x128xf32>
    %1 = vector.extract_strided_slice %0 {offsets = [0, 0, 0, 0], sizes = [2, 8, 8, 128], strides = [1, 1, 1, 1]} : vector<2x8x10x128xf32> to vector<2x8x8x128xf32>
    %2 = vector.shape_cast %1 : vector<2x8x8x128xf32> to vector<128x128xf32>
    %c0_3 = arith.constant 0 : index
    %c0_4 = arith.constant 0 : index
    %c0_5 = arith.constant 0 : index
    %3 = vector.load %arg2[%c0_3, %c0_4, %c0_5] : memref<9x128x128xf32, #tpu.memory_space<vmem>>, vector<1x128x128xf32>
    %4 = vector.shape_cast %3 : vector<1x128x128xf32> to vector<128x128xf32>
    %cst = arith.constant dense<0.000000e+00> : vector<128x128xf32>
    %5 = tpu.matmul %2, %4, %cst {dimension_numbers = #tpu.dot_dimension_numbers<[1], [0], [0], [1], [0, 0, 1, 1], [], []>} : vector<128x128xf32>, vector<128x128xf32>, vector<128x128xf32> -> vector<128x128xf32>
    %c0_6 = arith.constant 0 : index
    %c0_7 = arith.constant 0 : index
    %c0_8 = arith.constant 0 : index
    %c0_9 = arith.constant 0 : index
    %6 = vector.load %arg1[%c0_6, %c0_7, %c0_8, %c0_9] : memref<2x10x10x128xf32, #tpu.memory_space<vmem>>, vector<2x8x10x128xf32>
    %7 = vector.extract_strided_slice %6 {offsets = [0, 0, 1, 0], sizes = [2, 8, 8, 128], strides = [1, 1, 1, 1]} : vector<2x8x10x128xf32> to vector<2x8x8x128xf32>
    %8 = vector.shape_cast %7 : vector<2x8x8x128xf32> to vector<128x128xf32>
    %c1 = arith.constant 1 : index
    %c0_10 = arith.constant 0 : index
    %c0_11 = arith.constant 0 : index
    %9 = vector.load %arg2[%c1, %c0_10, %c0_11] : memref<9x128x128xf32, #tpu.memory_space<vmem>>, vector<1x128x128xf32>
    %10 = vector.shape_cast %9 : vector<1x128x128xf32> to vector<128x128xf32>
    %cst_12 = arith.constant dense<0.000000e+00> : vector<128x128xf32>
    %11 = tpu.matmul %8, %10, %cst_12 {dimension_numbers = #tpu.dot_dimension_numbers<[1], [0], [0], [1], [0, 0, 1, 1], [], []>} : vector<128x128xf32>, vector<128x128xf32>, vector<128x128xf32> -> vector<128x128xf32>
    %12 = arith.addf %5, %11 : vector<128x128xf32>
    %c0_13 = arith.constant 0 : index
    %c0_14 = arith.constant 0 : index
    %c0_15 = arith.constant 0 : index
    %c0_16 = arith.constant 0 : index
    %13 = vector.load %arg1[%c0_13, %c0_14, %c0_15, %c0_16] : memref<2x10x10x128xf32, #tpu.memory_space<vmem>>, vector<2x8x10x128xf32>
    %14 = vector.extract_strided_slice %13 {offsets = [0, 0, 2, 0], sizes = [2, 8, 8, 128], strides = [1, 1, 1, 1]} : vector<2x8x10x128xf32> to vector<2x8x8x128xf32>
    %15 = vector.shape_cast %14 : vector<2x8x8x128xf32> to vector<128x128xf32>
    %c2 = arith.constant 2 : index
    %c0_17 = arith.constant 0 : index
    %c0_18 = arith.constant 0 : index
    %16 = vector.load %arg2[%c2, %c0_17, %c0_18] : memref<9x128x128xf32, #tpu.memory_space<vmem>>, vector<1x128x128xf32>
    %17 = vector.shape_cast %16 : vector<1x128x128xf32> to vector<128x128xf32>
    %cst_19 = arith.constant dense<0.000000e+00> : vector<128x128xf32>
    %18 = tpu.matmul %15, %17, %cst_19 {dimension_numbers = #tpu.dot_dimension_numbers<[1], [0], [0], [1], [0, 0, 1, 1], [], []>} : vector<128x128xf32>, vector<128x128xf32>, vector<128x128xf32> -> vector<128x128xf32>
    %19 = arith.addf %12, %18 : vector<128x128xf32>
    %c0_20 = arith.constant 0 : index
    %c1_21 = arith.constant 1 : index
    %c0_22 = arith.constant 0 : index
    %c0_23 = arith.constant 0 : index
    %20 = vector.load %arg1[%c0_20, %c1_21, %c0_22, %c0_23] : memref<2x10x10x128xf32, #tpu.memory_space<vmem>>, vector<2x8x10x128xf32>
    %21 = vector.extract_strided_slice %20 {offsets = [0, 0, 0, 0], sizes = [2, 8, 8, 128], strides = [1, 1, 1, 1]} : vector<2x8x10x128xf32> to vector<2x8x8x128xf32>
    %22 = vector.shape_cast %21 : vector<2x8x8x128xf32> to vector<128x128xf32>
    %c3 = arith.constant 3 : index
    %c0_24 = arith.constant 0 : index
    %c0_25 = arith.constant 0 : index
    %23 = vector.load %arg2[%c3, %c0_24, %c0_25] : memref<9x128x128xf32, #tpu.memory_space<vmem>>, vector<1x128x128xf32>
    %24 = vector.shape_cast %23 : vector<1x128x128xf32> to vector<128x128xf32>
    %cst_26 = arith.constant dense<0.000000e+00> : vector<128x128xf32>
    %25 = tpu.matmul %22, %24, %cst_26 {dimension_numbers = #tpu.dot_dimension_numbers<[1], [0], [0], [1], [0, 0, 1, 1], [], []>} : vector<128x128xf32>, vector<128x128xf32>, vector<128x128xf32> -> vector<128x128xf32>
    %26 = arith.addf %19, %25 : vector<128x128xf32>
    %c0_27 = arith.constant 0 : index
    %c1_28 = arith.constant 1 : index
    %c0_29 = arith.constant 0 : index
    %c0_30 = arith.constant 0 : index
    %27 = vector.load %arg1[%c0_27, %c1_28, %c0_29, %c0_30] : memref<2x10x10x128xf32, #tpu.memory_space<vmem>>, vector<2x8x10x128xf32>
    %28 = vector.extract_strided_slice %27 {offsets = [0, 0, 1, 0], sizes = [2, 8, 8, 128], strides = [1, 1, 1, 1]} : vector<2x8x10x128xf32> to vector<2x8x8x128xf32>
    %29 = vector.shape_cast %28 : vector<2x8x8x128xf32> to vector<128x128xf32>
    %c4 = arith.constant 4 : index
    %c0_31 = arith.constant 0 : index
    %c0_32 = arith.constant 0 : index
    %30 = vector.load %arg2[%c4, %c0_31, %c0_32] : memref<9x128x128xf32, #tpu.memory_space<vmem>>, vector<1x128x128xf32>
    %31 = vector.shape_cast %30 : vector<1x128x128xf32> to vector<128x128xf32>
    %cst_33 = arith.constant dense<0.000000e+00> : vector<128x128xf32>
    %32 = tpu.matmul %29, %31, %cst_33 {dimension_numbers = #tpu.dot_dimension_numbers<[1], [0], [0], [1], [0, 0, 1, 1], [], []>} : vector<128x128xf32>, vector<128x128xf32>, vector<128x128xf32> -> vector<128x128xf32>
    %33 = arith.addf %26, %32 : vector<128x128xf32>
    %c0_34 = arith.constant 0 : index
    %c1_35 = arith.constant 1 : index
    %c0_36 = arith.constant 0 : index
    %c0_37 = arith.constant 0 : index
    %34 = vector.load %arg1[%c0_34, %c1_35, %c0_36, %c0_37] : memref<2x10x10x128xf32, #tpu.memory_space<vmem>>, vector<2x8x10x128xf32>
    %35 = vector.extract_strided_slice %34 {offsets = [0, 0, 2, 0], sizes = [2, 8, 8, 128], strides = [1, 1, 1, 1]} : vector<2x8x10x128xf32> to vector<2x8x8x128xf32>
    %36 = vector.shape_cast %35 : vector<2x8x8x128xf32> to vector<128x128xf32>
    %c5 = arith.constant 5 : index
    %c0_38 = arith.constant 0 : index
    %c0_39 = arith.constant 0 : index
    %37 = vector.load %arg2[%c5, %c0_38, %c0_39] : memref<9x128x128xf32, #tpu.memory_space<vmem>>, vector<1x128x128xf32>
    %38 = vector.shape_cast %37 : vector<1x128x128xf32> to vector<128x128xf32>
    %cst_40 = arith.constant dense<0.000000e+00> : vector<128x128xf32>
    %39 = tpu.matmul %36, %38, %cst_40 {dimension_numbers = #tpu.dot_dimension_numbers<[1], [0], [0], [1], [0, 0, 1, 1], [], []>} : vector<128x128xf32>, vector<128x128xf32>, vector<128x128xf32> -> vector<128x128xf32>
    %40 = arith.addf %33, %39 : vector<128x128xf32>
    %c0_41 = arith.constant 0 : index
    %c2_42 = arith.constant 2 : index
    %c0_43 = arith.constant 0 : index
    %c0_44 = arith.constant 0 : index
    %41 = vector.load %arg1[%c0_41, %c2_42, %c0_43, %c0_44] : memref<2x10x10x128xf32, #tpu.memory_space<vmem>>, vector<2x8x10x128xf32>
    %42 = vector.extract_strided_slice %41 {offsets = [0, 0, 0, 0], sizes = [2, 8, 8, 128], strides = [1, 1, 1, 1]} : vector<2x8x10x128xf32> to vector<2x8x8x128xf32>
    %43 = vector.shape_cast %42 : vector<2x8x8x128xf32> to vector<128x128xf32>
    %c6 = arith.constant 6 : index
    %c0_45 = arith.constant 0 : index
    %c0_46 = arith.constant 0 : index
    %44 = vector.load %arg2[%c6, %c0_45, %c0_46] : memref<9x128x128xf32, #tpu.memory_space<vmem>>, vector<1x128x128xf32>
    %45 = vector.shape_cast %44 : vector<1x128x128xf32> to vector<128x128xf32>
    %cst_47 = arith.constant dense<0.000000e+00> : vector<128x128xf32>
    %46 = tpu.matmul %43, %45, %cst_47 {dimension_numbers = #tpu.dot_dimension_numbers<[1], [0], [0], [1], [0, 0, 1, 1], [], []>} : vector<128x128xf32>, vector<128x128xf32>, vector<128x128xf32> -> vector<128x128xf32>
    %47 = arith.addf %40, %46 : vector<128x128xf32>
    %c0_48 = arith.constant 0 : index
    %c2_49 = arith.constant 2 : index
    %c0_50 = arith.constant 0 : index
    %c0_51 = arith.constant 0 : index
    %48 = vector.load %arg1[%c0_48, %c2_49, %c0_50, %c0_51] : memref<2x10x10x128xf32, #tpu.memory_space<vmem>>, vector<2x8x10x128xf32>
    %49 = vector.extract_strided_slice %48 {offsets = [0, 0, 1, 0], sizes = [2, 8, 8, 128], strides = [1, 1, 1, 1]} : vector<2x8x10x128xf32> to vector<2x8x8x128xf32>
    %50 = vector.shape_cast %49 : vector<2x8x8x128xf32> to vector<128x128xf32>
    %c7 = arith.constant 7 : index
    %c0_52 = arith.constant 0 : index
    %c0_53 = arith.constant 0 : index
    %51 = vector.load %arg2[%c7, %c0_52, %c0_53] : memref<9x128x128xf32, #tpu.memory_space<vmem>>, vector<1x128x128xf32>
    %52 = vector.shape_cast %51 : vector<1x128x128xf32> to vector<128x128xf32>
    %cst_54 = arith.constant dense<0.000000e+00> : vector<128x128xf32>
    %53 = tpu.matmul %50, %52, %cst_54 {dimension_numbers = #tpu.dot_dimension_numbers<[1], [0], [0], [1], [0, 0, 1, 1], [], []>} : vector<128x128xf32>, vector<128x128xf32>, vector<128x128xf32> -> vector<128x128xf32>
    %54 = arith.addf %47, %53 : vector<128x128xf32>
    %c0_55 = arith.constant 0 : index
    %c2_56 = arith.constant 2 : index
    %c0_57 = arith.constant 0 : index
    %c0_58 = arith.constant 0 : index
    %55 = vector.load %arg1[%c0_55, %c2_56, %c0_57, %c0_58] : memref<2x10x10x128xf32, #tpu.memory_space<vmem>>, vector<2x8x10x128xf32>
    %56 = vector.extract_strided_slice %55 {offsets = [0, 0, 2, 0], sizes = [2, 8, 8, 128], strides = [1, 1, 1, 1]} : vector<2x8x10x128xf32> to vector<2x8x8x128xf32>
    %57 = vector.shape_cast %56 : vector<2x8x8x128xf32> to vector<128x128xf32>
    %c8 = arith.constant 8 : index
    %c0_59 = arith.constant 0 : index
    %c0_60 = arith.constant 0 : index
    %58 = vector.load %arg2[%c8, %c0_59, %c0_60] : memref<9x128x128xf32, #tpu.memory_space<vmem>>, vector<1x128x128xf32>
    %59 = vector.shape_cast %58 : vector<1x128x128xf32> to vector<128x128xf32>
    %cst_61 = arith.constant dense<0.000000e+00> : vector<128x128xf32>
    %60 = tpu.matmul %57, %59, %cst_61 {dimension_numbers = #tpu.dot_dimension_numbers<[1], [0], [0], [1], [0, 0, 1, 1], [], []>} : vector<128x128xf32>, vector<128x128xf32>, vector<128x128xf32> -> vector<128x128xf32>
    %61 = arith.addf %54, %60 : vector<128x128xf32>
    %c0_62 = arith.constant 0 : index
    %c0_63 = arith.constant 0 : index
    %62 = vector.load %arg3[%c0_62, %c0_63] : memref<1x128xf32, #tpu.memory_space<vmem>>, vector<1x128xf32>
    %63 = vector.broadcast %62 : vector<1x128xf32> to vector<128x128xf32>
    %64 = arith.addf %61, %63 : vector<128x128xf32>
    %cst_64 = arith.constant 0.000000e+00 : f32
    %65 = vector.broadcast %cst_64 : f32 to vector<128x128xf32>
    %66 = arith.cmpf ogt, %64, %65 : vector<128x128xf32>
    %cst_65 = arith.constant 1.000000e-01 : f32
    %67 = vector.broadcast %cst_65 : f32 to vector<128x128xf32>
    %68 = arith.mulf %67, %64 : vector<128x128xf32>
    %69 = arith.select %66, %64, %68 : vector<128x128xi1>, vector<128x128xf32>
    %c0_66 = arith.constant 0 : index
    %c0_67 = arith.constant 0 : index
    %70 = vector.load %arg4[%c0_66, %c0_67] : memref<128x128xf32, #tpu.memory_space<vmem>>, vector<128x128xf32>
    tpu.vector_store %arg4[%c0_66, %c0_67], %69 {strides = array<i32>} : memref<128x128xf32, #tpu.memory_space<vmem>>, vector<128x128xf32>,
    return
  }
  func.func @transform_0(%arg0: i32) -> (i32, i32, i32, i32) {
    %c0_i32 = arith.constant 0 : i32
    %c0_i32_0 = arith.constant 0 : i32
    %c0_i32_1 = arith.constant 0 : i32
    %c0_i32_2 = arith.constant 0 : i32
    %c0_i32_3 = arith.constant 0 : i32
    return %c0_i32, %c0_i32_0, %c0_i32_1, %c0_i32_2 : i32, i32, i32, i32
  }
  func.func @transform_1(%arg0: i32) -> (i32, i32, i32) {
    %c0_i32 = arith.constant 0 : i32
    %c0_i32_0 = arith.constant 0 : i32
    %c0_i32_1 = arith.constant 0 : i32
    %c0_i32_2 = arith.constant 0 : i32
    return %c0_i32, %c0_i32_0, %c0_i32_1 : i32, i32, i32
  }
  func.func @transform_2(%arg0: i32) -> (i32, i32) {
    %c0_i32 = arith.constant 0 : i32
    %c0_i32_0 = arith.constant 0 : i32
    %c0_i32_1 = arith.constant 0 : i32
    return %c0_i32, %c0_i32_0 : i32, i32
  }
  func.func @transform_3(%arg0: i32) -> (i32, i32) {
    %c0_i32 = arith.constant 0 : i32
    %c0_i32_0 = arith.constant 0 : i32
    %c0_i32_1 = arith.constant 0 : i32
    return %c0_i32, %c0_i32_0 : i32, i32
  }
}

module attributes {stable_mosaic.version = 11 : i64} {
  func.func @_add_kernel(%arg0: i32, %arg1: memref<2x8x8x128xf32, #tpu.memory_space<vmem>>, %arg2: memref<2x8x8x128xf32, #tpu.memory_space<vmem>>, %arg3: memref<2x8x8x128xf32, #tpu.memory_space<vmem>>) attributes {dimension_semantics = [#tpu.dimension_semantics<arbitrary>], iteration_bounds = array<i64: 1>, scalar_prefetch = 0 : i64, scratch_operands = 0 : i64, tpu.core_type = #tpu.core_type<tc>, window_params = [{pipeline_mode = #tpu.pipeline_mode<synchronous>, transform_indices = @transform_0, window_bounds = array<i64: 2, 8, 8, 128>}, {pipeline_mode = #tpu.pipeline_mode<synchronous>, transform_indices = @transform_1, window_bounds = array<i64: 2, 8, 8, 128>}, {pipeline_mode = #tpu.pipeline_mode<synchronous>, transform_indices = @transform_2, window_bounds = array<i64: 2, 8, 8, 128>}]} {
    %c0 = arith.constant 0 : index
    %c0_0 = arith.constant 0 : index
    %c0_1 = arith.constant 0 : index
    %c0_2 = arith.constant 0 : index
    %0 = vector.load %arg1[%c0, %c0_0, %c0_1, %c0_2] : memref<2x8x8x128xf32, #tpu.memory_space<vmem>>, vector<2x8x8x128xf32>
    %c0_3 = arith.constant 0 : index
    %c0_4 = arith.constant 0 : index
    %c0_5 = arith.constant 0 : index
    %c0_6 = arith.constant 0 : index
    %1 = vector.load %arg2[%c0_3, %c0_4, %c0_5, %c0_6] : memref<2x8x8x128xf32, #tpu.memory_space<vmem>>, vector<2x8x8x128xf32>
    %2 = arith.addf %0, %1 : vector<2x8x8x128xf32>
    %c0_7 = arith.constant 0 : index
    %c0_8 = arith.constant 0 : index
    %c0_9 = arith.constant 0 : index
    %c0_10 = arith.constant 0 : index
    %3 = vector.load %arg3[%c0_7, %c0_8, %c0_9, %c0_10] : memref<2x8x8x128xf32, #tpu.memory_space<vmem>>, vector<2x8x8x128xf32>
    tpu.vector_store %arg3[%c0_7, %c0_8, %c0_9, %c0_10], %2 {strides = array<i32>} : memref<2x8x8x128xf32, #tpu.memory_space<vmem>>, vector<2x8x8x128xf32>,
    return
  }
  func.func @transform_0(%arg0: i32) -> (i32, i32, i32, i32) {
    %c0_i32 = arith.constant 0 : i32
    %c0_i32_0 = arith.constant 0 : i32
    %c0_i32_1 = arith.constant 0 : i32
    %c0_i32_2 = arith.constant 0 : i32
    %c0_i32_3 = arith.constant 0 : i32
    return %c0_i32, %c0_i32_0, %c0_i32_1, %c0_i32_2 : i32, i32, i32, i32
  }
  func.func @transform_1(%arg0: i32) -> (i32, i32, i32, i32) {
    %c0_i32 = arith.constant 0 : i32
    %c0_i32_0 = arith.constant 0 : i32
    %c0_i32_1 = arith.constant 0 : i32
    %c0_i32_2 = arith.constant 0 : i32
    %c0_i32_3 = arith.constant 0 : i32
    return %c0_i32, %c0_i32_0, %c0_i32_1, %c0_i32_2 : i32, i32, i32, i32
  }
  func.func @transform_2(%arg0: i32) -> (i32, i32, i32, i32) {
    %c0_i32 = arith.constant 0 : i32
    %c0_i32_0 = arith.constant 0 : i32
    %c0_i32_1 = arith.constant 0 : i32
    %c0_i32_2 = arith.constant 0 : i32
    %c0_i32_3 = arith.constant 0 : i32
    return %c0_i32, %c0_i32_0, %c0_i32_1, %c0_i32_2 : i32, i32, i32, i32
  }
}

module attributes {stable_mosaic.version = 11 : i64} {
  func.func @kernel(%arg0: i32, %arg1: memref<2x8x8x128xf32, #tpu.memory_space<vmem>>, %arg2: memref<1x128x128xf32, #tpu.memory_space<vmem>>, %arg3: memref<1x128xf32, #tpu.memory_space<vmem>>, %arg4: memref<128x128xf32, #tpu.memory_space<vmem>>) attributes {dimension_semantics = [#tpu.dimension_semantics<arbitrary>], iteration_bounds = array<i64: 1>, scalar_prefetch = 0 : i64, scratch_operands = 0 : i64, tpu.core_type = #tpu.core_type<tc>, window_params = [{pipeline_mode = #tpu.pipeline_mode<synchronous>, transform_indices = @transform_0, window_bounds = array<i64: 2, 8, 8, 128>}, {pipeline_mode = #tpu.pipeline_mode<synchronous>, transform_indices = @transform_1, window_bounds = array<i64: 1, 128, 128>}, {pipeline_mode = #tpu.pipeline_mode<synchronous>, transform_indices = @transform_2, window_bounds = array<i64: 1, 128>}, {pipeline_mode = #tpu.pipeline_mode<synchronous>, transform_indices = @transform_3, window_bounds = array<i64: 128, 128>}]} {
    %c0 = arith.constant 0 : index
    %c0_0 = arith.constant 0 : index
    %c0_1 = arith.constant 0 : index
    %c0_2 = arith.constant 0 : index
    %0 = vector.load %arg1[%c0, %c0_0, %c0_1, %c0_2] : memref<2x8x8x128xf32, #tpu.memory_space<vmem>>, vector<2x8x8x128xf32>
    %1 = vector.shape_cast %0 : vector<2x8x8x128xf32> to vector<128x128xf32>
    %c0_3 = arith.constant 0 : index
    %c0_4 = arith.constant 0 : index
    %c0_5 = arith.constant 0 : index
    %2 = vector.load %arg2[%c0_3, %c0_4, %c0_5] : memref<1x128x128xf32, #tpu.memory_space<vmem>>, vector<1x128x128xf32>
    %3 = vector.shape_cast %2 : vector<1x128x128xf32> to vector<128x128xf32>
    %cst = arith.constant dense<0.000000e+00> : vector<128x128xf32>
    %4 = tpu.matmul %1, %3, %cst {dimension_numbers = #tpu.dot_dimension_numbers<[1], [0], [0], [1], [0, 0, 1, 1], [], []>} : vector<128x128xf32>, vector<128x128xf32>, vector<128x128xf32> -> vector<128x128xf32>
    %c0_6 = arith.constant 0 : index
    %c0_7 = arith.constant 0 : index
    %5 = vector.load %arg3[%c0_6, %c0_7] : memref<1x128xf32, #tpu.memory_space<vmem>>, vector<1x128xf32>
    %6 = vector.broadcast %5 : vector<1x128xf32> to vector<128x128xf32>
    %7 = arith.addf %4, %6 : vector<128x128xf32>
    %8 = arith.negf %7 : vector<128x128xf32>
    %9 = math.exp %8 : vector<128x128xf32>
    %cst_8 = arith.constant 1.000000e+00 : f32
    %10 = vector.broadcast %cst_8 : f32 to vector<128x128xf32>
    %11 = arith.addf %10, %9 : vector<128x128xf32>
    %12 = arith.divf %10, %11 : vector<128x128xf32>
    %13 = arith.mulf %7, %12 : vector<128x128xf32>
    %c0_9 = arith.constant 0 : index
    %c0_10 = arith.constant 0 : index
    %14 = vector.load %arg4[%c0_9, %c0_10] : memref<128x128xf32, #tpu.memory_space<vmem>>, vector<128x128xf32>
    tpu.vector_store %arg4[%c0_9, %c0_10], %13 {strides = array<i32>} : memref<128x128xf32, #tpu.memory_space<vmem>>, vector<128x128xf32>,
    return
  }
  func.func @transform_0(%arg0: i32) -> (i32, i32, i32, i32) {
    %c0_i32 = arith.constant 0 : i32
    %c0_i32_0 = arith.constant 0 : i32
    %c0_i32_1 = arith.constant 0 : i32
    %c0_i32_2 = arith.constant 0 : i32
    %c0_i32_3 = arith.constant 0 : i32
    return %c0_i32, %c0_i32_0, %c0_i32_1, %c0_i32_2 : i32, i32, i32, i32
  }
  func.func @transform_1(%arg0: i32) -> (i32, i32, i32) {
    %c0_i32 = arith.constant 0 : i32
    %c0_i32_0 = arith.constant 0 : i32
    %c0_i32_1 = arith.constant 0 : i32
    %c0_i32_2 = arith.constant 0 : i32
    return %c0_i32, %c0_i32_0, %c0_i32_1 : i32, i32, i32
  }
  func.func @transform_2(%arg0: i32) -> (i32, i32) {
    %c0_i32 = arith.constant 0 : i32
    %c0_i32_0 = arith.constant 0 : i32
    %c0_i32_1 = arith.constant 0 : i32
    return %c0_i32, %c0_i32_0 : i32, i32
  }
  func.func @transform_3(%arg0: i32) -> (i32, i32) {
    %c0_i32 = arith.constant 0 : i32
    %c0_i32_0 = arith.constant 0 : i32
    %c0_i32_1 = arith.constant 0 : i32
    return %c0_i32, %c0_i32_0 : i32, i32
  }
}

</mosaic_0001>

<bundles_post_ra>
// kernel: forward.9
= control target key start
LH: loop header
LB: loop body
LE: loop exit
PB: predicated region body
PF: predicated region fallthrough
CT: control target
= control target key end

     0   :  { %s417_s1 = inlined_call_operand.vmem [shape: f32[1,128,128], index: 1, kind: input, shape index: {}]   ;;  %s418_s2 = inlined_call_operand.vmem [shape: f32[1,128], index: 2, kind: input, shape index: {}]   ;;  %s419_s0 = inlined_call_operand.vmem [shape: f32[2,8,8,128], index: 0, kind: input, shape index: {}]   ;;  %s420_s3 = inlined_call_operand.vmem [shape: f32[128,128], index: 3, kind: output, shape index: {}]  }
   0x1   :  { %v45_v0 = vld [vmem:[%s417_s1 + $0x78] sm:$0xff]  ;;  %v44_v1 = vld [vmem:[%s417_s1 + $0x70] sm:$0xff]  ;;  %v43_v2 = vld [vmem:[%s417_s1 + $0x68] sm:$0xff] }
   0x2   :  { %184 = vmatpush.msra.mxu2 %v45_v0  ;;  %185 = vmatpush.msra.mxu3 %v45_v0  ;;  %v42_v3 = vld [vmem:[%s417_s1 + $0x60] sm:$0xff]  ;;  %v41_v4 = vld [vmem:[%s417_s1 + $0x58] sm:$0xff]  ;;  %v40_v5 = vld [vmem:[%s417_s1 + $0x50] sm:$0xff] }
   0x3   :  { %50 = vmatpush.msra.mxu0 %v45_v0  ;;  %183 = vmatpush.msra.mxu1 %v45_v0  ;;  %v39_v6 = vld [vmem:[%s417_s1 + $0x48] sm:$0xff]  ;;  %v38_v7 = vld [vmem:[%s417_s1 + $0x40] sm:$0xff]  ;;  %v37_v8 = vld [vmem:[%s417_s1 + $0x38] sm:$0xff] }
   0x4   :  { %187 = vmatpush.msra.mxu2 %v44_v1  ;;  %188 = vmatpush.msra.mxu3 %v44_v1  ;;  %v36_v9 = vld [vmem:[%s417_s1 + $0x30] sm:$0xff]  ;;  %v35_v10 = vld [vmem:[%s417_s1 + $0x28] sm:$0xff]  ;;  %v34_v11 = vld [vmem:[%s417_s1 + $0x20] sm:$0xff] }
   0x5   :  { %51 = vmatpush.msra.mxu0 %v44_v1  ;;  %186 = vmatpush.msra.mxu1 %v44_v1  ;;  %v33_v12 = vld [vmem:[%s417_s1 + $0x18] sm:$0xff]  ;;  %v32_v13 = vld [vmem:[%s417_s1 + $0x10] sm:$0xff]  ;;  %v31_v14 = vld [vmem:[%s417_s1 + $0x8] sm:$0xff] }
   0x6   :  { %190 = vmatpush.msra.mxu2 %v43_v2  ;;  %191 = vmatpush.msra.mxu3 %v43_v2  ;;  %v30_v15 = vld [vmem:[%s417_s1] sm:$0xff]  ;;  %v23_v20 = vld [vmem:[%s419_s0 + $0x48] sm:$0xff]  ;;  %v24_v24 = vld [vmem:[%s419_s0 + $0x50] sm:$0xff] }
   0x7   :  { %52 = vmatpush.msra.mxu0 %v43_v2  ;;  %189 = vmatpush.msra.mxu1 %v43_v2  ;;  %v22_v16 = vld [vmem:[%s419_s0 + $0x40] sm:$0xff]  ;;  %v27_v21 = vld [vmem:[%s419_s0 + $0x68] sm:$0xff]  ;;  %v28_v25 = vld [vmem:[%s419_s0 + $0x70] sm:$0xff] }
   0x8   :  { %193 = vmatpush.msra.mxu2 %v42_v3  ;;  %194 = vmatpush.msra.mxu3 %v42_v3  ;;  %v26_v17 = vld [vmem:[%s419_s0 + $0x60] sm:$0xff]  ;;  %v15_v22 = vld [vmem:[%s419_s0 + $0x8] sm:$0xff]  ;;  %v16_v26 = vld [vmem:[%s419_s0 + $0x10] sm:$0xff] }
   0x9   :  { %53 = vmatpush.msra.mxu0 %v42_v3  ;;  %192 = vmatpush.msra.mxu1 %v42_v3  ;;  %v14_v18 = vld [vmem:[%s419_s0] sm:$0xff]  ;;  %v19_v23 = vld [vmem:[%s419_s0 + $0x28] sm:$0xff]  ;;  %v20_v27 = vld [vmem:[%s419_s0 + $0x30] sm:$0xff] }
   0xa   :  { %196 = vmatpush.msra.mxu2 %v41_v4  ;;  %197 = vmatpush.msra.mxu3 %v41_v4  ;;  %v18_v19 = vld [vmem:[%s419_s0 + $0x20] sm:$0xff]  ;;  %v25_v28 = vld [vmem:[%s419_s0 + $0x58] sm:$0xff] }
   0xb   :  { %54 = vmatpush.msra.mxu0 %v41_v4  ;;  %195 = vmatpush.msra.mxu1 %v41_v4  ;;  %v29_v29 = vld [vmem:[%s419_s0 + $0x78] sm:$0xff]  ;;  %v351_v32 = vld [vmem:[%s418_s2] ss:$0 sm:$0xff] }
   0xc   :  { %199 = vmatpush.msra.mxu2 %v40_v5  ;;  %200 = vmatpush.msra.mxu3 %v40_v5  ;;  %v17_v30 = vld [vmem:[%s419_s0 + $0x18] sm:$0xff] }
   0xd   :  { %55 = vmatpush.msra.mxu0 %v40_v5  ;;  %198 = vmatpush.msra.mxu1 %v40_v5  ;;  %v21_v31 = vld [vmem:[%s419_s0 + $0x38] sm:$0xff] }
   0xe   :  { %202 = vmatpush.msra.mxu2 %v39_v6  ;;  %203 = vmatpush.msra.mxu3 %v39_v6 }
   0xf   :  { %56 = vmatpush.msra.mxu0 %v39_v6  ;;  %201 = vmatpush.msra.mxu1 %v39_v6 }
  0x10   :  { %205 = vmatpush.msra.mxu2 %v38_v7  ;;  %206 = vmatpush.msra.mxu3 %v38_v7 }
  0x11   :  { %57 = vmatpush.msra.mxu0 %v38_v7  ;;  %204 = vmatpush.msra.mxu1 %v38_v7 }
  0x12   :  { %208 = vmatpush.msra.mxu2 %v37_v8  ;;  %209 = vmatpush.msra.mxu3 %v37_v8 }
  0x13   :  { %58 = vmatpush.msra.mxu0 %v37_v8  ;;  %207 = vmatpush.msra.mxu1 %v37_v8 }
  0x14   :  { %211 = vmatpush.msra.mxu2 %v36_v9  ;;  %212 = vmatpush.msra.mxu3 %v36_v9 }
  0x15   :  { %59 = vmatpush.msra.mxu0 %v36_v9  ;;  %210 = vmatpush.msra.mxu1 %v36_v9 }
  0x16   :  { %214 = vmatpush.msra.mxu2 %v35_v10  ;;  %215 = vmatpush.msra.mxu3 %v35_v10 }
  0x17   :  { %60 = vmatpush.msra.mxu0 %v35_v10  ;;  %213 = vmatpush.msra.mxu1 %v35_v10 }
  0x18   :  { %217 = vmatpush.msra.mxu2 %v34_v11  ;;  %218 = vmatpush.msra.mxu3 %v34_v11 }
  0x19   :  { %61 = vmatpush.msra.mxu0 %v34_v11  ;;  %216 = vmatpush.msra.mxu1 %v34_v11 }
  0x1a   :  { %220 = vmatpush.msra.mxu2 %v33_v12  ;;  %221 = vmatpush.msra.mxu3 %v33_v12 }
  0x1b   :  { %62 = vmatpush.msra.mxu0 %v33_v12  ;;  %219 = vmatpush.msra.mxu1 %v33_v12 }
  0x1c   :  { %223 = vmatpush.msra.mxu2 %v32_v13  ;;  %224 = vmatpush.msra.mxu3 %v32_v13 }
  0x1d   :  { %63 = vmatpush.msra.mxu0 %v32_v13  ;;  %222 = vmatpush.msra.mxu1 %v32_v13 }
  0x1e   :  { %226 = vmatpush.msra.mxu2 %v31_v14  ;;  %227 = vmatpush.msra.mxu3 %v31_v14 }
  0x1f   :  { %64 = vmatpush.msra.mxu0 %v31_v14  ;;  %225 = vmatpush.msra.mxu1 %v31_v14 }
  0x20   :  { %229 = vmatpush.msra.mxu2 %v30_v15  ;;  %230 = vmatpush.msra.mxu3 %v30_v15 }
  0x21   :  { %90 = vmatmul.f32.vlgmr.msra.gmra.mxu2 %v22_v16  ;;  %102 = vmatmul.f32.vlgmr.msra.gmra.mxu3 %v26_v17 }
  0x22   :  { %65 = vmatpush.msra.mxu0 %v30_v15  ;;  %228 = vmatpush.msra.mxu1 %v30_v15 }
  0x23   :  { %66 = vmatmul.f32.vlgmr.msra.gmra.mxu0 %v14_v18  ;;  %78 = vmatmul.f32.vlgmr.msra.gmra.mxu1 %v18_v19 }
  0x29   :  { %93 = vmatmul.f32.gmra.mxu2 %v23_v20  ;;  %105 = vmatmul.f32.gmra.mxu3 %v27_v21 }
  0x2b   :  { %69 = vmatmul.f32.gmra.mxu0 %v15_v22  ;;  %81 = vmatmul.f32.gmra.mxu1 %v19_v23 }
  0x31   :  { %96 = vmatmul.f32.gmra.mxu2 %v24_v24  ;;  %108 = vmatmul.f32.gmra.mxu3 %v28_v25 }
  0x33   :  { %72 = vmatmul.f32.gmra.mxu0 %v16_v26  ;;  %84 = vmatmul.f32.gmra.mxu1 %v20_v27 }
  0x39   :  { %99 = vmatmul.f32.gmra.mxu2 %v25_v28  ;;  %111 = vmatmul.f32.gmra.mxu3 %v29_v29 }
  0x3b   :  { %75 = vmatmul.f32.gmra.mxu0 %v17_v30  ;;  %87 = vmatmul.f32.gmra.mxu1 %v21_v31 }
  0xa0   :  { %v67_v33 = vpop.f32.mrf.mxu0  ;;  %v79_v34 = vpop.f32.mrf.mxu1 }
  0xa1   :  { %v68_v35 = vadd.f32 %v351_v32, %v67_v33  ;;  %v80_v36 = vadd.f32 %v351_v32, %v79_v34 }
  0xa3   :  { %vm115_vm0 = vcmp.gt.f32.partialorder %v68_v35, 0.0  ;;  %v131_v37 = vmul.f32 0.1, %v68_v35  ;;  %vm119_vm1 = vcmp.gt.f32.partialorder %v80_v36, 0.0  ;;  %v135_v38 = vmul.f32 0.1, %v80_v36 }
  0xa4   :  { %v91_v39 = vpop.f32.mrf.mxu2  ;;  %v103_v40 = vpop.f32.mrf.mxu3 }
  0xa5   :  { %v147_v41 = vsel %vm115_vm0, %v68_v35, %v131_v37  ;;  %v151_v42 = vsel %vm119_vm1, %v80_v36, %v135_v38  ;;  %v92_v43 = vadd.f32 %v351_v32, %v91_v39  ;;  %v104_v44 = vadd.f32 %v351_v32, %v103_v40 }
  0xa6   :  { %163 = vst [vmem:[%s420_s3] sm:$0xff] %v147_v41 }
  0xa7   :  { %167 = vst [vmem:[%s420_s3 + $0x20] sm:$0xff] %v151_v42  ;;  %vm123_vm2 = vcmp.gt.f32.partialorder %v92_v43, 0.0  ;;  %v139_v45 = vmul.f32 0.1, %v92_v43  ;;  %vm127_vm3 = vcmp.gt.f32.partialorder %v104_v44, 0.0 }
  0xa8   :  { %v143_v46 = vmul.f32 0.1, %v104_v44  ;;  %v70_v47 = vpop.f32.mrf.mxu0  ;;  %v82_v48 = vpop.f32.mrf.mxu1 }
  0xa9   :  { %v155_v49 = vsel %vm123_vm2, %v92_v43, %v139_v45  ;;  %v71_v50 = vadd.f32 %v351_v32, %v70_v47  ;;  %v83_v51 = vadd.f32 %v351_v32, %v82_v48 }
  0xaa   :  { %171 = vst [vmem:[%s420_s3 + $0x40] sm:$0xff] %v155_v49  ;;  %v159_v52 = vsel %vm127_vm3, %v104_v44, %v143_v46 }
  0xab   :  { %175 = vst [vmem:[%s420_s3 + $0x60] sm:$0xff] %v159_v52  ;;  %vm116_vm4 = vcmp.gt.f32.partialorder %v71_v50, 0.0  ;;  %v132_v53 = vmul.f32 0.1, %v71_v50  ;;  %vm120_vm5 = vcmp.gt.f32.partialorder %v83_v51, 0.0 }
  0xac   :  { %v136_v54 = vmul.f32 0.1, %v83_v51  ;;  %v94_v55 = vpop.f32.mrf.mxu2  ;;  %v106_v56 = vpop.f32.mrf.mxu3 }
  0xad   :  { %v148_v57 = vsel %vm116_vm4, %v71_v50, %v132_v53  ;;  %v95_v58 = vadd.f32 %v351_v32, %v94_v55  ;;  %v107_v59 = vadd.f32 %v351_v32, %v106_v56 }
  0xae   :  { %164 = vst [vmem:[%s420_s3 + $0x8] sm:$0xff] %v148_v57  ;;  %v152_v60 = vsel %vm120_vm5, %v83_v51, %v136_v54 }
  0xaf   :  { %168 = vst [vmem:[%s420_s3 + $0x28] sm:$0xff] %v152_v60  ;;  %vm124_vm6 = vcmp.gt.f32.partialorder %v95_v58, 0.0  ;;  %v140_v61 = vmul.f32 0.1, %v95_v58  ;;  %vm128_vm7 = vcmp.gt.f32.partialorder %v107_v59, 0.0 }
  0xb0   :  { %v144_v62 = vmul.f32 0.1, %v107_v59  ;;  %v73_v63 = vpop.f32.mrf.mxu0  ;;  %v85_v0 = vpop.f32.mrf.mxu1 }
  0xb1   :  { %v156_v1 = vsel %vm124_vm6, %v95_v58, %v140_v61  ;;  %v74_v2 = vadd.f32 %v351_v32, %v73_v63  ;;  %v86_v3 = vadd.f32 %v351_v32, %v85_v0 }
  0xb2   :  { %172 = vst [vmem:[%s420_s3 + $0x48] sm:$0xff] %v156_v1  ;;  %v160_v4 = vsel %vm128_vm7, %v107_v59, %v144_v62 }
  0xb3   :  { %176 = vst [vmem:[%s420_s3 + $0x68] sm:$0xff] %v160_v4  ;;  %vm117_vm8 = vcmp.gt.f32.partialorder %v74_v2, 0.0  ;;  %v133_v5 = vmul.f32 0.1, %v74_v2  ;;  %vm121_vm9 = vcmp.gt.f32.partialorder %v86_v3, 0.0 }
  0xb4   :  { %v137_v6 = vmul.f32 0.1, %v86_v3  ;;  %v97_v7 = vpop.f32.mrf.mxu2  ;;  %v109_v8 = vpop.f32.mrf.mxu3 }
  0xb5   :  { %v149_v9 = vsel %vm117_vm8, %v74_v2, %v133_v5  ;;  %v98_v10 = vadd.f32 %v351_v32, %v97_v7  ;;  %v110_v11 = vadd.f32 %v351_v32, %v109_v8 }
  0xb6   :  { %165 = vst [vmem:[%s420_s3 + $0x10] sm:$0xff] %v149_v9  ;;  %v153_v12 = vsel %vm121_vm9, %v86_v3, %v137_v6 }
  0xb7   :  { %169 = vst [vmem:[%s420_s3 + $0x30] sm:$0xff] %v153_v12  ;;  %vm125_vm10 = vcmp.gt.f32.partialorder %v98_v10, 0.0  ;;  %v141_v13 = vmul.f32 0.1, %v98_v10  ;;  %vm129_vm11 = vcmp.gt.f32.partialorder %v110_v11, 0.0 }
  0xb8   :  { %v145_v14 = vmul.f32 0.1, %v110_v11  ;;  %v76_v15 = vpop.f32.mrf.mxu0  ;;  %v88_v16 = vpop.f32.mrf.mxu1 }
  0xb9   :  { %v157_v17 = vsel %vm125_vm10, %v98_v10, %v141_v13  ;;  %v77_v18 = vadd.f32 %v351_v32, %v76_v15  ;;  %v89_v19 = vadd.f32 %v351_v32, %v88_v16 }
  0xba   :  { %173 = vst [vmem:[%s420_s3 + $0x50] sm:$0xff] %v157_v17  ;;  %v161_v20 = vsel %vm129_vm11, %v110_v11, %v145_v14 }
  0xbb   :  { %177 = vst [vmem:[%s420_s3 + $0x70] sm:$0xff] %v161_v20  ;;  %vm118_vm12 = vcmp.gt.f32.partialorder %v77_v18, 0.0  ;;  %v134_v21 = vmul.f32 0.1, %v77_v18  ;;  %vm122_vm13 = vcmp.gt.f32.partialorder %v89_v19, 0.0 }
  0xbc   :  { %v138_v22 = vmul.f32 0.1, %v89_v19  ;;  %v100_v23 = vpop.f32.mrf.mxu2  ;;  %v112_v24 = vpop.f32.mrf.mxu3 }
  0xbd   :  { %v150_v25 = vsel %vm118_vm12, %v77_v18, %v134_v21  ;;  %v101_v26 = vadd.f32 %v351_v32, %v100_v23  ;;  %v113_v27 = vadd.f32 %v351_v32, %v112_v24 }
  0xbe   :  { %166 = vst [vmem:[%s420_s3 + $0x18] sm:$0xff] %v150_v25  ;;  %v154_v28 = vsel %vm122_vm13, %v89_v19, %v138_v22 }
  0xbf   :  { %170 = vst [vmem:[%s420_s3 + $0x38] sm:$0xff] %v154_v28  ;;  %vm126_vm14 = vcmp.gt.f32.partialorder %v101_v26, 0.0  ;;  %v142_v29 = vmul.f32 0.1, %v101_v26  ;;  %vm130_vm15 = vcmp.gt.f32.partialorder %v113_v27, 0.0 }
  0xc0   :  { %v146_v30 = vmul.f32 0.1, %v113_v27 }
  0xc1   :  { %v158_v31 = vsel %vm126_vm14, %v101_v26, %v142_v29 }
  0xc2   :  { %174 = vst [vmem:[%s420_s3 + $0x58] sm:$0xff] %v158_v31  ;;  %v162_v33 = vsel %vm130_vm15, %v113_v27, %v146_v30 }
  0xc3   :  { %178 = vst [vmem:[%s420_s3 + $0x78] sm:$0xff] %v162_v33 }

// kernel: forward.7
= control target key start
LH: loop header
LB: loop body
LE: loop exit
PB: predicated region body
PF: predicated region fallthrough
CT: control target
= control target key end

     0   :  { %s414_s0 = inlined_call_operand.vmem [shape: f32[2,8,8,128], index: 0, kind: input, shape index: {}]   ;;  %s415_s1 = inlined_call_operand.vmem [shape: f32[2,8,8,128], index: 1, kind: input, shape index: {}]   ;;  %s416_s2 = inlined_call_operand.vmem [shape: f32[2,8,8,128], index: 2, kind: input, shape index: {}]   ;;  %s417_s3 = inlined_call_operand.vmem [shape: f32[2,8,8,128], index: 3, kind: input, shape index: {}]   ;;  %s418_s4 = inlined_call_operand.vmem [shape: f32[2,8,8,128], index: 4, kind: output, shape index: {}]  }
   0x1   :  { %v17_v0 = vld [vmem:[%s414_s0] sm:$0xff]  ;;  %v18_v5 = vld [vmem:[%s414_s0 + $0x8] sm:$0xff]  ;;  %v19_v11 = vld [vmem:[%s414_s0 + $0x10] sm:$0xff] }
   0x2   :  { %v33_v1 = vld [vmem:[%s415_s1] sm:$0xff]  ;;  %v34_v6 = vld [vmem:[%s415_s1 + $0x8] sm:$0xff]  ;;  %v35_v13 = vld [vmem:[%s415_s1 + $0x10] sm:$0xff] }
   0x3   :  { %v65_v2 = vld [vmem:[%s416_s2] sm:$0xff]  ;;  %v49_v3 = vmax.f32 %v17_v0, %v33_v1  ;;  %v50_v8 = vmax.f32 %v18_v5, %v34_v6  ;;  %v66_v9 = vld [vmem:[%s416_s2 + $0x8] sm:$0xff]  ;;  %v67_v14 = vld [vmem:[%s416_s2 + $0x10] sm:$0xff]  ;;  %v51_v17 = vmax.f32 %v19_v11, %v35_v13 }
   0x4   :  { %v81_v4 = vld [vmem:[%s417_s3] sm:$0xff]  ;;  %v82_v10 = vld [vmem:[%s417_s3 + $0x8] sm:$0xff]  ;;  %v83_v15 = vld [vmem:[%s417_s3 + $0x10] sm:$0xff] }
   0x5   :  { %v97_v7 = vmax.f32 %v65_v2, %v81_v4  ;;  %v98_v12 = vmax.f32 %v66_v9, %v82_v10  ;;  %v99_v18 = vmax.f32 %v67_v14, %v83_v15  ;;  %v20_v19 = vld [vmem:[%s414_s0 + $0x18] sm:$0xff]  ;;  %v21_v25 = vld [vmem:[%s414_s0 + $0x20] sm:$0xff]  ;;  %v22_v32 = vld [vmem:[%s414_s0 + $0x28] sm:$0xff] }
   0x6   :  { %v36_v20 = vld [vmem:[%s415_s1 + $0x18] sm:$0xff]  ;;  %v37_v26 = vld [vmem:[%s415_s1 + $0x20] sm:$0xff]  ;;  %v38_v34 = vld [vmem:[%s415_s1 + $0x28] sm:$0xff] }
   0x7   :  { %v113_v16 = vmax.f32 %v49_v3, %v97_v7  ;;  %v68_v21 = vld [vmem:[%s416_s2 + $0x18] sm:$0xff]  ;;  %v114_v22 = vmax.f32 %v50_v8, %v98_v12  ;;  %v52_v23 = vmax.f32 %v20_v19, %v36_v20  ;;  %v115_v27 = vmax.f32 %v51_v17, %v99_v18  ;;  %v69_v30 = vld [vmem:[%s416_s2 + $0x20] sm:$0xff]  ;;  %v70_v35 = vld [vmem:[%s416_s2 + $0x28] sm:$0xff] }
   0x8   :  { %v84_v24 = vld [vmem:[%s417_s3 + $0x18] sm:$0xff]  ;;  %v53_v29 = vmax.f32 %v21_v25, %v37_v26  ;;  %v85_v31 = vld [vmem:[%s417_s3 + $0x20] sm:$0xff]  ;;  %v86_v36 = vld [vmem:[%s417_s3 + $0x28] sm:$0xff]  ;;  %v54_v38 = vmax.f32 %v22_v32, %v38_v34 }
   0x9   :  { %129 = vst [vmem:[%s418_s4] sm:$0xff] %v113_v16  ;;  %v100_v28 = vmax.f32 %v68_v21, %v84_v24  ;;  %v101_v33 = vmax.f32 %v69_v30, %v85_v31  ;;  %v102_v39 = vmax.f32 %v70_v35, %v86_v36  ;;  %v23_v40 = vld [vmem:[%s414_s0 + $0x30] sm:$0xff]  ;;  %v24_v46 = vld [vmem:[%s414_s0 + $0x38] sm:$0xff]  ;;  %v25_v53 = vld [vmem:[%s414_s0 + $0x40] sm:$0xff] }
   0xa   :  { %130 = vst [vmem:[%s418_s4 + $0x8] sm:$0xff] %v114_v22  ;;  %v39_v41 = vld [vmem:[%s415_s1 + $0x30] sm:$0xff]  ;;  %v40_v47 = vld [vmem:[%s415_s1 + $0x38] sm:$0xff]  ;;  %v41_v55 = vld [vmem:[%s415_s1 + $0x40] sm:$0xff] }
   0xb   :  { %131 = vst [vmem:[%s418_s4 + $0x10] sm:$0xff] %v115_v27  ;;  %v116_v37 = vmax.f32 %v52_v23, %v100_v28  ;;  %v71_v42 = vld [vmem:[%s416_s2 + $0x30] sm:$0xff]  ;;  %v117_v43 = vmax.f32 %v53_v29, %v101_v33  ;;  %v55_v44 = vmax.f32 %v23_v40, %v39_v41  ;;  %v118_v48 = vmax.f32 %v54_v38, %v102_v39  ;;  %v72_v51 = vld [vmem:[%s416_s2 + $0x38] sm:$0xff]  ;;  %v73_v56 = vld [vmem:[%s416_s2 + $0x40] sm:$0xff] }
   0xc   :  { %v87_v45 = vld [vmem:[%s417_s3 + $0x30] sm:$0xff]  ;;  %v56_v50 = vmax.f32 %v24_v46, %v40_v47  ;;  %v88_v52 = vld [vmem:[%s417_s3 + $0x38] sm:$0xff]  ;;  %v89_v57 = vld [vmem:[%s417_s3 + $0x40] sm:$0xff]  ;;  %v57_v59 = vmax.f32 %v25_v53, %v41_v55 }
   0xd   :  { %132 = vst [vmem:[%s418_s4 + $0x18] sm:$0xff] %v116_v37  ;;  %v103_v49 = vmax.f32 %v71_v42, %v87_v45  ;;  %v104_v54 = vmax.f32 %v72_v51, %v88_v52  ;;  %v105_v60 = vmax.f32 %v73_v56, %v89_v57  ;;  %v26_v61 = vld [vmem:[%s414_s0 + $0x48] sm:$0xff]  ;;  %v27_v3 = vld [vmem:[%s414_s0 + $0x50] sm:$0xff]  ;;  %v28_v10 = vld [vmem:[%s414_s0 + $0x58] sm:$0xff] }
   0xe   :  { %133 = vst [vmem:[%s418_s4 + $0x20] sm:$0xff] %v117_v43  ;;  %v42_v62 = vld [vmem:[%s415_s1 + $0x48] sm:$0xff]  ;;  %v43_v4 = vld [vmem:[%s415_s1 + $0x50] sm:$0xff]  ;;  %v44_v12 = vld [vmem:[%s415_s1 + $0x58] sm:$0xff] }
   0xf   :  { %134 = vst [vmem:[%s418_s4 + $0x28] sm:$0xff] %v118_v48  ;;  %v119_v58 = vmax.f32 %v55_v44, %v103_v49  ;;  %v74_v63 = vld [vmem:[%s416_s2 + $0x48] sm:$0xff]  ;;  %v120_v0 = vmax.f32 %v56_v50, %v104_v54  ;;  %v58_v1 = vmax.f32 %v26_v61, %v42_v62  ;;  %v121_v5 = vmax.f32 %v57_v59, %v105_v60  ;;  %v75_v8 = vld [vmem:[%s416_s2 + $0x50] sm:$0xff]  ;;  %v76_v13 = vld [vmem:[%s416_s2 + $0x58] sm:$0xff] }
  0x10   :  { %v90_v2 = vld [vmem:[%s417_s3 + $0x48] sm:$0xff]  ;;  %v59_v7 = vmax.f32 %v27_v3, %v43_v4  ;;  %v91_v9 = vld [vmem:[%s417_s3 + $0x50] sm:$0xff]  ;;  %v92_v14 = vld [vmem:[%s417_s3 + $0x58] sm:$0xff]  ;;  %v60_v16 = vmax.f32 %v28_v10, %v44_v12 }
  0x11   :  { %135 = vst [vmem:[%s418_s4 + $0x30] sm:$0xff] %v119_v58  ;;  %v106_v6 = vmax.f32 %v74_v63, %v90_v2  ;;  %v107_v11 = vmax.f32 %v75_v8, %v91_v9  ;;  %v108_v17 = vmax.f32 %v76_v13, %v92_v14  ;;  %v29_v18 = vld [vmem:[%s414_s0 + $0x60] sm:$0xff]  ;;  %v30_v24 = vld [vmem:[%s414_s0 + $0x68] sm:$0xff]  ;;  %v31_v31 = vld [vmem:[%s414_s0 + $0x70] sm:$0xff] }
  0x12   :  { %136 = vst [vmem:[%s418_s4 + $0x38] sm:$0xff] %v120_v0  ;;  %v45_v19 = vld [vmem:[%s415_s1 + $0x60] sm:$0xff]  ;;  %v46_v25 = vld [vmem:[%s415_s1 + $0x68] sm:$0xff]  ;;  %v47_v33 = vld [vmem:[%s415_s1 + $0x70] sm:$0xff] }
  0x13   :  { %137 = vst [vmem:[%s418_s4 + $0x40] sm:$0xff] %v121_v5  ;;  %v122_v15 = vmax.f32 %v58_v1, %v106_v6  ;;  %v77_v20 = vld [vmem:[%s416_s2 + $0x60] sm:$0xff]  ;;  %v123_v21 = vmax.f32 %v59_v7, %v107_v11  ;;  %v61_v22 = vmax.f32 %v29_v18, %v45_v19  ;;  %v124_v26 = vmax.f32 %v60_v16, %v108_v17  ;;  %v78_v29 = vld [vmem:[%s416_s2 + $0x68] sm:$0xff]  ;;  %v79_v34 = vld [vmem:[%s416_s2 + $0x70] sm:$0xff] }
  0x14   :  { %v93_v23 = vld [vmem:[%s417_s3 + $0x60] sm:$0xff]  ;;  %v62_v28 = vmax.f32 %v30_v24, %v46_v25  ;;  %v94_v30 = vld [vmem:[%s417_s3 + $0x68] sm:$0xff]  ;;  %v95_v35 = vld [vmem:[%s417_s3 + $0x70] sm:$0xff]  ;;  %v63_v37 = vmax.f32 %v31_v31, %v47_v33 }
  0x15   :  { %138 = vst [vmem:[%s418_s4 + $0x48] sm:$0xff] %v122_v15  ;;  %v109_v27 = vmax.f32 %v77_v20, %v93_v23  ;;  %v110_v32 = vmax.f32 %v78_v29, %v94_v30  ;;  %v111_v38 = vmax.f32 %v79_v34, %v95_v35  ;;  %v32_v39 = vld [vmem:[%s414_s0 + $0x78] sm:$0xff] }
  0x16   :  { %139 = vst [vmem:[%s418_s4 + $0x50] sm:$0xff] %v123_v21  ;;  %v48_v40 = vld [vmem:[%s415_s1 + $0x78] sm:$0xff] }
  0x17   :  { %140 = vst [vmem:[%s418_s4 + $0x58] sm:$0xff] %v124_v26  ;;  %v125_v36 = vmax.f32 %v61_v22, %v109_v27  ;;  %v80_v41 = vld [vmem:[%s416_s2 + $0x78] sm:$0xff]  ;;  %v126_v42 = vmax.f32 %v62_v28, %v110_v32  ;;  %v64_v43 = vmax.f32 %v32_v39, %v48_v40  ;;  %v127_v45 = vmax.f32 %v63_v37, %v111_v38 }
  0x18   :  { %v96_v44 = vld [vmem:[%s417_s3 + $0x78] sm:$0xff] }
  0x19   :  { %141 = vst [vmem:[%s418_s4 + $0x60] sm:$0xff] %v125_v36  ;;  %v112_v46 = vmax.f32 %v80_v41, %v96_v44 }
  0x1a   :  { %142 = vst [vmem:[%s418_s4 + $0x68] sm:$0xff] %v126_v42 }
  0x1b   :  { %143 = vst [vmem:[%s418_s4 + $0x70] sm:$0xff] %v127_v45  ;;  %v128_v47 = vmax.f32 %v64_v43, %v112_v46 }
  0x1d   :  { %144 = vst [vmem:[%s418_s4 + $0x78] sm:$0xff] %v128_v47 }

// kernel: forward.10
= control target key start
LH: loop header
LB: loop body
LE: loop exit
PB: predicated region body
PF: predicated region fallthrough
CT: control target
= control target key end

     0   :  { %s238_s0 = inlined_call_operand.vmem [shape: f32[2,8,8,128], index: 0, kind: input, shape index: {}]   ;;  %s239_s1 = inlined_call_operand.vmem [shape: f32[2,8,8,128], index: 1, kind: input, shape index: {}]   ;;  %s240_s2 = inlined_call_operand.vmem [shape: f32[2,8,8,128], index: 2, kind: output, shape index: {}]  }
   0x1   :  { %v11_v0 = vld [vmem:[%s238_s0] sm:$0xff]  ;;  %v12_v2 = vld [vmem:[%s238_s0 + $0x8] sm:$0xff]  ;;  %v13_v5 = vld [vmem:[%s238_s0 + $0x10] sm:$0xff] }
   0x2   :  { %v27_v1 = vld [vmem:[%s239_s1] sm:$0xff]  ;;  %v28_v4 = vld [vmem:[%s239_s1 + $0x8] sm:$0xff]  ;;  %v29_v6 = vld [vmem:[%s239_s1 + $0x10] sm:$0xff] }
   0x3   :  { %v43_v3 = vadd.f32 %v27_v1, %v11_v0  ;;  %v44_v7 = vadd.f32 %v28_v4, %v12_v2  ;;  %v45_v8 = vadd.f32 %v29_v6, %v13_v5  ;;  %v14_v9 = vld [vmem:[%s238_s0 + $0x18] sm:$0xff]  ;;  %v15_v11 = vld [vmem:[%s238_s0 + $0x20] sm:$0xff]  ;;  %v16_v14 = vld [vmem:[%s238_s0 + $0x28] sm:$0xff] }
   0x4   :  { %v30_v10 = vld [vmem:[%s239_s1 + $0x18] sm:$0xff]  ;;  %v31_v13 = vld [vmem:[%s239_s1 + $0x20] sm:$0xff]  ;;  %v32_v15 = vld [vmem:[%s239_s1 + $0x28] sm:$0xff] }
   0x5   :  { %59 = vst [vmem:[%s240_s2] sm:$0xff] %v43_v3  ;;  %v46_v12 = vadd.f32 %v30_v10, %v14_v9  ;;  %v47_v16 = vadd.f32 %v31_v13, %v15_v11  ;;  %v48_v17 = vadd.f32 %v32_v15, %v16_v14  ;;  %v17_v18 = vld [vmem:[%s238_s0 + $0x30] sm:$0xff]  ;;  %v18_v20 = vld [vmem:[%s238_s0 + $0x38] sm:$0xff]  ;;  %v19_v23 = vld [vmem:[%s238_s0 + $0x40] sm:$0xff] }
   0x6   :  { %60 = vst [vmem:[%s240_s2 + $0x8] sm:$0xff] %v44_v7  ;;  %v33_v19 = vld [vmem:[%s239_s1 + $0x30] sm:$0xff]  ;;  %v34_v22 = vld [vmem:[%s239_s1 + $0x38] sm:$0xff]  ;;  %v35_v24 = vld [vmem:[%s239_s1 + $0x40] sm:$0xff] }
   0x7   :  { %61 = vst [vmem:[%s240_s2 + $0x10] sm:$0xff] %v45_v8  ;;  %v49_v21 = vadd.f32 %v33_v19, %v17_v18  ;;  %v50_v25 = vadd.f32 %v34_v22, %v18_v20  ;;  %v20_v26 = vld [vmem:[%s238_s0 + $0x48] sm:$0xff]  ;;  %v21_v28 = vld [vmem:[%s238_s0 + $0x50] sm:$0xff]  ;;  %v51_v29 = vadd.f32 %v35_v24, %v19_v23  ;;  %v22_v31 = vld [vmem:[%s238_s0 + $0x58] sm:$0xff] }
   0x8   :  { %62 = vst [vmem:[%s240_s2 + $0x18] sm:$0xff] %v46_v12  ;;  %v36_v27 = vld [vmem:[%s239_s1 + $0x48] sm:$0xff]  ;;  %v37_v30 = vld [vmem:[%s239_s1 + $0x50] sm:$0xff]  ;;  %v38_v32 = vld [vmem:[%s239_s1 + $0x58] sm:$0xff] }
   0x9   :  { %63 = vst [vmem:[%s240_s2 + $0x20] sm:$0xff] %v47_v16  ;;  %v52_v33 = vadd.f32 %v36_v27, %v20_v26  ;;  %v23_v34 = vld [vmem:[%s238_s0 + $0x60] sm:$0xff]  ;;  %v53_v36 = vadd.f32 %v37_v30, %v21_v28  ;;  %v24_v37 = vld [vmem:[%s238_s0 + $0x68] sm:$0xff]  ;;  %v54_v39 = vadd.f32 %v38_v32, %v22_v31  ;;  %v25_v40 = vld [vmem:[%s238_s0 + $0x70] sm:$0xff] }
   0xa   :  { %64 = vst [vmem:[%s240_s2 + $0x28] sm:$0xff] %v48_v17  ;;  %v39_v35 = vld [vmem:[%s239_s1 + $0x60] sm:$0xff]  ;;  %v40_v38 = vld [vmem:[%s239_s1 + $0x68] sm:$0xff]  ;;  %v41_v41 = vld [vmem:[%s239_s1 + $0x70] sm:$0xff] }
   0xb   :  { %65 = vst [vmem:[%s240_s2 + $0x30] sm:$0xff] %v49_v21  ;;  %v55_v42 = vadd.f32 %v39_v35, %v23_v34  ;;  %v26_v43 = vld [vmem:[%s238_s0 + $0x78] sm:$0xff]  ;;  %v56_v45 = vadd.f32 %v40_v38, %v24_v37  ;;  %v57_v46 = vadd.f32 %v41_v41, %v25_v40 }
   0xc   :  { %66 = vst [vmem:[%s240_s2 + $0x38] sm:$0xff] %v50_v25  ;;  %v42_v44 = vld [vmem:[%s239_s1 + $0x78] sm:$0xff] }
   0xd   :  { %67 = vst [vmem:[%s240_s2 + $0x40] sm:$0xff] %v51_v29  ;;  %v58_v47 = vadd.f32 %v42_v44, %v26_v43 }
   0xe   :  { %68 = vst [vmem:[%s240_s2 + $0x48] sm:$0xff] %v52_v33 }
   0xf   :  { %69 = vst [vmem:[%s240_s2 + $0x50] sm:$0xff] %v53_v36 }
  0x10   :  { %70 = vst [vmem:[%s240_s2 + $0x58] sm:$0xff] %v54_v39 }
  0x11   :  { %71 = vst [vmem:[%s240_s2 + $0x60] sm:$0xff] %v55_v42 }
  0x12   :  { %72 = vst [vmem:[%s240_s2 + $0x68] sm:$0xff] %v56_v45 }
  0x13   :  { %73 = vst [vmem:[%s240_s2 + $0x70] sm:$0xff] %v57_v46 }
  0x14   :  { %74 = vst [vmem:[%s240_s2 + $0x78] sm:$0xff] %v58_v47 }

// kernel: forward.11
= control target key start
LH: loop header
LB: loop body
LE: loop exit
PB: predicated region body
PF: predicated region fallthrough
CT: control target
= control target key end

     0   :  { %s1023_s1 = inlined_call_operand.vmem [shape: f32[1,128,128], index: 1, kind: input, shape index: {}]   ;;  %s1024_s2 = inlined_call_operand.vmem [shape: f32[1,128], index: 2, kind: input, shape index: {}]   ;;  %s1025_s0 = inlined_call_operand.vmem [shape: f32[2,8,8,128], index: 0, kind: input, shape index: {}]   ;;  %s1026_s3 = inlined_call_operand.vmem [shape: f32[128,128], index: 3, kind: output, shape index: {}]  }
   0x1   :  { %v45_v0 = vld [vmem:[%s1023_s1 + $0x78] sm:$0xff]  ;;  %v44_v1 = vld [vmem:[%s1023_s1 + $0x70] sm:$0xff]  ;;  %v43_v2 = vld [vmem:[%s1023_s1 + $0x68] sm:$0xff] }
   0x2   :  { %50 = vmatpush.msra.mxu0 %v45_v0  ;;  %471 = vmatpush.msra.mxu1 %v45_v0  ;;  %v42_v3 = vld [vmem:[%s1023_s1 + $0x60] sm:$0xff]  ;;  %v41_v4 = vld [vmem:[%s1023_s1 + $0x58] sm:$0xff]  ;;  %v40_v5 = vld [vmem:[%s1023_s1 + $0x50] sm:$0xff] }
   0x3   :  { %472 = vmatpush.msra.mxu2 %v45_v0  ;;  %473 = vmatpush.msra.mxu3 %v45_v0  ;;  %v39_v6 = vld [vmem:[%s1023_s1 + $0x48] sm:$0xff]  ;;  %v38_v7 = vld [vmem:[%s1023_s1 + $0x40] sm:$0xff]  ;;  %v37_v8 = vld [vmem:[%s1023_s1 + $0x38] sm:$0xff] }
   0x4   :  { %51 = vmatpush.msra.mxu0 %v44_v1  ;;  %474 = vmatpush.msra.mxu1 %v44_v1  ;;  %v36_v9 = vld [vmem:[%s1023_s1 + $0x30] sm:$0xff]  ;;  %v35_v10 = vld [vmem:[%s1023_s1 + $0x28] sm:$0xff]  ;;  %v34_v11 = vld [vmem:[%s1023_s1 + $0x20] sm:$0xff] }
   0x5   :  { %475 = vmatpush.msra.mxu2 %v44_v1  ;;  %476 = vmatpush.msra.mxu3 %v44_v1  ;;  %v33_v12 = vld [vmem:[%s1023_s1 + $0x18] sm:$0xff]  ;;  %v32_v13 = vld [vmem:[%s1023_s1 + $0x10] sm:$0xff]  ;;  %v31_v14 = vld [vmem:[%s1023_s1 + $0x8] sm:$0xff] }
   0x6   :  { %52 = vmatpush.msra.mxu0 %v43_v2  ;;  %477 = vmatpush.msra.mxu1 %v43_v2  ;;  %v30_v15 = vld [vmem:[%s1023_s1] sm:$0xff]  ;;  %v15_v20 = vld [vmem:[%s1025_s0 + $0x8] sm:$0xff]  ;;  %v16_v24 = vld [vmem:[%s1025_s0 + $0x10] sm:$0xff] }
   0x7   :  { %478 = vmatpush.msra.mxu2 %v43_v2  ;;  %479 = vmatpush.msra.mxu3 %v43_v2  ;;  %v14_v16 = vld [vmem:[%s1025_s0] sm:$0xff]  ;;  %v19_v21 = vld [vmem:[%s1025_s0 + $0x28] sm:$0xff]  ;;  %v20_v25 = vld [vmem:[%s1025_s0 + $0x30] sm:$0xff] }
   0x8   :  { %53 = vmatpush.msra.mxu0 %v42_v3  ;;  %480 = vmatpush.msra.mxu1 %v42_v3  ;;  %v18_v17 = vld [vmem:[%s1025_s0 + $0x20] sm:$0xff]  ;;  %v23_v22 = vld [vmem:[%s1025_s0 + $0x48] sm:$0xff]  ;;  %v24_v26 = vld [vmem:[%s1025_s0 + $0x50] sm:$0xff] }
   0x9   :  { %481 = vmatpush.msra.mxu2 %v42_v3  ;;  %482 = vmatpush.msra.mxu3 %v42_v3  ;;  %v22_v18 = vld [vmem:[%s1025_s0 + $0x40] sm:$0xff]  ;;  %v27_v23 = vld [vmem:[%s1025_s0 + $0x68] sm:$0xff]  ;;  %v28_v27 = vld [vmem:[%s1025_s0 + $0x70] sm:$0xff] }
   0xa   :  { %54 = vmatpush.msra.mxu0 %v41_v4  ;;  %483 = vmatpush.msra.mxu1 %v41_v4  ;;  %v26_v19 = vld [vmem:[%s1025_s0 + $0x60] sm:$0xff]  ;;  %v17_v28 = vld [vmem:[%s1025_s0 + $0x18] sm:$0xff] }
   0xb   :  { %484 = vmatpush.msra.mxu2 %v41_v4  ;;  %485 = vmatpush.msra.mxu3 %v41_v4  ;;  %v21_v29 = vld [vmem:[%s1025_s0 + $0x38] sm:$0xff]  ;;  %v703_v32 = vld [vmem:[%s1024_s2] ss:$0 sm:$0xff] }
   0xc   :  { %55 = vmatpush.msra.mxu0 %v40_v5  ;;  %486 = vmatpush.msra.mxu1 %v40_v5  ;;  %v25_v30 = vld [vmem:[%s1025_s0 + $0x58] sm:$0xff] }
   0xd   :  { %487 = vmatpush.msra.mxu2 %v40_v5  ;;  %488 = vmatpush.msra.mxu3 %v40_v5  ;;  %v29_v31 = vld [vmem:[%s1025_s0 + $0x78] sm:$0xff] }
   0xe   :  { %56 = vmatpush.msra.mxu0 %v39_v6  ;;  %489 = vmatpush.msra.mxu1 %v39_v6 }
   0xf   :  { %490 = vmatpush.msra.mxu2 %v39_v6  ;;  %491 = vmatpush.msra.mxu3 %v39_v6 }
  0x10   :  { %57 = vmatpush.msra.mxu0 %v38_v7  ;;  %492 = vmatpush.msra.mxu1 %v38_v7 }
  0x11   :  { %493 = vmatpush.msra.mxu2 %v38_v7  ;;  %494 = vmatpush.msra.mxu3 %v38_v7 }
  0x12   :  { %58 = vmatpush.msra.mxu0 %v37_v8  ;;  %495 = vmatpush.msra.mxu1 %v37_v8 }
  0x13   :  { %496 = vmatpush.msra.mxu2 %v37_v8  ;;  %497 = vmatpush.msra.mxu3 %v37_v8 }
  0x14   :  { %59 = vmatpush.msra.mxu0 %v36_v9  ;;  %498 = vmatpush.msra.mxu1 %v36_v9 }
  0x15   :  { %499 = vmatpush.msra.mxu2 %v36_v9  ;;  %500 = vmatpush.msra.mxu3 %v36_v9 }
  0x16   :  { %60 = vmatpush.msra.mxu0 %v35_v10  ;;  %501 = vmatpush.msra.mxu1 %v35_v10 }
  0x17   :  { %502 = vmatpush.msra.mxu2 %v35_v10  ;;  %503 = vmatpush.msra.mxu3 %v35_v10 }
  0x18   :  { %61 = vmatpush.msra.mxu0 %v34_v11  ;;  %504 = vmatpush.msra.mxu1 %v34_v11 }
  0x19   :  { %505 = vmatpush.msra.mxu2 %v34_v11  ;;  %506 = vmatpush.msra.mxu3 %v34_v11 }
  0x1a   :  { %62 = vmatpush.msra.mxu0 %v33_v12  ;;  %507 = vmatpush.msra.mxu1 %v33_v12 }
  0x1b   :  { %508 = vmatpush.msra.mxu2 %v33_v12  ;;  %509 = vmatpush.msra.mxu3 %v33_v12 }
  0x1c   :  { %63 = vmatpush.msra.mxu0 %v32_v13  ;;  %510 = vmatpush.msra.mxu1 %v32_v13 }
  0x1d   :  { %511 = vmatpush.msra.mxu2 %v32_v13  ;;  %512 = vmatpush.msra.mxu3 %v32_v13 }
  0x1e   :  { %64 = vmatpush.msra.mxu0 %v31_v14  ;;  %513 = vmatpush.msra.mxu1 %v31_v14 }
  0x1f   :  { %514 = vmatpush.msra.mxu2 %v31_v14  ;;  %515 = vmatpush.msra.mxu3 %v31_v14 }
  0x20   :  { %65 = vmatpush.msra.mxu0 %v30_v15  ;;  %516 = vmatpush.msra.mxu1 %v30_v15 }
  0x21   :  { %517 = vmatpush.msra.mxu2 %v30_v15  ;;  %518 = vmatpush.msra.mxu3 %v30_v15 }
  0x22   :  { %66 = vmatmul.f32.vlgmr.msra.gmra.mxu0 %v14_v16  ;;  %78 = vmatmul.f32.vlgmr.msra.gmra.mxu1 %v18_v17 }
  0x23   :  { %90 = vmatmul.f32.vlgmr.msra.gmra.mxu2 %v22_v18  ;;  %102 = vmatmul.f32.vlgmr.msra.gmra.mxu3 %v26_v19 }
  0x2a   :  { %69 = vmatmul.f32.gmra.mxu0 %v15_v20  ;;  %81 = vmatmul.f32.gmra.mxu1 %v19_v21 }
  0x2b   :  { %93 = vmatmul.f32.gmra.mxu2 %v23_v22  ;;  %105 = vmatmul.f32.gmra.mxu3 %v27_v23 }
  0x32   :  { %72 = vmatmul.f32.gmra.mxu0 %v16_v24  ;;  %84 = vmatmul.f32.gmra.mxu1 %v20_v25 }
  0x33   :  { %96 = vmatmul.f32.gmra.mxu2 %v24_v26  ;;  %108 = vmatmul.f32.gmra.mxu3 %v28_v27 }
  0x3a   :  { %75 = vmatmul.f32.gmra.mxu0 %v17_v28  ;;  %87 = vmatmul.f32.gmra.mxu1 %v21_v29 }
  0x3b   :  { %99 = vmatmul.f32.gmra.mxu2 %v25_v30  ;;  %111 = vmatmul.f32.gmra.mxu3 %v29_v31 }
  0x9f   :  { %v67_v33 = vpop.f32.mrf.mxu0  ;;  %v79_v34 = vpop.f32.mrf.mxu1 }
  0xa0   :  { %v706_v35 = vadd.f32 %v703_v32, %v67_v33  ;;  %v709_v36 = vadd.f32 %v703_v32, %v79_v34 }
  0xa2   :  { %v455_v37 = vmul.f32 -1.442695, %v706_v35  ;;  %v459_v38 = vmul.f32 -1.442695, %v709_v36 }
  0xa4   :  { %520 = vpow2.f32 %v455_v37 }
  0xa5   :  { %522 = vpow2.f32 %v459_v38 }
  0xa6   :  { %v91_v39 = vpop.f32.mrf.mxu2  ;;  %v103_v40 = vpop.f32.mrf.mxu3 }
  0xa7   :  { %v714_v41 = vadd.f32 %v703_v32, %v91_v39  ;;  %v717_v42 = vadd.f32 %v703_v32, %v103_v40  ;;  %v70_v43 = vpop.f32.mrf.mxu0  ;;  %v82_v44 = vpop.f32.mrf.mxu1 }
  0xa8   :  { %v720_v45 = vadd.f32 %v703_v32, %v70_v43  ;;  %v723_v46 = vadd.f32 %v703_v32, %v82_v44 }
  0xa9   :  { %v463_v47 = vmul.f32 -1.442695, %v714_v41  ;;  %v467_v48 = vmul.f32 -1.442695, %v717_v42 }
  0xaa   :  { %v521_v49 = vpop.eup %520  ;;  %v456_v52 = vmul.f32 -1.442695, %v720_v45  ;;  %v460_v54 = vmul.f32 -1.442695, %v723_v46 }
  0xab   :  { %v523_v50 = vpop.eup %522  ;;  %v727_v51 = vadd.f32 1.0, %v521_v49  ;;  %524 = vpow2.f32 %v463_v47 }
  0xac   :  { %v730_v53 = vadd.f32 1.0, %v523_v50  ;;  %526 = vpow2.f32 %v467_v48 }
  0xad   :  { %528 = vrcp.f32 %v727_v51  ;;  %v188_v59 = vand.u32 2147483647, %v727_v51  ;;  %v190_v60 = vand.u32 2147483648, %v727_v51  ;;  %vm184_vm0 = vweird.f32 %v727_v51 }
  0xae   :  { %530 = vrcp.f32 %v730_v53  ;;  %v94_v55 = vpop.f32.mrf.mxu2  ;;  %v106_v56 = vpop.f32.mrf.mxu3  ;;  %v248_v62 = vand.u32 2147483647, %v730_v53  ;;  %v250_v63 = vand.u32 2147483648, %v730_v53  ;;  %vm244_vm1 = vweird.f32 %v730_v53 }
  0xaf   :  { %532 = vpow2.f32 %v456_v52  ;;  %v736_v57 = vadd.f32 %v703_v32, %v94_v55  ;;  %v73_v58 = vpop.f32.mrf.mxu0  ;;  %v744_v1 = vadd.f32 %v703_v32, %v106_v56  ;;  %v85_v7 = vpop.f32.mrf.mxu1  ;;  %vm756_vm2 = vcmp.eq.f32.partialorder %v188_v59, 8.507059e+37 }
  0xb0   :  { %534 = vpow2.f32 %v460_v54  ;;  %v749_v4 = vadd.f32 %v703_v32, %v73_v58  ;;  %v191_v11 = vor.u32 1.1754944e-38, %v190_v60  ;;  %vm762_vm3 = vcmp.eq.f32.partialorder %v248_v62, 8.507059e+37 }
  0xb1   :  { %v525_v61 = vpop.eup %524  ;;  %v464_v0 = vmul.f32 -1.442695, %v736_v57  ;;  %v251_v15 = vor.u32 1.1754944e-38, %v250_v63  ;;  %v468_v16 = vmul.f32 -1.442695, %v744_v1  ;;  %v770_v20 = vadd.f32 %v703_v32, %v85_v7 }
  0xb2   :  { %v527_v2 = vpop.eup %526  ;;  %v746_v3 = vadd.f32 1.0, %v525_v61  ;;  %v457_v19 = vmul.f32 -1.442695, %v749_v4 }
  0xb3   :  { %v529_v5 = vpop.eup %528  ;;  %v753_v6 = vadd.f32 1.0, %v527_v2  ;;  %v783_v33 = vmul.f32 -1.442695, %v770_v20 }
  0xb4   :  { %v531_v8 = vpop.eup %530  ;;  %v180_v9 = vmul.f32 %v529_v5, %v727_v51  ;;  %536 = vrcp.f32 %v746_v3  ;;  %vm185_vm4 = vweird.f32 %v529_v5  ;;  %v308_v22 = vand.u32 2147483647, %v746_v3 }
  0xb5   :  { %v533_v12 = vpop.eup %532  ;;  %v240_v13 = vmul.f32 %v531_v8, %v730_v53  ;;  %538 = vpow2.f32 %v464_v0  ;;  %v310_v23 = vand.u32 2147483648, %v746_v3  ;;  %v370_v25 = vand.u32 2147483648, %v753_v6  ;;  %vm186_vm7 = vmor %vm184_vm0, %vm185_vm4 }
  0xb6   :  { %v535_v17 = vpop.eup %534  ;;  %v181_v18 = vsub.f32 1.0, %v180_v9  ;;  %540 = vrcp.f32 %v753_v6  ;;  %v775_v26 = vadd.f32 1.0, %v533_v12  ;;  %vm245_vm5 = vweird.f32 %v531_v8  ;;  %v97_v40 = vpop.f32.mrf.mxu2 }
  0xb7   :  { %v241_v21 = vsub.f32 1.0, %v240_v13  ;;  %v777_v27 = vadd.f32 1.0, %v535_v17  ;;  %v368_v29 = vand.u32 2147483647, %v753_v6  ;;  %542 = vpow2.f32 %v468_v16  ;;  %vm246_vm10 = vmor %vm244_vm1, %vm245_vm5 }
  0xb8   :  { %v182_v24 = vmul.f32 %v529_v5, %v181_v18  ;;  %vm304_vm6 = vweird.f32 %v746_v3  ;;  %544 = vrcp.f32 %v775_v26  ;;  %vm789_vm8 = vcmp.eq.f32.partialorder %v308_v22, 8.507059e+37 }
  0xb9   :  { %v242_v28 = vmul.f32 %v531_v8, %v241_v21  ;;  %vm364_vm9 = vweird.f32 %v753_v6  ;;  %v311_v47 = vor.u32 1.1754944e-38, %v310_v23  ;;  %v371_v48 = vor.u32 1.1754944e-38, %v370_v25 }
  0xba   :  { %v537_v30 = vpop.eup %536  ;;  %v183_v31 = vadd.f32 %v529_v5, %v182_v24  ;;  %546 = vrcp.f32 %v777_v27  ;;  %vm801_vm11 = vcmp.eq.f32.partialorder %v368_v29, 8.507059e+37  ;;  %v203_v56 = vand.u32 2147483647, %v775_v26 }
  0xbb   :  { %v539_v34 = vpop.eup %538  ;;  %v243_v37 = vadd.f32 %v531_v8, %v242_v28  ;;  %v300_v38 = vmul.f32 %v537_v30, %v746_v3  ;;  %v810_v58 = vadd.f32 %v703_v32, %v97_v40  ;;  %vm305_vm12 = vweird.f32 %v537_v30  ;;  %v109_v28 = vpop.f32.mrf.mxu3 }
  0xbc   :  { %v541_v43 = vpop.eup %540  ;;  %v187_v44 = vsel %vm186_vm7, %v529_v5, %v183_v31  ;;  %vm199_vm13 = vweird.f32 %v775_v26  ;;  %v818_v0 = vadd.f32 1.0, %v539_v34  ;;  %548 = vpow2.f32 %v457_v19  ;;  %vm306_vm15 = vmor %vm304_vm6, %vm305_vm12 }
  0xbd   :  { %v192_v49 = vsel %vm756_vm2, %v191_v11, %v187_v44  ;;  %v247_v50 = vsel %vm246_vm10, %v531_v8, %v243_v37  ;;  %v301_v51 = vsub.f32 1.0, %v300_v38  ;;  %v360_v52 = vmul.f32 %v541_v43, %v753_v6  ;;  %v543_v59 = vpop.eup %542 }
  0xbe   :  { %v419_v55 = vmul.f32 %v192_v49, %v706_v35  ;;  %v252_v53 = vsel %vm762_vm3, %v251_v15, %v247_v50  ;;  %v545_v63 = vpop.eup %544  ;;  %v205_v35 = vand.u32 2147483648, %v775_v26  ;;  %vm365_vm14 = vweird.f32 %v541_v43 }
  0xbf   :  { %v423_v60 = vmul.f32 %v252_v53, %v709_v36  ;;  %v302_v61 = vmul.f32 %v537_v30, %v301_v51  ;;  %v361_v62 = vsub.f32 1.0, %v360_v52  ;;  %v195_v5 = vmul.f32 %v545_v63, %v775_v26  ;;  %vm366_vm1 = vmor %vm364_vm9, %vm365_vm14  ;;  %v88_v53 = vpop.f32.mrf.mxu1 }
  0xc0   :  { %435 = vst [vmem:[%s1026_s3] sm:$0xff] %v419_v55  ;;  %v547_v7 = vpop.eup %546  ;;  %vm826_vm0 = vcmp.eq.f32.partialorder %v203_v56, 8.507059e+37  ;;  %v263_v9 = vand.u32 2147483647, %v777_v27  ;;  %550 = vrcp.f32 %v818_v0  ;;  %v832_v10 = vadd.f32 1.0, %v543_v59  ;;  %v76_v55 = vpop.f32.mrf.mxu0 }
  0xc1   :  { %439 = vst [vmem:[%s1026_s3 + $0x20] sm:$0xff] %v423_v60  ;;  %v303_v36 = vadd.f32 %v537_v30, %v302_v61  ;;  %v362_v2 = vmul.f32 %v541_v43, %v361_v62  ;;  %v196_v13 = vsub.f32 1.0, %v195_v5  ;;  %v255_v14 = vmul.f32 %v547_v7, %v777_v27 }
  0xc2   :  { %vm200_vm2 = vweird.f32 %v545_v63  ;;  %vm259_vm3 = vweird.f32 %v777_v27  ;;  %v265_v3 = vand.u32 2147483648, %v777_v27  ;;  %v549_v21 = vpop.eup %548  ;;  %v206_v23 = vor.u32 1.1754944e-38, %v205_v35 }
  0xc3   :  { %v307_v11 = vsel %vm306_vm15, %v537_v30, %v303_v36  ;;  %v363_v12 = vadd.f32 %v541_v43, %v362_v2  ;;  %v197_v18 = vmul.f32 %v545_v63, %v196_v13  ;;  %v256_v19 = vsub.f32 1.0, %v255_v14  ;;  %vm201_vm6 = vmor %vm199_vm13, %vm200_vm2 }
  0xc4   :  { %v312_v15 = vsel %vm789_vm8, %v311_v47, %v307_v11  ;;  %vm844_vm4 = vcmp.eq.f32.partialorder %v263_v9, 8.507059e+37  ;;  %552 = vrcp.f32 %v832_v10  ;;  %vm260_vm5 = vweird.f32 %v547_v7 }
  0xc5   :  { %v427_v16 = vmul.f32 %v312_v15, %v714_v41  ;;  %v367_v17 = vsel %vm366_vm1, %v541_v43, %v363_v12  ;;  %v198_v6 = vadd.f32 %v545_v63, %v197_v18  ;;  %v257_v25 = vmul.f32 %v547_v7, %v256_v19  ;;  %vm261_vm7 = vmor %vm259_vm3, %vm260_vm5  ;;  %v112_v12 = vpop.f32.mrf.mxu3 }
  0xc6   :  { %v372_v22 = vsel %vm801_vm11, %v371_v48, %v367_v17  ;;  %v551_v29 = vpop.eup %550  ;;  %v323_v30 = vand.u32 2147483647, %v818_v0  ;;  %v325_v31 = vand.u32 2147483648, %v818_v0  ;;  %v858_v34 = vadd.f32 1.0, %v549_v21 }
  0xc7   :  { %443 = vst [vmem:[%s1026_s3 + $0x40] sm:$0xff] %v427_v16  ;;  %v431_v41 = vmul.f32 %v372_v22, %v717_v42  ;;  %554 = vpow2.f32 %v783_v33  ;;  %v202_v42 = vsel %vm201_vm6, %v545_v63, %v198_v6  ;;  %v258_v37 = vadd.f32 %v547_v7, %v257_v25 }
  0xc8   :  { %v266_v38 = vor.u32 1.1754944e-38, %v265_v3  ;;  %v315_v39 = vmul.f32 %v551_v29, %v818_v0  ;;  %v207_v26 = vsel %vm826_vm0, %v206_v23, %v202_v42  ;;  %vm319_vm8 = vweird.f32 %v818_v0 }
  0xc9   :  { %447 = vst [vmem:[%s1026_s3 + $0x60] sm:$0xff] %v431_v41  ;;  %v383_v40 = vand.u32 2147483647, %v832_v10  ;;  %556 = vrcp.f32 %v858_v34  ;;  %v420_v33 = vmul.f32 %v207_v26, %v720_v45  ;;  %v262_v43 = vsel %vm261_vm7, %v547_v7, %v258_v37  ;;  %v100_v7 = vpop.f32.mrf.mxu2 }
  0xca   :  { %v316_v44 = vsub.f32 1.0, %v315_v39  ;;  %v385_v47 = vand.u32 2147483648, %v832_v10  ;;  %v553_v48 = vpop.eup %552  ;;  %v267_v49 = vsel %vm844_vm4, %v266_v38, %v262_v43  ;;  %vm876_vm9 = vcmp.eq.f32.partialorder %v323_v30, 8.507059e+37 }
  0xcb   :  { %v326_v27 = vor.u32 1.1754944e-38, %v325_v31  ;;  %v465_v51 = vmul.f32 -1.442695, %v810_v58  ;;  %436 = vst [vmem:[%s1026_s3 + $0x8] sm:$0xff] %v420_v33  ;;  %v424_v45 = vmul.f32 %v267_v49, %v723_v46  ;;  %vm320_vm10 = vweird.f32 %v551_v29 }
  0xcc   :  { %v317_v52 = vmul.f32 %v551_v29, %v316_v44  ;;  %v375_v54 = vmul.f32 %v553_v48, %v832_v10  ;;  %vm379_vm11 = vweird.f32 %v832_v10  ;;  %vm887_vm12 = vcmp.eq.f32.partialorder %v383_v40, 8.507059e+37  ;;  %vm321_vm13 = vmor %vm319_vm8, %vm320_vm10 }
  0xcd   :  { %v555_v56 = vpop.eup %554  ;;  %558 = vpow2.f32 %v465_v51  ;;  %v892_v60 = vadd.f32 %v703_v32, %v109_v28  ;;  %440 = vst [vmem:[%s1026_s3 + $0x28] sm:$0xff] %v424_v45  ;;  %v386_v62 = vor.u32 1.1754944e-38, %v385_v47  ;;  %vm214_vm14 = vweird.f32 %v858_v34 }
  0xce   :  { %v318_v46 = vadd.f32 %v551_v29, %v317_v52  ;;  %v376_v61 = vsub.f32 1.0, %v375_v54  ;;  %v897_v63 = vadd.f32 1.0, %v555_v56  ;;  %v905_v2 = vadd.f32 %v703_v32, %v76_v55 }
  0xcf   :  { %v557_v35 = vpop.eup %556  ;;  %v469_v36 = vmul.f32 -1.442695, %v892_v60  ;;  %v908_v5 = vadd.f32 %v703_v32, %v88_v53  ;;  %vm380_vm15 = vweird.f32 %v553_v48  ;;  %v218_v13 = vand.u32 2147483647, %v858_v34 }
  0xd0   :  { %v322_v8 = vsel %vm321_vm13, %v551_v29, %v318_v46  ;;  %v377_v9 = vmul.f32 %v553_v48, %v376_v61  ;;  %v210_v11 = vmul.f32 %v557_v35, %v858_v34  ;;  %v220_v14 = vand.u32 2147483648, %v858_v34  ;;  %vm381_vm0 = vmor %vm379_vm11, %vm380_vm15 }
  0xd1   :  { %v327_v0 = vsel %vm876_vm9, %v326_v27, %v322_v8  ;;  %560 = vrcp.f32 %v897_v63  ;;  %v918_v17 = vadd.f32 %v703_v32, %v100_v7  ;;  %v458_v19 = vmul.f32 -1.442695, %v905_v2 }
  0xd2   :  { %v428_v15 = vmul.f32 %v327_v0, %v736_v57  ;;  %v378_v3 = vadd.f32 %v553_v48, %v377_v9  ;;  %v211_v16 = vsub.f32 1.0, %v210_v11  ;;  %562 = vpow2.f32 %v469_v36 }
  0xd3   :  { %v559_v18 = vpop.eup %558  ;;  %v462_v21 = vmul.f32 -1.442695, %v908_v5  ;;  %v925_v22 = vadd.f32 %v703_v32, %v112_v12  ;;  %vm215_vm1 = vweird.f32 %v557_v35  ;;  %564 = vpow2.f32 %v458_v19 }
  0xd4   :  { %444 = vst [vmem:[%s1026_s3 + $0x48] sm:$0xff] %v428_v15  ;;  %v382_v57 = vsel %vm381_vm0, %v553_v48, %v378_v3  ;;  %v212_v23 = vmul.f32 %v557_v35, %v211_v16  ;;  %v173_v24 = vadd.f32 1.0, %v559_v18  ;;  %v466_v25 = vmul.f32 -1.442695, %v918_v17  ;;  %vm216_vm2 = vmor %vm214_vm14, %vm215_vm1 }
  0xd5   :  { %v387_v10 = vsel %vm887_vm12, %v386_v62, %v382_v57  ;;  %v221_v28 = vor.u32 1.1754944e-38, %v220_v14  ;;  %v470_v29 = vmul.f32 -1.442695, %v925_v22  ;;  %vm219_vm3 = vcmp.eq.f32.partialorder %v218_v13, 8.507059e+37 }
  0xd6   :  { %v432_v41 = vmul.f32 %v387_v10, %v744_v1  ;;  %v213_v6 = vadd.f32 %v557_v35, %v212_v23  ;;  %566 = vrcp.f32 %v173_v24  ;;  %v278_v26 = vand.u32 2147483647, %v897_v63 }
  0xd7   :  { %v561_v32 = vpop.eup %560  ;;  %568 = vpow2.f32 %v462_v21  ;;  %v280_v40 = vand.u32 2147483648, %v897_v63  ;;  %vm274_vm4 = vweird.f32 %v897_v63  ;;  %v338_v52 = vand.u32 2147483647, %v173_v24 }
  0xd8   :  { %448 = vst [vmem:[%s1026_s3 + $0x68] sm:$0xff] %v432_v41  ;;  %v217_v30 = vsel %vm216_vm2, %v557_v35, %v213_v6  ;;  %v270_v1 = vmul.f32 %v561_v32, %v897_v63  ;;  %v563_v31 = vpop.eup %562  ;;  %570 = vpow2.f32 %v466_v25  ;;  %vm275_vm5 = vweird.f32 %v561_v32 }
  0xd9   :  { %v222_v42 = vsel %vm219_vm3, %v221_v28, %v217_v30  ;;  %v942_v39 = vadd.f32 1.0, %v563_v31  ;;  %v565_v34 = vpop.eup %564  ;;  %572 = vpow2.f32 %v470_v29  ;;  %vm276_vm6 = vmor %vm274_vm4, %vm275_vm5  ;;  %vm279_vm7 = vcmp.eq.f32.partialorder %v278_v26, 8.507059e+37 }
  0xda   :  { %v421_v37 = vmul.f32 %v222_v42, %v749_v4  ;;  %v271_v38 = vsub.f32 1.0, %v270_v1  ;;  %v951_v47 = vadd.f32 1.0, %v565_v34  ;;  %v281_v50 = vor.u32 1.1754944e-38, %v280_v40 }
  0xdb   :  { %574 = vrcp.f32 %v942_v39  ;;  %v340_v54 = vand.u32 2147483648, %v173_v24  ;;  %v398_v61 = vand.u32 2147483647, %v942_v39  ;;  %vm334_vm9 = vweird.f32 %v173_v24 }
  0xdc   :  { %v567_v33 = vpop.eup %566  ;;  %437 = vst [vmem:[%s1026_s3 + $0x10] sm:$0xff] %v421_v37  ;;  %v272_v43 = vmul.f32 %v561_v32, %v271_v38  ;;  %576 = vrcp.f32 %v951_v47  ;;  %vm339_vm11 = vcmp.eq.f32.partialorder %v338_v52, 8.507059e+37  ;;  %v400_v36 = vand.u32 2147483648, %v942_v39 }
  0xdd   :  { %v569_v4 = vpop.eup %568  ;;  %v330_v44 = vmul.f32 %v567_v33, %v173_v24  ;;  %vm335_vm8 = vweird.f32 %v567_v33  ;;  %v341_v35 = vor.u32 1.1754944e-38, %v340_v54  ;;  %vm394_vm12 = vweird.f32 %v942_v39 }
  0xde   :  { %v273_v48 = vadd.f32 %v561_v32, %v272_v43  ;;  %v953_v49 = vadd.f32 1.0, %v569_v4  ;;  %v571_v51 = vpop.eup %570  ;;  %vm336_vm10 = vmor %vm334_vm9, %vm335_vm8  ;;  %vm969_vm13 = vcmp.eq.f32.partialorder %v398_v61, 8.507059e+37  ;;  %v401_v18 = vor.u32 1.1754944e-38, %v400_v36 }
  0xdf   :  { %v331_v27 = vsub.f32 1.0, %v330_v44  ;;  %v573_v55 = vpop.eup %572  ;;  %v964_v7 = vadd.f32 1.0, %v571_v51  ;;  %vm229_vm15 = vweird.f32 %v951_v47  ;;  %v233_v21 = vand.u32 2147483647, %v951_v47 }
  0xe0   :  { %v277_v45 = vsel %vm276_vm6, %v561_v32, %v273_v48  ;;  %578 = vrcp.f32 %v953_v49  ;;  %v967_v11 = vadd.f32 1.0, %v573_v55  ;;  %v235_v23 = vand.u32 2147483648, %v951_v47 }
  0xe1   :  { %v282_v53 = vsel %vm279_vm7, %v281_v50, %v277_v45  ;;  %v332_v56 = vmul.f32 %v567_v33, %v331_v27  ;;  %v575_v59 = vpop.eup %574  ;;  %580 = vrcp.f32 %v964_v7  ;;  %vm289_vm2 = vweird.f32 %v953_v49 }
  0xe2   :  { %v425_v46 = vmul.f32 %v282_v53, %v770_v20  ;;  %v390_v63 = vmul.f32 %v575_v59, %v942_v39  ;;  %v577_v8 = vpop.eup %576  ;;  %vm395_vm14 = vweird.f32 %v575_v59  ;;  %582 = vrcp.f32 %v967_v11 }
  0xe3   :  { %v333_v62 = vadd.f32 %v567_v33, %v332_v56  ;;  %v225_v14 = vmul.f32 %v577_v8, %v951_v47  ;;  %vm396_vm0 = vmor %vm394_vm12, %vm395_vm14  ;;  %vm230_vm1 = vweird.f32 %v577_v8  ;;  %v295_v10 = vand.u32 2147483648, %v953_v49 }
  0xe4   :  { %441 = vst [vmem:[%s1026_s3 + $0x30] sm:$0xff] %v425_v46  ;;  %v391_v20 = vsub.f32 1.0, %v390_v63  ;;  %v293_v25 = vand.u32 2147483647, %v953_v49  ;;  %vm231_vm4 = vmor %vm229_vm15, %vm230_vm1  ;;  %v236_v1 = vor.u32 1.1754944e-38, %v235_v23  ;;  %vm234_vm5 = vcmp.eq.f32.partialorder %v233_v21, 8.507059e+37 }
  0xe5   :  { %v337_v9 = vsel %vm336_vm10, %v567_v33, %v333_v62  ;;  %v226_v19 = vsub.f32 1.0, %v225_v14  ;;  %v296_v38 = vor.u32 1.1754944e-38, %v295_v10  ;;  %v355_v43 = vand.u32 2147483648, %v964_v7 }
  0xe6   :  { %v579_v12 = vpop.eup %578  ;;  %v342_v0 = vsel %vm339_vm11, %v341_v35, %v337_v9  ;;  %v392_v3 = vmul.f32 %v575_v59, %v391_v20  ;;  %vm294_vm7 = vcmp.eq.f32.partialorder %v293_v25, 8.507059e+37  ;;  %v353_v48 = vand.u32 2147483647, %v964_v7 }
  0xe7   :  { %v429_v15 = vmul.f32 %v342_v0, %v810_v58  ;;  %v285_v16 = vmul.f32 %v579_v12, %v953_v49  ;;  %v227_v58 = vmul.f32 %v577_v8, %v226_v19  ;;  %vm290_vm3 = vweird.f32 %v579_v12  ;;  %v581_v32 = vpop.eup %580 }
  0xe8   :  { %v393_v57 = vadd.f32 %v575_v59, %v392_v3  ;;  %v345_v42 = vmul.f32 %v581_v32, %v964_v7  ;;  %vm291_vm6 = vmor %vm289_vm2, %vm290_vm3  ;;  %v583_v39 = vpop.eup %582  ;;  %vm350_vm8 = vweird.f32 %v581_v32  ;;  %vm349_vm9 = vweird.f32 %v964_v7 }
  0xe9   :  { %445 = vst [vmem:[%s1026_s3 + $0x50] sm:$0xff] %v429_v15  ;;  %v286_v24 = vsub.f32 1.0, %v285_v16  ;;  %v228_v29 = vadd.f32 %v577_v8, %v227_v58  ;;  %v405_v4 = vmul.f32 %v583_v39, %v967_v11  ;;  %v415_v50 = vand.u32 2147483648, %v967_v11  ;;  %vm351_vm10 = vmor %vm349_vm9, %vm350_vm8 }
  0xea   :  { %v397_v41 = vsel %vm396_vm0, %v575_v59, %v393_v57  ;;  %v346_v26 = vsub.f32 1.0, %v345_v42  ;;  %vm410_vm11 = vweird.f32 %v583_v39  ;;  %v413_v51 = vand.u32 2147483647, %v967_v11 }
  0xeb   :  { %v287_v6 = vmul.f32 %v579_v12, %v286_v24  ;;  %v402_v28 = vsel %vm969_vm13, %v401_v18, %v397_v41  ;;  %v232_v37 = vsel %vm231_vm4, %v577_v8, %v228_v29  ;;  %v406_v49 = vsub.f32 1.0, %v405_v4 }
  0xec   :  { %v433_v30 = vmul.f32 %v402_v28, %v892_v60  ;;  %v237_v34 = vsel %vm234_vm5, %v236_v1, %v232_v37  ;;  %v347_v47 = vmul.f32 %v581_v32, %v346_v26  ;;  %vm354_vm12 = vcmp.eq.f32.partialorder %v353_v48, 8.507059e+37 }
  0xed   :  { %v288_v31 = vadd.f32 %v579_v12, %v287_v6  ;;  %v422_v40 = vmul.f32 %v237_v34, %v905_v2  ;;  %v407_v27 = vmul.f32 %v583_v39, %v406_v49  ;;  %vm409_vm13 = vweird.f32 %v967_v11 }
  0xee   :  { %449 = vst [vmem:[%s1026_s3 + $0x70] sm:$0xff] %v433_v30  ;;  %v348_v2 = vadd.f32 %v581_v32, %v347_v47  ;;  %vm411_vm14 = vmor %vm409_vm13, %vm410_vm11  ;;  %v416_v53 = vor.u32 1.1754944e-38, %v415_v50  ;;  %vm414_vm15 = vcmp.eq.f32.partialorder %v413_v51, 8.507059e+37 }
  0xef   :  { %v292_v60 = vsel %vm291_vm6, %v579_v12, %v288_v31  ;;  %438 = vst [vmem:[%s1026_s3 + $0x18] sm:$0xff] %v422_v40  ;;  %v408_v54 = vadd.f32 %v583_v39, %v407_v27 }
  0xf0   :  { %v297_v33 = vsel %vm294_vm7, %v296_v38, %v292_v60  ;;  %v352_v45 = vsel %vm351_vm10, %v581_v32, %v348_v2 }
  0xf1   :  { %v426_v44 = vmul.f32 %v297_v33, %v908_v5  ;;  %v356_v5 = vor.u32 1.1754944e-38, %v355_v43  ;;  %v412_v56 = vsel %vm411_vm14, %v583_v39, %v408_v54 }
  0xf2   :  { %v417_v59 = vsel %vm414_vm15, %v416_v53, %v412_v56 }
  0xf3   :  { %442 = vst [vmem:[%s1026_s3 + $0x38] sm:$0xff] %v426_v44  ;;  %v357_v52 = vsel %vm354_vm12, %v356_v5, %v352_v45  ;;  %v434_v46 = vmul.f32 %v417_v59, %v925_v22 }
  0xf4   :  { %v430_v55 = vmul.f32 %v357_v52, %v918_v17 }
  0xf5   :  { %450 = vst [vmem:[%s1026_s3 + $0x78] sm:$0xff] %v434_v46 }
  0xf6   :  { %446 = vst [vmem:[%s1026_s3 + $0x58] sm:$0xff] %v430_v55 }

// kernel: forward.8
= control target key start
LH: loop header
LB: loop body
LE: loop exit
PB: predicated region body
PF: predicated region fallthrough
CT: control target
= control target key end

     0   :  { %vm94_vm0 = vcmask 1046528   ;;  %vm306_vm1 = vcmask 1045504   ;;  %s3097_s1 = inlined_call_operand.vmem [shape: f32[9,128,128], index: 1, kind: input, shape index: {}]   ;;  %s3098_s0 = inlined_call_operand.vmem [shape: f32[2,10,10,128], index: 0, kind: input, shape index: {}]   ;;  %s3099_s2 = inlined_call_operand.vmem [shape: f32[1,128], index: 2, kind: input, shape index: {}]   ;;  %s3100_s3 = inlined_call_operand.vmem [shape: f32[128,128], index: 3, kind: output, shape index: {}]  }
   0x1   :  { %v1546_v0 = vld [vmem:[%s3097_s1 + $0xf8] sm:$0xff]  ;;  %v1545_v1 = vld [vmem:[%s3097_s1 + $0xf0] sm:$0xff]  ;;  %v1544_v2 = vld [vmem:[%s3097_s1 + $0xe8] sm:$0xff] }
   0x2   :  { %1723 = vmatpush.msra.mxu1 %v1546_v0  ;;  %1724 = vmatpush.msra.mxu2 %v1546_v0  ;;  %v1543_v3 = vld [vmem:[%s3097_s1 + $0xe0] sm:$0xff]  ;;  %v1542_v4 = vld [vmem:[%s3097_s1 + $0xd8] sm:$0xff]  ;;  %v1541_v5 = vld [vmem:[%s3097_s1 + $0xd0] sm:$0xff] }
   0x3   :  { %1725 = vmatpush.msra.mxu3 %v1546_v0  ;;  %176 = vmatpush.msra.mxu0 %v1546_v0  ;;  %v1540_v6 = vld [vmem:[%s3097_s1 + $0xc8] sm:$0xff]  ;;  %v1539_v7 = vld [vmem:[%s3097_s1 + $0xc0] sm:$0xff]  ;;  %v1538_v8 = vld [vmem:[%s3097_s1 + $0xb8] sm:$0xff] }
   0x4   :  { %1726 = vmatpush.msra.mxu1 %v1545_v1  ;;  %1727 = vmatpush.msra.mxu2 %v1545_v1  ;;  %v1537_v9 = vld [vmem:[%s3097_s1 + $0xb0] sm:$0xff]  ;;  %v1536_v10 = vld [vmem:[%s3097_s1 + $0xa8] sm:$0xff]  ;;  %v1535_v11 = vld [vmem:[%s3097_s1 + $0xa0] sm:$0xff] }
   0x5   :  { %1728 = vmatpush.msra.mxu3 %v1545_v1  ;;  %177 = vmatpush.msra.mxu0 %v1545_v1  ;;  %v1534_v12 = vld [vmem:[%s3097_s1 + $0x98] sm:$0xff]  ;;  %v1834_v13 = vld [vmem:[%s3098_s0 + $0x40] sm:$0xff]  ;;  %v1839_v14 = vld [vmem:[%s3098_s0 + $0x48] sm:$0x3] }
   0x6   :  { %1729 = vmatpush.msra.mxu1 %v1544_v2  ;;  %1730 = vmatpush.msra.mxu2 %v1544_v2  ;;  %v1844_v15 = vld [vmem:[%s3098_s0 + $0xa0] sm:$0xff]  ;;  %v1849_v16 = vld [vmem:[%s3098_s0 + $0xa8] sm:$0x3]  ;;  %v1533_v17 = vld [vmem:[%s3097_s1 + $0x90] sm:$0xff]  ;;  %v107_v20 = vrot.slane %v1834_v13, 1  ;;  %v108_v21 = vrot.slane %v1839_v14, 1 }
   0x7   :  { %1731 = vmatpush.msra.mxu3 %v1544_v2  ;;  %178 = vmatpush.msra.mxu0 %v1544_v2  ;;  %v1857_v18 = vld [vmem:[%s3098_s0 + $0xe0] sm:$0xff]  ;;  %v1862_v19 = vld [vmem:[%s3098_s0 + $0xe8] sm:$0x3]  ;;  %v119_v22 = vrot.slane %v1844_v15, 1  ;;  %v120_v23 = vrot.slane %v1849_v16, 1  ;;  %v1562_v32 = vld [vmem:[%s3097_s1 + $0x178] sm:$0xff] }
   0x8   :  { %1732 = vmatpush.msra.mxu1 %v1543_v3  ;;  %1733 = vmatpush.msra.mxu2 %v1543_v3  ;;  %v1532_v24 = vld [vmem:[%s3097_s1 + $0x88] sm:$0xff]  ;;  %v131_v25 = vrot.slane %v1857_v18, 1  ;;  %v132_v26 = vrot.slane %v1862_v19, 1  ;;  %v1531_v27 = vld [vmem:[%s3097_s1 + $0x80] sm:$0xff]  ;;  %v109_v30 = vsel %vm94_vm0, %v107_v20, %v108_v21  ;;  %v1896_v33 = vld [vmem:[%s3098_s0 + $0xb0] sm:$0xff] }
   0x9   :  { %1734 = vmatpush.msra.mxu3 %v1543_v3  ;;  %179 = vmatpush.msra.mxu0 %v1543_v3  ;;  %v1879_v28 = vld [vmem:[%s3098_s0] sm:$0xff]  ;;  %v1884_v29 = vld [vmem:[%s3098_s0 + $0x8] sm:$0x3]  ;;  %v121_v31 = vsel %vm94_vm0, %v119_v22, %v120_v23  ;;  %v1901_v34 = vld [vmem:[%s3098_s0 + $0xb8] sm:$0x3]  ;;  %v122_v44 = vrot.slane %v1896_v33, 1 }
   0xa   :  { %1735 = vmatpush.msra.mxu1 %v1542_v4  ;;  %1736 = vmatpush.msra.mxu2 %v1542_v4  ;;  %v61_v35 = vld [vmem:[%s3097_s1 + $0x78] sm:$0xff]  ;;  %v133_v36 = vsel %vm94_vm0, %v131_v25, %v132_v26  ;;  %v1912_v37 = vld [vmem:[%s3098_s0 + $0x50] sm:$0xff]  ;;  %v95_v39 = vrot.slane %v1879_v28, 1  ;;  %v96_v40 = vrot.slane %v1884_v29, 1  ;;  %v123_v45 = vrot.slane %v1901_v34, 1  ;;  %v1560_v48 = vld [vmem:[%s3097_s1 + $0x168] sm:$0xff] }
   0xb   :  { %1737 = vmatpush.msra.mxu3 %v1542_v4  ;;  %180 = vmatpush.msra.mxu0 %v1542_v4  ;;  %v1917_v38 = vld [vmem:[%s3098_s0 + $0x58] sm:$0x3]  ;;  %v1561_v41 = vld [vmem:[%s3097_s1 + $0x170] sm:$0xff]  ;;  %v110_v50 = vrot.slane %v1912_v37, 1  ;;  %v59_v52 = vld [vmem:[%s3097_s1 + $0x68] sm:$0xff] }
   0xc   :  { %1738 = vmatpush.msra.mxu1 %v1541_v5  ;;  %1739 = vmatpush.msra.mxu2 %v1541_v5  ;;  %v1610_v42 = vld [vmem:[%s3097_s1 + $0x1f8] sm:$0xff]  ;;  %v60_v43 = vld [vmem:[%s3097_s1 + $0x70] sm:$0xff]  ;;  %v111_v51 = vrot.slane %v1917_v38, 1  ;;  %v97_v53 = vsel %vm94_vm0, %v95_v39, %v96_v40  ;;  %v1559_v54 = vld [vmem:[%s3097_s1 + $0x160] sm:$0xff]  ;;  %v124_v59 = vsel %vm94_vm0, %v122_v44, %v123_v45 }
   0xd   :  { %1740 = vmatpush.msra.mxu3 %v1541_v5  ;;  %181 = vmatpush.msra.mxu0 %v1541_v5  ;;  %v1935_v46 = vld [vmem:[%s3098_s0 + $0xf0] sm:$0xff]  ;;  %v1940_v47 = vld [vmem:[%s3098_s0 + $0xf8] sm:$0x3]  ;;  %v1608_v55 = vld [vmem:[%s3097_s1 + $0x1e8] sm:$0xff] }
   0xe   :  { %1741 = vmatpush.msra.mxu1 %v1540_v6  ;;  %1742 = vmatpush.msra.mxu2 %v1540_v6  ;;  %v1609_v49 = vld [vmem:[%s3097_s1 + $0x1f0] sm:$0xff]  ;;  %v134_v56 = vrot.slane %v1935_v46, 1  ;;  %v135_v57 = vrot.slane %v1940_v47, 1  ;;  %v58_v58 = vld [vmem:[%s3097_s1 + $0x60] sm:$0xff]  ;;  %v112_v60 = vsel %vm94_vm0, %v110_v50, %v111_v51  ;;  %v1558_v61 = vld [vmem:[%s3097_s1 + $0x158] sm:$0xff] }
   0xf   :  { %1743 = vmatpush.msra.mxu3 %v1540_v6  ;;  %182 = vmatpush.msra.mxu0 %v1540_v6  ;;  %v1607_v62 = vld [vmem:[%s3097_s1 + $0x1e0] sm:$0xff]  ;;  %v57_v63 = vld [vmem:[%s3097_s1 + $0x58] sm:$0xff]  ;;  %v1557_v0 = vld [vmem:[%s3097_s1 + $0x150] sm:$0xff] }
  0x10   :  { %1744 = vmatpush.msra.mxu1 %v1539_v7  ;;  %1745 = vmatpush.msra.mxu2 %v1539_v7  ;;  %v1986_v1 = vld [vmem:[%s3098_s0 + $0xc0] sm:$0xff]  ;;  %v1991_v2 = vld [vmem:[%s3098_s0 + $0xc8] sm:$0x3]  ;;  %v136_v3 = vsel %vm94_vm0, %v134_v56, %v135_v57  ;;  %v1606_v4 = vld [vmem:[%s3097_s1 + $0x1d8] sm:$0xff] }
  0x11   :  { %1746 = vmatpush.msra.mxu3 %v1539_v7  ;;  %183 = vmatpush.msra.mxu0 %v1539_v7  ;;  %v2002_v5 = vld [vmem:[%s3098_s0 + $0x60] sm:$0xff]  ;;  %v2007_v6 = vld [vmem:[%s3098_s0 + $0x68] sm:$0x3]  ;;  %v1626_v7 = vld [vmem:[%s3097_s1 + $0x278] sm:$0xff] }
  0x12   :  { %1747 = vmatpush.msra.mxu1 %v1538_v8  ;;  %1748 = vmatpush.msra.mxu2 %v1538_v8  ;;  %v2031_v21 = vld [vmem:[%s3098_s0 + $0x18] sm:$0x3]  ;;  %v1625_v22 = vld [vmem:[%s3097_s1 + $0x270] sm:$0xff]  ;;  %v113_v23 = vrot.slane %v2002_v5, 1  ;;  %v2041_v26 = vld [vmem:[%s3098_s0 + $0x100] sm:$0xff] }
  0x13   :  { %1749 = vmatpush.msra.mxu3 %v1538_v8  ;;  %184 = vmatpush.msra.mxu0 %v1538_v8  ;;  %v56_v8 = vld [vmem:[%s3097_s1 + $0x50] sm:$0xff]  ;;  %v99_v39 = vrot.slane %v2031_v21, 1  ;;  %v54_v40 = vld [vmem:[%s3097_s1 + $0x40] sm:$0xff]  ;;  %v2099_v57 = vld [vmem:[%s3098_s0 + $0xd8] sm:$0x3] }
  0x14   :  { %1750 = vmatpush.msra.mxu1 %v1537_v9  ;;  %1751 = vmatpush.msra.mxu2 %v1537_v9  ;;  %v1623_v51 = vld [vmem:[%s3097_s1 + $0x260] sm:$0xff] }
  0x15   :  { %1752 = vmatpush.msra.mxu3 %v1537_v9  ;;  %185 = vmatpush.msra.mxu0 %v1537_v9  ;;  %v1556_v9 = vld [vmem:[%s3097_s1 + $0x148] sm:$0xff] }
  0x16   :  { %1753 = vmatpush.msra.mxu1 %v1536_v10  ;;  %1754 = vmatpush.msra.mxu2 %v1536_v10 }
  0x17   :  { %1755 = vmatpush.msra.mxu3 %v1536_v10  ;;  %186 = vmatpush.msra.mxu0 %v1536_v10  ;;  %v1605_v10 = vld [vmem:[%s3097_s1 + $0x1d0] sm:$0xff] }
  0x18   :  { %1756 = vmatpush.msra.mxu1 %v1535_v11  ;;  %1757 = vmatpush.msra.mxu2 %v1535_v11 }
  0x19   :  { %1758 = vmatpush.msra.mxu3 %v1535_v11  ;;  %187 = vmatpush.msra.mxu0 %v1535_v11  ;;  %v125_v11 = vrot.slane %v1986_v1, 1 }
  0x1a   :  { %1759 = vmatpush.msra.mxu1 %v1534_v12  ;;  %1760 = vmatpush.msra.mxu2 %v1534_v12 }
  0x1b   :  { %1761 = vmatpush.msra.mxu3 %v1534_v12  ;;  %188 = vmatpush.msra.mxu0 %v1534_v12  ;;  %v126_v12 = vrot.slane %v1991_v2, 1 }
  0x1c   :  { %1762 = vmatpush.msra.mxu1 %v1533_v17  ;;  %1763 = vmatpush.msra.mxu2 %v1533_v17 }
  0x1d   :  { %1764 = vmatpush.msra.mxu3 %v1533_v17  ;;  %189 = vmatpush.msra.mxu0 %v1533_v17  ;;  %v2026_v17 = vld [vmem:[%s3098_s0 + $0x10] sm:$0xff] }
  0x1e   :  { %1765 = vmatpush.msra.mxu1 %v1532_v24  ;;  %1766 = vmatpush.msra.mxu2 %v1532_v24 }
  0x1f   :  { %1767 = vmatpush.msra.mxu3 %v1532_v24  ;;  %190 = vmatpush.msra.mxu0 %v1532_v24  ;;  %v114_v24 = vrot.slane %v2007_v6, 1 }
  0x20   :  { %1768 = vmatpush.msra.mxu1 %v1531_v27  ;;  %1769 = vmatpush.msra.mxu2 %v1531_v27 }
  0x21   :  { %204 = vmatmul.f32.vlgmr.msra.gmra.mxu1 %v109_v30  ;;  %216 = vmatmul.f32.vlgmr.msra.gmra.mxu2 %v121_v31  ;;  %v55_v30 = vld [vmem:[%s3097_s1 + $0x48] sm:$0xff]  ;;  %v1555_v31 = vld [vmem:[%s3097_s1 + $0x140] sm:$0xff]  ;;  %v115_v45 = vsel %vm94_vm0, %v113_v23, %v114_v24  ;;  %v2149_v24 = vld [vmem:[%s3098_s0 + $0x110] sm:$0xff] }
  0x22   :  { %388 = vmatpush.msrb.mxu2 %v1562_v32  ;;  %1770 = vmatpush.msra.mxu3 %v1531_v27  ;;  %v1604_v32 = vld [vmem:[%s3097_s1 + $0x1c8] sm:$0xff] }
  0x23   :  { %241 = vmatpush.msrb.mxu1 %v61_v35  ;;  %228 = vmatmul.f32.vlgmr.msra.gmra.mxu3 %v133_v36  ;;  %v1624_v35 = vld [vmem:[%s3097_s1 + $0x268] sm:$0xff]  ;;  %v98_v36 = vrot.slane %v2026_v17, 1 }
  0x24   :  { %389 = vmatpush.msrb.mxu2 %v1561_v41  ;;  %519 = vmatpush.msrb.mxu3 %v1610_v42  ;;  %v127_v41 = vsel %vm94_vm0, %v125_v11, %v126_v12  ;;  %v137_v42 = vrot.slane %v2041_v26, 1 }
  0x25   :  { %242 = vmatpush.msrb.mxu1 %v60_v43  ;;  %191 = vmatpush.msra.mxu0 %v1531_v27  ;;  %v2046_v27 = vld [vmem:[%s3098_s0 + $0x108] sm:$0x3] }
  0x26   :  { %390 = vmatpush.msrb.mxu2 %v1560_v48  ;;  %520 = vmatpush.msrb.mxu3 %v1609_v49  ;;  %v138_v43 = vrot.slane %v2046_v27, 1  ;;  %v1554_v48 = vld [vmem:[%s3097_s1 + $0x138] sm:$0xff]  ;;  %v1603_v49 = vld [vmem:[%s3097_s1 + $0x1c0] sm:$0xff] }
  0x27   :  { %243 = vmatpush.msrb.mxu1 %v59_v52  ;;  %192 = vmatmul.f32.vlgmr.msra.gmra.mxu0 %v97_v53  ;;  %v53_v52 = vld [vmem:[%s3097_s1 + $0x38] sm:$0xff]  ;;  %v100_v53 = vsel %vm94_vm0, %v98_v36, %v99_v39  ;;  %v1620_v39 = vld [vmem:[%s3097_s1 + $0x248] sm:$0xff] }
  0x28   :  { %391 = vmatpush.msrb.mxu2 %v1559_v54  ;;  %521 = vmatpush.msrb.mxu3 %v1608_v55  ;;  %v1553_v54 = vld [vmem:[%s3097_s1 + $0x130] sm:$0xff] }
  0x29   :  { %244 = vmatpush.msrb.mxu1 %v58_v58  ;;  %219 = vmatmul.f32.gmra.mxu2 %v124_v59  ;;  %v2094_v55 = vld [vmem:[%s3098_s0 + $0xd0] sm:$0xff]  ;;  %v139_v58 = vsel %vm94_vm0, %v137_v42, %v138_v43  ;;  %v1602_v59 = vld [vmem:[%s3097_s1 + $0x1b8] sm:$0xff]  ;;  %v50_v43 = vld [vmem:[%s3097_s1 + $0x20] sm:$0xff] }
  0x2a   :  { %207 = vmatmul.f32.gmra.mxu1 %v112_v60  ;;  %392 = vmatpush.msrb.mxu2 %v1558_v61  ;;  %v2110_v60 = vld [vmem:[%s3098_s0 + $0x70] sm:$0xff]  ;;  %v2115_v61 = vld [vmem:[%s3098_s0 + $0x78] sm:$0x3] }
  0x2b   :  { %522 = vmatpush.msrb.mxu3 %v1607_v62  ;;  %245 = vmatpush.msrb.mxu1 %v57_v63  ;;  %v1622_v62 = vld [vmem:[%s3097_s1 + $0x258] sm:$0xff]  ;;  %v52_v63 = vld [vmem:[%s3097_s1 + $0x30] sm:$0xff]  ;;  %v116_v12 = vrot.slane %v2110_v60, 1 }
  0x2c   :  { %231 = vmatmul.f32.gmra.mxu3 %v136_v3  ;;  %393 = vmatpush.msrb.mxu2 %v1557_v0  ;;  %v1552_v0 = vld [vmem:[%s3097_s1 + $0x128] sm:$0xff]  ;;  %v1601_v3 = vld [vmem:[%s3097_s1 + $0x1b0] sm:$0xff] }
  0x2d   :  { %523 = vmatpush.msrb.mxu3 %v1606_v4  ;;  %713 = vmatpush.msrb.mxu0 %v1626_v7  ;;  %v128_v4 = vrot.slane %v2094_v55, 1  ;;  %v129_v7 = vrot.slane %v2099_v57, 1 }
  0x2e   :  { %246 = vmatpush.msrb.mxu1 %v56_v8  ;;  %394 = vmatpush.msrb.mxu2 %v1556_v9  ;;  %v2134_v8 = vld [vmem:[%s3098_s0 + $0x20] sm:$0xff]  ;;  %v2139_v9 = vld [vmem:[%s3098_s0 + $0x28] sm:$0x3] }
  0x2f   :  { %524 = vmatpush.msrb.mxu3 %v1605_v10  ;;  %714 = vmatpush.msrb.mxu0 %v1625_v22  ;;  %v1621_v10 = vld [vmem:[%s3097_s1 + $0x250] sm:$0xff]  ;;  %v117_v22 = vrot.slane %v2115_v61, 1 }
  0x30   :  { %247 = vmatpush.msrb.mxu1 %v55_v30  ;;  %395 = vmatpush.msrb.mxu2 %v1555_v31  ;;  %v2154_v30 = vld [vmem:[%s3098_s0 + $0x118] sm:$0x3]  ;;  %v51_v31 = vld [vmem:[%s3097_s1 + $0x28] sm:$0xff] }
  0x31   :  { %525 = vmatpush.msrb.mxu3 %v1604_v32  ;;  %715 = vmatpush.msrb.mxu0 %v1624_v35  ;;  %v1551_v32 = vld [vmem:[%s3097_s1 + $0x120] sm:$0xff]  ;;  %v1600_v35 = vld [vmem:[%s3097_s1 + $0x1a8] sm:$0xff] }
  0x32   :  { %248 = vmatpush.msrb.mxu1 %v54_v40  ;;  %222 = vmatmul.f32.gmra.mxu2 %v127_v41  ;;  %v2169_v40 = vrot.slane %v2134_v8, 1  ;;  %v102_v41 = vrot.slane %v2139_v9, 1 }
  0x33   :  { %210 = vmatmul.f32.gmra.mxu1 %v115_v45  ;;  %396 = vmatpush.msrb.mxu2 %v1554_v48  ;;  %v130_v45 = vsel %vm94_vm0, %v128_v4, %v129_v7  ;;  %v140_v48 = vrot.slane %v2149_v24, 1  ;;  %v48_v7 = vld [vmem:[%s3097_s1 + $0x10] sm:$0xff] }
  0x34   :  { %526 = vmatpush.msrb.mxu3 %v1603_v49  ;;  %716 = vmatpush.msrb.mxu0 %v1623_v51  ;;  %v141_v49 = vrot.slane %v2154_v30, 1  ;;  %v118_v51 = vsel %vm94_vm0, %v116_v12, %v117_v22  ;;  %v307_v22 = vrot.slane %v1879_v28, 2 }
  0x35   :  { %249 = vmatpush.msrb.mxu1 %v53_v52  ;;  %195 = vmatmul.f32.gmra.mxu0 %v100_v53  ;;  %v1550_v52 = vld [vmem:[%s3097_s1 + $0x118] sm:$0xff]  ;;  %v1599_v53 = vld [vmem:[%s3097_s1 + $0x1a0] sm:$0xff] }
  0x36   :  { %234 = vmatmul.f32.gmra.mxu3 %v139_v58  ;;  %397 = vmatpush.msrb.mxu2 %v1553_v54  ;;  %v1619_v54 = vld [vmem:[%s3097_s1 + $0x240] sm:$0xff]  ;;  %v49_v58 = vld [vmem:[%s3097_s1 + $0x18] sm:$0xff] }
  0x37   :  { %527 = vmatpush.msrb.mxu3 %v1602_v59  ;;  %717 = vmatpush.msrb.mxu0 %v1622_v62  ;;  %v103_v59 = vsel %vm94_vm0, %v2169_v40, %v102_v41  ;;  %v142_v62 = vsel %vm94_vm0, %v140_v48, %v141_v49  ;;  %v47_v41 = vld [vmem:[%s3097_s1 + $0x8] sm:$0xff] }
  0x38   :  { %250 = vmatpush.msrb.mxu1 %v52_v63  ;;  %398 = vmatpush.msrb.mxu2 %v1552_v0  ;;  %v1549_v63 = vld [vmem:[%s3097_s1 + $0x110] sm:$0xff]  ;;  %v1598_v0 = vld [vmem:[%s3097_s1 + $0x198] sm:$0xff]  ;;  %v1616_v49 = vld [vmem:[%s3097_s1 + $0x228] sm:$0xff] }
  0x39   :  { %528 = vmatpush.msrb.mxu3 %v1601_v3  ;;  %718 = vmatpush.msrb.mxu0 %v1621_v10  ;;  %v1618_v3 = vld [vmem:[%s3097_s1 + $0x238] sm:$0xff]  ;;  %v1548_v10 = vld [vmem:[%s3097_s1 + $0x108] sm:$0xff] }
  0x3a   :  { %251 = vmatpush.msrb.mxu1 %v51_v31  ;;  %399 = vmatpush.msrb.mxu2 %v1551_v32  ;;  %v308_v31 = vrot.slane %v1884_v29, 2  ;;  %v2220_v32 = vld [vmem:[%s3098_s0 + $0x30] sm:$0xff] }
  0x3b   :  { %529 = vmatpush.msrb.mxu3 %v1600_v35  ;;  %719 = vmatpush.msrb.mxu0 %v1620_v39  ;;  %v2225_v35 = vld [vmem:[%s3098_s0 + $0x38] sm:$0x3]  ;;  %v1597_v39 = vld [vmem:[%s3097_s1 + $0x190] sm:$0xff] }
  0x3c   :  { %252 = vmatpush.msrb.mxu1 %v50_v43  ;;  %225 = vmatmul.f32.gmra.mxu2 %v130_v45  ;;  %v1617_v29 = vld [vmem:[%s3097_s1 + $0x230] sm:$0xff]  ;;  %v1547_v43 = vld [vmem:[%s3097_s1 + $0x100] sm:$0xff]  ;;  %v1596_v45 = vld [vmem:[%s3097_s1 + $0x188] sm:$0xff] }
  0x3d   :  { %213 = vmatmul.f32.gmra.mxu1 %v118_v51  ;;  %400 = vmatpush.msrb.mxu2 %v1550_v52  ;;  %v2246_v51 = vrot.slane %v2220_v32, 1  ;;  %v105_v52 = vrot.slane %v2225_v35, 1 }
  0x3e   :  { %530 = vmatpush.msrb.mxu3 %v1599_v53  ;;  %720 = vmatpush.msrb.mxu0 %v1619_v54  ;;  %v46_v53 = vld [vmem:[%s3097_s1] sm:$0xff]  ;;  %v309_v54 = vsel %vm306_vm1, %v307_v22, %v308_v31  ;;  %v2276_v22 = vld [vmem:[%s3098_s0 + $0x18] sm:$0x3]  ;;  %v1689_v31 = vld [vmem:[%s3097_s1 + $0x370] sm:$0xff] }
  0x3f   :  { %253 = vmatpush.msrb.mxu1 %v49_v58  ;;  %198 = vmatmul.f32.gmra.mxu0 %v103_v59  ;;  %v1595_v58 = vld [vmem:[%s3097_s1 + $0x180] sm:$0xff] }
  0x40   :  { %237 = vmatmul.f32.gmra.mxu3 %v142_v62  ;;  %401 = vmatpush.msrb.mxu2 %v1549_v63  ;;  %v1615_v59 = vld [vmem:[%s3097_s1 + $0x220] sm:$0xff]  ;;  %v1690_v62 = vld [vmem:[%s3097_s1 + $0x378] sm:$0xff]  ;;  %v106_v63 = vsel %vm94_vm0, %v2246_v51, %v105_v52  ;;  %v1704_v52 = vld [vmem:[%s3097_s1 + $0x3e8] sm:$0xff] }
  0x41   :  { %531 = vmatpush.msrb.mxu3 %v1598_v0  ;;  %721 = vmatpush.msrb.mxu0 %v1618_v3  ;;  %v794_v0 = vrot.slane %v2026_v17, 2  ;;  %v1614_v3 = vld [vmem:[%s3097_s1 + $0x218] sm:$0xff] }
  0x42   :  { %254 = vmatpush.msrb.mxu1 %v48_v7  ;;  %402 = vmatpush.msrb.mxu2 %v1548_v10  ;;  %v1706_v7 = vld [vmem:[%s3097_s1 + $0x3f8] sm:$0xff]  ;;  %v311_v10 = vrot.slane %v2031_v21, 2  ;;  %v1613_v21 = vld [vmem:[%s3097_s1 + $0x210] sm:$0xff] }
  0x43   :  { %532 = vmatpush.msrb.mxu3 %v1597_v39  ;;  %722 = vmatpush.msrb.mxu0 %v1617_v29  ;;  %v1705_v39 = vld [vmem:[%s3097_s1 + $0x3f0] sm:$0xff]  ;;  %v633_v29 = vrot.slane %v2276_v22, 1 }
  0x44   :  { %255 = vmatpush.msrb.mxu1 %v47_v41  ;;  %403 = vmatpush.msrb.mxu2 %v1547_v43  ;;  %v1641_v41 = vld [vmem:[%s3097_s1 + $0x2f0] sm:$0xff]  ;;  %v1688_v43 = vld [vmem:[%s3097_s1 + $0x368] sm:$0xff] }
  0x45   :  { %533 = vmatpush.msrb.mxu3 %v1596_v45  ;;  %723 = vmatpush.msrb.mxu0 %v1616_v49  ;;  %v1612_v45 = vld [vmem:[%s3097_s1 + $0x208] sm:$0xff]  ;;  %v312_v49 = vsel %vm306_vm1, %v794_v0, %v311_v10  ;;  %v1721_v10 = vld [vmem:[%s3097_s1 + $0x470] sm:$0xff] }
  0x46   :  { %256 = vmatpush.msrb.mxu1 %v46_v53  ;;  %404 = vmatmul.f32.vlgmr.msrb.gmra.mxu2 %v309_v54  ;;  %v1611_v53 = vld [vmem:[%s3097_s1 + $0x200] sm:$0xff]  ;;  %v1640_v54 = vld [vmem:[%s3097_s1 + $0x2e8] sm:$0xff] }
  0x47   :  { %257 = vmatmul.f32.vlgmr.msrb.gmra.mxu1 %v1879_v28  ;;  %534 = vmatpush.msrb.mxu3 %v1595_v58  ;;  %v1642_v28 = vld [vmem:[%s3097_s1 + $0x2f8] sm:$0xff]  ;;  %v634_v58 = vsel %vm94_vm0, %v98_v36, %v633_v29  ;;  %v1687_v36 = vld [vmem:[%s3097_s1 + $0x360] sm:$0xff] }
  0x48   :  { %724 = vmatpush.msrb.mxu0 %v1615_v59  ;;  %1006 = vmatpush.msra.mxu2 %v1690_v62  ;;  %v2318_v59 = vrot.slane %v2134_v8, 2  ;;  %v1722_v62 = vld [vmem:[%s3097_s1 + $0x478] sm:$0xff] }
  0x49   :  { %201 = vmatmul.f32.gmra.mxu0 %v106_v63  ;;  %535 = vmatmul.f32.vlgmr.msrb.gmra.mxu3 %v2026_v17  ;;  %v314_v63 = vrot.slane %v2139_v9, 2  ;;  %v1639_v9 = vld [vmem:[%s3097_s1 + $0x2e0] sm:$0xff] }
  0x4a   :  { %725 = vmatpush.msrb.mxu0 %v1614_v3  ;;  %1200 = vmatpush.msra.mxu3 %v1706_v7  ;;  %v2327_v3 = vld [vmem:[%s3098_s0 + $0x28] sm:$0x3]  ;;  %v1703_v7 = vld [vmem:[%s3097_s1 + $0x3e0] sm:$0xff] }
  0x4b   :  { %875 = vmatpush.msra.mxu1 %v1642_v28  ;;  %1007 = vmatpush.msra.mxu2 %v1689_v31  ;;  %v1686_v28 = vld [vmem:[%s3097_s1 + $0x358] sm:$0xff]  ;;  %v636_v31 = vrot.slane %v2327_v3, 1  ;;  %v315_v29 = vsel %vm306_vm1, %v2318_v59, %v314_v63  ;;  %v1637_v63 = vld [vmem:[%s3097_s1 + $0x2d0] sm:$0xff] }
  0x4c   :  { %726 = vmatpush.msrb.mxu0 %v1613_v21  ;;  %1201 = vmatpush.msra.mxu3 %v1705_v39  ;;  %v1702_v21 = vld [vmem:[%s3097_s1 + $0x3d8] sm:$0xff] }
  0x4d   :  { %876 = vmatpush.msra.mxu1 %v1641_v41  ;;  %1008 = vmatpush.msra.mxu2 %v1688_v43  ;;  %v1638_v39 = vld [vmem:[%s3097_s1 + $0x2d8] sm:$0xff]  ;;  %v1720_v41 = vld [vmem:[%s3097_s1 + $0x468] sm:$0xff]  ;;  %v1685_v43 = vld [vmem:[%s3097_s1 + $0x350] sm:$0xff] }
  0x4e   :  { %727 = vmatpush.msrb.mxu0 %v1612_v45  ;;  %407 = vmatmul.f32.gmra.mxu2 %v312_v49  ;;  %v1719_v45 = vld [vmem:[%s3097_s1 + $0x460] sm:$0xff]  ;;  %v1701_v49 = vld [vmem:[%s3097_s1 + $0x3d0] sm:$0xff] }
  0x4f   :  { %260 = vmatmul.f32.gmra.mxu1 %v2026_v17  ;;  %1202 = vmatpush.msra.mxu3 %v1704_v52  ;;  %v637_v52 = vsel %vm94_vm0, %v2169_v40, %v636_v31  ;;  %v798_v17 = vrot.slane %v2327_v3, 2 }
  0x50   :  { %728 = vmatpush.msrb.mxu0 %v1611_v53  ;;  %877 = vmatpush.msra.mxu1 %v1640_v54  ;;  %v2370_v53 = vrot.slane %v2220_v32, 2  ;;  %v317_v54 = vrot.slane %v2225_v35, 2  ;;  %v1684_v35 = vld [vmem:[%s3097_s1 + $0x348] sm:$0xff] }
  0x51   :  { %538 = vmatmul.f32.gmra.mxu3 %v2134_v8  ;;  %729 = vmatmul.f32.vlgmr.msrb.gmra.mxu0 %v634_v58  ;;  %v2376_v58 = vld [vmem:[%s3098_s0 + $0x38] sm:$0x3] }
  0x52   :  { %1362 = vmatpush.msra.mxu0 %v1722_v62  ;;  %1009 = vmatpush.msra.mxu2 %v1687_v36  ;;  %v1718_v62 = vld [vmem:[%s3097_s1 + $0x458] sm:$0xff]  ;;  %v1700_v36 = vld [vmem:[%s3097_s1 + $0x3c8] sm:$0xff] }
  0x53   :  { %1203 = vmatpush.msra.mxu3 %v1703_v7  ;;  %878 = vmatpush.msra.mxu1 %v1639_v9  ;;  %v1717_v7 = vld [vmem:[%s3097_s1 + $0x450] sm:$0xff]  ;;  %v1636_v9 = vld [vmem:[%s3097_s1 + $0x2c8] sm:$0xff] }
  0x54   :  { %1363 = vmatpush.msra.mxu0 %v1721_v10  ;;  %1010 = vmatpush.msra.mxu2 %v1686_v28  ;;  %v639_v10 = vrot.slane %v2376_v58, 1  ;;  %v318_v28 = vsel %vm306_vm1, %v2370_v53, %v317_v54 }
  0x55   :  { %1204 = vmatpush.msra.mxu3 %v1702_v21  ;;  %879 = vmatpush.msra.mxu1 %v1638_v39  ;;  %v3112_v21 = vrot.slane %v1834_v13, 2  ;;  %v320_v39 = vrot.slane %v1839_v14, 2  ;;  %v1716_v14 = vld [vmem:[%s3097_s1 + $0x448] sm:$0xff] }
  0x56   :  { %410 = vmatmul.f32.gmra.mxu2 %v315_v29  ;;  %1364 = vmatpush.msra.mxu0 %v1720_v41  ;;  %v640_v31 = vsel %vm94_vm0, %v2246_v51, %v639_v10  ;;  %v2408_v29 = vld [vmem:[%s3098_s0 + $0x48] sm:$0x3]  ;;  %v1683_v41 = vld [vmem:[%s3097_s1 + $0x340] sm:$0xff] }
  0x57   :  { %263 = vmatmul.f32.gmra.mxu1 %v2134_v8  ;;  %1011 = vmatpush.msra.mxu2 %v1685_v43  ;;  %v1699_v43 = vld [vmem:[%s3097_s1 + $0x3c0] sm:$0xff] }
  0x58   :  { %1365 = vmatpush.msra.mxu0 %v1719_v45  ;;  %1205 = vmatpush.msra.mxu3 %v1701_v49  ;;  %v1635_v45 = vld [vmem:[%s3097_s1 + $0x2c0] sm:$0xff]  ;;  %v642_v49 = vrot.slane %v2408_v29, 1 }
  0x59   :  { %541 = vmatmul.f32.gmra.mxu3 %v2220_v32  ;;  %732 = vmatmul.f32.gmra.mxu0 %v637_v52  ;;  %v321_v52 = vsel %vm306_vm1, %v3112_v21, %v320_v39  ;;  %v326_v39 = vrot.slane %v2007_v6, 2  ;;  %v1714_v6 = vld [vmem:[%s3097_s1 + $0x438] sm:$0xff] }
  0x5a   :  { %1366 = vmatpush.msra.mxu0 %v1718_v62  ;;  %880 = vmatpush.msra.mxu1 %v1637_v63  ;;  %v643_v54 = vsel %vm94_vm0, %v107_v20, %v642_v49  ;;  %v3111_v62 = vrot.slane %v1912_v37, 2  ;;  %v323_v63 = vrot.slane %v1917_v38, 2  ;;  %v1698_v20 = vld [vmem:[%s3097_s1 + $0x3b8] sm:$0xff]  ;;  %v1715_v38 = vld [vmem:[%s3097_s1 + $0x440] sm:$0xff] }
  0x5b   :  { %1012 = vmatpush.msra.mxu2 %v1684_v35  ;;  %1206 = vmatpush.msra.mxu3 %v1700_v36  ;;  %v2436_v35 = vld [vmem:[%s3098_s0 + $0x58] sm:$0x3] }
  0x5c   :  { %1367 = vmatpush.msra.mxu0 %v1717_v7  ;;  %881 = vmatpush.msra.mxu1 %v1636_v9  ;;  %v1682_v36 = vld [vmem:[%s3097_s1 + $0x338] sm:$0xff]  ;;  %v645_v9 = vrot.slane %v2436_v35, 1  ;;  %v324_v10 = vsel %vm306_vm1, %v3111_v62, %v323_v63  ;;  %v329_v63 = vrot.slane %v2115_v61, 2  ;;  %v1713_v61 = vld [vmem:[%s3097_s1 + $0x430] sm:$0xff] }
  0x5d   :  { %1013 = vmatpush.msra.mxu2 %v1683_v41  ;;  %1207 = vmatpush.msra.mxu3 %v1699_v43  ;;  %v1634_v7 = vld [vmem:[%s3097_s1 + $0x2b8] sm:$0xff]  ;;  %v2464_v41 = vld [vmem:[%s3098_s0 + $0x68] sm:$0x3]  ;;  %v1681_v43 = vld [vmem:[%s3097_s1 + $0x330] sm:$0xff] }
  0x5e   :  { %413 = vmatmul.f32.gmra.mxu2 %v318_v28  ;;  %1368 = vmatpush.msra.mxu0 %v1716_v14  ;;  %v646_v28 = vsel %vm94_vm0, %v110_v50, %v645_v9  ;;  %v1697_v50 = vld [vmem:[%s3097_s1 + $0x3b0] sm:$0xff] }
  0x5f   :  { %266 = vmatmul.f32.gmra.mxu1 %v2220_v32  ;;  %1014 = vmatpush.msra.mxu2 %v1682_v36  ;;  %v1633_v14 = vld [vmem:[%s3097_s1 + $0x2b0] sm:$0xff]  ;;  %v2492_v36 = vld [vmem:[%s3098_s0 + $0x78] sm:$0x3] }
  0x60   :  { %882 = vmatpush.msra.mxu1 %v1635_v45  ;;  %1208 = vmatpush.msra.mxu3 %v1698_v20  ;;  %v648_v45 = vrot.slane %v2464_v41, 1  ;;  %v1680_v20 = vld [vmem:[%s3097_s1 + $0x328] sm:$0xff] }
  0x61   :  { %544 = vmatmul.f32.gmra.mxu3 %v1834_v13  ;;  %735 = vmatmul.f32.gmra.mxu0 %v640_v31  ;;  %v3110_v31 = vrot.slane %v2002_v5, 2 }
  0x62   :  { %1369 = vmatpush.msra.mxu0 %v1715_v38  ;;  %883 = vmatpush.msra.mxu1 %v1634_v7  ;;  %v1632_v38 = vld [vmem:[%s3097_s1 + $0x2a8] sm:$0xff]  ;;  %v651_v7 = vrot.slane %v2492_v36, 1 }
  0x63   :  { %1015 = vmatpush.msra.mxu2 %v1681_v43  ;;  %1209 = vmatpush.msra.mxu3 %v1697_v50  ;;  %v327_v49 = vsel %vm306_vm1, %v3110_v31, %v326_v39  ;;  %v331_v39 = vrot.slane %v1844_v15, 2  ;;  %v332_v43 = vrot.slane %v1849_v16, 2  ;;  %v2525_v50 = vld [vmem:[%s3098_s0 + $0x88] sm:$0x3]  ;;  %v1646_v31 = vld [vmem:[%s3098_s0 + $0x38] sm:$0x3] }
  0x64   :  { %1370 = vmatpush.msra.mxu0 %v1714_v6  ;;  %884 = vmatpush.msra.mxu1 %v1633_v14  ;;  %v1679_v6 = vld [vmem:[%s3097_s1 + $0x320] sm:$0xff]  ;;  %v1712_v16 = vld [vmem:[%s3097_s1 + $0x428] sm:$0xff] }
  0x65   :  { %1016 = vmatpush.msra.mxu2 %v1680_v20  ;;  %v1631_v14 = vld [vmem:[%s3097_s1 + $0x2a0] sm:$0xff]  ;;  %v3107_v20 = vrot.slane %v1896_v33, 2 }
  0x66   :  { %416 = vmatmul.f32.gmra.mxu2 %v321_v52  ;;  %v649_v52 = vsel %vm94_vm0, %v113_v23, %v648_v45  ;;  %v1696_v23 = vld [vmem:[%s3097_s1 + $0x3a8] sm:$0xff]  ;;  %1371 = vmatpush.msra.mxu0 %v1713_v61  ;;  %v2552_v61 = vld [vmem:[%s3098_s0 + $0xb8] sm:$0x3] }
  0x67   :  { %269 = vmatmul.f32.gmra.mxu1 %v1834_v13  ;;  %1210 = vmatpush.msra.mxu3 %v1696_v23  ;;  %v335_v23 = vrot.slane %v1901_v34, 2  ;;  %v1711_v34 = vld [vmem:[%s3097_s1 + $0x420] sm:$0xff] }
  0x68   :  { %885 = vmatpush.msra.mxu1 %v1632_v38  ;;  %1017 = vmatpush.msra.mxu2 %v1679_v6  ;;  %v1678_v38 = vld [vmem:[%s3097_s1 + $0x318] sm:$0xff]  ;;  %v338_v6 = vrot.slane %v1991_v2, 2 }
  0x69   :  { %547 = vmatmul.f32.gmra.mxu3 %v1912_v37  ;;  %738 = vmatmul.f32.gmra.mxu0 %v643_v54  ;;  %v3109_v54 = vrot.slane %v2110_v60, 2  ;;  %v1710_v2 = vld [vmem:[%s3097_s1 + $0x418] sm:$0xff] }
  0x6a   :  { %1372 = vmatpush.msra.mxu0 %v1712_v16  ;;  %886 = vmatpush.msra.mxu1 %v1631_v14  ;;  %v1677_v16 = vld [vmem:[%s3097_s1 + $0x310] sm:$0xff] }
  0x6b   :  { %v330_v9 = vsel %vm306_vm1, %v3109_v54, %v329_v63  ;;  %1018 = vmatpush.msra.mxu2 %v1678_v38  ;;  %v1629_v14 = vld [vmem:[%s3097_s1 + $0x290] sm:$0xff]  ;;  %v341_v38 = vrot.slane %v2099_v57, 2 }
  0x6c   :  { %1373 = vmatpush.msra.mxu0 %v1711_v34  ;;  %v1676_v34 = vld [vmem:[%s3097_s1 + $0x308] sm:$0xff]  ;;  %v1709_v57 = vld [vmem:[%s3097_s1 + $0x410] sm:$0xff] }
  0x6d   :  { %1019 = vmatpush.msra.mxu2 %v1677_v16  ;;  %v3103_v16 = vrot.slane %v1857_v18, 2 }
  0x6e   :  { %419 = vmatmul.f32.gmra.mxu2 %v324_v10  ;;  %v2514_v10 = vld [vmem:[%s3098_s0 + $0x80] sm:$0xff]  ;;  %1374 = vmatpush.msra.mxu0 %v1710_v2  ;;  %v2638_v2 = vld [vmem:[%s3098_s0 + $0xe8] sm:$0x3] }
  0x6f   :  { %272 = vmatmul.f32.gmra.mxu1 %v1912_v37  ;;  %v3108_v45 = vrot.slane %v2514_v10, 1  ;;  %1020 = vmatpush.msra.mxu2 %v1676_v34 }
  0x70   :  { %1375 = vmatpush.msra.mxu0 %v1709_v57  ;;  %v3101_v57 = vrot.slane %v1935_v46, 2 }
  0x71   :  { %550 = vmatmul.f32.gmra.mxu3 %v2002_v5  ;;  %741 = vmatmul.f32.gmra.mxu0 %v646_v28  ;;  %v652_v28 = vsel %vm94_vm0, %v116_v12, %v651_v7  ;;  %v1695_v12 = vld [vmem:[%s3097_s1 + $0x3a0] sm:$0xff]  ;;  %v1630_v7 = vld [vmem:[%s3097_s1 + $0x298] sm:$0xff] }
  0x72   :  { %1211 = vmatpush.msra.mxu3 %v1695_v12  ;;  %887 = vmatpush.msra.mxu1 %v1630_v7  ;;  %v2580_v12 = vld [vmem:[%s3098_s0 + $0xc8] sm:$0x3] }
  0x73   :  { %v1628_v7 = vld [vmem:[%s3097_s1 + $0x288] sm:$0xff] }
  0x74   :  { %888 = vmatpush.msra.mxu1 %v1629_v14  ;;  %v1675_v14 = vld [vmem:[%s3097_s1 + $0x300] sm:$0xff] }
  0x75   :  { %1021 = vmatpush.msra.mxu2 %v1675_v14 }
  0x76   :  { %422 = vmatmul.f32.gmra.mxu2 %v327_v49  ;;  %v654_v49 = vrot.slane %v2525_v50, 1  ;;  %889 = vmatpush.msra.mxu1 %v1628_v7 }
  0x77   :  { %275 = vmatmul.f32.gmra.mxu1 %v2002_v5 }
  0x78   :  { %v655_v63 = vsel %vm94_vm0, %v3108_v45, %v654_v49  ;;  %v660_v49 = vrot.slane %v2580_v12, 1 }
  0x79   :  { %553 = vmatmul.f32.gmra.mxu3 %v2110_v60  ;;  %744 = vmatmul.f32.gmra.mxu0 %v649_v52  ;;  %v333_v52 = vsel %vm306_vm1, %v331_v39, %v332_v43  ;;  %v3106_v43 = vrot.slane %v1986_v1, 2 }
  0x7e   :  { %425 = vmatmul.f32.gmra.mxu2 %v330_v9  ;;  %v657_v9 = vrot.slane %v2552_v61, 1 }
  0x7f   :  { %278 = vmatmul.f32.gmra.mxu1 %v2110_v60 }
  0x80   :  { %v658_v39 = vsel %vm94_vm0, %v122_v44, %v657_v9  ;;  %v1693_v44 = vld [vmem:[%s3097_s1 + $0x390] sm:$0xff] }
  0x81   :  { %556 = vmatmul.f32.gmra.mxu3 %v2514_v10  ;;  %747 = vmatmul.f32.gmra.mxu0 %v652_v28  ;;  %v336_v28 = vsel %vm306_vm1, %v3107_v20, %v335_v23  ;;  %v3105_v23 = vrot.slane %v2094_v55, 2 }
  0x86   :  { %428 = vmatmul.f32.gmra.mxu2 %v333_v52  ;;  %v339_v52 = vsel %vm306_vm1, %v3106_v43, %v338_v6 }
  0x87   :  { %281 = vmatmul.f32.gmra.mxu1 %v1844_v15  ;;  %v1694_v15 = vld [vmem:[%s3097_s1 + $0x398] sm:$0xff] }
  0x88   :  { %1212 = vmatpush.msra.mxu3 %v1694_v15  ;;  %v2608_v15 = vld [vmem:[%s3098_s0 + $0xd8] sm:$0x3] }
  0x89   :  { %559 = vmatmul.f32.gmra.mxu3 %v1896_v33  ;;  %750 = vmatmul.f32.gmra.mxu0 %v655_v63  ;;  %v661_v63 = vsel %vm94_vm0, %v125_v11, %v660_v49  ;;  %v1692_v11 = vld [vmem:[%s3097_s1 + $0x388] sm:$0xff]  ;;  %v663_v9 = vrot.slane %v2608_v15, 1  ;;  %v1627_v49 = vld [vmem:[%s3097_s1 + $0x280] sm:$0xff] }
  0x8a   :  { %1213 = vmatpush.msra.mxu3 %v1693_v44  ;;  %v344_v44 = vrot.slane %v1862_v19, 2  ;;  %v1708_v19 = vld [vmem:[%s3097_s1 + $0x408] sm:$0xff]  ;;  %890 = vmatpush.msra.mxu1 %v1627_v49 }
  0x8b   :  { %1376 = vmatpush.msra.mxu0 %v1708_v19  ;;  %v3102_v19 = vrot.slane %v2041_v26, 2 }
  0x8c   :  { %1214 = vmatpush.msra.mxu3 %v1692_v11 }
  0x8e   :  { %431 = vmatmul.f32.gmra.mxu2 %v336_v28  ;;  %v342_v28 = vsel %vm306_vm1, %v3105_v23, %v341_v38 }
  0x8f   :  { %284 = vmatmul.f32.gmra.mxu1 %v1896_v33 }
  0x91   :  { %562 = vmatmul.f32.gmra.mxu3 %v1986_v1  ;;  %753 = vmatmul.f32.gmra.mxu0 %v658_v39  ;;  %v664_v39 = vsel %vm94_vm0, %v128_v4, %v663_v9  ;;  %v1691_v4 = vld [vmem:[%s3097_s1 + $0x380] sm:$0xff]  ;;  %v347_v9 = vrot.slane %v1940_v47, 2 }
  0x92   :  { %1215 = vmatpush.msra.mxu3 %v1691_v4 }
  0x93   :  { %v348_v47 = vsel %vm306_vm1, %v3101_v57, %v347_v9  ;;  %v2715_v57 = vld [vmem:[%s3098_s0 + $0x118] sm:$0x3] }
  0x96   :  { %434 = vmatmul.f32.gmra.mxu2 %v339_v52  ;;  %v666_v52 = vrot.slane %v2638_v2, 1 }
  0x97   :  { %287 = vmatmul.f32.gmra.mxu1 %v1986_v1 }
  0x98   :  { %v667_v34 = vsel %vm94_vm0, %v131_v25, %v666_v52  ;;  %v1707_v25 = vld [vmem:[%s3097_s1 + $0x400] sm:$0xff]  ;;  %v350_v52 = vrot.slane %v2046_v27, 2 }
  0x99   :  { %565 = vmatmul.f32.gmra.mxu3 %v2094_v55  ;;  %756 = vmatmul.f32.gmra.mxu0 %v661_v63  ;;  %v345_v63 = vsel %vm306_vm1, %v3103_v16, %v344_v44 }
  0x9a   :  { %1377 = vmatpush.msra.mxu0 %v1707_v25  ;;  %v351_v25 = vsel %vm306_vm1, %v3102_v19, %v350_v52 }
  0x9e   :  { %437 = vmatmul.f32.gmra.mxu2 %v342_v28  ;;  %v2630_v6 = vpop.f32.mrf.mxu1  ;;  %v2672_v28 = vld [vmem:[%s3098_s0 + $0xf8] sm:$0x3] }
  0x9f   :  { %290 = vmatmul.f32.gmra.mxu1 %v2094_v55  ;;  %v669_v44 = vrot.slane %v2672_v28, 1 }
  0xa1   :  { %568 = vmatmul.f32.gmra.mxu3 %v1857_v18  ;;  %759 = vmatmul.f32.gmra.mxu0 %v664_v39  ;;  %v670_v4 = vsel %vm94_vm0, %v134_v56, %v669_v44 }
  0xa4   :  { %v2657_v38 = vpop.f32.mrf.mxu2  ;;  %v193_v39 = vpop.f32.mrf.mxu0 }
  0xa6   :  { %440 = vmatmul.f32.gmra.mxu2 %v345_v63  ;;  %v2662_v11 = vpop.f32.mrf.mxu3  ;;  %v2695_v63 = vld [vmem:[%s3098_s0 + $0x108] sm:$0x3] }
  0xa7   :  { %293 = vmatmul.f32.gmra.mxu1 %v1857_v18  ;;  %v2666_v7 = vpop.f32.mrf.mxu1  ;;  %v672_v56 = vrot.slane %v2695_v63, 1 }
  0xa9   :  { %571 = vmatmul.f32.gmra.mxu3 %v1935_v46  ;;  %762 = vmatmul.f32.gmra.mxu0 %v667_v34  ;;  %v673_v27 = vsel %vm94_vm0, %v137_v42, %v672_v56  ;;  %v675_v42 = vrot.slane %v2715_v57, 1 }
  0xac   :  { %v2682_v14 = vpop.f32.mrf.mxu2 }
  0xae   :  { %443 = vmatmul.f32.gmra.mxu2 %v348_v47  ;;  %v3104_v47 = vrot.slane %v2149_v24, 2 }
  0xaf   :  { %296 = vmatmul.f32.gmra.mxu1 %v1935_v46  ;;  %v2689_v49 = vpop.f32.mrf.mxu3 }
  0xb0   :  { %v2697_v34 = vpop.f32.mrf.mxu1 }
  0xb1   :  { %574 = vmatmul.f32.gmra.mxu3 %v2041_v26  ;;  %765 = vmatmul.f32.gmra.mxu0 %v670_v4  ;;  %v353_v4 = vrot.slane %v2154_v30, 2  ;;  %v2731_v30 = vld [vmem:[%s3098_s0 + $0x120] sm:$0xff] }
  0xb2   :  { %v196_v9 = vpop.f32.mrf.mxu0 }
  0xb3   :  { %v354_v56 = vsel %vm306_vm1, %v3104_v47, %v353_v4  ;;  %v2742_v4 = vld [vmem:[%s3098_s0 + $0x128] sm:$0x3]  ;;  %v795_v47 = vrot.slane %v2276_v22, 2 }
  0xb4   :  { %3114 = vst [vmem:[#allocation2_spill] sm:$0xff] %v2742_v4 }
  0xb5   :  { %v2704_v44 = vpop.f32.mrf.mxu2  ;;  %v796_v45 = vsel %vm306_vm1, %v794_v0, %v795_v47 }
  0xb6   :  { %446 = vmatmul.f32.gmra.mxu2 %v351_v25 }
  0xb7   :  { %299 = vmatmul.f32.gmra.mxu1 %v2041_v26 }
  0xb9   :  { %577 = vmatmul.f32.gmra.mxu3 %v2149_v24  ;;  %768 = vmatmul.f32.gmra.mxu0 %v673_v27  ;;  %v2718_v52 = vpop.f32.mrf.mxu3  ;;  %v676_v27 = vsel %vm94_vm0, %v140_v48, %v675_v42  ;;  %v677_v48 = vrot.slane %v2731_v30, 1  ;;  %v678_v42 = vrot.slane %v2742_v4, 1 }
  0xba   :  { %v2720_v25 = vpop.f32.mrf.mxu1 }
  0xbb   :  { %v679_v22 = vsel %vm94_vm0, %v677_v48, %v678_v42  ;;  %v799_v42 = vsel %vm306_vm1, %v2318_v59, %v798_v17 }
  0xbc   :  { %v2726_v19 = vpop.f32.mrf.mxu0 }
  0xbe   :  { %449 = vmatmul.f32.gmra.mxu2 %v354_v56  ;;  %v1644_v56 = vld [vmem:[%s3098_s0 + $0x28] sm:$0x3] }
  0xbf   :  { %302 = vmatmul.f32.gmra.mxu1 %v2149_v24  ;;  %v2737_v16 = vpop.f32.mrf.mxu2  ;;  %v1120_v23 = vrot.slane %v1644_v56, 1  ;;  %v1282_v21 = vrot.slane %v1644_v56, 2 }
  0xc1   :  { %580 = vmatmul.f32.gmra.mxu3 %v2731_v30  ;;  %771 = vmatmul.f32.gmra.mxu0 %v676_v27  ;;  %v1121_v27 = vsel %vm94_vm0, %v2169_v40, %v1120_v23  ;;  %v1648_v23 = vld [vmem:[%s3098_s0 + $0x48] sm:$0x3] }
  0xc3   :  { %v2751_v43 = vpop.f32.mrf.mxu3 }
  0xc4   :  { %3115 = vst [vmem:[#allocation3_spill] sm:$0xff] %v2751_v43  ;;  %v258_v20 = vpop.f32.mrf.mxu1 }
  0xc5   :  { %v259_v62 = vadd.f32 %v258_v20, %v193_v39  ;;  %v1283_v20 = vsel %vm306_vm1, %v2318_v59, %v1282_v21 }
  0xc6   :  { %v2756_v54 = vpop.f32.mrf.mxu0  ;;  %1022 = vmatmul.f32.vlgmr.msra.gmra.mxu2 %v2134_v8  ;;  %v1123_v8 = vrot.slane %v1646_v31, 1 }
  0xc7   :  { %891 = vmatmul.f32.vlgmr.msra.gmra.mxu1 %v796_v45 }
  0xc8   :  { %v1124_v3 = vsel %vm94_vm0, %v2246_v51, %v1123_v8 }
  0xc9   :  { %774 = vmatmul.f32.gmra.mxu0 %v679_v22  ;;  %1216 = vmatmul.f32.vlgmr.msra.gmra.mxu3 %v1121_v27  ;;  %v405_v0 = vpop.f32.mrf.mxu2  ;;  %v1126_v22 = vrot.slane %v1648_v23, 1  ;;  %v1285_v27 = vrot.slane %v1646_v31, 2  ;;  %v1649_v31 = vld [vmem:[%s3098_s0 + $0x50] sm:$0xff] }
  0xca   :  { %v453_v47 = vadd.f32 %v405_v0, %v259_v62  ;;  %v1647_v62 = vld [vmem:[%s3098_s0 + $0x40] sm:$0xff] }
  0xcb   :  { %v1125_v51 = vrot.slane %v1647_v62, 1 }
  0xcc   :  { %v261_v43 = vpop.f32.mrf.mxu1  ;;  %v536_v4 = vpop.f32.mrf.mxu3 }
  0xcd   :  { %v2770_v40 = vadd.f32 %v536_v4, %v453_v47  ;;  %v262_v39 = vadd.f32 %v261_v43, %v196_v9  ;;  %v801_v4 = vrot.slane %v2376_v58, 2  ;;  %v1127_v43 = vsel %vm94_vm0, %v1125_v51, %v1126_v22  ;;  %v1650_v9 = vld [vmem:[%s3098_s0 + $0x58] sm:$0x3] }
  0xce   :  { %v2772_v45 = vpop.f32.mrf.mxu0  ;;  %1025 = vmatmul.f32.gmra.mxu2 %v2220_v32  ;;  %v1286_v58 = vsel %vm306_vm1, %v2370_v53, %v1285_v27  ;;  %v3116_v22 = vrot.slane %v1834_v13, 2  ;;  %v1652_v13 = vld [vmem:[%s3098_s0 + $0x68] sm:$0x3] }
  0xcf   :  { %894 = vmatmul.f32.gmra.mxu1 %v799_v42  ;;  %v802_v17 = vsel %vm306_vm1, %v2370_v53, %v801_v4  ;;  %v804_v42 = vrot.slane %v2408_v29, 2  ;;  %v1128_v4 = vrot.slane %v1649_v31, 1  ;;  %v1129_v53 = vrot.slane %v1650_v9, 1 }
  0xd1   :  { %1219 = vmatmul.f32.gmra.mxu3 %v1124_v3  ;;  %1378 = vmatmul.f32.vlgmr.msra.gmra.mxu0 %v1283_v20  ;;  %v408_v32 = vpop.f32.mrf.mxu2  ;;  %v1287_v3 = vrot.slane %v1647_v62, 2  ;;  %v805_v27 = vsel %vm306_vm1, %v3116_v22, %v804_v42  ;;  %v1130_v29 = vsel %vm94_vm0, %v1128_v4, %v1129_v53  ;;  %v3117_v53 = vrot.slane %v1912_v37, 2  ;;  %v1654_v37 = vld [vmem:[%s3098_s0 + $0x78] sm:$0x3] }
  0xd2   :  { %v454_v56 = vadd.f32 %v408_v32, %v262_v39  ;;  %v1288_v32 = vrot.slane %v1648_v23, 2 }
  0xd4   :  { %v264_v59 = vpop.f32.mrf.mxu1  ;;  %v539_v21 = vpop.f32.mrf.mxu3 }
  0xd5   :  { %v2788_v0 = vadd.f32 %v539_v21, %v454_v56  ;;  %v265_v8 = vadd.f32 %v264_v59, %v2726_v19  ;;  %v1289_v19 = vsel %vm306_vm1, %v1287_v3, %v1288_v32  ;;  %v807_v59 = vrot.slane %v2436_v35, 2 }
  0xd6   :  { %v2790_v47 = vpop.f32.mrf.mxu0  ;;  %1028 = vmatmul.f32.gmra.mxu2 %v1647_v62  ;;  %v1651_v62 = vld [vmem:[%s3098_s0 + $0x60] sm:$0xff]  ;;  %v1132_v3 = vrot.slane %v1652_v13, 1 }
  0xd7   :  { %897 = vmatmul.f32.gmra.mxu1 %v802_v17  ;;  %v1131_v42 = vrot.slane %v1651_v62, 1  ;;  %v808_v32 = vsel %vm306_vm1, %v3117_v53, %v807_v59  ;;  %v1135_v59 = vrot.slane %v1654_v37, 1 }
  0xd9   :  { %1222 = vmatmul.f32.gmra.mxu3 %v1127_v43  ;;  %1381 = vmatmul.f32.gmra.mxu0 %v1286_v58  ;;  %v411_v20 = vpop.f32.mrf.mxu2  ;;  %v1290_v43 = vrot.slane %v1649_v31, 2  ;;  %v1133_v35 = vsel %vm94_vm0, %v1131_v42, %v1132_v3  ;;  %v3118_v42 = vrot.slane %v2002_v5, 2  ;;  %v813_v5 = vrot.slane %v2492_v36, 2 }
  0xda   :  { %v455_v39 = vadd.f32 %v411_v20, %v265_v8  ;;  %v1291_v20 = vrot.slane %v1650_v9, 2  ;;  %v3120_v36 = vrot.slane %v2514_v10, 1 }
  0xdc   :  { %v267_v56 = vpop.f32.mrf.mxu1  ;;  %v542_v51 = vpop.f32.mrf.mxu3 }
  0xdd   :  { %v2806_v21 = vadd.f32 %v542_v51, %v455_v39  ;;  %v268_v23 = vadd.f32 %v267_v56, %v2756_v54  ;;  %v1292_v54 = vsel %vm306_vm1, %v1290_v43, %v1291_v20  ;;  %v810_v56 = vrot.slane %v2464_v41, 2 }
  0xde   :  { %v2808_v17 = vpop.f32.mrf.mxu0  ;;  %1031 = vmatmul.f32.gmra.mxu2 %v1649_v31  ;;  %v1653_v31 = vld [vmem:[%s3098_s0 + $0x70] sm:$0xff]  ;;  %v1294_v43 = vrot.slane %v1652_v13, 2 }
  0xdf   :  { %900 = vmatmul.f32.gmra.mxu1 %v805_v27  ;;  %v1293_v27 = vrot.slane %v1651_v62, 2  ;;  %v811_v3 = vsel %vm306_vm1, %v3118_v42, %v810_v56  ;;  %v1296_v53 = vrot.slane %v1653_v31, 2 }
  0xe1   :  { %1225 = vmatmul.f32.gmra.mxu3 %v1130_v29  ;;  %1384 = vmatmul.f32.gmra.mxu0 %v1289_v19  ;;  %v414_v58 = vpop.f32.mrf.mxu2 }
  0xe2   :  { %v456_v8 = vadd.f32 %v414_v58, %v268_v23  ;;  %v1134_v23 = vrot.slane %v1653_v31, 1 }
  0xe4   :  { %v270_v39 = vpop.f32.mrf.mxu1  ;;  %v545_v4 = vpop.f32.mrf.mxu3  ;;  %v1136_v41 = vsel %vm94_vm0, %v1134_v23, %v1135_v59  ;;  %v815_v59 = vrot.slane %v2514_v10, 2 }
  0xe5   :  { %v2823_v51 = vadd.f32 %v545_v4, %v456_v8  ;;  %v271_v9 = vadd.f32 %v270_v39, %v2630_v6  ;;  %v1295_v6 = vsel %vm306_vm1, %v1293_v27, %v1294_v43  ;;  %v3119_v27 = vrot.slane %v2110_v60, 2  ;;  %v1658_v60 = vld [vmem:[%s3098_s0 + $0x98] sm:$0x3] }
  0xe6   :  { %v2825_v22 = vpop.f32.mrf.mxu0  ;;  %1034 = vmatmul.f32.gmra.mxu2 %v1651_v62  ;;  %v1656_v62 = vld [vmem:[%s3098_s0 + $0x88] sm:$0x3] }
  0xe7   :  { %903 = vmatmul.f32.gmra.mxu1 %v808_v32 }
  0xe9   :  { %1228 = vmatmul.f32.gmra.mxu3 %v1133_v35  ;;  %1387 = vmatmul.f32.gmra.mxu0 %v1292_v54  ;;  %v417_v29 = vpop.f32.mrf.mxu2  ;;  %v1138_v35 = vrot.slane %v1656_v62, 1  ;;  %v1297_v54 = vrot.slane %v1654_v37, 2  ;;  %v1657_v37 = vld [vmem:[%s3098_s0 + $0x90] sm:$0xff] }
  0xea   :  { %v457_v19 = vadd.f32 %v417_v29, %v271_v9  ;;  %v814_v29 = vsel %vm306_vm1, %v3119_v27, %v813_v5 }
  0xec   :  { %v273_v58 = vpop.f32.mrf.mxu1  ;;  %v548_v8 = vpop.f32.mrf.mxu3 }
  0xed   :  { %v2840_v20 = vadd.f32 %v548_v8, %v457_v19  ;;  %v274_v13 = vadd.f32 %v273_v58, %v2666_v7  ;;  %v1139_v7 = vsel %vm94_vm0, %v3120_v36, %v1138_v35  ;;  %v816_v58 = vrot.slane %v2525_v50, 2 }
  0xee   :  { %v2842_v4 = vpop.f32.mrf.mxu0  ;;  %1037 = vmatmul.f32.gmra.mxu2 %v1653_v31  ;;  %v1298_v31 = vsel %vm306_vm1, %v1296_v53, %v1297_v54  ;;  %v819_v54 = vrot.slane %v2552_v61, 2 }
  0xef   :  { %906 = vmatmul.f32.gmra.mxu1 %v811_v3  ;;  %v1140_v3 = vrot.slane %v1657_v37, 1 }
  0xf1   :  { %1231 = vmatmul.f32.gmra.mxu3 %v1136_v41  ;;  %1390 = vmatmul.f32.gmra.mxu0 %v1295_v6  ;;  %v420_v39 = vpop.f32.mrf.mxu2  ;;  %v1141_v41 = vrot.slane %v1658_v60, 1  ;;  %v1300_v6 = vrot.slane %v1656_v62, 2  ;;  %v1660_v62 = vld [vmem:[%s3098_s0 + $0xc8] sm:$0x3] }
  0xf2   :  { %v458_v32 = vadd.f32 %v420_v39, %v274_v13  ;;  %v817_v39 = vsel %vm306_vm1, %v815_v59, %v816_v58  ;;  %v1144_v36 = vrot.slane %v1660_v62, 1 }
  0xf3   :  { %v1301_v50 = vsel %vm306_vm1, %v815_v59, %v1300_v6 }
  0xf4   :  { %v276_v9 = vpop.f32.mrf.mxu1  ;;  %v551_v56 = vpop.f32.mrf.mxu3 }
  0xf5   :  { %v2854_v19 = vadd.f32 %v551_v56, %v458_v32  ;;  %v277_v43 = vadd.f32 %v276_v9, %v2697_v34  ;;  %v1659_v34 = vld [vmem:[%s3098_s0 + $0xc0] sm:$0xff]  ;;  %v1302_v9 = vrot.slane %v1657_v37, 2 }
  0xf6   :  { %v2856_v23 = vpop.f32.mrf.mxu0  ;;  %1040 = vmatmul.f32.gmra.mxu2 %v2514_v10  ;;  %v1142_v10 = vsel %vm94_vm0, %v1140_v3, %v1141_v41  ;;  %v822_v3 = vrot.slane %v2580_v12, 2  ;;  %v1305_v41 = vrot.slane %v1659_v34, 2 }
  0xf7   :  { %909 = vmatmul.f32.gmra.mxu1 %v814_v29  ;;  %v1143_v29 = vrot.slane %v1659_v34, 1 }
  0xf9   :  { %1234 = vmatmul.f32.gmra.mxu3 %v1139_v7  ;;  %1393 = vmatmul.f32.gmra.mxu0 %v1298_v31  ;;  %v423_v8 = vpop.f32.mrf.mxu2  ;;  %v1303_v7 = vrot.slane %v1658_v60, 2  ;;  %v1145_v61 = vsel %vm94_vm0, %v1143_v29, %v1144_v36  ;;  %v825_v36 = vrot.slane %v2608_v15, 2 }
  0xfa   :  { %v459_v42 = vadd.f32 %v423_v8, %v277_v43  ;;  %v3121_v43 = vrot.slane %v1896_v33, 2  ;;  %v1662_v33 = vld [vmem:[%s3098_s0 + $0xd8] sm:$0x3] }
  0xfc   :  { %v279_v13 = vpop.f32.mrf.mxu1  ;;  %v554_v5 = vpop.f32.mrf.mxu3  ;;  %v820_v58 = vsel %vm306_vm1, %v3121_v43, %v819_v54  ;;  %v3122_v54 = vrot.slane %v1986_v1, 2  ;;  %v1664_v1 = vld [vmem:[%s3098_s0 + $0xe8] sm:$0x3] }
  0xfd   :  { %v2873_v53 = vadd.f32 %v554_v5, %v459_v42  ;;  %v280_v35 = vadd.f32 %v279_v13, %v2720_v25  ;;  %v1304_v25 = vsel %vm306_vm1, %v1302_v9, %v1303_v7 }
  0xfe   :  { %v2875_v32 = vpop.f32.mrf.mxu0  ;;  %1043 = vmatmul.f32.gmra.mxu2 %v1657_v37  ;;  %v1661_v37 = vld [vmem:[%s3098_s0 + $0xd0] sm:$0xff]  ;;  %v823_v9 = vsel %vm306_vm1, %v3122_v54, %v822_v3  ;;  %v3123_v3 = vrot.slane %v2094_v55, 2  ;;  %v1666_v55 = vld [vmem:[%s3098_s0 + $0xf8] sm:$0x3] }
  0xff   :  { %912 = vmatmul.f32.gmra.mxu1 %v817_v39  ;;  %v1146_v5 = vrot.slane %v1661_v37, 1  ;;  %v1147_v39 = vrot.slane %v1662_v33, 1  ;;  %v1308_v7 = vrot.slane %v1661_v37, 2 }
 0x101   :  { %1237 = vmatmul.f32.gmra.mxu3 %v1142_v10  ;;  %1396 = vmatmul.f32.gmra.mxu0 %v1301_v50  ;;  %v426_v56 = vpop.f32.mrf.mxu2  ;;  %v1306_v10 = vrot.slane %v1660_v62, 2  ;;  %v1663_v62 = vld [vmem:[%s3098_s0 + $0xe0] sm:$0xff] }
 0x102   :  { %v460_v27 = vadd.f32 %v426_v56, %v280_v35  ;;  %v1149_v43 = vrot.slane %v1663_v62, 1 }
 0x103   :  { %v1307_v12 = vsel %vm306_vm1, %v1305_v41, %v1306_v10  ;;  %v826_v41 = vsel %vm306_vm1, %v3123_v3, %v825_v36  ;;  %v1311_v10 = vrot.slane %v1663_v62, 2  ;;  %v1315_v3 = vrot.slane %v1666_v55, 2 }
 0x104   :  { %v282_v31 = vpop.f32.mrf.mxu1  ;;  %v557_v59 = vpop.f32.mrf.mxu3 }
 0x105   :  { %v2890_v8 = vadd.f32 %v557_v59, %v460_v27  ;;  %v283_v60 = vadd.f32 %v282_v31, %v2657_v38  ;;  %v1148_v38 = vsel %vm94_vm0, %v1146_v5, %v1147_v39  ;;  %v828_v39 = vrot.slane %v2638_v2, 2 }
 0x106   :  { %v2892_v42 = vpop.f32.mrf.mxu0  ;;  %1046 = vmatmul.f32.gmra.mxu2 %v1659_v34 }
 0x107   :  { %915 = vmatmul.f32.gmra.mxu1 %v820_v58  ;;  %v1150_v58 = vrot.slane %v1664_v1, 1 }
 0x109   :  { %1240 = vmatmul.f32.gmra.mxu3 %v1145_v61  ;;  %1399 = vmatmul.f32.gmra.mxu0 %v1304_v25  ;;  %v429_v6 = vpop.f32.mrf.mxu2  ;;  %v1309_v61 = vrot.slane %v1662_v33, 2  ;;  %v1665_v33 = vld [vmem:[%s3098_s0 + $0xf0] sm:$0xff] }
 0x10a   :  { %v461_v13 = vadd.f32 %v429_v6, %v283_v60  ;;  %v1152_v54 = vrot.slane %v1665_v33, 1 }
 0x10b   :  { %v1310_v15 = vsel %vm306_vm1, %v1308_v7, %v1309_v61 }
 0x10c   :  { %v285_v50 = vpop.f32.mrf.mxu1  ;;  %v560_v35 = vpop.f32.mrf.mxu3 }
 0x10d   :  { %v592_v56 = vadd.f32 %v560_v35, %v461_v13  ;;  %v286_v29 = vadd.f32 %v285_v50, %v2682_v14  ;;  %v1151_v14 = vsel %vm94_vm0, %v1149_v43, %v1150_v58  ;;  %v1314_v43 = vrot.slane %v1665_v33, 2 }
 0x10e   :  { %v754_v27 = vpop.f32.mrf.mxu0  ;;  %1049 = vmatmul.f32.gmra.mxu2 %v1661_v37 }
 0x10f   :  { %v2909_v34 = vadd.f32 %v754_v27, %v592_v56  ;;  %918 = vmatmul.f32.gmra.mxu1 %v823_v9  ;;  %v1153_v9 = vrot.slane %v1666_v55, 1  ;;  %v1312_v56 = vrot.slane %v1664_v1, 2  ;;  %v1667_v1 = vld [vmem:[%s3098_s0 + $0x100] sm:$0xff]  ;;  %v1669_v55 = vld [vmem:[%s3098_s0 + $0x110] sm:$0xff] }
 0x111   :  { %1243 = vmatmul.f32.gmra.mxu3 %v1148_v38  ;;  %1402 = vmatmul.f32.gmra.mxu0 %v1307_v12  ;;  %v432_v31 = vpop.f32.mrf.mxu2  ;;  %v3124_v12 = vrot.slane %v1857_v18, 2  ;;  %v1313_v2 = vsel %vm306_vm1, %v1311_v10, %v1312_v56  ;;  %v1668_v18 = vld [vmem:[%s3098_s0 + $0x108] sm:$0x3]  ;;  %v834_v10 = vrot.slane %v2695_v63, 2 }
 0x112   :  { %v462_v59 = vadd.f32 %v432_v31, %v286_v29 }
 0x113   :  { %v829_v29 = vsel %vm306_vm1, %v3124_v12, %v828_v39 }
 0x114   :  { %v288_v25 = vpop.f32.mrf.mxu1  ;;  %v563_v60 = vpop.f32.mrf.mxu3 }
 0x115   :  { %v593_v6 = vadd.f32 %v563_v60, %v462_v59  ;;  %v289_v5 = vadd.f32 %v288_v25, %v2704_v44  ;;  %v1154_v44 = vsel %vm94_vm0, %v1152_v54, %v1153_v9  ;;  %v831_v59 = vrot.slane %v2672_v28, 2 }
 0x116   :  { %v757_v13 = vpop.f32.mrf.mxu0  ;;  %1052 = vmatmul.f32.gmra.mxu2 %v1663_v62  ;;  %v1155_v25 = vrot.slane %v1667_v1, 1  ;;  %v1156_v60 = vrot.slane %v1668_v18, 1  ;;  %v1316_v28 = vsel %vm306_vm1, %v1314_v43, %v1315_v3  ;;  %v1158_v9 = vrot.slane %v1669_v55, 1 }
 0x117   :  { %v2924_v37 = vadd.f32 %v757_v13, %v593_v6  ;;  %921 = vmatmul.f32.gmra.mxu1 %v826_v41  ;;  %v3125_v13 = vrot.slane %v1935_v46, 2  ;;  %v1670_v46 = vld [vmem:[%s3098_s0 + $0x118] sm:$0x3]  ;;  %v3127_v3 = vrot.slane %v2149_v24, 2 }
 0x118   :  { %v1159_v56 = vrot.slane %v1670_v46, 1  ;;  %v1674_v24 = vld [vmem:[%s3098_s0 + $0x138] sm:$0x3] }
 0x119   :  { %1246 = vmatmul.f32.gmra.mxu3 %v1151_v14  ;;  %1405 = vmatmul.f32.gmra.mxu0 %v1310_v15  ;;  %v435_v50 = vpop.f32.mrf.mxu2  ;;  %v832_v14 = vsel %vm306_vm1, %v3125_v13, %v831_v59  ;;  %v1320_v59 = vrot.slane %v1669_v55, 2 }
 0x11a   :  { %v463_v35 = vadd.f32 %v435_v50, %v289_v5  ;;  %v1317_v50 = vrot.slane %v1667_v1, 2 }
 0x11c   :  { %v291_v27 = vpop.f32.mrf.mxu1  ;;  %v566_v38 = vpop.f32.mrf.mxu3 }
 0x11d   :  { %v594_v36 = vadd.f32 %v566_v38, %v463_v35  ;;  %v292_v31 = vadd.f32 %v291_v27, %v2737_v16  ;;  %v1157_v16 = vsel %vm94_vm0, %v1155_v25, %v1156_v60  ;;  %v1318_v27 = vrot.slane %v1668_v18, 2 }
 0x11e   :  { %v760_v7 = vpop.f32.mrf.mxu0  ;;  %1055 = vmatmul.f32.gmra.mxu2 %v1665_v33 }
 0x11f   :  { %v2939_v62 = vadd.f32 %v760_v7, %v594_v36  ;;  %924 = vmatmul.f32.gmra.mxu1 %v829_v29  ;;  %v3126_v29 = vrot.slane %v2041_v26, 2  ;;  %v1319_v63 = vsel %vm306_vm1, %v1317_v50, %v1318_v27  ;;  %v837_v26 = vrot.slane %v2715_v57, 2 }
 0x121   :  { %1249 = vmatmul.f32.gmra.mxu3 %v1154_v44  ;;  %1408 = vmatmul.f32.gmra.mxu0 %v1313_v2  ;;  %v438_v58 = vpop.f32.mrf.mxu2  ;;  %v835_v36 = vsel %vm306_vm1, %v3126_v29, %v834_v10  ;;  %v1165_v10 = vrot.slane %v1674_v24, 1 }
 0x122   :  { %v464_v61 = vadd.f32 %v438_v58, %v292_v31 }
 0x124   :  { %v294_v41 = vpop.f32.mrf.mxu1  ;;  %v569_v6 = vpop.f32.mrf.mxu3 }
 0x125   :  { %v595_v15 = vadd.f32 %v569_v6, %v464_v61  ;;  %v295_v39 = vadd.f32 %v294_v41, %v2662_v11  ;;  %v1160_v11 = vsel %vm94_vm0, %v1158_v9, %v1159_v56  ;;  %v1321_v61 = vrot.slane %v1670_v46, 2 }
 0x126   :  { %v763_v5 = vpop.f32.mrf.mxu0  ;;  %1058 = vmatmul.f32.gmra.mxu2 %v1667_v1  ;;  %v1672_v1 = vld [vmem:[%s3098_s0 + $0x128] sm:$0x3]  ;;  %v838_v41 = vsel %vm306_vm1, %v3127_v3, %v837_v26  ;;  %v778_v26 = vadd.f32 %v2772_v45, %v2770_v40  ;;  %v779_v40 = vadd.f32 %v2790_v47, %v2788_v0 }
 0x127   :  { %v2954_v33 = vadd.f32 %v763_v5, %v595_v15  ;;  %927 = vmatmul.f32.gmra.mxu1 %v832_v14  ;;  %v1162_v58 = vrot.slane %v1672_v1, 1  ;;  %v1673_v15 = vld [vmem:[%s3098_s0 + $0x130] sm:$0xff]  ;;  %v839_v5 = vrot.slane %v2731_v30, 2  ;;  %v1324_v50 = vrot.slane %v1672_v1, 2 }
 0x129   :  { %1252 = vmatmul.f32.gmra.mxu3 %v1157_v16  ;;  %1411 = vmatmul.f32.gmra.mxu0 %v1316_v28  ;;  %v441_v35 = vpop.f32.mrf.mxu2  ;;  %v1163_v57 = vsel %vm94_vm0, %v677_v48, %v1162_v58  ;;  %v3128_v28 = vld [vmem:[#allocation2_spill] sm:$0xff] }
 0x12a   :  { %v465_v54 = vadd.f32 %v441_v35, %v295_v39  ;;  %v1164_v39 = vrot.slane %v1673_v15, 1 }
 0x12c   :  { %v297_v38 = vpop.f32.mrf.mxu1  ;;  %v572_v12 = vpop.f32.mrf.mxu3 }
 0x12d   :  { %v596_v7 = vadd.f32 %v572_v12, %v465_v54  ;;  %v298_v18 = vadd.f32 %v297_v38, %v2689_v49  ;;  %v1322_v49 = vsel %vm306_vm1, %v1320_v59, %v1321_v61  ;;  %v3129_v12 = vld [vmem:[#allocation3_spill] sm:$0xff] }
 0x12e   :  { %v766_v44 = vpop.f32.mrf.mxu0  ;;  %1061 = vmatmul.f32.gmra.mxu2 %v1669_v55  ;;  %v840_v55 = vrot.slane %v3128_v28, 2 }
 0x12f   :  { %v2969_v2 = vadd.f32 %v766_v44, %v596_v7  ;;  %930 = vmatmul.f32.gmra.mxu1 %v835_v36  ;;  %v1326_v7 = vrot.slane %v1673_v15, 2 }
 0x130   :  { %v841_v9 = vsel %vm306_vm1, %v839_v5, %v840_v55 }
 0x131   :  { %1255 = vmatmul.f32.gmra.mxu3 %v1160_v11  ;;  %1414 = vmatmul.f32.gmra.mxu0 %v1319_v63  ;;  %v444_v31 = vpop.f32.mrf.mxu2  ;;  %v1327_v11 = vrot.slane %v1674_v24, 2 }
 0x132   :  { %v466_v43 = vadd.f32 %v444_v31, %v298_v18 }
 0x133   :  { %v1328_v59 = vsel %vm306_vm1, %v1326_v7, %v1327_v11 }
 0x134   :  { %v300_v25 = vpop.f32.mrf.mxu1  ;;  %v575_v60 = vpop.f32.mrf.mxu3 }
 0x135   :  { %v597_v6 = vadd.f32 %v575_v60, %v466_v43  ;;  %v301_v16 = vadd.f32 %v300_v25, %v2718_v52  ;;  %v1325_v52 = vsel %vm306_vm1, %v839_v5, %v1324_v50 }
 0x136   :  { %v769_v13 = vpop.f32.mrf.mxu0  ;;  %1064 = vmatmul.f32.gmra.mxu2 %v2731_v30  ;;  %v1166_v30 = vsel %vm94_vm0, %v1164_v39, %v1165_v10 }
 0x137   :  { %v2984_v14 = vadd.f32 %v769_v13, %v597_v6  ;;  %933 = vmatmul.f32.gmra.mxu1 %v838_v41  ;;  %v3009_v6 = vld [vmem:[%s3099_s2] ss:$0 sm:$0xff] }
 0x139   :  { %1258 = vmatmul.f32.gmra.mxu3 %v1163_v57  ;;  %1417 = vmatmul.f32.gmra.mxu0 %v1322_v49  ;;  %v447_v48 = vpop.f32.mrf.mxu2 }
 0x13a   :  { %v467_v46 = vadd.f32 %v447_v48, %v301_v16 }
 0x13c   :  { %v303_v35 = vpop.f32.mrf.mxu1  ;;  %v578_v54 = vpop.f32.mrf.mxu3 }
 0x13d   :  { %v598_v56 = vadd.f32 %v578_v54, %v467_v46  ;;  %v304_v29 = vadd.f32 %v303_v35, %v3129_v12  ;;  %v780_v46 = vadd.f32 %v2808_v17, %v2806_v21  ;;  %v781_v21 = vadd.f32 %v2825_v22, %v2823_v51 }
 0x13e   :  { %v772_v27 = vpop.f32.mrf.mxu0  ;;  %1067 = vmatmul.f32.gmra.mxu2 %v1673_v15  ;;  %v782_v51 = vadd.f32 %v2842_v4, %v2840_v20  ;;  %v783_v20 = vadd.f32 %v2856_v23, %v2854_v19  ;;  %v784_v19 = vadd.f32 %v2875_v32, %v2873_v53  ;;  %v785_v53 = vadd.f32 %v2892_v42, %v2890_v8 }
 0x13f   :  { %v2998_v38 = vadd.f32 %v772_v27, %v598_v56  ;;  %936 = vmatmul.f32.gmra.mxu1 %v841_v9 }
 0x141   :  { %1261 = vmatmul.f32.gmra.mxu3 %v1166_v30  ;;  %1420 = vmatmul.f32.gmra.mxu0 %v1325_v52  ;;  %v450_v36 = vpop.f32.mrf.mxu2 }
 0x142   :  { %v468_v44 = vadd.f32 %v450_v36, %v304_v29 }
 0x144   :  { %v581_v63 = vpop.f32.mrf.mxu3  ;;  %v892_v1 = vpop.f32.mrf.mxu1 }
 0x145   :  { %v599_v18 = vadd.f32 %v581_v63, %v468_v44  ;;  %v940_v58 = vadd.f32 %v892_v1, %v778_v26 }
 0x146   :  { %v775_v31 = vpop.f32.mrf.mxu0 }
 0x147   :  { %v3004_v43 = vadd.f32 %v775_v31, %v599_v18 }
 0x149   :  { %1423 = vmatmul.f32.gmra.mxu0 %v1328_v59  ;;  %v1023_v61 = vpop.f32.mrf.mxu2 }
 0x14a   :  { %v1071_v25 = vadd.f32 %v1023_v61, %v940_v58 }
 0x14c   :  { %v895_v60 = vpop.f32.mrf.mxu1  ;;  %v1217_v3 = vpop.f32.mrf.mxu3 }
 0x14d   :  { %v1265_v41 = vadd.f32 %v1217_v3, %v1071_v25  ;;  %v941_v57 = vadd.f32 %v895_v60, %v779_v40 }
 0x14e   :  { %v1379_v45 = vpop.f32.mrf.mxu0 }
 0x14f   :  { %v1427_v13 = vadd.f32 %v1379_v45, %v1265_v41 }
 0x151   :  { %v1447_v49 = vadd.f32 %v3009_v6, %v1427_v13  ;;  %v1026_v15 = vpop.f32.mrf.mxu2 }
 0x152   :  { %v1072_v24 = vadd.f32 %v1026_v15, %v941_v57 }
 0x153   :  { %vm1463_vm2 = vcmp.gt.f32.partialorder %v1447_v49, 0.0  ;;  %v1479_v5 = vmul.f32 0.1, %v1447_v49 }
 0x154   :  { %v898_v16 = vpop.f32.mrf.mxu1  ;;  %v1220_v28 = vpop.f32.mrf.mxu3 }
 0x155   :  { %v1495_v55 = vsel %vm1463_vm2, %v1447_v49, %v1479_v5  ;;  %v1266_v48 = vadd.f32 %v1220_v28, %v1072_v24  ;;  %v942_v39 = vadd.f32 %v898_v16, %v780_v46 }
 0x156   :  { %1511 = vst [vmem:[%s3100_s3] sm:$0xff] %v1495_v55  ;;  %v1382_v0 = vpop.f32.mrf.mxu0 }
 0x157   :  { %v1428_v47 = vadd.f32 %v1382_v0, %v1266_v48 }
 0x159   :  { %v1448_v10 = vadd.f32 %v3009_v6, %v1428_v47  ;;  %v1029_v50 = vpop.f32.mrf.mxu2 }
 0x15a   :  { %v1073_v35 = vadd.f32 %v1029_v50, %v942_v39 }
 0x15b   :  { %vm1464_vm3 = vcmp.gt.f32.partialorder %v1448_v10, 0.0  ;;  %v1480_v54 = vmul.f32 0.1, %v1448_v10 }
 0x15c   :  { %v901_v9 = vpop.f32.mrf.mxu1  ;;  %v1223_v56 = vpop.f32.mrf.mxu3 }
 0x15d   :  { %v1496_v27 = vsel %vm1464_vm3, %v1448_v10, %v1480_v54  ;;  %v1267_v30 = vadd.f32 %v1223_v56, %v1073_v35  ;;  %v943_v12 = vadd.f32 %v901_v9, %v781_v21 }
 0x15e   :  { %1512 = vst [vmem:[%s3100_s3 + $0x8] sm:$0xff] %v1496_v27  ;;  %v1385_v17 = vpop.f32.mrf.mxu0 }
 0x15f   :  { %v1429_v52 = vadd.f32 %v1385_v17, %v1267_v30 }
 0x161   :  { %v1449_v29 = vadd.f32 %v3009_v6, %v1429_v52  ;;  %v1032_v36 = vpop.f32.mrf.mxu2 }
 0x162   :  { %v1074_v7 = vadd.f32 %v1032_v36, %v943_v12 }
 0x163   :  { %vm1465_vm4 = vcmp.gt.f32.partialorder %v1449_v29, 0.0  ;;  %v1481_v44 = vmul.f32 0.1, %v1449_v29 }
 0x164   :  { %v904_v11 = vpop.f32.mrf.mxu1  ;;  %v1226_v63 = vpop.f32.mrf.mxu3 }
 0x165   :  { %v1497_v1 = vsel %vm1465_vm4, %v1449_v29, %v1481_v44  ;;  %v1268_v18 = vadd.f32 %v1226_v63, %v1074_v7  ;;  %v944_v31 = vadd.f32 %v904_v11, %v782_v51 }
 0x166   :  { %1513 = vst [vmem:[%s3100_s3 + $0x10] sm:$0xff] %v1497_v1  ;;  %v1388_v22 = vpop.f32.mrf.mxu0 }
 0x167   :  { %v1430_v26 = vadd.f32 %v1388_v22, %v1268_v18 }
 0x169   :  { %v1450_v59 = vadd.f32 %v3009_v6, %v1430_v26  ;;  %v1035_v58 = vpop.f32.mrf.mxu2 }
 0x16a   :  { %v1075_v61 = vadd.f32 %v1035_v58, %v944_v31 }
 0x16b   :  { %vm1466_vm5 = vcmp.gt.f32.partialorder %v1450_v59, 0.0  ;;  %v1482_v25 = vmul.f32 0.1, %v1450_v59 }
 0x16c   :  { %v907_v60 = vpop.f32.mrf.mxu1  ;;  %v1229_v3 = vpop.f32.mrf.mxu3 }
 0x16d   :  { %v1498_v41 = vsel %vm1466_vm5, %v1450_v59, %v1482_v25  ;;  %v1269_v40 = vadd.f32 %v1229_v3, %v1075_v61  ;;  %v945_v13 = vadd.f32 %v907_v60, %v783_v20 }
 0x16e   :  { %1514 = vst [vmem:[%s3100_s3 + $0x18] sm:$0xff] %v1498_v41  ;;  %v1391_v4 = vpop.f32.mrf.mxu0 }
 0x16f   :  { %v1431_v45 = vadd.f32 %v1391_v4, %v1269_v40 }
 0x171   :  { %v1451_v57 = vadd.f32 %v3009_v6, %v1431_v45  ;;  %v1038_v49 = vpop.f32.mrf.mxu2 }
 0x172   :  { %v1076_v15 = vadd.f32 %v1038_v49, %v945_v13 }
 0x173   :  { %vm1467_vm6 = vcmp.gt.f32.partialorder %v1451_v57, 0.0  ;;  %v1483_v24 = vmul.f32 0.1, %v1451_v57 }
 0x174   :  { %v910_v5 = vpop.f32.mrf.mxu1  ;;  %v1232_v16 = vpop.f32.mrf.mxu3 }
 0x175   :  { %v1499_v28 = vsel %vm1467_vm6, %v1451_v57, %v1483_v24  ;;  %v1270_v55 = vadd.f32 %v1232_v16, %v1076_v15  ;;  %v946_v46 = vadd.f32 %v910_v5, %v784_v19 }
 0x176   :  { %1515 = vst [vmem:[%s3100_s3 + $0x20] sm:$0xff] %v1499_v28  ;;  %v1394_v23 = vpop.f32.mrf.mxu0 }
 0x177   :  { %v1432_v48 = vadd.f32 %v1394_v23, %v1270_v55 }
 0x179   :  { %v1452_v0 = vadd.f32 %v3009_v6, %v1432_v48  ;;  %v1041_v47 = vpop.f32.mrf.mxu2 }
 0x17a   :  { %v1077_v39 = vadd.f32 %v1041_v47, %v946_v46 }
 0x17b   :  { %vm1468_vm7 = vcmp.gt.f32.partialorder %v1452_v0, 0.0  ;;  %v1484_v10 = vmul.f32 0.1, %v1452_v0 }
 0x17c   :  { %v913_v50 = vpop.f32.mrf.mxu1  ;;  %v1235_v35 = vpop.f32.mrf.mxu3 }
 0x17d   :  { %v1500_v54 = vsel %vm1468_vm7, %v1452_v0, %v1484_v10  ;;  %v1271_v9 = vadd.f32 %v1235_v35, %v1077_v39  ;;  %v947_v27 = vadd.f32 %v913_v50, %v785_v53 }
 0x17e   :  { %1516 = vst [vmem:[%s3100_s3 + $0x28] sm:$0xff] %v1500_v54  ;;  %v1397_v32 = vpop.f32.mrf.mxu0 }
 0x17f   :  { %v1433_v56 = vadd.f32 %v1397_v32, %v1271_v9 }
 0x181   :  { %v1453_v30 = vadd.f32 %v3009_v6, %v1433_v56  ;;  %v1044_v21 = vpop.f32.mrf.mxu2 }
 0x182   :  { %v1078_v17 = vadd.f32 %v1044_v21, %v947_v27 }
 0x183   :  { %vm1469_vm8 = vcmp.gt.f32.partialorder %v1453_v30, 0.0  ;;  %v1485_v52 = vmul.f32 0.1, %v1453_v30 }
 0x184   :  { %v916_v12 = vpop.f32.mrf.mxu1  ;;  %v1238_v29 = vpop.f32.mrf.mxu3 }
 0x185   :  { %v1501_v36 = vsel %vm1469_vm8, %v1453_v30, %v1485_v52  ;;  %v1272_v7 = vadd.f32 %v1238_v29, %v1078_v17  ;;  %v948_v44 = vadd.f32 %v916_v12, %v2909_v34 }
 0x186   :  { %1517 = vst [vmem:[%s3100_s3 + $0x30] sm:$0xff] %v1501_v36  ;;  %v1400_v8 = vpop.f32.mrf.mxu0 }
 0x187   :  { %v1434_v42 = vadd.f32 %v1400_v8, %v1272_v7 }
 0x189   :  { %v1454_v11 = vadd.f32 %v3009_v6, %v1434_v42  ;;  %v1047_v63 = vpop.f32.mrf.mxu2 }
 0x18a   :  { %v1079_v1 = vadd.f32 %v1047_v63, %v948_v44 }
 0x18b   :  { %vm1470_vm9 = vcmp.gt.f32.partialorder %v1454_v11, 0.0  ;;  %v1486_v18 = vmul.f32 0.1, %v1454_v11 }
 0x18c   :  { %v919_v51 = vpop.f32.mrf.mxu1  ;;  %v1241_v22 = vpop.f32.mrf.mxu3 }
 0x18d   :  { %v1502_v26 = vsel %vm1470_vm9, %v1454_v11, %v1486_v18  ;;  %v1273_v31 = vadd.f32 %v1241_v22, %v1079_v1  ;;  %v949_v61 = vadd.f32 %v919_v51, %v2924_v37 }
 0x18e   :  { %1518 = vst [vmem:[%s3100_s3 + $0x38] sm:$0xff] %v1502_v26  ;;  %v1403_v59 = vpop.f32.mrf.mxu0 }
 0x18f   :  { %v1435_v58 = vadd.f32 %v1403_v59, %v1273_v31 }
 0x191   :  { %v1455_v34 = vadd.f32 %v3009_v6, %v1435_v58  ;;  %v1050_v25 = vpop.f32.mrf.mxu2 }
 0x192   :  { %v1080_v60 = vadd.f32 %v1050_v25, %v949_v61 }
 0x193   :  { %vm1471_vm10 = vcmp.gt.f32.partialorder %v1455_v34, 0.0  ;;  %v1487_v3 = vmul.f32 0.1, %v1455_v34 }
 0x194   :  { %v922_v41 = vpop.f32.mrf.mxu1  ;;  %v1244_v40 = vpop.f32.mrf.mxu3 }
 0x195   :  { %v1503_v20 = vsel %vm1471_vm10, %v1455_v34, %v1487_v3  ;;  %v1274_v4 = vadd.f32 %v1244_v40, %v1080_v60  ;;  %v950_v57 = vadd.f32 %v922_v41, %v2939_v62 }
 0x196   :  { %1519 = vst [vmem:[%s3100_s3 + $0x40] sm:$0xff] %v1503_v20  ;;  %v1406_v45 = vpop.f32.mrf.mxu0 }
 0x197   :  { %v1436_v13 = vadd.f32 %v1406_v45, %v1274_v4 }
 0x199   :  { %v1456_v37 = vadd.f32 %v3009_v6, %v1436_v13  ;;  %v1053_v49 = vpop.f32.mrf.mxu2 }
 0x19a   :  { %v1081_v15 = vadd.f32 %v1053_v49, %v950_v57 }
 0x19b   :  { %vm1472_vm11 = vcmp.gt.f32.partialorder %v1456_v37, 0.0  ;;  %v1488_v24 = vmul.f32 0.1, %v1456_v37 }
 0x19c   :  { %v925_v5 = vpop.f32.mrf.mxu1  ;;  %v1247_v16 = vpop.f32.mrf.mxu3 }
 0x19d   :  { %v1504_v28 = vsel %vm1472_vm11, %v1456_v37, %v1488_v24  ;;  %v1275_v55 = vadd.f32 %v1247_v16, %v1081_v15  ;;  %v951_v48 = vadd.f32 %v925_v5, %v2954_v33 }
 0x19e   :  { %1520 = vst [vmem:[%s3100_s3 + $0x48] sm:$0xff] %v1504_v28  ;;  %v1409_v19 = vpop.f32.mrf.mxu0 }
 0x19f   :  { %v1437_v23 = vadd.f32 %v1409_v19, %v1275_v55 }
 0x1a1   :  { %v1457_v62 = vadd.f32 %v3009_v6, %v1437_v23  ;;  %v1056_v46 = vpop.f32.mrf.mxu2 }
 0x1a2   :  { %v1082_v0 = vadd.f32 %v1056_v46, %v951_v48 }
 0x1a3   :  { %vm1473_vm12 = vcmp.gt.f32.partialorder %v1457_v62, 0.0  ;;  %v1489_v47 = vmul.f32 0.1, %v1457_v62 }
 0x1a4   :  { %v928_v39 = vpop.f32.mrf.mxu1  ;;  %v1250_v10 = vpop.f32.mrf.mxu3 }
 0x1a5   :  { %v1505_v50 = vsel %vm1473_vm12, %v1457_v62, %v1489_v47  ;;  %v1276_v35 = vadd.f32 %v1250_v10, %v1082_v0  ;;  %v952_v53 = vadd.f32 %v928_v39, %v2969_v2 }
 0x1a6   :  { %1521 = vst [vmem:[%s3100_s3 + $0x50] sm:$0xff] %v1505_v50  ;;  %v1412_v54 = vpop.f32.mrf.mxu0 }
 0x1a7   :  { %v1438_v9 = vadd.f32 %v1412_v54, %v1276_v35 }
 0x1a9   :  { %v1458_v33 = vadd.f32 %v3009_v6, %v1438_v9  ;;  %v1059_v32 = vpop.f32.mrf.mxu2 }
 0x1aa   :  { %v1083_v56 = vadd.f32 %v1059_v32, %v952_v53 }
 0x1ab   :  { %vm1474_vm13 = vcmp.gt.f32.partialorder %v1458_v33, 0.0  ;;  %v1490_v27 = vmul.f32 0.1, %v1458_v33 }
 0x1ac   :  { %v931_v30 = vpop.f32.mrf.mxu1  ;;  %v1253_v21 = vpop.f32.mrf.mxu3 }
 0x1ad   :  { %v1506_v17 = vsel %vm1474_vm13, %v1458_v33, %v1490_v27  ;;  %v1277_v52 = vadd.f32 %v1253_v21, %v1083_v56  ;;  %v953_v36 = vadd.f32 %v931_v30, %v2984_v14 }
 0x1ae   :  { %1522 = vst [vmem:[%s3100_s3 + $0x58] sm:$0xff] %v1506_v17  ;;  %v1415_v12 = vpop.f32.mrf.mxu0 }
 0x1af   :  { %v1439_v29 = vadd.f32 %v1415_v12, %v1277_v52 }
 0x1b1   :  { %v1459_v2 = vadd.f32 %v3009_v6, %v1439_v29  ;;  %v1062_v7 = vpop.f32.mrf.mxu2 }
 0x1b2   :  { %v1084_v8 = vadd.f32 %v1062_v7, %v953_v36 }
 0x1b3   :  { %vm1475_vm14 = vcmp.gt.f32.partialorder %v1459_v2, 0.0  ;;  %v1491_v42 = vmul.f32 0.1, %v1459_v2 }
 0x1b4   :  { %v934_v44 = vpop.f32.mrf.mxu1  ;;  %v1256_v11 = vpop.f32.mrf.mxu3 }
 0x1b5   :  { %v1507_v63 = vsel %vm1475_vm14, %v1459_v2, %v1491_v42  ;;  %v1278_v1 = vadd.f32 %v1256_v11, %v1084_v8  ;;  %v954_v22 = vadd.f32 %v934_v44, %v2998_v38 }
 0x1b6   :  { %1523 = vst [vmem:[%s3100_s3 + $0x60] sm:$0xff] %v1507_v63  ;;  %v1418_v18 = vpop.f32.mrf.mxu0 }
 0x1b7   :  { %v1440_v51 = vadd.f32 %v1418_v18, %v1278_v1 }
 0x1b9   :  { %v1460_v14 = vadd.f32 %v3009_v6, %v1440_v51  ;;  %v1065_v26 = vpop.f32.mrf.mxu2 }
 0x1ba   :  { %v1085_v31 = vadd.f32 %v1065_v26, %v954_v22 }
 0x1bb   :  { %vm1476_vm15 = vcmp.gt.f32.partialorder %v1460_v14, 0.0  ;;  %v1492_v59 = vmul.f32 0.1, %v1460_v14 }
 0x1bc   :  { %v1259_v58 = vpop.f32.mrf.mxu3  ;;  %v937_v34 = vpop.f32.mrf.mxu1 }
 0x1bd   :  { %v1508_v61 = vsel %vm1476_vm15, %v1460_v14, %v1492_v59  ;;  %v1279_v25 = vadd.f32 %v1259_v58, %v1085_v31  ;;  %v955_v41 = vadd.f32 %v937_v34, %v3004_v43 }
 0x1be   :  { %1524 = vst [vmem:[%s3100_s3 + $0x68] sm:$0xff] %v1508_v61  ;;  %v1421_v60 = vpop.f32.mrf.mxu0 }
 0x1bf   :  { %v1441_v3 = vadd.f32 %v1421_v60, %v1279_v25 }
 0x1c1   :  { %v1461_v38 = vadd.f32 %v3009_v6, %v1441_v3  ;;  %v1068_v40 = vpop.f32.mrf.mxu2 }
 0x1c2   :  { %v1086_v20 = vadd.f32 %v1068_v40, %v955_v41 }
 0x1c3   :  { %vm1477_vm0 = vcmp.gt.f32.partialorder %v1461_v38, 0.0  ;;  %v1493_v4 = vmul.f32 0.1, %v1461_v38 }
 0x1c4   :  { %v1262_v45 = vpop.f32.mrf.mxu3 }
 0x1c5   :  { %v1509_v13 = vsel %vm1477_vm0, %v1461_v38, %v1493_v4  ;;  %v1280_v57 = vadd.f32 %v1262_v45, %v1086_v20 }
 0x1c6   :  { %1525 = vst [vmem:[%s3100_s3 + $0x70] sm:$0xff] %v1509_v13  ;;  %v1424_v37 = vpop.f32.mrf.mxu0 }
 0x1c7   :  { %v1442_v49 = vadd.f32 %v1424_v37, %v1280_v57 }
 0x1c9   :  { %v1462_v15 = vadd.f32 %v3009_v6, %v1442_v49 }
 0x1cb   :  { %vm1478_vm1 = vcmp.gt.f32.partialorder %v1462_v15, 0.0  ;;  %v1494_v24 = vmul.f32 0.1, %v1462_v15 }
 0x1cd   :  { %v1510_v43 = vsel %vm1478_vm1, %v1462_v15, %v1494_v24 }
 0x1ce   :  { %1526 = vst [vmem:[%s3100_s3 + $0x78] sm:$0xff] %v1510_v43 }

// kernel: forward.6
= control target key start
LH: loop header
LB: loop body
LE: loop exit
PB: predicated region body
PF: predicated region fallthrough
CT: control target
= control target key end

     0   :  { %vm222_vm0 = vcmask 1046528   ;;  %vm882_vm1 = vcmask 1045504   ;;  %s8578_s1 = inlined_call_operand.vmem [shape: f32[9,128,128], index: 1, kind: input, shape index: {}]   ;;  %s8579_s0 = inlined_call_operand.vmem [shape: f32[2,18,18,128], index: 0, kind: input, shape index: {}]   ;;  %s8580_s2 = inlined_call_operand.vmem [shape: f32[1,128], index: 2, kind: input, shape index: {}]   ;;  %s8581_s3 = inlined_call_operand.vmem [shape: f32[512,128], index: 3, kind: output, shape index: {}]  }
   0x1   :  { %v4762_v0 = vld [vmem:[%s8578_s1 + $0xf8] sm:$0xff]  ;;  %v4761_v1 = vld [vmem:[%s8578_s1 + $0xf0] sm:$0xff]  ;;  %v4760_v2 = vld [vmem:[%s8578_s1 + $0xe8] sm:$0xff] }
   0x2   :  { %5067 = vmatpush.msra.mxu1 %v4762_v0  ;;  %5068 = vmatpush.msra.mxu2 %v4762_v0  ;;  %v4759_v3 = vld [vmem:[%s8578_s1 + $0xe0] sm:$0xff]  ;;  %v4758_v4 = vld [vmem:[%s8578_s1 + $0xd8] sm:$0xff]  ;;  %v4757_v5 = vld [vmem:[%s8578_s1 + $0xd0] sm:$0xff] }
   0x3   :  { %5069 = vmatpush.msra.mxu3 %v4762_v0  ;;  %464 = vmatpush.msra.mxu0 %v4762_v0  ;;  %v4756_v6 = vld [vmem:[%s8578_s1 + $0xc8] sm:$0xff]  ;;  %v4755_v7 = vld [vmem:[%s8578_s1 + $0xc0] sm:$0xff]  ;;  %v4754_v8 = vld [vmem:[%s8578_s1 + $0xb8] sm:$0xff] }
   0x4   :  { %5070 = vmatpush.msra.mxu1 %v4761_v1  ;;  %5071 = vmatpush.msra.mxu2 %v4761_v1  ;;  %v4753_v9 = vld [vmem:[%s8578_s1 + $0xb0] sm:$0xff]  ;;  %v4752_v10 = vld [vmem:[%s8578_s1 + $0xa8] sm:$0xff]  ;;  %v4751_v11 = vld [vmem:[%s8578_s1 + $0xa0] sm:$0xff] }
   0x5   :  { %5072 = vmatpush.msra.mxu3 %v4761_v1  ;;  %465 = vmatpush.msra.mxu0 %v4761_v1  ;;  %v4750_v12 = vld [vmem:[%s8578_s1 + $0x98] sm:$0xff]  ;;  %v38_v13 = vld [vmem:[%s8579_s0 + $0xc0] sm:$0xff]  ;;  %v5337_v14 = vld [vmem:[%s8579_s0 + $0xc8] sm:$0xff] }
   0x6   :  { %5073 = vmatpush.msra.mxu1 %v4760_v2  ;;  %5074 = vmatpush.msra.mxu2 %v4760_v2  ;;  %v62_v15 = vld [vmem:[%s8579_s0 + $0x1b0] sm:$0xff]  ;;  %v5345_v16 = vld [vmem:[%s8579_s0 + $0x1b8] sm:$0xff]  ;;  %v263_v20 = vrot.slane %v38_v13, 1  ;;  %v264_v21 = vrot.slane %v5337_v14, 1  ;;  %v4748_v24 = vld [vmem:[%s8578_s1 + $0x88] sm:$0xff] }
   0x7   :  { %5075 = vmatpush.msra.mxu3 %v4760_v2  ;;  %466 = vmatpush.msra.mxu0 %v4760_v2  ;;  %v4749_v17 = vld [vmem:[%s8578_s1 + $0x90] sm:$0xff]  ;;  %v5356_v19 = vld [vmem:[%s8579_s0 + $0x278] sm:$0xff]  ;;  %v303_v22 = vrot.slane %v62_v15, 1  ;;  %v304_v23 = vrot.slane %v5345_v16, 1  ;;  %v5367_v27 = vld [vmem:[%s8579_s0] sm:$0xff] }
   0x8   :  { %5076 = vmatpush.msra.mxu1 %v4759_v3  ;;  %5077 = vmatpush.msra.mxu2 %v4759_v3  ;;  %v86_v18 = vld [vmem:[%s8579_s0 + $0x270] sm:$0xff]  ;;  %v344_v26 = vrot.slane %v5356_v19, 1  ;;  %v5372_v28 = vld [vmem:[%s8579_s0 + $0x8] sm:$0xff]  ;;  %v4747_v29 = vld [vmem:[%s8578_s1 + $0x80] sm:$0xff]  ;;  %v265_v30 = vsel %vm222_vm0, %v263_v20, %v264_v21  ;;  %v223_v35 = vrot.slane %v5367_v27, 1 }
   0x9   :  { %5078 = vmatpush.msra.mxu3 %v4759_v3  ;;  %467 = vmatpush.msra.mxu0 %v4759_v3  ;;  %v343_v25 = vrot.slane %v86_v18, 1  ;;  %v305_v31 = vsel %vm222_vm0, %v303_v22, %v304_v23  ;;  %v4778_v32 = vld [vmem:[%s8578_s1 + $0x178] sm:$0xff]  ;;  %v40_v33 = vld [vmem:[%s8579_s0 + $0xd0] sm:$0x3]  ;;  %v64_v34 = vld [vmem:[%s8579_s0 + $0x1c0] sm:$0x3] }
   0xa   :  { %5079 = vmatpush.msra.mxu1 %v4758_v4  ;;  %5080 = vmatpush.msra.mxu2 %v4758_v4  ;;  %v224_v36 = vrot.slane %v5372_v28, 1  ;;  %v125_v38 = vld [vmem:[%s8578_s1 + $0x78] sm:$0xff]  ;;  %v4777_v40 = vld [vmem:[%s8578_s1 + $0x170] sm:$0xff]  ;;  %v88_v41 = vld [vmem:[%s8579_s0 + $0x280] sm:$0x3]  ;;  %v266_v42 = vrot.slane %v40_v33, 1 }
   0xb   :  { %5081 = vmatpush.msra.mxu3 %v4758_v4  ;;  %468 = vmatpush.msra.mxu0 %v4758_v4  ;;  %v345_v37 = vsel %vm222_vm0, %v343_v25, %v344_v26  ;;  %v4890_v39 = vld [vmem:[%s8578_s1 + $0x1f8] sm:$0xff]  ;;  %v306_v43 = vrot.slane %v64_v34, 1  ;;  %v124_v44 = vld [vmem:[%s8578_s1 + $0x70] sm:$0xff]  ;;  %v346_v47 = vrot.slane %v88_v41, 1  ;;  %v4776_v49 = vld [vmem:[%s8578_s1 + $0x168] sm:$0xff] }
   0xc   :  { %5082 = vmatpush.msra.mxu1 %v4757_v5  ;;  %5083 = vmatpush.msra.mxu2 %v4757_v5  ;;  %v225_v45 = vsel %vm222_vm0, %v223_v35, %v224_v36  ;;  %v4889_v46 = vld [vmem:[%s8578_s1 + $0x1f0] sm:$0xff]  ;;  %v4906_v48 = vld [vmem:[%s8578_s1 + $0x278] sm:$0xff]  ;;  %v4888_v51 = vld [vmem:[%s8578_s1 + $0x1e8] sm:$0xff]  ;;  %v267_v53 = vsel %vm222_vm0, %v264_v21, %v266_v42 }
   0xd   :  { %5084 = vmatpush.msra.mxu3 %v4757_v5  ;;  %469 = vmatpush.msra.mxu0 %v4757_v5  ;;  %v5419_v50 = vld [vmem:[%s8579_s0 + $0x10] sm:$0x3]  ;;  %v123_v52 = vld [vmem:[%s8578_s1 + $0x68] sm:$0xff]  ;;  %v307_v54 = vsel %vm222_vm0, %v304_v23, %v306_v43  ;;  %v41_v55 = vld [vmem:[%s8579_s0 + $0xd8] sm:$0xff]  ;;  %v347_v62 = vsel %vm222_vm0, %v344_v26, %v346_v47 }
   0xe   :  { %5085 = vmatpush.msra.mxu1 %v4756_v6  ;;  %5086 = vmatpush.msra.mxu2 %v4756_v6  ;;  %v5435_v56 = vld [vmem:[%s8579_s0 + $0xe0] sm:$0xff]  ;;  %v65_v57 = vld [vmem:[%s8579_s0 + $0x1c8] sm:$0xff]  ;;  %v5443_v58 = vld [vmem:[%s8579_s0 + $0x1d0] sm:$0xff]  ;;  %v226_v59 = vrot.slane %v5419_v50, 1  ;;  %v268_v4 = vrot.slane %v41_v55, 1 }
   0xf   :  { %5087 = vmatpush.msra.mxu3 %v4756_v6  ;;  %470 = vmatpush.msra.mxu0 %v4756_v6  ;;  %v4905_v60 = vld [vmem:[%s8578_s1 + $0x270] sm:$0xff]  ;;  %v4775_v61 = vld [vmem:[%s8578_s1 + $0x160] sm:$0xff]  ;;  %v89_v63 = vld [vmem:[%s8579_s0 + $0x288] sm:$0xff]  ;;  %v269_v5 = vrot.slane %v5435_v56, 1  ;;  %v308_v6 = vrot.slane %v65_v57, 1 }
  0x10   :  { %5088 = vmatpush.msra.mxu1 %v4755_v7  ;;  %5089 = vmatpush.msra.mxu2 %v4755_v7  ;;  %v122_v0 = vld [vmem:[%s8578_s1 + $0x60] sm:$0xff]  ;;  %v5462_v1 = vld [vmem:[%s8579_s0 + $0x290] sm:$0xff]  ;;  %v4904_v3 = vld [vmem:[%s8578_s1 + $0x268] sm:$0xff]  ;;  %v348_v13 = vrot.slane %v89_v63, 1 }
  0x11   :  { %5090 = vmatpush.msra.mxu3 %v4755_v7  ;;  %471 = vmatpush.msra.mxu0 %v4755_v7  ;;  %v4887_v2 = vld [vmem:[%s8578_s1 + $0x1e0] sm:$0xff]  ;;  %v309_v7 = vrot.slane %v5443_v58, 1  ;;  %v349_v14 = vrot.slane %v5462_v1, 1  ;;  %v4885_v18 = vld [vmem:[%s8578_s1 + $0x1d0] sm:$0xff]  ;;  %v270_v20 = vsel %vm222_vm0, %v268_v4, %v269_v5  ;;  %v43_v22 = vld [vmem:[%s8579_s0 + $0xe8] sm:$0x3] }
  0x12   :  { %5091 = vmatpush.msra.mxu1 %v4754_v8  ;;  %5092 = vmatpush.msra.mxu2 %v4754_v8  ;;  %v5491_v15 = vld [vmem:[%s8579_s0 + $0x20] sm:$0xff]  ;;  %v120_v19 = vld [vmem:[%s8578_s1 + $0x50] sm:$0xff]  ;;  %v67_v23 = vld [vmem:[%s8579_s0 + $0x1d8] sm:$0x3] }
  0x13   :  { %5093 = vmatpush.msra.mxu3 %v4754_v8  ;;  %472 = vmatpush.msra.mxu0 %v4754_v8  ;;  %v4774_v8 = vld [vmem:[%s8578_s1 + $0x158] sm:$0xff]  ;;  %v4903_v16 = vld [vmem:[%s8578_s1 + $0x260] sm:$0xff]  ;;  %v310_v21 = vsel %vm222_vm0, %v308_v6, %v309_v7  ;;  %v5515_v25 = vrot.slane %v5491_v15, 1  ;;  %v311_v33 = vrot.slane %v67_v23, 1  ;;  %v4884_v35 = vld [vmem:[%s8578_s1 + $0x1c8] sm:$0xff] }
  0x14   :  { %5094 = vmatpush.msra.mxu1 %v4753_v9  ;;  %5095 = vmatpush.msra.mxu2 %v4753_v9  ;;  %v4902_v26 = vld [vmem:[%s8578_s1 + $0x258] sm:$0xff]  ;;  %v44_v42 = vld [vmem:[%s8579_s0 + $0xf0] sm:$0xff]  ;;  %v4883_v57 = vld [vmem:[%s8578_s1 + $0x1c0] sm:$0xff] }
  0x15   :  { %5096 = vmatpush.msra.mxu3 %v4753_v9  ;;  %473 = vmatpush.msra.mxu0 %v4753_v9  ;;  %v121_v9 = vld [vmem:[%s8578_s1 + $0x58] sm:$0xff]  ;;  %v312_v41 = vsel %vm222_vm0, %v309_v7, %v311_v33  ;;  %v4900_v58 = vld [vmem:[%s8578_s1 + $0x248] sm:$0xff]  ;;  %v94_v7 = vld [vmem:[%s8579_s0 + $0x2b0] sm:$0x3] }
  0x16   :  { %5097 = vmatpush.msra.mxu1 %v4752_v10  ;;  %5098 = vmatpush.msra.mxu2 %v4752_v10  ;;  %v45_v43 = vld [vmem:[%s8579_s0 + $0xf8] sm:$0xff] }
  0x17   :  { %5099 = vmatpush.msra.mxu3 %v4752_v10  ;;  %474 = vmatpush.msra.mxu0 %v4752_v10  ;;  %v227_v10 = vsel %vm222_vm0, %v224_v36, %v226_v59  ;;  %v4901_v36 = vld [vmem:[%s8578_s1 + $0x250] sm:$0xff]  ;;  %v118_v59 = vld [vmem:[%s8578_s1 + $0x40] sm:$0xff]  ;;  %v5590_v63 = vld [vmem:[%s8579_s0 + $0x38] sm:$0xff] }
  0x18   :  { %5100 = vmatpush.msra.mxu1 %v4751_v11  ;;  %5101 = vmatpush.msra.mxu2 %v4751_v11  ;;  %v71_v23 = vld [vmem:[%s8579_s0 + $0x1f8] sm:$0xff] }
  0x19   :  { %5102 = vmatpush.msra.mxu3 %v4751_v11  ;;  %475 = vmatpush.msra.mxu0 %v4751_v11  ;;  %v5482_v11 = vld [vmem:[%s8579_s0 + $0x18] sm:$0xff] }
  0x1a   :  { %5103 = vmatpush.msra.mxu1 %v4750_v12  ;;  %5104 = vmatpush.msra.mxu2 %v4750_v12 }
  0x1b   :  { %5105 = vmatpush.msra.mxu3 %v4750_v12  ;;  %476 = vmatpush.msra.mxu0 %v4750_v12  ;;  %v4886_v12 = vld [vmem:[%s8578_s1 + $0x1d8] sm:$0xff] }
  0x1c   :  { %5106 = vmatpush.msra.mxu1 %v4749_v17  ;;  %5107 = vmatpush.msra.mxu2 %v4749_v17 }
  0x1d   :  { %5108 = vmatpush.msra.mxu3 %v4749_v17  ;;  %477 = vmatpush.msra.mxu0 %v4749_v17  ;;  %v4773_v17 = vld [vmem:[%s8578_s1 + $0x150] sm:$0xff] }
  0x1e   :  { %5109 = vmatpush.msra.mxu1 %v4748_v24  ;;  %5110 = vmatpush.msra.mxu2 %v4748_v24 }
  0x1f   :  { %5111 = vmatpush.msra.mxu3 %v4748_v24  ;;  %478 = vmatpush.msra.mxu0 %v4748_v24  ;;  %v228_v24 = vrot.slane %v5482_v11, 1 }
  0x20   :  { %5112 = vmatpush.msra.mxu1 %v4747_v29  ;;  %5113 = vmatpush.msra.mxu2 %v4747_v29 }
  0x21   :  { %528 = vmatmul.f32.vlgmr.msra.gmra.mxu1 %v265_v30  ;;  %576 = vmatmul.f32.vlgmr.msra.gmra.mxu2 %v305_v31  ;;  %v91_v30 = vld [vmem:[%s8579_s0 + $0x298] sm:$0x3]  ;;  %v4772_v31 = vld [vmem:[%s8578_s1 + $0x148] sm:$0xff]  ;;  %v5529_v34 = vsel %vm222_vm0, %v228_v24, %v5515_v25  ;;  %v72_v24 = vld [vmem:[%s8579_s0 + $0x200] sm:$0xff] }
  0x22   :  { %1124 = vmatpush.msrb.mxu2 %v4778_v32  ;;  %5114 = vmatpush.msra.mxu3 %v4747_v29  ;;  %v271_v32 = vrot.slane %v43_v22, 1  ;;  %v48_v22 = vld [vmem:[%s8579_s0 + $0x110] sm:$0xff] }
  0x23   :  { %624 = vmatmul.f32.vlgmr.msra.gmra.mxu3 %v345_v37  ;;  %673 = vmatpush.msrb.mxu1 %v125_v38  ;;  %v119_v37 = vld [vmem:[%s8578_s1 + $0x48] sm:$0xff]  ;;  %v351_v38 = vrot.slane %v91_v30, 1  ;;  %v95_v30 = vld [vmem:[%s8579_s0 + $0x2b8] sm:$0xff] }
  0x24   :  { %1511 = vmatpush.msrb.mxu3 %v4890_v39  ;;  %1125 = vmatpush.msrb.mxu2 %v4777_v40  ;;  %v5543_v39 = vld [vmem:[%s8579_s0 + $0x28] sm:$0x3]  ;;  %v272_v40 = vsel %vm222_vm0, %v269_v5, %v271_v32  ;;  %v5602_v5 = vrot.slane %v5590_v63, 1  ;;  %v4769_v32 = vld [vmem:[%s8578_s1 + $0x130] sm:$0xff] }
  0x25   :  { %479 = vmatpush.msra.mxu0 %v4747_v29  ;;  %674 = vmatpush.msrb.mxu1 %v124_v44  ;;  %v350_v29 = vsel %vm222_vm0, %v348_v13, %v349_v14  ;;  %v68_v44 = vld [vmem:[%s8579_s0 + $0x1e0] sm:$0xff]  ;;  %v352_v47 = vsel %vm222_vm0, %v349_v14, %v351_v38  ;;  %v4882_v13 = vld [vmem:[%s8578_s1 + $0x1b8] sm:$0xff] }
  0x26   :  { %480 = vmatmul.f32.vlgmr.msra.gmra.mxu0 %v225_v45  ;;  %1512 = vmatpush.msrb.mxu3 %v4889_v46  ;;  %v69_v45 = vld [vmem:[%s8579_s0 + $0x1e8] sm:$0xff]  ;;  %v231_v46 = vrot.slane %v5543_v39, 1  ;;  %v4899_v14 = vld [vmem:[%s8578_s1 + $0x240] sm:$0xff] }
  0x27   :  { %2121 = vmatpush.msrb.mxu0 %v4906_v48  ;;  %1126 = vmatpush.msrb.mxu2 %v4776_v49  ;;  %v92_v48 = vld [vmem:[%s8579_s0 + $0x2a0] sm:$0xff]  ;;  %v93_v49 = vld [vmem:[%s8579_s0 + $0x2a8] sm:$0xff]  ;;  %v314_v55 = vrot.slane %v69_v45, 1 }
  0x28   :  { %1513 = vmatpush.msrb.mxu3 %v4888_v51  ;;  %675 = vmatpush.msrb.mxu1 %v123_v52  ;;  %v4771_v51 = vld [vmem:[%s8578_s1 + $0x140] sm:$0xff]  ;;  %v273_v52 = vrot.slane %v44_v42, 1  ;;  %v232_v56 = vsel %vm222_vm0, %v5515_v25, %v231_v46  ;;  %v116_v42 = vld [vmem:[%s8578_s1 + $0x30] sm:$0xff]  ;;  %v5669_v45 = vld [vmem:[%s8579_s0 + $0x48] sm:$0xff] }
  0x29   :  { %531 = vmatmul.f32.gmra.mxu1 %v267_v53  ;;  %579 = vmatmul.f32.gmra.mxu2 %v307_v54  ;;  %v274_v53 = vrot.slane %v45_v43, 1  ;;  %v313_v54 = vrot.slane %v68_v44, 1  ;;  %v358_v43 = vrot.slane %v95_v30, 1  ;;  %v5674_v46 = vld [vmem:[%s8579_s0 + $0x50] sm:$0xff] }
  0x2a   :  { %2122 = vmatpush.msrb.mxu0 %v4905_v60  ;;  %1127 = vmatpush.msrb.mxu2 %v4775_v61  ;;  %v353_v60 = vrot.slane %v92_v48, 1  ;;  %v354_v61 = vrot.slane %v93_v49, 1  ;;  %v49_v49 = vld [vmem:[%s8579_s0 + $0x118] sm:$0x3] }
  0x2b   :  { %627 = vmatmul.f32.gmra.mxu3 %v347_v62  ;;  %676 = vmatpush.msrb.mxu1 %v122_v0  ;;  %v5585_v62 = vld [vmem:[%s8579_s0 + $0x30] sm:$0xff]  ;;  %v275_v0 = vsel %vm222_vm0, %v273_v52, %v274_v53  ;;  %v315_v1 = vsel %vm222_vm0, %v313_v54, %v314_v55  ;;  %v238_v52 = vrot.slane %v5669_v45, 1 }
  0x2c   :  { %1514 = vmatpush.msrb.mxu3 %v4887_v2  ;;  %2123 = vmatpush.msrb.mxu0 %v4904_v3  ;;  %v46_v2 = vld [vmem:[%s8579_s0 + $0x100] sm:$0x3]  ;;  %v70_v3 = vld [vmem:[%s8579_s0 + $0x1f0] sm:$0x3]  ;;  %v233_v4 = vrot.slane %v5585_v62, 1  ;;  %v355_v6 = vsel %vm222_vm0, %v353_v60, %v354_v61  ;;  %v4880_v60 = vld [vmem:[%s8578_s1 + $0x1a8] sm:$0xff] }
  0x2d   :  { %1128 = vmatpush.msrb.mxu2 %v4774_v8  ;;  %677 = vmatpush.msrb.mxu1 %v121_v9  ;;  %v4770_v8 = vld [vmem:[%s8578_s1 + $0x138] sm:$0xff]  ;;  %v276_v9 = vrot.slane %v46_v2, 1 }
  0x2e   :  { %483 = vmatmul.f32.gmra.mxu0 %v227_v10  ;;  %1515 = vmatpush.msrb.mxu3 %v4886_v12  ;;  %v316_v10 = vrot.slane %v70_v3, 1  ;;  %v5613_v12 = vsel %vm222_vm0, %v233_v4, %v5602_v5  ;;  %v5711_v2 = vld [vmem:[%s8579_s0 + $0x58] sm:$0x3] }
  0x2f   :  { %2124 = vmatpush.msrb.mxu0 %v4903_v16  ;;  %1129 = vmatpush.msrb.mxu2 %v4773_v17  ;;  %v117_v16 = vld [vmem:[%s8578_s1 + $0x38] sm:$0xff]  ;;  %v356_v17 = vrot.slane %v94_v7, 1  ;;  %v51_v7 = vld [vmem:[%s8579_s0 + $0x128] sm:$0xff] }
  0x30   :  { %1516 = vmatpush.msrb.mxu3 %v4885_v18  ;;  %678 = vmatpush.msrb.mxu1 %v120_v19  ;;  %v5627_v18 = vld [vmem:[%s8579_s0 + $0x40] sm:$0x3]  ;;  %v277_v19 = vsel %vm222_vm0, %v274_v53, %v276_v9  ;;  %v5686_v53 = vrot.slane %v5674_v46, 1  ;;  %v75_v9 = vld [vmem:[%s8579_s0 + $0x218] sm:$0xff] }
  0x31   :  { %534 = vmatmul.f32.gmra.mxu1 %v270_v20  ;;  %582 = vmatmul.f32.gmra.mxu2 %v310_v21  ;;  %v317_v20 = vsel %vm222_vm0, %v314_v55, %v316_v10  ;;  %v47_v21 = vld [vmem:[%s8579_s0 + $0x108] sm:$0xff]  ;;  %v241_v10 = vrot.slane %v5711_v2, 1 }
  0x32   :  { %2125 = vmatpush.msrb.mxu0 %v4902_v26  ;;  %1130 = vmatpush.msrb.mxu2 %v4772_v31  ;;  %v236_v26 = vrot.slane %v5627_v18, 1  ;;  %v96_v31 = vld [vmem:[%s8579_s0 + $0x2c0] sm:$0xff]  ;;  %v278_v33 = vrot.slane %v47_v21, 1  ;;  %v97_v55 = vld [vmem:[%s8579_s0 + $0x2c8] sm:$0x3] }
  0x33   :  { %630 = vmatmul.f32.gmra.mxu3 %v350_v29  ;;  %679 = vmatpush.msrb.mxu1 %v119_v37  ;;  %v357_v29 = vsel %vm222_vm0, %v354_v61, %v356_v17  ;;  %v319_v37 = vrot.slane %v72_v24, 1  ;;  %v359_v44 = vrot.slane %v96_v31, 1  ;;  %v4897_v61 = vld [vmem:[%s8578_s1 + $0x230] sm:$0xff]  ;;  %v4767_v17 = vld [vmem:[%s8578_s1 + $0x120] sm:$0xff] }
  0x34   :  { %1517 = vmatpush.msrb.mxu3 %v4884_v35  ;;  %2126 = vmatpush.msrb.mxu0 %v4901_v36  ;;  %v279_v35 = vrot.slane %v48_v22, 1  ;;  %v318_v36 = vrot.slane %v71_v23, 1  ;;  %v237_v38 = vsel %vm222_vm0, %v5602_v5, %v236_v26  ;;  %v324_v22 = vrot.slane %v75_v9, 1  ;;  %v4879_v24 = vld [vmem:[%s8578_s1 + $0x1a0] sm:$0xff]  ;;  %v4896_v26 = vld [vmem:[%s8578_s1 + $0x228] sm:$0xff] }
  0x35   :  { %1131 = vmatpush.msrb.mxu2 %v4771_v51  ;;  %680 = vmatpush.msrb.mxu1 %v118_v59  ;;  %v73_v51 = vld [vmem:[%s8579_s0 + $0x208] sm:$0x3]  ;;  %v360_v54 = vsel %vm222_vm0, %v358_v43, %v359_v44  ;;  %v5697_v59 = vsel %vm222_vm0, %v238_v52, %v5686_v53  ;;  %v242_v23 = vsel %vm222_vm0, %v5686_v53, %v241_v10  ;;  %v100_v43 = vld [vmem:[%s8579_s0 + $0x2e0] sm:$0x3] }
  0x36   :  { %486 = vmatmul.f32.gmra.mxu0 %v5529_v34  ;;  %1518 = vmatpush.msrb.mxu3 %v4883_v57  ;;  %v320_v48 = vsel %vm222_vm0, %v318_v36, %v319_v37  ;;  %v281_v57 = vrot.slane %v49_v49, 1  ;;  %v4895_v52 = vld [vmem:[%s8578_s1 + $0x220] sm:$0xff] }
  0x37   :  { %2127 = vmatpush.msrb.mxu0 %v4900_v58  ;;  %1132 = vmatpush.msrb.mxu2 %v4770_v8  ;;  %v321_v58 = vrot.slane %v73_v51, 1  ;;  %v74_v8 = vld [vmem:[%s8579_s0 + $0x210] sm:$0xff]  ;;  %v4878_v51 = vld [vmem:[%s8578_s1 + $0x198] sm:$0xff] }
  0x38   :  { %1519 = vmatpush.msrb.mxu3 %v4882_v13  ;;  %681 = vmatpush.msrb.mxu1 %v117_v16  ;;  %v282_v3 = vsel %vm222_vm0, %v279_v35, %v281_v57  ;;  %v99_v16 = vld [vmem:[%s8579_s0 + $0x2d8] sm:$0xff]  ;;  %v323_v21 = vrot.slane %v74_v8, 1  ;;  %v4765_v8 = vld [vmem:[%s8578_s1 + $0x110] sm:$0xff] }
  0x39   :  { %537 = vmatmul.f32.gmra.mxu1 %v272_v40  ;;  %585 = vmatmul.f32.gmra.mxu2 %v312_v41  ;;  %v4881_v40 = vld [vmem:[%s8578_s1 + $0x1b0] sm:$0xff]  ;;  %v4898_v41 = vld [vmem:[%s8578_s1 + $0x238] sm:$0xff]  ;;  %v322_v4 = vsel %vm222_vm0, %v319_v37, %v321_v58  ;;  %v364_v31 = vrot.slane %v99_v16, 1 }
  0x3a   :  { %2128 = vmatpush.msrb.mxu0 %v4899_v14  ;;  %1133 = vmatpush.msrb.mxu2 %v4769_v32  ;;  %v98_v14 = vld [vmem:[%s8579_s0 + $0x2d0] sm:$0xff]  ;;  %v5753_v32 = vld [vmem:[%s8579_s0 + $0x60] sm:$0xff]  ;;  %v325_v36 = vsel %vm222_vm0, %v323_v21, %v324_v22 }
  0x3b   :  { %633 = vmatmul.f32.gmra.mxu3 %v352_v47  ;;  %682 = vmatpush.msrb.mxu1 %v116_v42  ;;  %v280_v47 = vsel %vm222_vm0, %v278_v33, %v279_v35  ;;  %v363_v30 = vrot.slane %v98_v14, 1  ;;  %v5758_v33 = vld [vmem:[%s8579_s0 + $0x68] sm:$0xff]  ;;  %v52_v37 = vld [vmem:[%s8579_s0 + $0x130] sm:$0x3] }
  0x3c   :  { %1520 = vmatpush.msrb.mxu3 %v4881_v40  ;;  %2129 = vmatpush.msrb.mxu0 %v4898_v41  ;;  %v243_v40 = vrot.slane %v5753_v32, 1  ;;  %v5770_v41 = vrot.slane %v5758_v33, 1 }
  0x3d   :  { %v365_v42 = vsel %vm222_vm0, %v363_v30, %v364_v31  ;;  %v55_v30 = vld [vmem:[%s8579_s0 + $0x148] sm:$0x3] }
  0x3e   :  { %489 = vmatmul.f32.gmra.mxu0 %v232_v56  ;;  %v4768_v56 = vld [vmem:[%s8578_s1 + $0x128] sm:$0xff]  ;;  %1521 = vmatpush.msrb.mxu3 %v4880_v60  ;;  %v5781_v49 = vsel %vm222_vm0, %v243_v40, %v5770_v41  ;;  %v53_v60 = vld [vmem:[%s8579_s0 + $0x138] sm:$0xff] }
  0x3f   :  { %1134 = vmatpush.msrb.mxu2 %v4768_v56  ;;  %2130 = vmatpush.msrb.mxu0 %v4897_v61  ;;  %v5795_v56 = vld [vmem:[%s8579_s0 + $0x70] sm:$0x3]  ;;  %v54_v61 = vld [vmem:[%s8579_s0 + $0x140] sm:$0xff]  ;;  %v288_v9 = vrot.slane %v53_v60, 1  ;;  %v4764_v40 = vld [vmem:[%s8578_s1 + $0x108] sm:$0xff] }
  0x40   :  { %1522 = vmatpush.msrb.mxu3 %v4879_v24  ;;  %v289_v10 = vrot.slane %v54_v61, 1  ;;  %v5842_v24 = vld [vmem:[%s8579_s0 + $0x80] sm:$0xff]  ;;  %v57_v60 = vld [vmem:[%s8579_s0 + $0x158] sm:$0xff] }
  0x41   :  { %540 = vmatmul.f32.gmra.mxu1 %v275_v0  ;;  %588 = vmatmul.f32.gmra.mxu2 %v315_v1  ;;  %v115_v0 = vld [vmem:[%s8578_s1 + $0x28] sm:$0xff]  ;;  %v361_v1 = vrot.slane %v97_v55, 1  ;;  %v366_v55 = vrot.slane %v100_v43, 1  ;;  %v80_v61 = vld [vmem:[%s8579_s0 + $0x240] sm:$0xff] }
  0x42   :  { %683 = vmatpush.msrb.mxu1 %v115_v0  ;;  %1135 = vmatpush.msrb.mxu2 %v4767_v17  ;;  %v77_v0 = vld [vmem:[%s8579_s0 + $0x228] sm:$0xff]  ;;  %v4877_v17 = vld [vmem:[%s8578_s1 + $0x190] sm:$0xff] }
  0x43   :  { %636 = vmatmul.f32.gmra.mxu3 %v355_v6  ;;  %v50_v6 = vld [vmem:[%s8579_s0 + $0x120] sm:$0xff]  ;;  %v362_v13 = vsel %vm222_vm0, %v359_v44, %v361_v1  ;;  %2131 = vmatpush.msrb.mxu0 %v4896_v26  ;;  %v4766_v44 = vld [vmem:[%s8578_s1 + $0x118] sm:$0xff]  ;;  %v78_v1 = vld [vmem:[%s8579_s0 + $0x230] sm:$0xff]  ;;  %v290_v26 = vsel %vm222_vm0, %v288_v9, %v289_v10  ;;  %v294_v9 = vrot.slane %v57_v60, 1 }
  0x44   :  { %1136 = vmatpush.msrb.mxu2 %v4766_v44  ;;  %1523 = vmatpush.msrb.mxu3 %v4878_v51  ;;  %v329_v14 = vrot.slane %v78_v1, 1  ;;  %v111_v51 = vld [vmem:[%s8578_s1 + $0x8] sm:$0xff]  ;;  %v4922_v60 = vld [vmem:[%s8578_s1 + $0x2f8] sm:$0xff] }
  0x45   :  { %2132 = vmatpush.msrb.mxu0 %v4895_v52 }
  0x46   :  { %492 = vmatmul.f32.gmra.mxu0 %v5613_v12  ;;  %1137 = vmatpush.msrb.mxu2 %v4765_v8 }
  0x47   :  { %1524 = vmatpush.msrb.mxu3 %v4877_v17  ;;  %v4892_v17 = vld [vmem:[%s8578_s1 + $0x208] sm:$0xff] }
  0x48   :  { %1138 = vmatpush.msrb.mxu2 %v4764_v40 }
  0x49   :  { %543 = vmatmul.f32.gmra.mxu1 %v277_v19  ;;  %591 = vmatmul.f32.gmra.mxu2 %v317_v20  ;;  %v283_v19 = vrot.slane %v50_v6, 1  ;;  %v284_v20 = vrot.slane %v51_v7, 1  ;;  %v101_v6 = vld [vmem:[%s8579_s0 + $0x2e8] sm:$0xff]  ;;  %v102_v7 = vld [vmem:[%s8579_s0 + $0x2f0] sm:$0xff] }
  0x4a   :  { %v368_v21 = vrot.slane %v101_v6, 1  ;;  %v105_v6 = vld [vmem:[%s8579_s0 + $0x308] sm:$0xff] }
  0x4b   :  { %639 = vmatmul.f32.gmra.mxu3 %v357_v29  ;;  %v114_v29 = vld [vmem:[%s8578_s1 + $0x20] sm:$0xff]  ;;  %v285_v35 = vsel %vm222_vm0, %v283_v19, %v284_v20  ;;  %v4894_v19 = vld [vmem:[%s8578_s1 + $0x218] sm:$0xff] }
  0x4c   :  { %684 = vmatpush.msrb.mxu1 %v114_v29  ;;  %2133 = vmatpush.msrb.mxu0 %v4894_v19  ;;  %v110_v19 = vld [vmem:[%s8578_s1] sm:$0xff] }
  0x4e   :  { %495 = vmatmul.f32.gmra.mxu0 %v237_v38  ;;  %v76_v38 = vld [vmem:[%s8579_s0 + $0x220] sm:$0x3] }
  0x51   :  { %546 = vmatmul.f32.gmra.mxu1 %v280_v47  ;;  %594 = vmatmul.f32.gmra.mxu2 %v320_v48  ;;  %v286_v47 = vrot.slane %v52_v37, 1  ;;  %v326_v48 = vrot.slane %v76_v38, 1  ;;  %v103_v38 = vld [vmem:[%s8579_s0 + $0x2f8] sm:$0x3] }
  0x52   :  { %v371_v52 = vrot.slane %v103_v38, 1 }
  0x53   :  { %642 = vmatmul.f32.gmra.mxu3 %v360_v54  ;;  %v113_v54 = vld [vmem:[%s8578_s1 + $0x18] sm:$0xff]  ;;  %v287_v57 = vsel %vm222_vm0, %v284_v20, %v286_v47  ;;  %v327_v58 = vsel %vm222_vm0, %v324_v22, %v326_v48  ;;  %v112_v20 = vld [vmem:[%s8578_s1 + $0x10] sm:$0xff]  ;;  %v369_v22 = vrot.slane %v102_v7, 1  ;;  %v4876_v47 = vld [vmem:[%s8578_s1 + $0x188] sm:$0xff] }
  0x54   :  { %685 = vmatpush.msrb.mxu1 %v113_v54  ;;  %v4893_v48 = vld [vmem:[%s8578_s1 + $0x210] sm:$0xff]  ;;  %v5879_v54 = vld [vmem:[%s8579_s0 + $0x88] sm:$0x3]  ;;  %1525 = vmatpush.msrb.mxu3 %v4876_v47  ;;  %v4763_v7 = vld [vmem:[%s8578_s1 + $0x100] sm:$0xff] }
  0x55   :  { %v370_v37 = vsel %vm222_vm0, %v368_v21, %v369_v22  ;;  %2134 = vmatpush.msrb.mxu0 %v4893_v48  ;;  %v251_v1 = vrot.slane %v5879_v54, 1  ;;  %1139 = vmatpush.msrb.mxu2 %v4763_v7  ;;  %v374_v21 = vrot.slane %v105_v6, 1  ;;  %v84_v6 = vld [vmem:[%s8579_s0 + $0x260] sm:$0xff] }
  0x56   :  { %498 = vmatmul.f32.gmra.mxu0 %v5697_v59  ;;  %686 = vmatpush.msrb.mxu1 %v112_v20 }
  0x57   :  { %2135 = vmatpush.msrb.mxu0 %v4892_v17  ;;  %v339_v17 = vrot.slane %v84_v6, 1 }
  0x58   :  { %687 = vmatpush.msrb.mxu1 %v111_v51 }
  0x59   :  { %549 = vmatmul.f32.gmra.mxu1 %v282_v3  ;;  %597 = vmatmul.f32.gmra.mxu2 %v322_v4  ;;  %v246_v3 = vrot.slane %v5795_v56, 1  ;;  %v367_v4 = vsel %vm222_vm0, %v364_v31, %v366_v55  ;;  %v79_v31 = vld [vmem:[%s8579_s0 + $0x238] sm:$0x3] }
  0x5a   :  { %v331_v43 = vrot.slane %v79_v31, 1  ;;  %688 = vmatpush.msrb.mxu1 %v110_v19  ;;  %v58_v31 = vld [vmem:[%s8579_s0 + $0x160] sm:$0x3] }
  0x5b   :  { %645 = vmatmul.f32.gmra.mxu3 %v362_v13  ;;  %v328_v13 = vrot.slane %v77_v0, 1  ;;  %v247_v16 = vsel %vm222_vm0, %v5770_v41, %v246_v3  ;;  %v81_v0 = vld [vmem:[%s8579_s0 + $0x248] sm:$0xff]  ;;  %v372_v3 = vsel %vm222_vm0, %v369_v22, %v371_v52  ;;  %v5921_v22 = vld [vmem:[%s8579_s0 + $0x90] sm:$0xff]  ;;  %v296_v47 = vrot.slane %v58_v31, 1  ;;  %v4891_v52 = vld [vmem:[%s8578_s1 + $0x200] sm:$0xff] }
  0x5c   :  { %2136 = vmatpush.msrb.mxu0 %v4891_v52  ;;  %2635 = vmatpush.msra.mxu1 %v4922_v60  ;;  %v6001_v31 = vld [vmem:[%s8579_s0 + $0xb0] sm:$0xff]  ;;  %v109_v52 = vld [vmem:[%s8579_s0 + $0x328] sm:$0x3] }
  0x5d   :  { %v330_v29 = vsel %vm222_vm0, %v328_v13, %v329_v14  ;;  %v334_v13 = vrot.slane %v81_v0, 1 }
  0x5e   :  { %501 = vmatmul.f32.gmra.mxu0 %v242_v23  ;;  %v5837_v23 = vld [vmem:[%s8579_s0 + $0x78] sm:$0xff] }
  0x61   :  { %552 = vmatmul.f32.gmra.mxu1 %v285_v35  ;;  %600 = vmatmul.f32.gmra.mxu2 %v325_v36  ;;  %v248_v35 = vrot.slane %v5837_v23, 1  ;;  %v5854_v36 = vrot.slane %v5842_v24, 1 }
  0x63   :  { %648 = vmatmul.f32.gmra.mxu3 %v365_v42  ;;  %v291_v42 = vrot.slane %v55_v30, 1  ;;  %v5865_v44 = vsel %vm222_vm0, %v248_v35, %v5854_v36  ;;  %v82_v35 = vld [vmem:[%s8579_s0 + $0x250] sm:$0x3] }
  0x64   :  { %v336_v48 = vrot.slane %v82_v35, 1 }
  0x65   :  { %v292_v55 = vsel %vm222_vm0, %v289_v10, %v291_v42  ;;  %v333_v10 = vrot.slane %v80_v61, 1  ;;  %v106_v42 = vld [vmem:[%s8579_s0 + $0x310] sm:$0x3]  ;;  %v297_v61 = vsel %vm222_vm0, %v294_v9, %v296_v47  ;;  %v6013_v47 = vrot.slane %v6001_v31, 1 }
  0x66   :  { %504 = vmatmul.f32.gmra.mxu0 %v5781_v49  ;;  %v337_v0 = vsel %vm222_vm0, %v334_v13, %v336_v48 }
  0x67   :  { %v335_v30 = vsel %vm222_vm0, %v333_v10, %v334_v13  ;;  %v108_v10 = vld [vmem:[%s8579_s0 + $0x320] sm:$0xff] }
  0x69   :  { %555 = vmatmul.f32.gmra.mxu1 %v287_v57  ;;  %603 = vmatmul.f32.gmra.mxu2 %v327_v58  ;;  %v332_v57 = vsel %vm222_vm0, %v329_v14, %v331_v43  ;;  %v56_v58 = vld [vmem:[%s8579_s0 + $0x150] sm:$0xff]  ;;  %v252_v14 = vsel %vm222_vm0, %v5854_v36, %v251_v1  ;;  %v5034_v43 = vld [vmem:[%s8578_s1 + $0x378] sm:$0xff]  ;;  %v59_v1 = vld [vmem:[%s8579_s0 + $0x168] sm:$0xff] }
  0x6a   :  { %v293_v8 = vrot.slane %v56_v58, 1  ;;  %3022 = vmatpush.msra.mxu2 %v5034_v43  ;;  %v5960_v58 = vld [vmem:[%s8579_s0 + $0xa0] sm:$0x3]  ;;  %v298_v13 = vrot.slane %v59_v1, 1 }
  0x6b   :  { %651 = vmatmul.f32.gmra.mxu3 %v367_v4  ;;  %v104_v4 = vld [vmem:[%s8579_s0 + $0x300] sm:$0xff]  ;;  %v256_v7 = vrot.slane %v5960_v58, 1 }
  0x6c   :  { %v373_v20 = vrot.slane %v104_v4, 1  ;;  %v83_v4 = vld [vmem:[%s8579_s0 + $0x258] sm:$0xff] }
  0x6e   :  { %507 = vmatmul.f32.gmra.mxu0 %v247_v16  ;;  %v4875_v16 = vld [vmem:[%s8578_s1 + $0x180] sm:$0xff]  ;;  %v375_v40 = vsel %vm222_vm0, %v373_v20, %v374_v21  ;;  %v5066_v20 = vld [vmem:[%s8578_s1 + $0x478] sm:$0xff] }
  0x6f   :  { %1526 = vmatpush.msrb.mxu3 %v4875_v16  ;;  %v338_v16 = vrot.slane %v83_v4, 1  ;;  %4146 = vmatpush.msra.mxu0 %v5066_v20 }
  0x71   :  { %558 = vmatmul.f32.gmra.mxu1 %v290_v26  ;;  %606 = vmatmul.f32.gmra.mxu2 %v330_v29  ;;  %v5926_v26 = vld [vmem:[%s8579_s0 + $0x98] sm:$0xff]  ;;  %v295_v29 = vsel %vm222_vm0, %v293_v8, %v294_v9 }
  0x72   :  { %v5938_v38 = vrot.slane %v5926_v26, 1  ;;  %v107_v9 = vld [vmem:[%s8579_s0 + $0x318] sm:$0xff] }
  0x73   :  { %654 = vmatmul.f32.gmra.mxu3 %v370_v37  ;;  %v253_v37 = vrot.slane %v5921_v22, 1 }
  0x74   :  { %v257_v19 = vsel %vm222_vm0, %v5938_v38, %v256_v7  ;;  %v883_v7 = vrot.slane %v5367_v27, 2 }
  0x75   :  { %v5949_v51 = vsel %vm222_vm0, %v253_v37, %v5938_v38  ;;  %v340_v37 = vsel %vm222_vm0, %v338_v16, %v339_v17  ;;  %v886_v16 = vrot.slane %v5419_v50, 2  ;;  %v4921_v50 = vld [vmem:[%s8578_s1 + $0x2f0] sm:$0xff] }
  0x76   :  { %510 = vmatmul.f32.gmra.mxu0 %v5865_v44  ;;  %2636 = vmatpush.msra.mxu1 %v4921_v50  ;;  %v5048_v50 = vld [vmem:[%s8578_s1 + $0x3e8] sm:$0xff] }
  0x79   :  { %561 = vmatmul.f32.gmra.mxu1 %v292_v55  ;;  %609 = vmatmul.f32.gmra.mxu2 %v332_v57  ;;  %v5050_v55 = vld [vmem:[%s8578_s1 + $0x3f8] sm:$0xff]  ;;  %v376_v57 = vrot.slane %v106_v42, 1  ;;  %v85_v42 = vld [vmem:[%s8579_s0 + $0x268] sm:$0x3] }
  0x7a   :  { %3632 = vmatpush.msra.mxu3 %v5050_v55 }
  0x7b   :  { %657 = vmatmul.f32.gmra.mxu3 %v372_v3  ;;  %v60_v3 = vld [vmem:[%s8579_s0 + $0x170] sm:$0xff]  ;;  %v377_v8 = vsel %vm222_vm0, %v374_v21, %v376_v57  ;;  %v378_v21 = vrot.slane %v107_v9, 1  ;;  %v341_v57 = vrot.slane %v85_v42, 1  ;;  %v6068_v42 = vrot.slane %v5491_v15, 2 }
  0x7d   :  { %8602 = vst [vmem:[#allocation3_spill] sm:$0xff] %v6068_v42 }
  0x7e   :  { %513 = vmatmul.f32.gmra.mxu0 %v252_v14  ;;  %v299_v14 = vrot.slane %v60_v3, 1  ;;  %v342_v3 = vsel %vm222_vm0, %v339_v17, %v341_v57 }
  0x80   :  { %v300_v35 = vsel %vm222_vm0, %v298_v13, %v299_v14 }
  0x81   :  { %564 = vmatmul.f32.gmra.mxu1 %v295_v29  ;;  %612 = vmatmul.f32.gmra.mxu2 %v335_v30  ;;  %v379_v29 = vrot.slane %v108_v10, 1  ;;  %v5996_v30 = vld [vmem:[%s8579_s0 + $0xa8] sm:$0xff] }
  0x82   :  { %v258_v43 = vrot.slane %v5996_v30, 1 }
  0x83   :  { %660 = vmatmul.f32.gmra.mxu3 %v375_v40  ;;  %v61_v40 = vld [vmem:[%s8579_s0 + $0x178] sm:$0x3]  ;;  %v380_v48 = vsel %vm222_vm0, %v378_v21, %v379_v29 }
  0x84   :  { %v301_v55 = vrot.slane %v61_v40, 1  ;;  %v6021_v60 = vsel %vm222_vm0, %v258_v43, %v6013_v47  ;;  %v2394_v40 = vrot.slane %v5482_v11, 2 }
  0x86   :  { %516 = vmatmul.f32.gmra.mxu0 %v5949_v51  ;;  %v302_v1 = vsel %vm222_vm0, %v299_v14, %v301_v55  ;;  %v5033_v14 = vld [vmem:[%s8578_s1 + $0x370] sm:$0xff]  ;;  %v6086_v57 = vsel %vm882_vm1, %v2394_v40, %v6068_v42 }
  0x87   :  { %3023 = vmatpush.msra.mxu2 %v5033_v14  ;;  %8604 = vst [vmem:[#allocation5_spill] sm:$0xff] %v6086_v57 }
  0x89   :  { %567 = vmatmul.f32.gmra.mxu1 %v297_v61  ;;  %615 = vmatmul.f32.gmra.mxu2 %v337_v0  ;;  %v381_v61 = vrot.slane %v109_v52, 1  ;;  %v6026_v0 = vld [vmem:[%s8579_s0 + $0xb8] sm:$0x3] }
  0x8a   :  { %v261_v4 = vrot.slane %v6026_v0, 1 }
  0x8b   :  { %663 = vmatmul.f32.gmra.mxu3 %v377_v8  ;;  %v382_v6 = vsel %vm222_vm0, %v379_v29, %v381_v61  ;;  %v884_v8 = vrot.slane %v5372_v28, 2 }
  0x8c   :  { %v262_v9 = vsel %vm222_vm0, %v6013_v47, %v261_v4 }
  0x8d   :  { %v885_v13 = vsel %vm882_vm1, %v883_v7, %v884_v8  ;;  %v2399_v7 = vrot.slane %v5585_v62, 2 }
  0x8e   :  { %519 = vmatmul.f32.gmra.mxu0 %v257_v19  ;;  %v5049_v19 = vld [vmem:[%s8578_s1 + $0x3f0] sm:$0xff] }
  0x8f   :  { %3633 = vmatpush.msra.mxu3 %v5049_v19  ;;  %v5032_v19 = vld [vmem:[%s8578_s1 + $0x368] sm:$0xff] }
  0x90   :  { %3024 = vmatpush.msra.mxu2 %v5032_v19 }
  0x91   :  { %570 = vmatmul.f32.gmra.mxu1 %v300_v35  ;;  %618 = vmatmul.f32.gmra.mxu2 %v340_v37  ;;  %v887_v35 = vsel %vm882_vm1, %v884_v8, %v886_v16  ;;  %v6109_v8 = vrot.slane %v5590_v63, 2 }
  0x92   :  { %3634 = vmatpush.msra.mxu3 %v5048_v50 }
  0x93   :  { %666 = vmatmul.f32.gmra.mxu3 %v380_v48  ;;  %8606 = vst [vmem:[#allocation7_spill] sm:$0xff] %v6109_v8 }
  0x96   :  { %522 = vmatmul.f32.gmra.mxu0 %v6021_v60 }
  0x99   :  { %573 = vmatmul.f32.gmra.mxu1 %v302_v1  ;;  %621 = vmatmul.f32.gmra.mxu2 %v342_v3  ;;  %v4784_v3 = vld [vmem:[%s8579_s0 + $0x40] sm:$0x3] }
  0x9b   :  { %669 = vmatmul.f32.gmra.mxu3 %v382_v6 }
  0x9e   :  { %v6037_v10 = vpop.f32.mrf.mxu1  ;;  %525 = vmatmul.f32.gmra.mxu0 %v262_v9 }
  0xa1   :  { %689 = vmatmul.f32.vlgmr.msrb.gmra.mxu1 %v5367_v27  ;;  %1140 = vmatmul.f32.vlgmr.msrb.gmra.mxu2 %v885_v13  ;;  %v4781_v27 = vld [vmem:[%s8579_s0 + $0x28] sm:$0x3] }
  0xa2   :  { %v1883_v37 = vrot.slane %v4781_v27, 1 }
  0xa3   :  { %1527 = vmatmul.f32.vlgmr.msrb.gmra.mxu3 %v5482_v11  ;;  %v6046_v17 = vpop.f32.mrf.mxu0 }
  0xa4   :  { %v6051_v20 = vpop.f32.mrf.mxu2  ;;  %v1884_v48 = vsel %vm222_vm0, %v5515_v25, %v1883_v37  ;;  %v891_v25 = vrot.slane %v5543_v39, 2  ;;  %v1888_v39 = vrot.slane %v4784_v3, 1  ;;  %v6156_v3 = vrot.slane %v5674_v46, 2 }
  0xa6   :  { %v6059_v21 = vpop.f32.mrf.mxu1  ;;  %v6061_v29 = vpop.f32.mrf.mxu3  ;;  %2137 = vmatmul.f32.vlgmr.msrb.gmra.mxu0 %v5529_v34  ;;  %v5065_v34 = vld [vmem:[%s8578_s1 + $0x470] sm:$0xff]  ;;  %v1889_v13 = vsel %vm222_vm0, %v5602_v5, %v1888_v39  ;;  %v896_v5 = vrot.slane %v5627_v18, 2  ;;  %v4920_v18 = vld [vmem:[%s8578_s1 + $0x2e8] sm:$0xff]  ;;  %8610 = vst [vmem:[#allocation11_spill] sm:$0xff] %v6156_v3 }
  0xa7   :  { %8601 = vst [vmem:[#allocation2_spill] sm:$0xff] %v6061_v29  ;;  %4147 = vmatpush.msra.mxu0 %v5065_v34  ;;  %2637 = vmatpush.msra.mxu1 %v4920_v18 }
  0xa9   :  { %692 = vmatmul.f32.gmra.mxu1 %v5372_v28  ;;  %1143 = vmatmul.f32.gmra.mxu2 %v887_v35 }
  0xab   :  { %1530 = vmatmul.f32.gmra.mxu3 %v5491_v15  ;;  %v6071_v43 = vpop.f32.mrf.mxu0 }
  0xac   :  { %v6078_v52 = vpop.f32.mrf.mxu2 }
  0xae   :  { %v6080_v28 = vpop.f32.mrf.mxu1  ;;  %v6082_v55 = vpop.f32.mrf.mxu3  ;;  %2140 = vmatmul.f32.gmra.mxu0 %v1884_v48  ;;  %v897_v48 = vsel %vm882_vm1, %v6109_v8, %v896_v5 }
  0xaf   :  { %8603 = vst [vmem:[#allocation4_spill] sm:$0xff] %v6082_v55  ;;  %v4803_v55 = vld [vmem:[%s8579_s0 + $0xd8] sm:$0xff] }
  0xb1   :  { %695 = vmatmul.f32.gmra.mxu1 %v5482_v11  ;;  %1146 = vmatmul.f32.gmra.mxu2 %v6086_v57  ;;  %v892_v11 = vsel %vm882_vm1, %v6068_v42, %v891_v25  ;;  %v2404_v25 = vrot.slane %v5669_v45, 2  ;;  %v4805_v57 = vld [vmem:[%s8579_s0 + $0xe8] sm:$0x3] }
  0xb3   :  { %1533 = vmatmul.f32.gmra.mxu3 %v5585_v62  ;;  %v6092_v61 = vpop.f32.mrf.mxu0  ;;  %v6174_v19 = vsel %vm882_vm1, %v2404_v25, %v6156_v3  ;;  %v6197_v25 = vrot.slane %v5758_v33, 2 }
  0xb4   :  { %v6094_v1 = vpop.f32.mrf.mxu2  ;;  %8612 = vst [vmem:[#allocation13_spill] sm:$0xff] %v6174_v19 }
  0xb5   :  { %8614 = vst [vmem:[#allocation15_spill] sm:$0xff] %v6197_v25 }
  0xb6   :  { %v6099_v4 = vpop.f32.mrf.mxu1  ;;  %v6101_v6 = vpop.f32.mrf.mxu3  ;;  %2143 = vmatmul.f32.gmra.mxu0 %v5613_v12 }
  0xb7   :  { %8605 = vst [vmem:[#allocation6_spill] sm:$0xff] %v6101_v6 }
  0xb9   :  { %698 = vmatmul.f32.gmra.mxu1 %v5491_v15  ;;  %1149 = vmatmul.f32.gmra.mxu2 %v892_v11  ;;  %v6124_v15 = vsel %vm882_vm1, %v2399_v7, %v6109_v8  ;;  %v4802_v8 = vld [vmem:[%s8579_s0 + $0xd0] sm:$0x3] }
  0xba   :  { %8608 = vst [vmem:[#allocation9_spill] sm:$0xff] %v6124_v15 }
  0xbb   :  { %1536 = vmatmul.f32.gmra.mxu3 %v5590_v63  ;;  %v6112_v9 = vpop.f32.mrf.mxu0 }
  0xbc   :  { %v6116_v14 = vpop.f32.mrf.mxu2 }
  0xbe   :  { %v6118_v16 = vpop.f32.mrf.mxu1  ;;  %v6120_v12 = vpop.f32.mrf.mxu3  ;;  %2146 = vmatmul.f32.gmra.mxu0 %v1889_v13 }
  0xbf   :  { %8607 = vst [vmem:[#allocation8_spill] sm:$0xff] %v6120_v12 }
  0xc1   :  { %701 = vmatmul.f32.gmra.mxu1 %v5585_v62  ;;  %1152 = vmatmul.f32.gmra.mxu2 %v6124_v15  ;;  %v4787_v62 = vld [vmem:[%s8579_s0 + $0x58] sm:$0x3] }
  0xc2   :  { %v1893_v34 = vrot.slane %v4787_v62, 1  ;;  %v4790_v62 = vld [vmem:[%s8579_s0 + $0x70] sm:$0x3] }
  0xc3   :  { %1539 = vmatmul.f32.gmra.mxu3 %v5669_v45  ;;  %v6133_v27 = vpop.f32.mrf.mxu0 }
  0xc4   :  { %v6138_v35 = vpop.f32.mrf.mxu2  ;;  %v1894_v39 = vsel %vm222_vm0, %v5686_v53, %v1893_v34  ;;  %v901_v53 = vrot.slane %v5711_v2, 2  ;;  %v1898_v2 = vrot.slane %v4790_v62, 1  ;;  %v2409_v34 = vrot.slane %v5753_v32, 2  ;;  %v5031_v62 = vld [vmem:[%s8578_s1 + $0x360] sm:$0xff] }
  0xc5   :  { %3025 = vmatpush.msra.mxu2 %v5031_v62 }
  0xc6   :  { %v6146_v37 = vpop.f32.mrf.mxu1  ;;  %v6148_v40 = vpop.f32.mrf.mxu3  ;;  %2149 = vmatmul.f32.gmra.mxu0 %v5697_v59  ;;  %v5064_v59 = vld [vmem:[%s8578_s1 + $0x468] sm:$0xff] }
  0xc7   :  { %8609 = vst [vmem:[#allocation10_spill] sm:$0xff] %v6148_v40  ;;  %4148 = vmatpush.msra.mxu0 %v5064_v59  ;;  %v1899_v59 = vsel %vm222_vm0, %v5770_v41, %v1898_v2  ;;  %v906_v41 = vrot.slane %v5795_v56, 2  ;;  %v5047_v2 = vld [vmem:[%s8578_s1 + $0x3e0] sm:$0xff] }
  0xc8   :  { %3635 = vmatpush.msra.mxu3 %v5047_v2  ;;  %v4919_v56 = vld [vmem:[%s8578_s1 + $0x2e0] sm:$0xff]  ;;  %v2414_v2 = vrot.slane %v5837_v23, 2 }
  0xc9   :  { %704 = vmatmul.f32.gmra.mxu1 %v5590_v63  ;;  %1155 = vmatmul.f32.gmra.mxu2 %v897_v48 }
  0xca   :  { %2638 = vmatpush.msra.mxu1 %v4919_v56 }
  0xcb   :  { %1542 = vmatmul.f32.gmra.mxu3 %v5674_v46  ;;  %v6159_v11 = vpop.f32.mrf.mxu0 }
  0xcc   :  { %v6166_v7 = vpop.f32.mrf.mxu2 }
  0xce   :  { %v6168_v63 = vpop.f32.mrf.mxu1  ;;  %v6170_v13 = vpop.f32.mrf.mxu3  ;;  %2152 = vmatmul.f32.gmra.mxu0 %v1894_v39 }
  0xcf   :  { %8611 = vst [vmem:[#allocation12_spill] sm:$0xff] %v6170_v13  ;;  %v6244_v13 = vrot.slane %v5842_v24, 2 }
  0xd1   :  { %707 = vmatmul.f32.gmra.mxu1 %v5669_v45  ;;  %1158 = vmatmul.f32.gmra.mxu2 %v6174_v19  ;;  %v902_v45 = vsel %vm882_vm1, %v6156_v3, %v901_v53  ;;  %8618 = vst [vmem:[#allocation19_spill] sm:$0xff] %v6244_v13 }
  0xd3   :  { %1545 = vmatmul.f32.gmra.mxu3 %v5753_v32  ;;  %v6180_v5 = vpop.f32.mrf.mxu0 }
  0xd4   :  { %v6182_v50 = vpop.f32.mrf.mxu2 }
  0xd6   :  { %v6187_v18 = vpop.f32.mrf.mxu1  ;;  %v6189_v48 = vpop.f32.mrf.mxu3  ;;  %2155 = vmatmul.f32.gmra.mxu0 %v5781_v49 }
  0xd7   :  { %8613 = vst [vmem:[#allocation14_spill] sm:$0xff] %v6189_v48 }
  0xd9   :  { %710 = vmatmul.f32.gmra.mxu1 %v5674_v46  ;;  %1161 = vmatmul.f32.gmra.mxu2 %v902_v45  ;;  %v6212_v46 = vsel %vm882_vm1, %v2409_v34, %v6197_v25 }
  0xda   :  { %8616 = vst [vmem:[#allocation17_spill] sm:$0xff] %v6212_v46 }
  0xdb   :  { %1548 = vmatmul.f32.gmra.mxu3 %v5758_v33  ;;  %v6200_v39 = vpop.f32.mrf.mxu0 }
  0xdc   :  { %v6204_v48 = vpop.f32.mrf.mxu2 }
  0xde   :  { %v6206_v53 = vpop.f32.mrf.mxu1  ;;  %v6208_v49 = vpop.f32.mrf.mxu3  ;;  %2158 = vmatmul.f32.gmra.mxu0 %v1899_v59 }
  0xdf   :  { %8615 = vst [vmem:[#allocation16_spill] sm:$0xff] %v6208_v49  ;;  %v907_v49 = vsel %vm882_vm1, %v6197_v25, %v906_v41 }
  0xe1   :  { %713 = vmatmul.f32.gmra.mxu1 %v5753_v32  ;;  %1164 = vmatmul.f32.gmra.mxu2 %v6212_v46  ;;  %v4793_v32 = vld [vmem:[%s8579_s0 + $0x88] sm:$0x3] }
  0xe2   :  { %v1903_v46 = vrot.slane %v4793_v32, 1  ;;  %v6262_v32 = vsel %vm882_vm1, %v2414_v2, %v6244_v13 }
  0xe3   :  { %1551 = vmatmul.f32.gmra.mxu3 %v5837_v23  ;;  %v6221_v45 = vpop.f32.mrf.mxu0  ;;  %8620 = vst [vmem:[#allocation21_spill] sm:$0xff] %v6262_v32 }
  0xe4   :  { %v6226_v34 = vpop.f32.mrf.mxu2 }
  0xe6   :  { %v6234_v59 = vpop.f32.mrf.mxu1  ;;  %v6236_v62 = vpop.f32.mrf.mxu3  ;;  %2161 = vmatmul.f32.gmra.mxu0 %v5865_v44  ;;  %v5063_v44 = vld [vmem:[%s8578_s1 + $0x460] sm:$0xff] }
  0xe7   :  { %8617 = vst [vmem:[#allocation18_spill] sm:$0xff] %v6236_v62  ;;  %v1904_v62 = vsel %vm222_vm0, %v5854_v36, %v1903_v46  ;;  %4149 = vmatpush.msra.mxu0 %v5063_v44  ;;  %v911_v36 = vrot.slane %v5879_v54, 2 }
  0xe9   :  { %716 = vmatmul.f32.gmra.mxu1 %v5758_v33  ;;  %1167 = vmatmul.f32.gmra.mxu2 %v907_v49 }
  0xeb   :  { %1554 = vmatmul.f32.gmra.mxu3 %v5842_v24  ;;  %v6247_v56 = vpop.f32.mrf.mxu0 }
  0xec   :  { %v6254_v41 = vpop.f32.mrf.mxu2 }
  0xee   :  { %v6256_v33 = vpop.f32.mrf.mxu1  ;;  %v6258_v49 = vpop.f32.mrf.mxu3  ;;  %2164 = vmatmul.f32.gmra.mxu0 %v1904_v62  ;;  %v2419_v62 = vrot.slane %v5921_v22, 2 }
  0xef   :  { %8619 = vst [vmem:[#allocation20_spill] sm:$0xff] %v6258_v49  ;;  %v4796_v49 = vld [vmem:[%s8579_s0 + $0xa0] sm:$0x3] }
  0xf0   :  { %v1908_v54 = vrot.slane %v4796_v49, 1  ;;  %v5030_v49 = vld [vmem:[%s8578_s1 + $0x358] sm:$0xff] }
  0xf1   :  { %719 = vmatmul.f32.gmra.mxu1 %v5837_v23  ;;  %1170 = vmatmul.f32.gmra.mxu2 %v6262_v32  ;;  %v912_v23 = vsel %vm882_vm1, %v6244_v13, %v911_v36  ;;  %v6285_v32 = vrot.slane %v5926_v26, 2  ;;  %v6332_v13 = vrot.slane %v6001_v31, 2 }
  0xf2   :  { %3026 = vmatpush.msra.mxu2 %v5030_v49 }
  0xf3   :  { %1557 = vmatmul.f32.gmra.mxu3 %v5921_v22  ;;  %v6268_v46 = vpop.f32.mrf.mxu0  ;;  %8622 = vst [vmem:[#allocation23_spill] sm:$0xff] %v6285_v32 }
  0xf4   :  { %v6270_v44 = vpop.f32.mrf.mxu2  ;;  %8626 = vst [vmem:[#allocation27_spill] sm:$0xff] %v6332_v13 }
  0xf6   :  { %v6275_v25 = vpop.f32.mrf.mxu1  ;;  %v6277_v2 = vpop.f32.mrf.mxu3  ;;  %2167 = vmatmul.f32.gmra.mxu0 %v5949_v51 }
  0xf7   :  { %8621 = vst [vmem:[#allocation22_spill] sm:$0xff] %v6277_v2  ;;  %v1909_v2 = vsel %vm222_vm0, %v5938_v38, %v1908_v54  ;;  %v916_v38 = vrot.slane %v5960_v58, 2  ;;  %v5046_v54 = vld [vmem:[%s8578_s1 + $0x3d8] sm:$0xff] }
  0xf8   :  { %3636 = vmatpush.msra.mxu3 %v5046_v54  ;;  %v4918_v58 = vld [vmem:[%s8578_s1 + $0x2d8] sm:$0xff]  ;;  %v2424_v54 = vrot.slane %v5996_v30, 2 }
  0xf9   :  { %722 = vmatmul.f32.gmra.mxu1 %v5842_v24  ;;  %1173 = vmatmul.f32.gmra.mxu2 %v912_v23  ;;  %v6300_v24 = vsel %vm882_vm1, %v2419_v62, %v6285_v32 }
  0xfa   :  { %8624 = vst [vmem:[#allocation25_spill] sm:$0xff] %v6300_v24  ;;  %2639 = vmatpush.msra.mxu1 %v4918_v58  ;;  %v6353_v58 = vsel %vm882_vm1, %v2424_v54, %v6332_v13 }
  0xfb   :  { %1560 = vmatmul.f32.gmra.mxu3 %v5926_v26  ;;  %v6288_v3 = vpop.f32.mrf.mxu0  ;;  %8629 = vst [vmem:[#allocation30_spill] sm:$0xff] %v6353_v58 }
  0xfc   :  { %v6292_v40 = vpop.f32.mrf.mxu2 }
  0xfe   :  { %v6294_v36 = vpop.f32.mrf.mxu1  ;;  %v6296_v51 = vpop.f32.mrf.mxu3  ;;  %2170 = vmatmul.f32.gmra.mxu0 %v1909_v2 }
  0xff   :  { %8623 = vst [vmem:[#allocation24_spill] sm:$0xff] %v6296_v51  ;;  %v917_v51 = vsel %vm882_vm1, %v6285_v32, %v916_v38 }
 0x101   :  { %725 = vmatmul.f32.gmra.mxu1 %v5921_v22  ;;  %1176 = vmatmul.f32.gmra.mxu2 %v6300_v24  ;;  %v4799_v22 = vld [vmem:[%s8579_s0 + $0xb8] sm:$0x3] }
 0x102   :  { %v1913_v24 = vrot.slane %v4799_v22, 1 }
 0x103   :  { %1563 = vmatmul.f32.gmra.mxu3 %v5996_v30  ;;  %v6309_v23 = vpop.f32.mrf.mxu0 }
 0x104   :  { %v6314_v2 = vpop.f32.mrf.mxu2 }
 0x106   :  { %v6322_v62 = vpop.f32.mrf.mxu1  ;;  %v6324_v49 = vpop.f32.mrf.mxu3  ;;  %2173 = vmatmul.f32.gmra.mxu0 %v6021_v60  ;;  %v5062_v60 = vld [vmem:[%s8578_s1 + $0x458] sm:$0xff] }
 0x107   :  { %8625 = vst [vmem:[#allocation26_spill] sm:$0xff] %v6324_v49  ;;  %v1914_v49 = vsel %vm222_vm0, %v6013_v47, %v1913_v24  ;;  %4150 = vmatpush.msra.mxu0 %v5062_v60  ;;  %v4800_v47 = vld [vmem:[%s8579_s0 + $0xc0] sm:$0xff]  ;;  %v921_v60 = vrot.slane %v6026_v0, 2  ;;  %v1918_v0 = vrot.slane %v4802_v8, 1 }
 0x108   :  { %v1915_v24 = vrot.slane %v4800_v47, 1 }
 0x109   :  { %728 = vmatmul.f32.gmra.mxu1 %v5926_v26  ;;  %1179 = vmatmul.f32.gmra.mxu2 %v917_v51  ;;  %v4801_v26 = vld [vmem:[%s8579_s0 + $0xc8] sm:$0xff] }
 0x10a   :  { %v1916_v32 = vrot.slane %v4801_v26, 1 }
 0x10b   :  { %1566 = vmatmul.f32.gmra.mxu3 %v6001_v31  ;;  %v6335_v19 = vpop.f32.mrf.mxu0 }
 0x10c   :  { %v6342_v38 = vpop.f32.mrf.mxu2 }
 0x10d   :  { %8627 = vst [vmem:[#allocation28_spill] sm:$0xff] %v6342_v38 }
 0x10e   :  { %v6347_v51 = vpop.f32.mrf.mxu1  ;;  %v6349_v22 = vpop.f32.mrf.mxu3  ;;  %2176 = vmatmul.f32.gmra.mxu0 %v1914_v49 }
 0x10f   :  { %8628 = vst [vmem:[#allocation29_spill] sm:$0xff] %v6349_v22  ;;  %v1917_v22 = vsel %vm222_vm0, %v1915_v24, %v1916_v32 }
 0x111   :  { %731 = vmatmul.f32.gmra.mxu1 %v5996_v30  ;;  %1182 = vmatmul.f32.gmra.mxu2 %v6353_v58  ;;  %v922_v30 = vsel %vm882_vm1, %v6332_v13, %v921_v60  ;;  %v5117_v58 = vld [vmem:[%s8579_s0 + $0xc8] sm:$0xff]  ;;  %v1919_v60 = vsel %vm222_vm0, %v1916_v32, %v1918_v0  ;;  %v5029_v32 = vld [vmem:[%s8578_s1 + $0x350] sm:$0xff] }
 0x112   :  { %v924_v15 = vrot.slane %v5117_v58, 2  ;;  %v5118_v0 = vld [vmem:[%s8579_s0 + $0xd0] sm:$0x3]  ;;  %3027 = vmatpush.msra.mxu2 %v5029_v32 }
 0x113   :  { %1569 = vmatmul.f32.gmra.mxu3 %v4800_v47  ;;  %v6361_v12 = vpop.f32.mrf.mxu0  ;;  %v5116_v47 = vld [vmem:[%s8579_s0 + $0xc0] sm:$0xff]  ;;  %v4917_v32 = vld [vmem:[%s8578_s1 + $0x2d0] sm:$0xff] }
 0x114   :  { %v6364_v54 = vpop.f32.mrf.mxu2  ;;  %v923_v24 = vrot.slane %v5116_v47, 2  ;;  %2640 = vmatpush.msra.mxu1 %v4917_v32 }
 0x115   :  { %8630 = vst [vmem:[#allocation31_spill] sm:$0xff] %v6364_v54 }
 0x116   :  { %v6369_v49 = vpop.f32.mrf.mxu1  ;;  %v6371_v6 = vpop.f32.mrf.mxu3  ;;  %2179 = vmatmul.f32.gmra.mxu0 %v1917_v22  ;;  %v925_v13 = vsel %vm882_vm1, %v923_v24, %v924_v15 }
 0x117   :  { %8631 = vst [vmem:[#allocation32_spill] sm:$0xff] %v6371_v6 }
 0x119   :  { %734 = vmatmul.f32.gmra.mxu1 %v6001_v31  ;;  %1185 = vmatmul.f32.gmra.mxu2 %v922_v30  ;;  %v4804_v31 = vld [vmem:[%s8579_s0 + $0xe0] sm:$0xff] }
 0x11a   :  { %v1921_v42 = vrot.slane %v4804_v31, 1 }
 0x11b   :  { %1572 = vmatmul.f32.gmra.mxu3 %v4801_v26  ;;  %v6382_v6 = vpop.f32.mrf.mxu0  ;;  %v1920_v26 = vrot.slane %v4803_v55, 1 }
 0x11c   :  { %v6385_v22 = vpop.f32.mrf.mxu2 }
 0x11d   :  { %8632 = vst [vmem:[#allocation33_spill] sm:$0xff] %v6385_v22 }
 0x11e   :  { %v6390_v8 = vpop.f32.mrf.mxu3  ;;  %v690_v30 = vpop.f32.mrf.mxu1  ;;  %2182 = vmatmul.f32.gmra.mxu0 %v1919_v60  ;;  %v1922_v60 = vsel %vm222_vm0, %v1920_v26, %v1921_v42 }
 0x11f   :  { %8633 = vst [vmem:[#allocation34_spill] sm:$0xff] %v6390_v8  ;;  %v926_v8 = vrot.slane %v5118_v0, 2  ;;  %v691_v24 = vadd.f32 %v690_v30, %v6046_v17  ;;  %v1923_v0 = vrot.slane %v4805_v57, 1 }
 0x121   :  { %737 = vmatmul.f32.gmra.mxu1 %v5116_v47  ;;  %1188 = vmatmul.f32.gmra.mxu2 %v925_v13  ;;  %v5045_v13 = vld [vmem:[%s8578_s1 + $0x3d0] sm:$0xff]  ;;  %v927_v30 = vsel %vm882_vm1, %v924_v15, %v926_v8  ;;  %v1924_v57 = vsel %vm222_vm0, %v1921_v42, %v1923_v0  ;;  %v5121_v0 = vld [vmem:[%s8579_s0 + $0xe8] sm:$0x3] }
 0x122   :  { %3637 = vmatpush.msra.mxu3 %v5045_v13 }
 0x123   :  { %1575 = vmatmul.f32.gmra.mxu3 %v4803_v55  ;;  %v2138_v29 = vpop.f32.mrf.mxu0 }
 0x124   :  { %v1141_v47 = vpop.f32.mrf.mxu2 }
 0x125   :  { %v1333_v22 = vadd.f32 %v1141_v47, %v691_v24  ;;  %v5119_v24 = vld [vmem:[%s8579_s0 + $0xd8] sm:$0xff]  ;;  %v5120_v47 = vld [vmem:[%s8579_s0 + $0xe0] sm:$0xff] }
 0x126   :  { %v693_v17 = vpop.f32.mrf.mxu1  ;;  %v1528_v55 = vpop.f32.mrf.mxu3  ;;  %2185 = vmatmul.f32.gmra.mxu0 %v1922_v60  ;;  %v928_v13 = vrot.slane %v5119_v24, 2  ;;  %v929_v38 = vrot.slane %v5120_v47, 2 }
 0x127   :  { %v1720_v26 = vadd.f32 %v1528_v55, %v1333_v22  ;;  %v694_v15 = vadd.f32 %v693_v17, %v6071_v43  ;;  %v4807_v22 = vld [vmem:[%s8579_s0 + $0xf8] sm:$0xff]  ;;  %v4806_v43 = vld [vmem:[%s8579_s0 + $0xf0] sm:$0xff] }
 0x128   :  { %v1926_v17 = vrot.slane %v4807_v22, 1 }
 0x129   :  { %v6414_v54 = vadd.f32 %v2138_v29, %v1720_v26  ;;  %740 = vmatmul.f32.gmra.mxu1 %v5117_v58  ;;  %1191 = vmatmul.f32.gmra.mxu2 %v927_v30  ;;  %v5061_v29 = vld [vmem:[%s8578_s1 + $0x450] sm:$0xff]  ;;  %v930_v30 = vsel %vm882_vm1, %v928_v13, %v929_v38 }
 0x12a   :  { %4151 = vmatpush.msra.mxu0 %v5061_v29 }
 0x12b   :  { %8634 = vst [vmem:[#allocation35_spill] sm:$0xff] %v6414_v54  ;;  %1578 = vmatmul.f32.gmra.mxu3 %v4804_v31  ;;  %v2141_v8 = vpop.f32.mrf.mxu0  ;;  %v1925_v31 = vrot.slane %v4806_v43, 1 }
 0x12c   :  { %v1144_v58 = vpop.f32.mrf.mxu2 }
 0x12d   :  { %v1334_v60 = vadd.f32 %v1144_v58, %v694_v15  ;;  %v931_v15 = vrot.slane %v5121_v0, 2  ;;  %v1927_v58 = vsel %vm222_vm0, %v1925_v31, %v1926_v17 }
 0x12e   :  { %v696_v32 = vpop.f32.mrf.mxu1  ;;  %v1531_v55 = vpop.f32.mrf.mxu3  ;;  %2188 = vmatmul.f32.gmra.mxu0 %v1924_v57  ;;  %v4808_v57 = vld [vmem:[%s8579_s0 + $0x100] sm:$0x3] }
 0x12f   :  { %v1721_v42 = vadd.f32 %v1531_v55, %v1334_v60  ;;  %v697_v29 = vadd.f32 %v696_v32, %v6092_v61  ;;  %v932_v55 = vsel %vm882_vm1, %v929_v38, %v931_v15  ;;  %v5122_v61 = vld [vmem:[%s8579_s0 + $0xf0] sm:$0xff] }
 0x130   :  { %v933_v32 = vrot.slane %v5122_v61, 2 }
 0x131   :  { %v6434_v26 = vadd.f32 %v2141_v8, %v1721_v42  ;;  %743 = vmatmul.f32.gmra.mxu1 %v5119_v24  ;;  %1194 = vmatmul.f32.gmra.mxu2 %v930_v30  ;;  %v1928_v42 = vrot.slane %v4808_v57, 1 }
 0x133   :  { %1581 = vmatmul.f32.gmra.mxu3 %v4806_v43  ;;  %v2144_v13 = vpop.f32.mrf.mxu0  ;;  %v1929_v15 = vsel %vm222_vm0, %v1926_v17, %v1928_v42  ;;  %v5028_v17 = vld [vmem:[%s8578_s1 + $0x348] sm:$0xff] }
 0x134   :  { %v1147_v54 = vpop.f32.mrf.mxu2  ;;  %3028 = vmatpush.msra.mxu2 %v5028_v17  ;;  %v5125_v17 = vld [vmem:[%s8579_s0 + $0x108] sm:$0xff] }
 0x135   :  { %v1335_v8 = vadd.f32 %v1147_v54, %v697_v29  ;;  %v5123_v54 = vld [vmem:[%s8579_s0 + $0xf8] sm:$0xff] }
 0x136   :  { %v699_v60 = vpop.f32.mrf.mxu1  ;;  %v1534_v24 = vpop.f32.mrf.mxu3  ;;  %2191 = vmatmul.f32.gmra.mxu0 %v1927_v58  ;;  %v934_v43 = vrot.slane %v5123_v54, 2 }
 0x137   :  { %v1722_v30 = vadd.f32 %v1534_v24, %v1335_v8  ;;  %v700_v31 = vadd.f32 %v699_v60, %v6112_v9  ;;  %v4809_v24 = vld [vmem:[%s8579_s0 + $0x108] sm:$0xff] }
 0x138   :  { %v935_v8 = vsel %vm882_vm1, %v933_v32, %v934_v43 }
 0x139   :  { %v6445_v0 = vadd.f32 %v2144_v13, %v1722_v30  ;;  %746 = vmatmul.f32.gmra.mxu1 %v5120_v47  ;;  %1197 = vmatmul.f32.gmra.mxu2 %v932_v55  ;;  %v4810_v47 = vld [vmem:[%s8579_s0 + $0x110] sm:$0xff]  ;;  %v5124_v30 = vld [vmem:[%s8579_s0 + $0x100] sm:$0x3] }
 0x13a   :  { %v1931_v60 = vrot.slane %v4810_v47, 1  ;;  %v936_v42 = vrot.slane %v5124_v30, 2  ;;  %v938_v30 = vrot.slane %v5125_v17, 2 }
 0x13b   :  { %1584 = vmatmul.f32.gmra.mxu3 %v4807_v22  ;;  %v2147_v38 = vpop.f32.mrf.mxu0  ;;  %v1930_v22 = vrot.slane %v4809_v24, 1 }
 0x13c   :  { %v1150_v29 = vpop.f32.mrf.mxu2 }
 0x13d   :  { %v1336_v13 = vadd.f32 %v1150_v29, %v700_v31  ;;  %v4811_v29 = vld [vmem:[%s8579_s0 + $0x118] sm:$0x3] }
 0x13e   :  { %v702_v58 = vpop.f32.mrf.mxu1  ;;  %v1537_v57 = vpop.f32.mrf.mxu3  ;;  %2194 = vmatmul.f32.gmra.mxu0 %v1929_v15  ;;  %v1932_v15 = vsel %vm222_vm0, %v1930_v22, %v1931_v60 }
 0x13f   :  { %v1723_v9 = vadd.f32 %v1537_v57, %v1336_v13  ;;  %v703_v32 = vadd.f32 %v702_v58, %v6133_v27  ;;  %v4916_v57 = vld [vmem:[%s8578_s1 + $0x2c8] sm:$0xff] }
 0x140   :  { %2641 = vmatpush.msra.mxu1 %v4916_v57 }
 0x141   :  { %v6462_v55 = vadd.f32 %v2147_v38, %v1723_v9  ;;  %749 = vmatmul.f32.gmra.mxu1 %v5122_v61  ;;  %1200 = vmatmul.f32.gmra.mxu2 %v935_v8  ;;  %v5044_v61 = vld [vmem:[%s8578_s1 + $0x3c8] sm:$0xff]  ;;  %v937_v8 = vsel %vm882_vm1, %v934_v43, %v936_v42  ;;  %v1933_v9 = vrot.slane %v4811_v29, 1 }
 0x142   :  { %3638 = vmatpush.msra.mxu3 %v5044_v61 }
 0x143   :  { %1587 = vmatmul.f32.gmra.mxu3 %v4809_v24  ;;  %v2150_v31 = vpop.f32.mrf.mxu0 }
 0x144   :  { %v1153_v38 = vpop.f32.mrf.mxu2 }
 0x145   :  { %v1337_v13 = vadd.f32 %v1153_v38, %v703_v32  ;;  %v5126_v32 = vld [vmem:[%s8579_s0 + $0x110] sm:$0xff]  ;;  %v4813_v38 = vld [vmem:[%s8579_s0 + $0x128] sm:$0xff] }
 0x146   :  { %v705_v27 = vpop.f32.mrf.mxu1  ;;  %v1540_v58 = vpop.f32.mrf.mxu3  ;;  %2197 = vmatmul.f32.gmra.mxu0 %v1932_v15  ;;  %v939_v61 = vrot.slane %v5126_v32, 2  ;;  %v1934_v15 = vsel %vm222_vm0, %v1931_v60, %v1933_v9 }
 0x147   :  { %v1724_v24 = vadd.f32 %v1540_v58, %v1337_v13  ;;  %v706_v43 = vadd.f32 %v705_v27, %v6159_v11  ;;  %v4812_v11 = vld [vmem:[%s8579_s0 + $0x120] sm:$0xff]  ;;  %v1936_v27 = vrot.slane %v4813_v38, 1 }
 0x148   :  { %v940_v58 = vsel %vm882_vm1, %v938_v30, %v939_v61  ;;  %v1935_v60 = vrot.slane %v4812_v11, 1 }
 0x149   :  { %v6482_v22 = vadd.f32 %v2150_v31, %v1724_v24  ;;  %752 = vmatmul.f32.gmra.mxu1 %v5123_v54  ;;  %1203 = vmatmul.f32.gmra.mxu2 %v937_v8  ;;  %v5060_v54 = vld [vmem:[%s8578_s1 + $0x448] sm:$0xff]  ;;  %v5127_v24 = vld [vmem:[%s8579_s0 + $0x118] sm:$0x3] }
 0x14a   :  { %4152 = vmatpush.msra.mxu0 %v5060_v54  ;;  %v941_v9 = vrot.slane %v5127_v24, 2  ;;  %v1937_v54 = vsel %vm222_vm0, %v1935_v60, %v1936_v27 }
 0x14b   :  { %1590 = vmatmul.f32.gmra.mxu3 %v4810_v47  ;;  %v2153_v42 = vpop.f32.mrf.mxu0 }
 0x14c   :  { %v1156_v31 = vpop.f32.mrf.mxu2 }
 0x14d   :  { %v1338_v29 = vadd.f32 %v1156_v31, %v706_v43 }
 0x14e   :  { %v708_v13 = vpop.f32.mrf.mxu1  ;;  %v1543_v57 = vpop.f32.mrf.mxu3  ;;  %2200 = vmatmul.f32.gmra.mxu0 %v1934_v15  ;;  %v4814_v15 = vld [vmem:[%s8579_s0 + $0x130] sm:$0x3] }
 0x14f   :  { %v1725_v47 = vadd.f32 %v1543_v57, %v1338_v29  ;;  %v709_v43 = vadd.f32 %v708_v13, %v6180_v5  ;;  %v942_v57 = vsel %vm882_vm1, %v939_v61, %v941_v9  ;;  %v5128_v5 = vld [vmem:[%s8579_s0 + $0x120] sm:$0xff] }
 0x150   :  { %v943_v13 = vrot.slane %v5128_v5, 2 }
 0x151   :  { %v6502_v8 = vadd.f32 %v2153_v42, %v1725_v47  ;;  %755 = vmatmul.f32.gmra.mxu1 %v5125_v17  ;;  %1206 = vmatmul.f32.gmra.mxu2 %v940_v58  ;;  %v1938_v47 = vrot.slane %v4814_v15, 1 }
 0x153   :  { %1593 = vmatmul.f32.gmra.mxu3 %v4812_v11  ;;  %v2156_v30 = vpop.f32.mrf.mxu0  ;;  %v5129_v11 = vld [vmem:[%s8579_s0 + $0x128] sm:$0xff]  ;;  %v1939_v9 = vsel %vm222_vm0, %v1936_v27, %v1938_v47  ;;  %v5027_v27 = vld [vmem:[%s8578_s1 + $0x340] sm:$0xff] }
 0x154   :  { %v1159_v31 = vpop.f32.mrf.mxu2  ;;  %v944_v60 = vrot.slane %v5129_v11, 2  ;;  %3029 = vmatpush.msra.mxu2 %v5027_v27  ;;  %v5131_v27 = vld [vmem:[%s8579_s0 + $0x138] sm:$0xff] }
 0x155   :  { %v1339_v42 = vadd.f32 %v1159_v31, %v709_v43 }
 0x156   :  { %v711_v29 = vpop.f32.mrf.mxu1  ;;  %v1546_v17 = vpop.f32.mrf.mxu3  ;;  %2203 = vmatmul.f32.gmra.mxu0 %v1937_v54 }
 0x157   :  { %v1726_v58 = vadd.f32 %v1546_v17, %v1339_v42  ;;  %v712_v43 = vadd.f32 %v711_v29, %v6200_v39  ;;  %v945_v42 = vsel %vm882_vm1, %v943_v13, %v944_v60  ;;  %v4815_v17 = vld [vmem:[%s8579_s0 + $0x138] sm:$0xff] }
 0x159   :  { %v6513_v24 = vadd.f32 %v2156_v30, %v1726_v58  ;;  %758 = vmatmul.f32.gmra.mxu1 %v5126_v32  ;;  %1209 = vmatmul.f32.gmra.mxu2 %v942_v57  ;;  %v4816_v32 = vld [vmem:[%s8579_s0 + $0x140] sm:$0xff]  ;;  %v5130_v58 = vld [vmem:[%s8579_s0 + $0x130] sm:$0x3] }
 0x15a   :  { %v1941_v29 = vrot.slane %v4816_v32, 1  ;;  %v946_v47 = vrot.slane %v5130_v58, 2  ;;  %v948_v58 = vrot.slane %v5131_v27, 2 }
 0x15b   :  { %1596 = vmatmul.f32.gmra.mxu3 %v4813_v38  ;;  %v2159_v61 = vpop.f32.mrf.mxu0  ;;  %v1940_v38 = vrot.slane %v4815_v17, 1 }
 0x15c   :  { %v1162_v30 = vpop.f32.mrf.mxu2 }
 0x15d   :  { %v1340_v54 = vadd.f32 %v1162_v30, %v712_v43  ;;  %v4817_v30 = vld [vmem:[%s8579_s0 + $0x148] sm:$0x3] }
 0x15e   :  { %v714_v31 = vpop.f32.mrf.mxu1  ;;  %v1549_v15 = vpop.f32.mrf.mxu3  ;;  %2206 = vmatmul.f32.gmra.mxu0 %v1939_v9  ;;  %v1942_v9 = vsel %vm222_vm0, %v1940_v38, %v1941_v29 }
 0x15f   :  { %v1727_v39 = vadd.f32 %v1549_v15, %v1340_v54  ;;  %v715_v13 = vadd.f32 %v714_v31, %v6221_v45  ;;  %v4915_v15 = vld [vmem:[%s8578_s1 + $0x2c0] sm:$0xff] }
 0x160   :  { %2642 = vmatpush.msra.mxu1 %v4915_v15 }
 0x161   :  { %v6530_v57 = vadd.f32 %v2159_v61, %v1727_v39  ;;  %761 = vmatmul.f32.gmra.mxu1 %v5128_v5  ;;  %1212 = vmatmul.f32.gmra.mxu2 %v945_v42  ;;  %v5043_v5 = vld [vmem:[%s8578_s1 + $0x3c0] sm:$0xff]  ;;  %v947_v42 = vsel %vm882_vm1, %v944_v60, %v946_v47  ;;  %v1943_v39 = vrot.slane %v4817_v30, 1 }
 0x162   :  { %3639 = vmatpush.msra.mxu3 %v5043_v5 }
 0x163   :  { %1599 = vmatmul.f32.gmra.mxu3 %v4815_v17  ;;  %v2162_v43 = vpop.f32.mrf.mxu0 }
 0x164   :  { %v1165_v61 = vpop.f32.mrf.mxu2 }
 0x165   :  { %v1341_v54 = vadd.f32 %v1165_v61, %v715_v13  ;;  %v5132_v13 = vld [vmem:[%s8579_s0 + $0x140] sm:$0xff]  ;;  %v4819_v61 = vld [vmem:[%s8579_s0 + $0x158] sm:$0xff] }
 0x166   :  { %v717_v45 = vpop.f32.mrf.mxu1  ;;  %v1552_v31 = vpop.f32.mrf.mxu3  ;;  %2209 = vmatmul.f32.gmra.mxu0 %v1942_v9  ;;  %v949_v5 = vrot.slane %v5132_v13, 2  ;;  %v1944_v9 = vsel %vm222_vm0, %v1941_v29, %v1943_v39 }
 0x167   :  { %v1728_v17 = vadd.f32 %v1552_v31, %v1341_v54  ;;  %v718_v60 = vadd.f32 %v717_v45, %v6247_v56  ;;  %v4818_v56 = vld [vmem:[%s8579_s0 + $0x150] sm:$0xff]  ;;  %v1946_v45 = vrot.slane %v4819_v61, 1 }
 0x168   :  { %v950_v31 = vsel %vm882_vm1, %v948_v58, %v949_v5  ;;  %v1945_v29 = vrot.slane %v4818_v56, 1 }
 0x169   :  { %v6550_v38 = vadd.f32 %v2162_v43, %v1728_v17  ;;  %764 = vmatmul.f32.gmra.mxu1 %v5129_v11  ;;  %1215 = vmatmul.f32.gmra.mxu2 %v947_v42  ;;  %v5059_v11 = vld [vmem:[%s8578_s1 + $0x440] sm:$0xff]  ;;  %v5133_v17 = vld [vmem:[%s8579_s0 + $0x148] sm:$0x3] }
 0x16a   :  { %4153 = vmatpush.msra.mxu0 %v5059_v11  ;;  %v951_v39 = vrot.slane %v5133_v17, 2  ;;  %v1947_v11 = vsel %vm222_vm0, %v1945_v29, %v1946_v45 }
 0x16b   :  { %1602 = vmatmul.f32.gmra.mxu3 %v4816_v32  ;;  %v2165_v47 = vpop.f32.mrf.mxu0 }
 0x16c   :  { %v1168_v43 = vpop.f32.mrf.mxu2 }
 0x16d   :  { %v1342_v30 = vadd.f32 %v1168_v43, %v718_v60 }
 0x16e   :  { %v720_v54 = vpop.f32.mrf.mxu1  ;;  %v1555_v15 = vpop.f32.mrf.mxu3  ;;  %2212 = vmatmul.f32.gmra.mxu0 %v1944_v9  ;;  %v4820_v9 = vld [vmem:[%s8579_s0 + $0x160] sm:$0x3] }
 0x16f   :  { %v1729_v32 = vadd.f32 %v1555_v15, %v1342_v30  ;;  %v721_v60 = vadd.f32 %v720_v54, %v6268_v46  ;;  %v952_v15 = vsel %vm882_vm1, %v949_v5, %v951_v39  ;;  %v5134_v46 = vld [vmem:[%s8579_s0 + $0x150] sm:$0xff] }
 0x170   :  { %v953_v54 = vrot.slane %v5134_v46, 2 }
 0x171   :  { %v6570_v42 = vadd.f32 %v2165_v47, %v1729_v32  ;;  %767 = vmatmul.f32.gmra.mxu1 %v5131_v27  ;;  %1218 = vmatmul.f32.gmra.mxu2 %v950_v31  ;;  %v1948_v32 = vrot.slane %v4820_v9, 1 }
 0x173   :  { %1605 = vmatmul.f32.gmra.mxu3 %v4818_v56  ;;  %v2168_v58 = vpop.f32.mrf.mxu0  ;;  %v5135_v56 = vld [vmem:[%s8579_s0 + $0x158] sm:$0xff]  ;;  %v1949_v39 = vsel %vm222_vm0, %v1946_v45, %v1948_v32 }
 0x174   :  { %v1171_v43 = vpop.f32.mrf.mxu2  ;;  %v954_v29 = vrot.slane %v5135_v56, 2  ;;  %v5026_v45 = vld [vmem:[%s8578_s1 + $0x338] sm:$0xff] }
 0x175   :  { %v1343_v47 = vadd.f32 %v1171_v43, %v721_v60  ;;  %3030 = vmatpush.msra.mxu2 %v5026_v45  ;;  %v5137_v45 = vld [vmem:[%s8579_s0 + $0x168] sm:$0xff] }
 0x176   :  { %v723_v30 = vpop.f32.mrf.mxu1  ;;  %v1558_v27 = vpop.f32.mrf.mxu3  ;;  %2215 = vmatmul.f32.gmra.mxu0 %v1947_v11 }
 0x177   :  { %v1730_v31 = vadd.f32 %v1558_v27, %v1343_v47  ;;  %v724_v60 = vadd.f32 %v723_v30, %v6288_v3  ;;  %v955_v47 = vsel %vm882_vm1, %v953_v54, %v954_v29  ;;  %v4821_v27 = vld [vmem:[%s8579_s0 + $0x168] sm:$0xff] }
 0x179   :  { %v6581_v17 = vadd.f32 %v2168_v58, %v1730_v31  ;;  %770 = vmatmul.f32.gmra.mxu1 %v5132_v13  ;;  %1221 = vmatmul.f32.gmra.mxu2 %v952_v15  ;;  %v4822_v13 = vld [vmem:[%s8579_s0 + $0x170] sm:$0xff]  ;;  %v5136_v31 = vld [vmem:[%s8579_s0 + $0x160] sm:$0x3] }
 0x17a   :  { %v1951_v30 = vrot.slane %v4822_v13, 1  ;;  %v956_v32 = vrot.slane %v5136_v31, 2  ;;  %v958_v31 = vrot.slane %v5137_v45, 2 }
 0x17b   :  { %1608 = vmatmul.f32.gmra.mxu3 %v4819_v61  ;;  %v2171_v5 = vpop.f32.mrf.mxu0  ;;  %v1950_v61 = vrot.slane %v4821_v27, 1 }
 0x17c   :  { %v1174_v58 = vpop.f32.mrf.mxu2 }
 0x17d   :  { %v1344_v11 = vadd.f32 %v1174_v58, %v724_v60  ;;  %v4823_v58 = vld [vmem:[%s8579_s0 + $0x178] sm:$0x3] }
 0x17e   :  { %v726_v43 = vpop.f32.mrf.mxu1  ;;  %v1561_v9 = vpop.f32.mrf.mxu3  ;;  %2218 = vmatmul.f32.gmra.mxu0 %v1949_v39  ;;  %v1952_v39 = vsel %vm222_vm0, %v1950_v61, %v1951_v30 }
 0x17f   :  { %v1731_v3 = vadd.f32 %v1561_v9, %v1344_v11  ;;  %v727_v54 = vadd.f32 %v726_v43, %v6309_v23  ;;  %v4914_v9 = vld [vmem:[%s8578_s1 + $0x2b8] sm:$0xff] }
 0x180   :  { %2643 = vmatpush.msra.mxu1 %v4914_v9 }
 0x181   :  { %v6598_v15 = vadd.f32 %v2171_v5, %v1731_v3  ;;  %773 = vmatmul.f32.gmra.mxu1 %v5134_v46  ;;  %1224 = vmatmul.f32.gmra.mxu2 %v955_v47  ;;  %v5042_v46 = vld [vmem:[%s8578_s1 + $0x3b8] sm:$0xff]  ;;  %v957_v47 = vsel %vm882_vm1, %v954_v29, %v956_v32  ;;  %v1953_v3 = vrot.slane %v4823_v58, 1 }
 0x182   :  { %3640 = vmatpush.msra.mxu3 %v5042_v46 }
 0x183   :  { %1611 = vmatmul.f32.gmra.mxu3 %v4821_v27  ;;  %v2174_v60 = vpop.f32.mrf.mxu0 }
 0x184   :  { %v1177_v5 = vpop.f32.mrf.mxu2 }
 0x185   :  { %v1345_v11 = vadd.f32 %v1177_v5, %v727_v54  ;;  %v5138_v54 = vld [vmem:[%s8579_s0 + $0x170] sm:$0xff]  ;;  %v4825_v5 = vld [vmem:[%s8579_s0 + $0x188] sm:$0xff] }
 0x186   :  { %v729_v23 = vpop.f32.mrf.mxu1  ;;  %v1564_v43 = vpop.f32.mrf.mxu3  ;;  %2221 = vmatmul.f32.gmra.mxu0 %v1952_v39  ;;  %v959_v46 = vrot.slane %v5138_v54, 2  ;;  %v1954_v39 = vsel %vm222_vm0, %v1951_v30, %v1953_v3 }
 0x187   :  { %v1732_v27 = vadd.f32 %v1564_v43, %v1345_v11  ;;  %v730_v29 = vadd.f32 %v729_v23, %v6335_v19  ;;  %v4824_v19 = vld [vmem:[%s8579_s0 + $0x180] sm:$0xff]  ;;  %v1956_v23 = vrot.slane %v4825_v5, 1 }
 0x188   :  { %v960_v43 = vsel %vm882_vm1, %v958_v31, %v959_v46  ;;  %v1955_v30 = vrot.slane %v4824_v19, 1 }
 0x189   :  { %v6618_v61 = vadd.f32 %v2174_v60, %v1732_v27  ;;  %776 = vmatmul.f32.gmra.mxu1 %v5135_v56  ;;  %1227 = vmatmul.f32.gmra.mxu2 %v957_v47  ;;  %v5058_v56 = vld [vmem:[%s8578_s1 + $0x438] sm:$0xff] }
 0x18a   :  { %4154 = vmatpush.msra.mxu0 %v5058_v56  ;;  %v5139_v27 = vld [vmem:[%s8579_s0 + $0x178] sm:$0x3]  ;;  %v1957_v56 = vsel %vm222_vm0, %v1955_v30, %v1956_v23 }
 0x18b   :  { %1614 = vmatmul.f32.gmra.mxu3 %v4822_v13  ;;  %v2177_v32 = vpop.f32.mrf.mxu0  ;;  %v961_v3 = vrot.slane %v5139_v27, 2 }
 0x18c   :  { %v1180_v60 = vpop.f32.mrf.mxu2 }
 0x18d   :  { %v1346_v58 = vadd.f32 %v1180_v60, %v730_v29 }
 0x18e   :  { %v732_v11 = vpop.f32.mrf.mxu1  ;;  %v1567_v9 = vpop.f32.mrf.mxu3  ;;  %2224 = vmatmul.f32.gmra.mxu0 %v1954_v39  ;;  %v4826_v39 = vld [vmem:[%s8579_s0 + $0x190] sm:$0x3] }
 0x18f   :  { %v1733_v13 = vadd.f32 %v1567_v9, %v1346_v58  ;;  %v733_v29 = vadd.f32 %v732_v11, %v6361_v12  ;;  %v962_v9 = vsel %vm882_vm1, %v959_v46, %v961_v3  ;;  %v5140_v12 = vld [vmem:[%s8579_s0 + $0x1b0] sm:$0xff] }
 0x190   :  { %v963_v11 = vrot.slane %v5140_v12, 2 }
 0x191   :  { %v6638_v47 = vadd.f32 %v2177_v32, %v1733_v13  ;;  %779 = vmatmul.f32.gmra.mxu1 %v5137_v45  ;;  %1230 = vmatmul.f32.gmra.mxu2 %v960_v43  ;;  %v1958_v13 = vrot.slane %v4826_v39, 1 }
 0x193   :  { %1617 = vmatmul.f32.gmra.mxu3 %v4824_v19  ;;  %v2180_v31 = vpop.f32.mrf.mxu0  ;;  %v5141_v19 = vld [vmem:[%s8579_s0 + $0x1b8] sm:$0xff]  ;;  %v1959_v3 = vsel %vm222_vm0, %v1956_v23, %v1958_v13  ;;  %v5025_v23 = vld [vmem:[%s8578_s1 + $0x330] sm:$0xff] }
 0x194   :  { %v1183_v60 = vpop.f32.mrf.mxu2  ;;  %v964_v30 = vrot.slane %v5141_v19, 2  ;;  %3031 = vmatpush.msra.mxu2 %v5025_v23  ;;  %v5143_v23 = vld [vmem:[%s8579_s0 + $0x1c8] sm:$0xff] }
 0x195   :  { %v1347_v32 = vadd.f32 %v1183_v60, %v733_v29 }
 0x196   :  { %v735_v58 = vpop.f32.mrf.mxu1  ;;  %v1570_v45 = vpop.f32.mrf.mxu3  ;;  %2227 = vmatmul.f32.gmra.mxu0 %v1957_v56 }
 0x197   :  { %v1734_v43 = vadd.f32 %v1570_v45, %v1347_v32  ;;  %v736_v29 = vadd.f32 %v735_v58, %v6382_v6  ;;  %v965_v32 = vsel %vm882_vm1, %v963_v11, %v964_v30  ;;  %v4827_v45 = vld [vmem:[%s8579_s0 + $0x1c8] sm:$0xff] }
 0x199   :  { %v6649_v27 = vadd.f32 %v2180_v31, %v1734_v43  ;;  %782 = vmatmul.f32.gmra.mxu1 %v5138_v54  ;;  %1233 = vmatmul.f32.gmra.mxu2 %v962_v9  ;;  %v4828_v54 = vld [vmem:[%s8579_s0 + $0x1d0] sm:$0xff]  ;;  %v5142_v43 = vld [vmem:[%s8579_s0 + $0x1c0] sm:$0x3] }
 0x19a   :  { %v1961_v58 = vrot.slane %v4828_v54, 1  ;;  %v966_v13 = vrot.slane %v5142_v43, 2  ;;  %v968_v43 = vrot.slane %v5143_v23, 2 }
 0x19b   :  { %1620 = vmatmul.f32.gmra.mxu3 %v4825_v5  ;;  %v2183_v46 = vpop.f32.mrf.mxu0  ;;  %v1960_v5 = vrot.slane %v4827_v45, 1 }
 0x19c   :  { %v1186_v31 = vpop.f32.mrf.mxu2 }
 0x19d   :  { %v1348_v56 = vadd.f32 %v1186_v31, %v736_v29  ;;  %v4829_v31 = vld [vmem:[%s8579_s0 + $0x1d8] sm:$0x3] }
 0x19e   :  { %v738_v60 = vpop.f32.mrf.mxu1  ;;  %v1573_v39 = vpop.f32.mrf.mxu3  ;;  %2230 = vmatmul.f32.gmra.mxu0 %v1959_v3  ;;  %v1962_v3 = vsel %vm222_vm0, %v1960_v5, %v1961_v58 }
 0x19f   :  { %v1735_v6 = vadd.f32 %v1573_v39, %v1348_v56  ;;  %v739_v11 = vadd.f32 %v738_v60, %v6037_v10  ;;  %v4913_v39 = vld [vmem:[%s8578_s1 + $0x2b0] sm:$0xff] }
 0x1a0   :  { %2644 = vmatpush.msra.mxu1 %v4913_v39 }
 0x1a1   :  { %v6666_v9 = vadd.f32 %v2183_v46, %v1735_v6  ;;  %785 = vmatmul.f32.gmra.mxu1 %v5140_v12  ;;  %1236 = vmatmul.f32.gmra.mxu2 %v965_v32  ;;  %v5041_v12 = vld [vmem:[%s8578_s1 + $0x3b0] sm:$0xff]  ;;  %v967_v32 = vsel %vm882_vm1, %v964_v30, %v966_v13  ;;  %v1963_v6 = vrot.slane %v4829_v31, 1 }
 0x1a2   :  { %3641 = vmatpush.msra.mxu3 %v5041_v12 }
 0x1a3   :  { %1623 = vmatmul.f32.gmra.mxu3 %v4827_v45  ;;  %v2186_v29 = vpop.f32.mrf.mxu0 }
 0x1a4   :  { %v1189_v46 = vpop.f32.mrf.mxu2 }
 0x1a5   :  { %v1349_v56 = vadd.f32 %v1189_v46, %v739_v11  ;;  %v5144_v11 = vld [vmem:[%s8579_s0 + $0x1d0] sm:$0xff]  ;;  %v4831_v46 = vld [vmem:[%s8579_s0 + $0x1e8] sm:$0xff] }
 0x1a6   :  { %v741_v10 = vpop.f32.mrf.mxu1  ;;  %v1576_v60 = vpop.f32.mrf.mxu3  ;;  %2233 = vmatmul.f32.gmra.mxu0 %v1962_v3  ;;  %v969_v12 = vrot.slane %v5144_v11, 2  ;;  %v1964_v3 = vsel %vm222_vm0, %v1961_v58, %v1963_v6 }
 0x1a7   :  { %v1736_v45 = vadd.f32 %v1576_v60, %v1349_v56  ;;  %v742_v30 = vadd.f32 %v741_v10, %v6059_v21  ;;  %v4830_v21 = vld [vmem:[%s8579_s0 + $0x1e0] sm:$0xff]  ;;  %v1966_v10 = vrot.slane %v4831_v46, 1 }
 0x1a8   :  { %v970_v60 = vsel %vm882_vm1, %v968_v43, %v969_v12  ;;  %v1965_v58 = vrot.slane %v4830_v21, 1 }
 0x1a9   :  { %v6686_v5 = vadd.f32 %v2186_v29, %v1736_v45  ;;  %788 = vmatmul.f32.gmra.mxu1 %v5141_v19  ;;  %1239 = vmatmul.f32.gmra.mxu2 %v967_v32  ;;  %v5057_v19 = vld [vmem:[%s8578_s1 + $0x430] sm:$0xff]  ;;  %v5145_v45 = vld [vmem:[%s8579_s0 + $0x1d8] sm:$0x3] }
 0x1aa   :  { %4155 = vmatpush.msra.mxu0 %v5057_v19  ;;  %v971_v6 = vrot.slane %v5145_v45, 2  ;;  %v1967_v19 = vsel %vm222_vm0, %v1965_v58, %v1966_v10 }
 0x1ab   :  { %1626 = vmatmul.f32.gmra.mxu3 %v4828_v54  ;;  %v2189_v13 = vpop.f32.mrf.mxu0 }
 0x1ac   :  { %v1192_v29 = vpop.f32.mrf.mxu2 }
 0x1ad   :  { %v1350_v31 = vadd.f32 %v1192_v29, %v742_v30 }
 0x1ae   :  { %v744_v56 = vpop.f32.mrf.mxu1  ;;  %v1579_v39 = vpop.f32.mrf.mxu3  ;;  %2236 = vmatmul.f32.gmra.mxu0 %v1964_v3  ;;  %v4832_v3 = vld [vmem:[%s8579_s0 + $0x1f0] sm:$0x3] }
 0x1af   :  { %v1737_v54 = vadd.f32 %v1579_v39, %v1350_v31  ;;  %v745_v30 = vadd.f32 %v744_v56, %v6080_v28  ;;  %v972_v39 = vsel %vm882_vm1, %v969_v12, %v971_v6  ;;  %v5146_v28 = vld [vmem:[%s8579_s0 + $0x1e0] sm:$0xff] }
 0x1b0   :  { %v973_v56 = vrot.slane %v5146_v28, 2 }
 0x1b1   :  { %v6706_v32 = vadd.f32 %v2189_v13, %v1737_v54  ;;  %791 = vmatmul.f32.gmra.mxu1 %v5143_v23  ;;  %1242 = vmatmul.f32.gmra.mxu2 %v970_v60  ;;  %v1968_v54 = vrot.slane %v4832_v3, 1 }
 0x1b3   :  { %1629 = vmatmul.f32.gmra.mxu3 %v4830_v21  ;;  %v2192_v43 = vpop.f32.mrf.mxu0  ;;  %v5147_v21 = vld [vmem:[%s8579_s0 + $0x1e8] sm:$0xff]  ;;  %v1969_v6 = vsel %vm222_vm0, %v1966_v10, %v1968_v54 }
 0x1b4   :  { %v1195_v29 = vpop.f32.mrf.mxu2  ;;  %v974_v58 = vrot.slane %v5147_v21, 2  ;;  %v5024_v10 = vld [vmem:[%s8578_s1 + $0x328] sm:$0xff] }
 0x1b5   :  { %v1351_v13 = vadd.f32 %v1195_v29, %v745_v30  ;;  %3032 = vmatpush.msra.mxu2 %v5024_v10  ;;  %v5149_v10 = vld [vmem:[%s8579_s0 + $0x1f8] sm:$0xff] }
 0x1b6   :  { %v747_v31 = vpop.f32.mrf.mxu1  ;;  %v1582_v23 = vpop.f32.mrf.mxu3  ;;  %2239 = vmatmul.f32.gmra.mxu0 %v1967_v19 }
 0x1b7   :  { %v1738_v60 = vadd.f32 %v1582_v23, %v1351_v13  ;;  %v748_v30 = vadd.f32 %v747_v31, %v6099_v4  ;;  %v975_v13 = vsel %vm882_vm1, %v973_v56, %v974_v58  ;;  %v4833_v23 = vld [vmem:[%s8579_s0 + $0x1f8] sm:$0xff] }
 0x1b9   :  { %v6717_v45 = vadd.f32 %v2192_v43, %v1738_v60  ;;  %794 = vmatmul.f32.gmra.mxu1 %v5144_v11  ;;  %1245 = vmatmul.f32.gmra.mxu2 %v972_v39  ;;  %v4834_v11 = vld [vmem:[%s8579_s0 + $0x200] sm:$0xff]  ;;  %v5148_v60 = vld [vmem:[%s8579_s0 + $0x1f0] sm:$0x3] }
 0x1ba   :  { %v1971_v31 = vrot.slane %v4834_v11, 1  ;;  %v976_v54 = vrot.slane %v5148_v60, 2  ;;  %v978_v60 = vrot.slane %v5149_v10, 2 }
 0x1bb   :  { %1632 = vmatmul.f32.gmra.mxu3 %v4831_v46  ;;  %v2195_v12 = vpop.f32.mrf.mxu0  ;;  %v1970_v46 = vrot.slane %v4833_v23, 1 }
 0x1bc   :  { %v1198_v43 = vpop.f32.mrf.mxu2 }
 0x1bd   :  { %v1352_v19 = vadd.f32 %v1198_v43, %v748_v30  ;;  %v4835_v43 = vld [vmem:[%s8579_s0 + $0x208] sm:$0x3] }
 0x1be   :  { %v750_v29 = vpop.f32.mrf.mxu1  ;;  %v1585_v3 = vpop.f32.mrf.mxu3  ;;  %2242 = vmatmul.f32.gmra.mxu0 %v1969_v6  ;;  %v1972_v6 = vsel %vm222_vm0, %v1970_v46, %v1971_v31 }
 0x1bf   :  { %v1739_v4 = vadd.f32 %v1585_v3, %v1352_v19  ;;  %v751_v56 = vadd.f32 %v750_v29, %v6118_v16  ;;  %v4912_v3 = vld [vmem:[%s8578_s1 + $0x2a8] sm:$0xff] }
 0x1c0   :  { %2645 = vmatpush.msra.mxu1 %v4912_v3 }
 0x1c1   :  { %v6734_v39 = vadd.f32 %v2195_v12, %v1739_v4  ;;  %797 = vmatmul.f32.gmra.mxu1 %v5146_v28  ;;  %1248 = vmatmul.f32.gmra.mxu2 %v975_v13  ;;  %v5040_v28 = vld [vmem:[%s8578_s1 + $0x3a8] sm:$0xff]  ;;  %v977_v13 = vsel %vm882_vm1, %v974_v58, %v976_v54  ;;  %v1973_v4 = vrot.slane %v4835_v43, 1 }
 0x1c2   :  { %3642 = vmatpush.msra.mxu3 %v5040_v28 }
 0x1c3   :  { %1635 = vmatmul.f32.gmra.mxu3 %v4833_v23  ;;  %v2198_v30 = vpop.f32.mrf.mxu0 }
 0x1c4   :  { %v1201_v12 = vpop.f32.mrf.mxu2 }
 0x1c5   :  { %v1353_v19 = vadd.f32 %v1201_v12, %v751_v56  ;;  %v5150_v56 = vld [vmem:[%s8579_s0 + $0x200] sm:$0xff]  ;;  %v4837_v12 = vld [vmem:[%s8579_s0 + $0x218] sm:$0xff] }
 0x1c6   :  { %v753_v16 = vpop.f32.mrf.mxu1  ;;  %v1588_v29 = vpop.f32.mrf.mxu3  ;;  %2245 = vmatmul.f32.gmra.mxu0 %v1972_v6  ;;  %v979_v28 = vrot.slane %v5150_v56, 2  ;;  %v1974_v6 = vsel %vm222_vm0, %v1971_v31, %v1973_v4 }
 0x1c7   :  { %v1740_v23 = vadd.f32 %v1588_v29, %v1353_v19  ;;  %v754_v58 = vadd.f32 %v753_v16, %v6146_v37  ;;  %v4836_v37 = vld [vmem:[%s8579_s0 + $0x210] sm:$0xff]  ;;  %v1976_v16 = vrot.slane %v4837_v12, 1 }
 0x1c8   :  { %v980_v29 = vsel %vm882_vm1, %v978_v60, %v979_v28  ;;  %v1975_v31 = vrot.slane %v4836_v37, 1 }
 0x1c9   :  { %v6754_v46 = vadd.f32 %v2198_v30, %v1740_v23  ;;  %800 = vmatmul.f32.gmra.mxu1 %v5147_v21  ;;  %1251 = vmatmul.f32.gmra.mxu2 %v977_v13  ;;  %v5056_v21 = vld [vmem:[%s8578_s1 + $0x428] sm:$0xff] }
 0x1ca   :  { %4156 = vmatpush.msra.mxu0 %v5056_v21  ;;  %v5151_v23 = vld [vmem:[%s8579_s0 + $0x208] sm:$0x3]  ;;  %v1977_v21 = vsel %vm222_vm0, %v1975_v31, %v1976_v16 }
 0x1cb   :  { %1638 = vmatmul.f32.gmra.mxu3 %v4834_v11  ;;  %v2201_v54 = vpop.f32.mrf.mxu0  ;;  %v981_v4 = vrot.slane %v5151_v23, 2 }
 0x1cc   :  { %v1204_v30 = vpop.f32.mrf.mxu2 }
 0x1cd   :  { %v1354_v43 = vadd.f32 %v1204_v30, %v754_v58 }
 0x1ce   :  { %v756_v19 = vpop.f32.mrf.mxu1  ;;  %v1591_v3 = vpop.f32.mrf.mxu3  ;;  %2248 = vmatmul.f32.gmra.mxu0 %v1974_v6  ;;  %v4838_v6 = vld [vmem:[%s8579_s0 + $0x220] sm:$0x3] }
 0x1cf   :  { %v1741_v11 = vadd.f32 %v1591_v3, %v1354_v43  ;;  %v757_v58 = vadd.f32 %v756_v19, %v6168_v63  ;;  %v982_v3 = vsel %vm882_vm1, %v979_v28, %v981_v4  ;;  %v5152_v63 = vld [vmem:[%s8579_s0 + $0x210] sm:$0xff] }
 0x1d0   :  { %v983_v19 = vrot.slane %v5152_v63, 2 }
 0x1d1   :  { %v6774_v13 = vadd.f32 %v2201_v54, %v1741_v11  ;;  %803 = vmatmul.f32.gmra.mxu1 %v5149_v10  ;;  %1254 = vmatmul.f32.gmra.mxu2 %v980_v29  ;;  %v1978_v11 = vrot.slane %v4838_v6, 1 }
 0x1d3   :  { %1641 = vmatmul.f32.gmra.mxu3 %v4836_v37  ;;  %v2204_v60 = vpop.f32.mrf.mxu0  ;;  %v5153_v37 = vld [vmem:[%s8579_s0 + $0x218] sm:$0xff]  ;;  %v1979_v4 = vsel %vm222_vm0, %v1976_v16, %v1978_v11  ;;  %v5023_v16 = vld [vmem:[%s8578_s1 + $0x320] sm:$0xff] }
 0x1d4   :  { %v1207_v30 = vpop.f32.mrf.mxu2  ;;  %v984_v31 = vrot.slane %v5153_v37, 2  ;;  %3033 = vmatpush.msra.mxu2 %v5023_v16  ;;  %v5155_v16 = vld [vmem:[%s8579_s0 + $0x228] sm:$0xff] }
 0x1d5   :  { %v1355_v54 = vadd.f32 %v1207_v30, %v757_v58 }
 0x1d6   :  { %v759_v43 = vpop.f32.mrf.mxu1  ;;  %v1594_v10 = vpop.f32.mrf.mxu3  ;;  %2251 = vmatmul.f32.gmra.mxu0 %v1977_v21 }
 0x1d7   :  { %v1742_v29 = vadd.f32 %v1594_v10, %v1355_v54  ;;  %v760_v58 = vadd.f32 %v759_v43, %v6187_v18  ;;  %v985_v54 = vsel %vm882_vm1, %v983_v19, %v984_v31  ;;  %v4839_v10 = vld [vmem:[%s8579_s0 + $0x228] sm:$0xff] }
 0x1d9   :  { %v6785_v23 = vadd.f32 %v2204_v60, %v1742_v29  ;;  %806 = vmatmul.f32.gmra.mxu1 %v5150_v56  ;;  %1257 = vmatmul.f32.gmra.mxu2 %v982_v3  ;;  %v4840_v56 = vld [vmem:[%s8579_s0 + $0x230] sm:$0xff]  ;;  %v5154_v29 = vld [vmem:[%s8579_s0 + $0x220] sm:$0x3] }
 0x1da   :  { %v1981_v43 = vrot.slane %v4840_v56, 1  ;;  %v986_v11 = vrot.slane %v5154_v29, 2  ;;  %v988_v29 = vrot.slane %v5155_v16, 2 }
 0x1db   :  { %1644 = vmatmul.f32.gmra.mxu3 %v4837_v12  ;;  %v2207_v28 = vpop.f32.mrf.mxu0  ;;  %v1980_v12 = vrot.slane %v4839_v10, 1 }
 0x1dc   :  { %v1210_v60 = vpop.f32.mrf.mxu2 }
 0x1dd   :  { %v1356_v21 = vadd.f32 %v1210_v60, %v760_v58  ;;  %v4841_v60 = vld [vmem:[%s8579_s0 + $0x238] sm:$0x3] }
 0x1de   :  { %v762_v30 = vpop.f32.mrf.mxu1  ;;  %v1597_v6 = vpop.f32.mrf.mxu3  ;;  %2254 = vmatmul.f32.gmra.mxu0 %v1979_v4  ;;  %v1982_v4 = vsel %vm222_vm0, %v1980_v12, %v1981_v43 }
 0x1df   :  { %v1743_v18 = vadd.f32 %v1597_v6, %v1356_v21  ;;  %v763_v19 = vadd.f32 %v762_v30, %v6206_v53  ;;  %v4911_v6 = vld [vmem:[%s8578_s1 + $0x2a0] sm:$0xff] }
 0x1e0   :  { %2646 = vmatpush.msra.mxu1 %v4911_v6 }
 0x1e1   :  { %v6802_v3 = vadd.f32 %v2207_v28, %v1743_v18  ;;  %809 = vmatmul.f32.gmra.mxu1 %v5152_v63  ;;  %1260 = vmatmul.f32.gmra.mxu2 %v985_v54  ;;  %v5039_v63 = vld [vmem:[%s8578_s1 + $0x3a0] sm:$0xff]  ;;  %v987_v54 = vsel %vm882_vm1, %v984_v31, %v986_v11  ;;  %v1983_v18 = vrot.slane %v4841_v60, 1 }
 0x1e2   :  { %3643 = vmatpush.msra.mxu3 %v5039_v63 }
 0x1e3   :  { %1647 = vmatmul.f32.gmra.mxu3 %v4839_v10  ;;  %v2210_v58 = vpop.f32.mrf.mxu0 }
 0x1e4   :  { %v1213_v28 = vpop.f32.mrf.mxu2 }
 0x1e5   :  { %v1357_v21 = vadd.f32 %v1213_v28, %v763_v19  ;;  %v5156_v19 = vld [vmem:[%s8579_s0 + $0x230] sm:$0xff]  ;;  %v4843_v28 = vld [vmem:[%s8579_s0 + $0x248] sm:$0xff] }
 0x1e6   :  { %v765_v53 = vpop.f32.mrf.mxu1  ;;  %v1600_v30 = vpop.f32.mrf.mxu3  ;;  %2257 = vmatmul.f32.gmra.mxu0 %v1982_v4  ;;  %v989_v63 = vrot.slane %v5156_v19, 2  ;;  %v1984_v4 = vsel %vm222_vm0, %v1981_v43, %v1983_v18 }
 0x1e7   :  { %v1744_v10 = vadd.f32 %v1600_v30, %v1357_v21  ;;  %v766_v31 = vadd.f32 %v765_v53, %v6234_v59  ;;  %v4842_v59 = vld [vmem:[%s8579_s0 + $0x240] sm:$0xff]  ;;  %v1986_v53 = vrot.slane %v4843_v28, 1 }
 0x1e8   :  { %v990_v30 = vsel %vm882_vm1, %v988_v29, %v989_v63  ;;  %v1985_v43 = vrot.slane %v4842_v59, 1 }
 0x1e9   :  { %v6822_v12 = vadd.f32 %v2210_v58, %v1744_v10  ;;  %812 = vmatmul.f32.gmra.mxu1 %v5153_v37  ;;  %1263 = vmatmul.f32.gmra.mxu2 %v987_v54  ;;  %v5055_v37 = vld [vmem:[%s8578_s1 + $0x420] sm:$0xff]  ;;  %v5157_v10 = vld [vmem:[%s8579_s0 + $0x238] sm:$0x3] }
 0x1ea   :  { %4157 = vmatpush.msra.mxu0 %v5055_v37  ;;  %v991_v18 = vrot.slane %v5157_v10, 2  ;;  %v1987_v37 = vsel %vm222_vm0, %v1985_v43, %v1986_v53 }
 0x1eb   :  { %1650 = vmatmul.f32.gmra.mxu3 %v4840_v56  ;;  %v2213_v11 = vpop.f32.mrf.mxu0 }
 0x1ec   :  { %v1216_v58 = vpop.f32.mrf.mxu2 }
 0x1ed   :  { %v1358_v60 = vadd.f32 %v1216_v58, %v766_v31 }
 0x1ee   :  { %v768_v21 = vpop.f32.mrf.mxu1  ;;  %v1603_v6 = vpop.f32.mrf.mxu3  ;;  %2260 = vmatmul.f32.gmra.mxu0 %v1984_v4  ;;  %v4844_v4 = vld [vmem:[%s8579_s0 + $0x250] sm:$0x3] }
 0x1ef   :  { %v1745_v56 = vadd.f32 %v1603_v6, %v1358_v60  ;;  %v769_v31 = vadd.f32 %v768_v21, %v6256_v33  ;;  %v992_v6 = vsel %vm882_vm1, %v989_v63, %v991_v18  ;;  %v5158_v33 = vld [vmem:[%s8579_s0 + $0x240] sm:$0xff] }
 0x1f0   :  { %v993_v21 = vrot.slane %v5158_v33, 2 }
 0x1f1   :  { %v6842_v54 = vadd.f32 %v2213_v11, %v1745_v56  ;;  %815 = vmatmul.f32.gmra.mxu1 %v5155_v16  ;;  %1266 = vmatmul.f32.gmra.mxu2 %v990_v30  ;;  %v1988_v56 = vrot.slane %v4844_v4, 1 }
 0x1f3   :  { %1653 = vmatmul.f32.gmra.mxu3 %v4842_v59  ;;  %v2216_v29 = vpop.f32.mrf.mxu0  ;;  %v5159_v59 = vld [vmem:[%s8579_s0 + $0x248] sm:$0xff]  ;;  %v1989_v18 = vsel %vm222_vm0, %v1986_v53, %v1988_v56  ;;  %v5022_v53 = vld [vmem:[%s8578_s1 + $0x318] sm:$0xff] }
 0x1f4   :  { %v1219_v58 = vpop.f32.mrf.mxu2  ;;  %v994_v43 = vrot.slane %v5159_v59, 2  ;;  %3034 = vmatpush.msra.mxu2 %v5022_v53  ;;  %v5161_v53 = vld [vmem:[%s8579_s0 + $0x258] sm:$0xff] }
 0x1f5   :  { %v1359_v11 = vadd.f32 %v1219_v58, %v769_v31 }
 0x1f6   :  { %v771_v60 = vpop.f32.mrf.mxu1  ;;  %v1606_v16 = vpop.f32.mrf.mxu3  ;;  %2263 = vmatmul.f32.gmra.mxu0 %v1987_v37 }
 0x1f7   :  { %v1746_v30 = vadd.f32 %v1606_v16, %v1359_v11  ;;  %v772_v31 = vadd.f32 %v771_v60, %v6275_v25  ;;  %v995_v11 = vsel %vm882_vm1, %v993_v21, %v994_v43  ;;  %v4845_v16 = vld [vmem:[%s8579_s0 + $0x258] sm:$0xff] }
 0x1f9   :  { %v6853_v10 = vadd.f32 %v2216_v29, %v1746_v30  ;;  %818 = vmatmul.f32.gmra.mxu1 %v5156_v19  ;;  %1269 = vmatmul.f32.gmra.mxu2 %v992_v6  ;;  %v4846_v19 = vld [vmem:[%s8579_s0 + $0x260] sm:$0xff]  ;;  %v5160_v30 = vld [vmem:[%s8579_s0 + $0x250] sm:$0x3] }
 0x1fa   :  { %v1991_v60 = vrot.slane %v4846_v19, 1  ;;  %v996_v56 = vrot.slane %v5160_v30, 2  ;;  %v998_v30 = vrot.slane %v5161_v53, 2 }
 0x1fb   :  { %1656 = vmatmul.f32.gmra.mxu3 %v4843_v28  ;;  %v2219_v63 = vpop.f32.mrf.mxu0  ;;  %v1990_v28 = vrot.slane %v4845_v16, 1 }
 0x1fc   :  { %v1222_v29 = vpop.f32.mrf.mxu2 }
 0x1fd   :  { %v1360_v37 = vadd.f32 %v1222_v29, %v772_v31  ;;  %v4847_v29 = vld [vmem:[%s8579_s0 + $0x268] sm:$0x3] }
 0x1fe   :  { %v774_v58 = vpop.f32.mrf.mxu1  ;;  %v1609_v4 = vpop.f32.mrf.mxu3  ;;  %2266 = vmatmul.f32.gmra.mxu0 %v1989_v18  ;;  %v1992_v18 = vsel %vm222_vm0, %v1990_v28, %v1991_v60 }
 0x1ff   :  { %v1747_v25 = vadd.f32 %v1609_v4, %v1360_v37  ;;  %v775_v21 = vadd.f32 %v774_v58, %v6294_v36  ;;  %v4910_v4 = vld [vmem:[%s8578_s1 + $0x298] sm:$0xff] }
 0x200   :  { %2647 = vmatpush.msra.mxu1 %v4910_v4 }
 0x201   :  { %v6870_v6 = vadd.f32 %v2219_v63, %v1747_v25  ;;  %821 = vmatmul.f32.gmra.mxu1 %v5158_v33  ;;  %1272 = vmatmul.f32.gmra.mxu2 %v995_v11  ;;  %v5038_v33 = vld [vmem:[%s8578_s1 + $0x398] sm:$0xff]  ;;  %v997_v11 = vsel %vm882_vm1, %v994_v43, %v996_v56  ;;  %v1993_v25 = vrot.slane %v4847_v29, 1 }
 0x202   :  { %3644 = vmatpush.msra.mxu3 %v5038_v33 }
 0x203   :  { %1659 = vmatmul.f32.gmra.mxu3 %v4845_v16  ;;  %v2222_v31 = vpop.f32.mrf.mxu0 }
 0x204   :  { %v1225_v63 = vpop.f32.mrf.mxu2 }
 0x205   :  { %v1361_v37 = vadd.f32 %v1225_v63, %v775_v21  ;;  %v5162_v21 = vld [vmem:[%s8579_s0 + $0x260] sm:$0xff]  ;;  %v4849_v63 = vld [vmem:[%s8579_s0 + $0x278] sm:$0xff] }
 0x206   :  { %v777_v36 = vpop.f32.mrf.mxu1  ;;  %v1612_v58 = vpop.f32.mrf.mxu3  ;;  %2269 = vmatmul.f32.gmra.mxu0 %v1992_v18  ;;  %v999_v33 = vrot.slane %v5162_v21, 2  ;;  %v1994_v18 = vsel %vm222_vm0, %v1991_v60, %v1993_v25 }
 0x207   :  { %v1748_v16 = vadd.f32 %v1612_v58, %v1361_v37  ;;  %v778_v43 = vadd.f32 %v777_v36, %v6322_v62  ;;  %v4848_v62 = vld [vmem:[%s8579_s0 + $0x270] sm:$0xff]  ;;  %v1996_v36 = vrot.slane %v4849_v63, 1 }
 0x208   :  { %v1000_v58 = vsel %vm882_vm1, %v998_v30, %v999_v33  ;;  %v1995_v60 = vrot.slane %v4848_v62, 1 }
 0x209   :  { %v6890_v28 = vadd.f32 %v2222_v31, %v1748_v16  ;;  %824 = vmatmul.f32.gmra.mxu1 %v5159_v59  ;;  %1275 = vmatmul.f32.gmra.mxu2 %v997_v11  ;;  %v5054_v59 = vld [vmem:[%s8578_s1 + $0x418] sm:$0xff]  ;;  %v5163_v16 = vld [vmem:[%s8579_s0 + $0x268] sm:$0x3] }
 0x20a   :  { %4158 = vmatpush.msra.mxu0 %v5054_v59  ;;  %v1001_v25 = vrot.slane %v5163_v16, 2  ;;  %v1997_v59 = vsel %vm222_vm0, %v1995_v60, %v1996_v36 }
 0x20b   :  { %1662 = vmatmul.f32.gmra.mxu3 %v4846_v19  ;;  %v2225_v56 = vpop.f32.mrf.mxu0 }
 0x20c   :  { %v1228_v31 = vpop.f32.mrf.mxu2 }
 0x20d   :  { %v1362_v29 = vadd.f32 %v1228_v31, %v778_v43 }
 0x20e   :  { %v780_v37 = vpop.f32.mrf.mxu1  ;;  %v1615_v4 = vpop.f32.mrf.mxu3  ;;  %2272 = vmatmul.f32.gmra.mxu0 %v1994_v18  ;;  %v4850_v18 = vld [vmem:[%s8579_s0 + $0x280] sm:$0x3] }
 0x20f   :  { %v1749_v19 = vadd.f32 %v1615_v4, %v1362_v29  ;;  %v781_v43 = vadd.f32 %v780_v37, %v6347_v51  ;;  %v1002_v4 = vsel %vm882_vm1, %v999_v33, %v1001_v25  ;;  %v5164_v51 = vld [vmem:[%s8579_s0 + $0x270] sm:$0xff] }
 0x210   :  { %v1003_v37 = vrot.slane %v5164_v51, 2 }
 0x211   :  { %v6910_v11 = vadd.f32 %v2225_v56, %v1749_v19  ;;  %827 = vmatmul.f32.gmra.mxu1 %v5161_v53  ;;  %1278 = vmatmul.f32.gmra.mxu2 %v1000_v58  ;;  %v1998_v19 = vrot.slane %v4850_v18, 1 }
 0x213   :  { %1665 = vmatmul.f32.gmra.mxu3 %v4848_v62  ;;  %v2228_v30 = vpop.f32.mrf.mxu0  ;;  %v5165_v62 = vld [vmem:[%s8579_s0 + $0x278] sm:$0xff]  ;;  %v1999_v25 = vsel %vm222_vm0, %v1996_v36, %v1998_v19  ;;  %v5021_v36 = vld [vmem:[%s8578_s1 + $0x310] sm:$0xff] }
 0x214   :  { %v1231_v31 = vpop.f32.mrf.mxu2  ;;  %v1004_v60 = vrot.slane %v5165_v62, 2  ;;  %3035 = vmatpush.msra.mxu2 %v5021_v36  ;;  %v5167_v36 = vld [vmem:[%s8579_s0 + $0x288] sm:$0xff] }
 0x215   :  { %v1363_v56 = vadd.f32 %v1231_v31, %v781_v43 }
 0x216   :  { %v783_v29 = vpop.f32.mrf.mxu1  ;;  %v1618_v53 = vpop.f32.mrf.mxu3  ;;  %2275 = vmatmul.f32.gmra.mxu0 %v1997_v59 }
 0x217   :  { %v1750_v58 = vadd.f32 %v1618_v53, %v1363_v56  ;;  %v784_v43 = vadd.f32 %v783_v29, %v6369_v49  ;;  %v1005_v56 = vsel %vm882_vm1, %v1003_v37, %v1004_v60  ;;  %v4851_v53 = vld [vmem:[%s8579_s0 + $0x288] sm:$0xff] }
 0x219   :  { %v6921_v16 = vadd.f32 %v2228_v30, %v1750_v58  ;;  %830 = vmatmul.f32.gmra.mxu1 %v5162_v21  ;;  %1281 = vmatmul.f32.gmra.mxu2 %v1002_v4  ;;  %v4852_v21 = vld [vmem:[%s8579_s0 + $0x290] sm:$0xff]  ;;  %v5166_v58 = vld [vmem:[%s8579_s0 + $0x280] sm:$0x3] }
 0x21a   :  { %v2001_v29 = vrot.slane %v4852_v21, 1  ;;  %v1006_v19 = vrot.slane %v5166_v58, 2  ;;  %v1008_v58 = vrot.slane %v5167_v36, 2 }
 0x21b   :  { %1668 = vmatmul.f32.gmra.mxu3 %v4849_v63  ;;  %v2231_v33 = vpop.f32.mrf.mxu0  ;;  %v2000_v63 = vrot.slane %v4851_v53, 1 }
 0x21c   :  { %v1234_v30 = vpop.f32.mrf.mxu2 }
 0x21d   :  { %v1364_v59 = vadd.f32 %v1234_v30, %v784_v43  ;;  %v4853_v30 = vld [vmem:[%s8579_s0 + $0x298] sm:$0x3] }
 0x21e   :  { %v786_v31 = vpop.f32.mrf.mxu1  ;;  %v1621_v18 = vpop.f32.mrf.mxu3  ;;  %2278 = vmatmul.f32.gmra.mxu0 %v1999_v25  ;;  %v2002_v25 = vsel %vm222_vm0, %v2000_v63, %v2001_v29 }
 0x21f   :  { %v1751_v49 = vadd.f32 %v1621_v18, %v1364_v59  ;;  %v787_v37 = vadd.f32 %v786_v31, %v6051_v20  ;;  %v4909_v18 = vld [vmem:[%s8578_s1 + $0x290] sm:$0xff] }
 0x220   :  { %2648 = vmatpush.msra.mxu1 %v4909_v18 }
 0x221   :  { %v6938_v4 = vadd.f32 %v2231_v33, %v1751_v49  ;;  %833 = vmatmul.f32.gmra.mxu1 %v5164_v51  ;;  %1284 = vmatmul.f32.gmra.mxu2 %v1005_v56  ;;  %v5037_v51 = vld [vmem:[%s8578_s1 + $0x390] sm:$0xff]  ;;  %v1007_v56 = vsel %vm882_vm1, %v1004_v60, %v1006_v19  ;;  %v2003_v49 = vrot.slane %v4853_v30, 1 }
 0x222   :  { %3645 = vmatpush.msra.mxu3 %v5037_v51 }
 0x223   :  { %1671 = vmatmul.f32.gmra.mxu3 %v4851_v53  ;;  %v2234_v43 = vpop.f32.mrf.mxu0 }
 0x224   :  { %v1237_v33 = vpop.f32.mrf.mxu2 }
 0x225   :  { %v1365_v59 = vadd.f32 %v1237_v33, %v787_v37  ;;  %v5168_v37 = vld [vmem:[%s8579_s0 + $0x290] sm:$0xff]  ;;  %v4855_v33 = vld [vmem:[%s8579_s0 + $0x2a8] sm:$0xff] }
 0x226   :  { %v789_v20 = vpop.f32.mrf.mxu1  ;;  %v1624_v31 = vpop.f32.mrf.mxu3  ;;  %2281 = vmatmul.f32.gmra.mxu0 %v2002_v25  ;;  %v1009_v51 = vrot.slane %v5168_v37, 2  ;;  %v2004_v25 = vsel %vm222_vm0, %v2001_v29, %v2003_v49 }
 0x227   :  { %v1752_v53 = vadd.f32 %v1624_v31, %v1365_v59  ;;  %v790_v60 = vadd.f32 %v789_v20, %v6078_v52  ;;  %v4854_v52 = vld [vmem:[%s8579_s0 + $0x2a0] sm:$0xff]  ;;  %v2006_v20 = vrot.slane %v4855_v33, 1 }
 0x228   :  { %v1010_v31 = vsel %vm882_vm1, %v1008_v58, %v1009_v51  ;;  %v2005_v29 = vrot.slane %v4854_v52, 1 }
 0x229   :  { %v6958_v63 = vadd.f32 %v2234_v43, %v1752_v53  ;;  %836 = vmatmul.f32.gmra.mxu1 %v5165_v62  ;;  %1287 = vmatmul.f32.gmra.mxu2 %v1007_v56  ;;  %v5053_v62 = vld [vmem:[%s8578_s1 + $0x410] sm:$0xff]  ;;  %v5169_v53 = vld [vmem:[%s8579_s0 + $0x298] sm:$0x3] }
 0x22a   :  { %4159 = vmatpush.msra.mxu0 %v5053_v62  ;;  %v1011_v49 = vrot.slane %v5169_v53, 2  ;;  %v2007_v62 = vsel %vm222_vm0, %v2005_v29, %v2006_v20 }
 0x22b   :  { %1674 = vmatmul.f32.gmra.mxu3 %v4852_v21  ;;  %v2237_v19 = vpop.f32.mrf.mxu0 }
 0x22c   :  { %v1240_v43 = vpop.f32.mrf.mxu2 }
 0x22d   :  { %v1366_v30 = vadd.f32 %v1240_v43, %v790_v60 }
 0x22e   :  { %v792_v59 = vpop.f32.mrf.mxu1  ;;  %v1627_v18 = vpop.f32.mrf.mxu3  ;;  %2284 = vmatmul.f32.gmra.mxu0 %v2004_v25  ;;  %v4856_v25 = vld [vmem:[%s8579_s0 + $0x2b0] sm:$0x3] }
 0x22f   :  { %v1753_v21 = vadd.f32 %v1627_v18, %v1366_v30  ;;  %v793_v60 = vadd.f32 %v792_v59, %v6094_v1  ;;  %v1012_v18 = vsel %vm882_vm1, %v1009_v51, %v1011_v49  ;;  %v5170_v1 = vld [vmem:[%s8579_s0 + $0x2a0] sm:$0xff] }
 0x230   :  { %v1013_v59 = vrot.slane %v5170_v1, 2 }
 0x231   :  { %v6978_v56 = vadd.f32 %v2237_v19, %v1753_v21  ;;  %839 = vmatmul.f32.gmra.mxu1 %v5167_v36  ;;  %1290 = vmatmul.f32.gmra.mxu2 %v1010_v31  ;;  %v2008_v21 = vrot.slane %v4856_v25, 1 }
 0x233   :  { %1677 = vmatmul.f32.gmra.mxu3 %v4854_v52  ;;  %v2240_v58 = vpop.f32.mrf.mxu0  ;;  %v5171_v52 = vld [vmem:[%s8579_s0 + $0x2a8] sm:$0xff]  ;;  %v2009_v49 = vsel %vm222_vm0, %v2006_v20, %v2008_v21 }
 0x234   :  { %v1243_v43 = vpop.f32.mrf.mxu2  ;;  %v1014_v29 = vrot.slane %v5171_v52, 2  ;;  %v5020_v20 = vld [vmem:[%s8578_s1 + $0x308] sm:$0xff] }
 0x235   :  { %v1367_v19 = vadd.f32 %v1243_v43, %v793_v60  ;;  %3036 = vmatpush.msra.mxu2 %v5020_v20  ;;  %v5173_v20 = vld [vmem:[%s8579_s0 + $0x2b8] sm:$0xff] }
 0x236   :  { %v795_v30 = vpop.f32.mrf.mxu1  ;;  %v1630_v36 = vpop.f32.mrf.mxu3  ;;  %2287 = vmatmul.f32.gmra.mxu0 %v2007_v62 }
 0x237   :  { %v1754_v31 = vadd.f32 %v1630_v36, %v1367_v19  ;;  %v796_v60 = vadd.f32 %v795_v30, %v6116_v14  ;;  %v1015_v19 = vsel %vm882_vm1, %v1013_v59, %v1014_v29  ;;  %v4857_v36 = vld [vmem:[%s8579_s0 + $0x2b8] sm:$0xff] }
 0x239   :  { %v6989_v53 = vadd.f32 %v2240_v58, %v1754_v31  ;;  %842 = vmatmul.f32.gmra.mxu1 %v5168_v37  ;;  %1293 = vmatmul.f32.gmra.mxu2 %v1012_v18  ;;  %v4858_v37 = vld [vmem:[%s8579_s0 + $0x2c0] sm:$0xff]  ;;  %v5172_v31 = vld [vmem:[%s8579_s0 + $0x2b0] sm:$0x3] }
 0x23a   :  { %v2011_v30 = vrot.slane %v4858_v37, 1  ;;  %v1016_v21 = vrot.slane %v5172_v31, 2  ;;  %v1018_v31 = vrot.slane %v5173_v20, 2 }
 0x23b   :  { %1680 = vmatmul.f32.gmra.mxu3 %v4855_v33  ;;  %v2243_v51 = vpop.f32.mrf.mxu0  ;;  %v2010_v33 = vrot.slane %v4857_v36, 1 }
 0x23c   :  { %v1246_v58 = vpop.f32.mrf.mxu2 }
 0x23d   :  { %v1368_v62 = vadd.f32 %v1246_v58, %v796_v60  ;;  %v4859_v58 = vld [vmem:[%s8579_s0 + $0x2c8] sm:$0x3] }
 0x23e   :  { %v798_v43 = vpop.f32.mrf.mxu1  ;;  %v1633_v25 = vpop.f32.mrf.mxu3  ;;  %2290 = vmatmul.f32.gmra.mxu0 %v2009_v49  ;;  %v2012_v49 = vsel %vm222_vm0, %v2010_v33, %v2011_v30 }
 0x23f   :  { %v1755_v14 = vadd.f32 %v1633_v25, %v1368_v62  ;;  %v799_v59 = vadd.f32 %v798_v43, %v6138_v35  ;;  %v4908_v25 = vld [vmem:[%s8578_s1 + $0x288] sm:$0xff] }
 0x240   :  { %2649 = vmatpush.msra.mxu1 %v4908_v25 }
 0x241   :  { %v7006_v18 = vadd.f32 %v2243_v51, %v1755_v14  ;;  %845 = vmatmul.f32.gmra.mxu1 %v5170_v1  ;;  %1296 = vmatmul.f32.gmra.mxu2 %v1015_v19  ;;  %v5036_v1 = vld [vmem:[%s8578_s1 + $0x388] sm:$0xff]  ;;  %v1017_v19 = vsel %vm882_vm1, %v1014_v29, %v1016_v21  ;;  %v2013_v14 = vrot.slane %v4859_v58, 1 }
 0x242   :  { %3646 = vmatpush.msra.mxu3 %v5036_v1 }
 0x243   :  { %1683 = vmatmul.f32.gmra.mxu3 %v4857_v36  ;;  %v2246_v60 = vpop.f32.mrf.mxu0 }
 0x244   :  { %v1249_v51 = vpop.f32.mrf.mxu2 }
 0x245   :  { %v1369_v62 = vadd.f32 %v1249_v51, %v799_v59  ;;  %v5174_v59 = vld [vmem:[%s8579_s0 + $0x2c0] sm:$0xff]  ;;  %v4861_v51 = vld [vmem:[%s8579_s0 + $0x2d8] sm:$0xff] }
 0x246   :  { %v801_v35 = vpop.f32.mrf.mxu1  ;;  %v1636_v43 = vpop.f32.mrf.mxu3  ;;  %2293 = vmatmul.f32.gmra.mxu0 %v2012_v49  ;;  %v1019_v1 = vrot.slane %v5174_v59, 2  ;;  %v2014_v49 = vsel %vm222_vm0, %v2011_v30, %v2013_v14 }
 0x247   :  { %v1756_v36 = vadd.f32 %v1636_v43, %v1369_v62  ;;  %v802_v29 = vadd.f32 %v801_v35, %v6166_v7  ;;  %v4860_v7 = vld [vmem:[%s8579_s0 + $0x2d0] sm:$0xff]  ;;  %v2016_v35 = vrot.slane %v4861_v51, 1 }
 0x248   :  { %v1020_v43 = vsel %vm882_vm1, %v1018_v31, %v1019_v1  ;;  %v2015_v30 = vrot.slane %v4860_v7, 1 }
 0x249   :  { %v7026_v33 = vadd.f32 %v2246_v60, %v1756_v36  ;;  %848 = vmatmul.f32.gmra.mxu1 %v5171_v52  ;;  %1299 = vmatmul.f32.gmra.mxu2 %v1017_v19  ;;  %v5052_v52 = vld [vmem:[%s8578_s1 + $0x408] sm:$0xff] }
 0x24a   :  { %4160 = vmatpush.msra.mxu0 %v5052_v52  ;;  %v5175_v36 = vld [vmem:[%s8579_s0 + $0x2c8] sm:$0x3]  ;;  %v2017_v52 = vsel %vm222_vm0, %v2015_v30, %v2016_v35 }
 0x24b   :  { %1686 = vmatmul.f32.gmra.mxu3 %v4858_v37  ;;  %v2249_v21 = vpop.f32.mrf.mxu0  ;;  %v1021_v14 = vrot.slane %v5175_v36, 2 }
 0x24c   :  { %v1252_v60 = vpop.f32.mrf.mxu2 }
 0x24d   :  { %v1370_v58 = vadd.f32 %v1252_v60, %v802_v29 }
 0x24e   :  { %v804_v62 = vpop.f32.mrf.mxu1  ;;  %v1639_v25 = vpop.f32.mrf.mxu3  ;;  %2296 = vmatmul.f32.gmra.mxu0 %v2014_v49  ;;  %v4862_v49 = vld [vmem:[%s8579_s0 + $0x2e0] sm:$0x3] }
 0x24f   :  { %v1757_v37 = vadd.f32 %v1639_v25, %v1370_v58  ;;  %v805_v29 = vadd.f32 %v804_v62, %v6182_v50  ;;  %v1022_v25 = vsel %vm882_vm1, %v1019_v1, %v1021_v14  ;;  %v5176_v50 = vld [vmem:[%s8579_s0 + $0x2d0] sm:$0xff] }
 0x250   :  { %v1023_v62 = vrot.slane %v5176_v50, 2 }
 0x251   :  { %v7046_v19 = vadd.f32 %v2249_v21, %v1757_v37  ;;  %851 = vmatmul.f32.gmra.mxu1 %v5173_v20  ;;  %1302 = vmatmul.f32.gmra.mxu2 %v1020_v43  ;;  %v2018_v37 = vrot.slane %v4862_v49, 1 }
 0x253   :  { %8635 = vst [vmem:[#allocation36_spill] sm:$0xff] %v7046_v19  ;;  %1689 = vmatmul.f32.gmra.mxu3 %v4860_v7  ;;  %v2252_v31 = vpop.f32.mrf.mxu0  ;;  %v5177_v7 = vld [vmem:[%s8579_s0 + $0x2d8] sm:$0xff]  ;;  %v2019_v14 = vsel %vm222_vm0, %v2016_v35, %v2018_v37  ;;  %v5019_v35 = vld [vmem:[%s8578_s1 + $0x300] sm:$0xff] }
 0x254   :  { %v1255_v60 = vpop.f32.mrf.mxu2  ;;  %v1024_v30 = vrot.slane %v5177_v7, 2  ;;  %3037 = vmatpush.msra.mxu2 %v5019_v35  ;;  %v5179_v35 = vld [vmem:[%s8579_s0 + $0x2e8] sm:$0xff] }
 0x255   :  { %v1371_v21 = vadd.f32 %v1255_v60, %v805_v29 }
 0x256   :  { %v807_v58 = vpop.f32.mrf.mxu1  ;;  %v1642_v20 = vpop.f32.mrf.mxu3  ;;  %2299 = vmatmul.f32.gmra.mxu0 %v2017_v52 }
 0x257   :  { %v1758_v43 = vadd.f32 %v1642_v20, %v1371_v21  ;;  %v808_v29 = vadd.f32 %v807_v58, %v6204_v48  ;;  %v1025_v21 = vsel %vm882_vm1, %v1023_v62, %v1024_v30  ;;  %v4863_v20 = vld [vmem:[%s8579_s0 + $0x2e8] sm:$0xff] }
 0x259   :  { %v7057_v36 = vadd.f32 %v2252_v31, %v1758_v43  ;;  %854 = vmatmul.f32.gmra.mxu1 %v5174_v59  ;;  %1305 = vmatmul.f32.gmra.mxu2 %v1022_v25  ;;  %v4864_v59 = vld [vmem:[%s8579_s0 + $0x2f0] sm:$0xff]  ;;  %v5178_v43 = vld [vmem:[%s8579_s0 + $0x2e0] sm:$0x3] }
 0x25a   :  { %v2021_v58 = vrot.slane %v4864_v59, 1  ;;  %v1026_v37 = vrot.slane %v5178_v43, 2  ;;  %v1028_v43 = vrot.slane %v5179_v35, 2 }
 0x25b   :  { %8636 = vst [vmem:[#allocation37_spill] sm:$0xff] %v7057_v36  ;;  %1692 = vmatmul.f32.gmra.mxu3 %v4861_v51  ;;  %v2255_v1 = vpop.f32.mrf.mxu0  ;;  %v2020_v51 = vrot.slane %v4863_v20, 1 }
 0x25c   :  { %v1258_v31 = vpop.f32.mrf.mxu2 }
 0x25d   :  { %v1372_v52 = vadd.f32 %v1258_v31, %v808_v29  ;;  %v4865_v31 = vld [vmem:[%s8579_s0 + $0x2f8] sm:$0x3] }
 0x25e   :  { %v810_v60 = vpop.f32.mrf.mxu1  ;;  %v1645_v49 = vpop.f32.mrf.mxu3  ;;  %2302 = vmatmul.f32.gmra.mxu0 %v2019_v14  ;;  %v2022_v14 = vsel %vm222_vm0, %v2020_v51, %v2021_v58 }
 0x25f   :  { %v1759_v48 = vadd.f32 %v1645_v49, %v1372_v52  ;;  %v811_v62 = vadd.f32 %v810_v60, %v6226_v34  ;;  %v4907_v49 = vld [vmem:[%s8578_s1 + $0x280] sm:$0xff] }
 0x260   :  { %2650 = vmatpush.msra.mxu1 %v4907_v49 }
 0x261   :  { %v7074_v25 = vadd.f32 %v2255_v1, %v1759_v48  ;;  %857 = vmatmul.f32.gmra.mxu1 %v5176_v50  ;;  %1308 = vmatmul.f32.gmra.mxu2 %v1025_v21  ;;  %v5035_v50 = vld [vmem:[%s8578_s1 + $0x380] sm:$0xff]  ;;  %v1027_v21 = vsel %vm882_vm1, %v1024_v30, %v1026_v37  ;;  %v2023_v48 = vrot.slane %v4865_v31, 1 }
 0x262   :  { %3647 = vmatpush.msra.mxu3 %v5035_v50 }
 0x263   :  { %8637 = vst [vmem:[#allocation38_spill] sm:$0xff] %v7074_v25  ;;  %1695 = vmatmul.f32.gmra.mxu3 %v4863_v20  ;;  %v2258_v29 = vpop.f32.mrf.mxu0 }
 0x264   :  { %v1261_v1 = vpop.f32.mrf.mxu2 }
 0x265   :  { %v1373_v52 = vadd.f32 %v1261_v1, %v811_v62  ;;  %v5180_v62 = vld [vmem:[%s8579_s0 + $0x2f0] sm:$0xff]  ;;  %v4867_v1 = vld [vmem:[%s8579_s0 + $0x308] sm:$0xff] }
 0x266   :  { %v813_v34 = vpop.f32.mrf.mxu1  ;;  %v1648_v60 = vpop.f32.mrf.mxu3  ;;  %2305 = vmatmul.f32.gmra.mxu0 %v2022_v14  ;;  %v1029_v50 = vrot.slane %v5180_v62, 2  ;;  %v2024_v14 = vsel %vm222_vm0, %v2021_v58, %v2023_v48 }
 0x267   :  { %v1760_v20 = vadd.f32 %v1648_v60, %v1373_v52  ;;  %v814_v30 = vadd.f32 %v813_v34, %v6254_v41  ;;  %v4866_v41 = vld [vmem:[%s8579_s0 + $0x300] sm:$0xff]  ;;  %v2026_v34 = vrot.slane %v4867_v1, 1 }
 0x268   :  { %v1030_v60 = vsel %vm882_vm1, %v1028_v43, %v1029_v50  ;;  %v2025_v58 = vrot.slane %v4866_v41, 1 }
 0x269   :  { %v7094_v51 = vadd.f32 %v2258_v29, %v1760_v20  ;;  %860 = vmatmul.f32.gmra.mxu1 %v5177_v7  ;;  %1311 = vmatmul.f32.gmra.mxu2 %v1027_v21  ;;  %v5051_v7 = vld [vmem:[%s8578_s1 + $0x400] sm:$0xff]  ;;  %v5181_v20 = vld [vmem:[%s8579_s0 + $0x2f8] sm:$0x3] }
 0x26a   :  { %4161 = vmatpush.msra.mxu0 %v5051_v7  ;;  %v1031_v48 = vrot.slane %v5181_v20, 2  ;;  %v2027_v7 = vsel %vm222_vm0, %v2025_v58, %v2026_v34 }
 0x26b   :  { %8638 = vst [vmem:[#allocation39_spill] sm:$0xff] %v7094_v51  ;;  %1698 = vmatmul.f32.gmra.mxu3 %v4864_v59  ;;  %v2261_v37 = vpop.f32.mrf.mxu0 }
 0x26c   :  { %v1264_v29 = vpop.f32.mrf.mxu2 }
 0x26d   :  { %v1374_v31 = vadd.f32 %v1264_v29, %v814_v30 }
 0x26e   :  { %v816_v52 = vpop.f32.mrf.mxu1  ;;  %v1651_v49 = vpop.f32.mrf.mxu3  ;;  %2308 = vmatmul.f32.gmra.mxu0 %v2024_v14  ;;  %v4868_v14 = vld [vmem:[%s8579_s0 + $0x310] sm:$0x3] }
 0x26f   :  { %v1761_v59 = vadd.f32 %v1651_v49, %v1374_v31  ;;  %v817_v30 = vadd.f32 %v816_v52, %v6270_v44  ;;  %v1032_v49 = vsel %vm882_vm1, %v1029_v50, %v1031_v48  ;;  %v5182_v44 = vld [vmem:[%s8579_s0 + $0x300] sm:$0xff] }
 0x270   :  { %v1033_v52 = vrot.slane %v5182_v44, 2 }
 0x271   :  { %v7114_v21 = vadd.f32 %v2261_v37, %v1761_v59  ;;  %863 = vmatmul.f32.gmra.mxu1 %v5179_v35  ;;  %1314 = vmatmul.f32.gmra.mxu2 %v1030_v60  ;;  %v2028_v59 = vrot.slane %v4868_v14, 1 }
 0x273   :  { %8639 = vst [vmem:[#allocation40_spill] sm:$0xff] %v7114_v21  ;;  %1701 = vmatmul.f32.gmra.mxu3 %v4866_v41  ;;  %v2264_v43 = vpop.f32.mrf.mxu0  ;;  %v5183_v41 = vld [vmem:[%s8579_s0 + $0x308] sm:$0xff]  ;;  %v2029_v48 = vsel %vm222_vm0, %v2026_v34, %v2028_v59  ;;  %v5184_v34 = vld [vmem:[%s8579_s0 + $0x310] sm:$0x3] }
 0x274   :  { %v1267_v29 = vpop.f32.mrf.mxu2  ;;  %v1034_v58 = vrot.slane %v5183_v41, 2 }
 0x275   :  { %v1375_v37 = vadd.f32 %v1267_v29, %v817_v30 }
 0x276   :  { %v819_v31 = vpop.f32.mrf.mxu1  ;;  %v1654_v35 = vpop.f32.mrf.mxu3  ;;  %2311 = vmatmul.f32.gmra.mxu0 %v2027_v7 }
 0x277   :  { %v1762_v60 = vadd.f32 %v1654_v35, %v1375_v37  ;;  %v820_v30 = vadd.f32 %v819_v31, %v6292_v40  ;;  %v1035_v37 = vsel %vm882_vm1, %v1033_v52, %v1034_v58  ;;  %v4869_v35 = vld [vmem:[%s8579_s0 + $0x318] sm:$0xff] }
 0x279   :  { %v7125_v20 = vadd.f32 %v2264_v43, %v1762_v60  ;;  %866 = vmatmul.f32.gmra.mxu1 %v5180_v62  ;;  %1317 = vmatmul.f32.gmra.mxu2 %v1032_v49  ;;  %v4870_v62 = vld [vmem:[%s8579_s0 + $0x320] sm:$0xff]  ;;  %v1036_v60 = vrot.slane %v5184_v34, 2 }
 0x27a   :  { %v2031_v31 = vrot.slane %v4870_v62, 1 }
 0x27b   :  { %8640 = vst [vmem:[#allocation41_spill] sm:$0xff] %v7125_v20  ;;  %1704 = vmatmul.f32.gmra.mxu3 %v4867_v1  ;;  %v2267_v50 = vpop.f32.mrf.mxu0  ;;  %v2030_v1 = vrot.slane %v4869_v35, 1 }
 0x27c   :  { %v1270_v43 = vpop.f32.mrf.mxu2 }
 0x27d   :  { %v1376_v7 = vadd.f32 %v1270_v43, %v820_v30  ;;  %v2032_v30 = vsel %vm222_vm0, %v2030_v1, %v2031_v31 }
 0x27e   :  { %v822_v29 = vpop.f32.mrf.mxu1  ;;  %v1657_v14 = vpop.f32.mrf.mxu3  ;;  %2314 = vmatmul.f32.gmra.mxu0 %v2029_v48  ;;  %v4871_v48 = vld [vmem:[%s8579_s0 + $0x328] sm:$0x3] }
 0x27f   :  { %v1763_v40 = vadd.f32 %v1657_v14, %v1376_v7  ;;  %v823_v59 = vadd.f32 %v822_v29, %v6314_v2  ;;  %v1037_v14 = vsel %vm882_vm1, %v1034_v58, %v1036_v60  ;;  %v5185_v2 = vld [vmem:[%s8579_s0 + $0x318] sm:$0xff] }
 0x280   :  { %v1038_v29 = vrot.slane %v5185_v2, 2 }
 0x281   :  { %v7142_v49 = vadd.f32 %v2267_v50, %v1763_v40  ;;  %869 = vmatmul.f32.gmra.mxu1 %v5182_v44  ;;  %1320 = vmatmul.f32.gmra.mxu2 %v1035_v37  ;;  %v2033_v40 = vrot.slane %v4871_v48, 1 }
 0x283   :  { %8641 = vst [vmem:[#allocation42_spill] sm:$0xff] %v7142_v49  ;;  %1707 = vmatmul.f32.gmra.mxu3 %v4869_v35  ;;  %v2270_v52 = vpop.f32.mrf.mxu0  ;;  %v5186_v35 = vld [vmem:[%s8579_s0 + $0x320] sm:$0xff]  ;;  %v2034_v60 = vsel %vm222_vm0, %v2031_v31, %v2033_v40  ;;  %v5187_v31 = vld [vmem:[%s8579_s0 + $0x328] sm:$0x3] }
 0x284   :  { %v1273_v43 = vpop.f32.mrf.mxu2  ;;  %v1039_v1 = vrot.slane %v5186_v35, 2  ;;  %v1041_v40 = vrot.slane %v5187_v31, 2 }
 0x285   :  { %v1377_v50 = vadd.f32 %v1273_v43, %v823_v59  ;;  %v8643_v59 = vld [vmem:[#allocation28_spill] sm:$0xff] }
 0x286   :  { %v825_v7 = vpop.f32.mrf.mxu1  ;;  %v1660_v44 = vpop.f32.mrf.mxu3  ;;  %2317 = vmatmul.f32.gmra.mxu0 %v2032_v30 }
 0x287   :  { %v1764_v37 = vadd.f32 %v1660_v44, %v1377_v50  ;;  %v826_v43 = vadd.f32 %v825_v7, %v8643_v59  ;;  %v1040_v44 = vsel %vm882_vm1, %v1038_v29, %v1039_v1 }
 0x289   :  { %v7153_v34 = vadd.f32 %v2270_v52, %v1764_v37  ;;  %872 = vmatmul.f32.gmra.mxu1 %v5183_v41  ;;  %1323 = vmatmul.f32.gmra.mxu2 %v1037_v14  ;;  %v4873_v41 = vld [vmem:[%s8579_s0 + $0x338] sm:$0xff]  ;;  %v4872_v14 = vld [vmem:[%s8579_s0 + $0x330] sm:$0xff] }
 0x28a   :  { %v2036_v37 = vrot.slane %v4873_v41, 1 }
 0x28b   :  { %8642 = vst [vmem:[#allocation43_spill] sm:$0xff] %v7153_v34  ;;  %1710 = vmatmul.f32.gmra.mxu3 %v4870_v62  ;;  %v2273_v58 = vpop.f32.mrf.mxu0  ;;  %v2035_v62 = vrot.slane %v4872_v14, 1 }
 0x28c   :  { %v1276_v52 = vpop.f32.mrf.mxu2 }
 0x28d   :  { %v1378_v30 = vadd.f32 %v1276_v52, %v826_v43  ;;  %v8645_v43 = vld [vmem:[#allocation31_spill] sm:$0xff]  ;;  %v2037_v34 = vsel %vm222_vm0, %v2035_v62, %v2036_v37 }
 0x28e   :  { %v828_v48 = vpop.f32.mrf.mxu1  ;;  %v1663_v50 = vpop.f32.mrf.mxu3  ;;  %2320 = vmatmul.f32.gmra.mxu0 %v2034_v60  ;;  %v4874_v60 = vld [vmem:[%s8579_s0 + $0x340] sm:$0x3] }
 0x28f   :  { %v1765_v7 = vadd.f32 %v1663_v50, %v1378_v30  ;;  %v829_v52 = vadd.f32 %v828_v48, %v8645_v43  ;;  %v1042_v50 = vsel %vm882_vm1, %v1039_v1, %v1041_v40  ;;  %v4923_v48 = vld [vmem:[%s8579_s0 + $0x30] sm:$0xff] }
 0x290   :  { %v3391_v40 = vrot.slane %v4923_v48, 1 }
 0x291   :  { %v7170_v59 = vadd.f32 %v2273_v58, %v1765_v7  ;;  %875 = vmatmul.f32.gmra.mxu1 %v5185_v2  ;;  %1326 = vmatmul.f32.gmra.mxu2 %v1040_v44  ;;  %v2038_v7 = vrot.slane %v4874_v60, 1 }
 0x293   :  { %8644 = vst [vmem:[#allocation28_spill] sm:$0xff] %v7170_v59  ;;  %1713 = vmatmul.f32.gmra.mxu3 %v4872_v14  ;;  %v2276_v29 = vpop.f32.mrf.mxu0  ;;  %v4924_v14 = vld [vmem:[%s8579_s0 + $0x38] sm:$0xff] }
 0x294   :  { %v1279_v49 = vpop.f32.mrf.mxu2  ;;  %v8649_v59 = vld [vmem:[#allocation5_spill] sm:$0xff] }
 0x295   :  { %v1379_v58 = vadd.f32 %v1279_v49, %v829_v52  ;;  %v8647_v49 = vld [vmem:[#allocation33_spill] sm:$0xff]  ;;  %v3392_v52 = vrot.slane %v4924_v14, 1 }
 0x296   :  { %v831_v30 = vpop.f32.mrf.mxu1  ;;  %v1666_v2 = vpop.f32.mrf.mxu3  ;;  %2323 = vmatmul.f32.gmra.mxu0 %v2037_v34  ;;  %v2039_v34 = vsel %vm222_vm0, %v2036_v37, %v2038_v7  ;;  %v5188_v37 = vld [vmem:[%s8579_s0 + $0x28] sm:$0x3]  ;;  %v8650_v7 = vld [vmem:[#allocation2_spill] sm:$0xff] }
 0x297   :  { %v1766_v44 = vadd.f32 %v1666_v2, %v1379_v58  ;;  %v832_v62 = vadd.f32 %v831_v30, %v8647_v49  ;;  %v3905_v2 = vrot.slane %v4923_v48, 2  ;;  %v2397_v30 = vrot.slane %v5188_v37, 2 }
 0x299   :  { %v7181_v31 = vadd.f32 %v2276_v29, %v1766_v44  ;;  %878 = vmatmul.f32.gmra.mxu1 %v5186_v35  ;;  %1329 = vmatmul.f32.gmra.mxu2 %v1042_v50  ;;  %v3906_v50 = vrot.slane %v4924_v14, 2  ;;  %v3393_v44 = vsel %vm222_vm0, %v3391_v40, %v3392_v52 }
 0x29b   :  { %8646 = vst [vmem:[#allocation31_spill] sm:$0xff] %v7181_v31  ;;  %1716 = vmatmul.f32.gmra.mxu3 %v4873_v41  ;;  %v2279_v43 = vpop.f32.mrf.mxu0  ;;  %v4925_v41 = vld [vmem:[%s8579_s0 + $0x40] sm:$0x3] }
 0x29c   :  { %v1282_v1 = vpop.f32.mrf.mxu2 }
 0x29d   :  { %v1380_v29 = vadd.f32 %v1282_v1, %v832_v62  ;;  %v3394_v1 = vrot.slane %v4925_v41, 1 }
 0x29e   :  { %v834_v35 = vpop.f32.mrf.mxu1  ;;  %v1669_v60 = vpop.f32.mrf.mxu3  ;;  %2326 = vmatmul.f32.gmra.mxu0 %v2039_v34  ;;  %v3907_v34 = vsel %vm882_vm1, %v3905_v2, %v3906_v50  ;;  %v4927_v2 = vld [vmem:[%s8579_s0 + $0x50] sm:$0xff] }
 0x29f   :  { %v1767_v58 = vadd.f32 %v1669_v60, %v1380_v29  ;;  %v835_v49 = vadd.f32 %v834_v35, %v8650_v7  ;;  %v8651_v29 = vld [vmem:[#allocation3_spill] sm:$0xff]  ;;  %v3395_v20 = vsel %vm222_vm0, %v3392_v52, %v3394_v1 }
 0x2a0   :  { %v2398_v60 = vsel %vm882_vm1, %v8651_v29, %v2397_v30  ;;  %v4926_v35 = vld [vmem:[%s8579_s0 + $0x48] sm:$0xff] }
 0x2a1   :  { %v7192_v31 = vadd.f32 %v2279_v43, %v1767_v58  ;;  %2651 = vmatmul.f32.vlgmr.msra.gmra.mxu1 %v8649_v59  ;;  %3038 = vmatmul.f32.vlgmr.msra.gmra.mxu2 %v4923_v48  ;;  %v3396_v52 = vrot.slane %v4926_v35, 1 }
 0x2a3   :  { %8648 = vst [vmem:[#allocation33_spill] sm:$0xff] %v7192_v31  ;;  %3648 = vmatmul.f32.vlgmr.msra.gmra.mxu3 %v3393_v44  ;;  %v2282_v62 = vpop.f32.mrf.mxu0  ;;  %v3908_v31 = vrot.slane %v4925_v41, 2  ;;  %v8653_v44 = vld [vmem:[#allocation4_spill] sm:$0xff] }
 0x2a4   :  { %v1285_v43 = vpop.f32.mrf.mxu2 }
 0x2a5   :  { %v1381_v40 = vadd.f32 %v1285_v43, %v835_v49  ;;  %v3909_v41 = vsel %vm882_vm1, %v3906_v50, %v3908_v31  ;;  %v5189_v31 = vld [vmem:[%s8579_s0 + $0x40] sm:$0x3] }
 0x2a6   :  { %v837_v59 = vpop.f32.mrf.mxu1  ;;  %v1672_v48 = vpop.f32.mrf.mxu3  ;;  %4162 = vmatmul.f32.vlgmr.msra.gmra.mxu0 %v3907_v34  ;;  %v2402_v50 = vrot.slane %v5189_v31, 2 }
 0x2a7   :  { %v1768_v58 = vadd.f32 %v1672_v48, %v1381_v40  ;;  %v838_v7 = vadd.f32 %v837_v59, %v8653_v44  ;;  %v3910_v40 = vrot.slane %v4926_v35, 2  ;;  %v3911_v48 = vrot.slane %v4927_v2, 2  ;;  %v8656_v59 = vld [vmem:[#allocation6_spill] sm:$0xff] }
 0x2a9   :  { %v7206_v37 = vadd.f32 %v2282_v62, %v1768_v58  ;;  %2654 = vmatmul.f32.gmra.mxu1 %v2398_v60  ;;  %3041 = vmatmul.f32.gmra.mxu2 %v4924_v14  ;;  %v3397_v62 = vrot.slane %v4927_v2, 1  ;;  %v8655_v58 = vld [vmem:[#allocation9_spill] sm:$0xff] }
 0x2ab   :  { %8652 = vst [vmem:[#allocation5_spill] sm:$0xff] %v7206_v37  ;;  %3651 = vmatmul.f32.gmra.mxu3 %v3395_v20  ;;  %v2285_v30 = vpop.f32.mrf.mxu0  ;;  %v3398_v29 = vsel %vm222_vm0, %v3396_v52, %v3397_v62  ;;  %v4928_v20 = vld [vmem:[%s8579_s0 + $0x58] sm:$0x3] }
 0x2ac   :  { %v1288_v49 = vpop.f32.mrf.mxu2 }
 0x2ad   :  { %v1382_v34 = vadd.f32 %v1288_v49, %v838_v7  ;;  %v3399_v49 = vrot.slane %v4928_v20, 1 }
 0x2ae   :  { %v840_v43 = vpop.f32.mrf.mxu1  ;;  %v1675_v14 = vpop.f32.mrf.mxu3  ;;  %4165 = vmatmul.f32.gmra.mxu0 %v3909_v41  ;;  %v3912_v41 = vsel %vm882_vm1, %v3910_v40, %v3911_v48  ;;  %v4930_v40 = vld [vmem:[%s8579_s0 + $0x68] sm:$0xff] }
 0x2af   :  { %v1769_v1 = vadd.f32 %v1675_v14, %v1382_v34  ;;  %v841_v44 = vadd.f32 %v840_v43, %v8656_v59  ;;  %v8657_v14 = vld [vmem:[#allocation7_spill] sm:$0xff]  ;;  %v3400_v37 = vsel %vm222_vm0, %v3397_v62, %v3399_v49  ;;  %v4929_v43 = vld [vmem:[%s8579_s0 + $0x60] sm:$0xff] }
 0x2b0   :  { %v3401_v62 = vrot.slane %v4929_v43, 1 }
 0x2b1   :  { %v7217_v60 = vadd.f32 %v2285_v30, %v1769_v1  ;;  %2657 = vmatmul.f32.gmra.mxu1 %v8655_v58  ;;  %3044 = vmatmul.f32.gmra.mxu2 %v4926_v35  ;;  %v2403_v1 = vsel %vm882_vm1, %v8657_v14, %v2402_v50 }
 0x2b3   :  { %8654 = vst [vmem:[#allocation2_spill] sm:$0xff] %v7217_v60  ;;  %3654 = vmatmul.f32.gmra.mxu3 %v3398_v29  ;;  %v2288_v7 = vpop.f32.mrf.mxu0  ;;  %v3913_v60 = vrot.slane %v4928_v20, 2  ;;  %v8659_v29 = vld [vmem:[#allocation8_spill] sm:$0xff] }
 0x2b4   :  { %v1291_v30 = vpop.f32.mrf.mxu2 }
 0x2b5   :  { %v1383_v52 = vadd.f32 %v1291_v30, %v841_v44  ;;  %v3914_v20 = vsel %vm882_vm1, %v3911_v48, %v3913_v60  ;;  %v5190_v48 = vld [vmem:[%s8579_s0 + $0x58] sm:$0x3] }
 0x2b6   :  { %v843_v34 = vpop.f32.mrf.mxu1  ;;  %v1678_v35 = vpop.f32.mrf.mxu3  ;;  %4168 = vmatmul.f32.gmra.mxu0 %v3912_v41  ;;  %v2407_v60 = vrot.slane %v5190_v48, 2 }
 0x2b7   :  { %v1770_v58 = vadd.f32 %v1678_v35, %v1383_v52  ;;  %v844_v59 = vadd.f32 %v843_v34, %v8659_v29  ;;  %v3915_v52 = vrot.slane %v4929_v43, 2  ;;  %v3916_v35 = vrot.slane %v4930_v40, 2  ;;  %v8662_v34 = vld [vmem:[#allocation10_spill] sm:$0xff] }
 0x2b9   :  { %v7231_v31 = vadd.f32 %v2288_v7, %v1770_v58  ;;  %2660 = vmatmul.f32.gmra.mxu1 %v2403_v1  ;;  %3047 = vmatmul.f32.gmra.mxu2 %v4927_v2  ;;  %v3402_v7 = vrot.slane %v4930_v40, 1  ;;  %v8661_v58 = vld [vmem:[#allocation13_spill] sm:$0xff] }
 0x2bb   :  { %8658 = vst [vmem:[#allocation3_spill] sm:$0xff] %v7231_v31  ;;  %3657 = vmatmul.f32.gmra.mxu3 %v3400_v37  ;;  %v2291_v50 = vpop.f32.mrf.mxu0  ;;  %v3403_v14 = vsel %vm222_vm0, %v3401_v62, %v3402_v7  ;;  %v4931_v37 = vld [vmem:[%s8579_s0 + $0x70] sm:$0x3] }
 0x2bc   :  { %v1294_v44 = vpop.f32.mrf.mxu2 }
 0x2bd   :  { %v1384_v41 = vadd.f32 %v1294_v44, %v844_v59  ;;  %v3404_v44 = vrot.slane %v4931_v37, 1 }
 0x2be   :  { %v846_v30 = vpop.f32.mrf.mxu1  ;;  %v1681_v2 = vpop.f32.mrf.mxu3  ;;  %4171 = vmatmul.f32.gmra.mxu0 %v3914_v20  ;;  %v3917_v20 = vsel %vm882_vm1, %v3915_v52, %v3916_v35  ;;  %v4933_v52 = vld [vmem:[%s8579_s0 + $0x80] sm:$0xff] }
 0x2bf   :  { %v1771_v49 = vadd.f32 %v1681_v2, %v1384_v41  ;;  %v847_v29 = vadd.f32 %v846_v30, %v8662_v34  ;;  %v8663_v2 = vld [vmem:[#allocation11_spill] sm:$0xff]  ;;  %v3405_v31 = vsel %vm222_vm0, %v3402_v7, %v3404_v44  ;;  %v4932_v30 = vld [vmem:[%s8579_s0 + $0x78] sm:$0xff] }
 0x2c0   :  { %v3406_v7 = vrot.slane %v4932_v30, 1 }
 0x2c1   :  { %v7242_v1 = vadd.f32 %v2291_v50, %v1771_v49  ;;  %2663 = vmatmul.f32.gmra.mxu1 %v8661_v58  ;;  %3050 = vmatmul.f32.gmra.mxu2 %v4929_v43  ;;  %v2408_v49 = vsel %vm882_vm1, %v8663_v2, %v2407_v60 }
 0x2c3   :  { %8660 = vst [vmem:[#allocation4_spill] sm:$0xff] %v7242_v1  ;;  %3660 = vmatmul.f32.gmra.mxu3 %v3403_v14  ;;  %v2294_v59 = vpop.f32.mrf.mxu0  ;;  %v3918_v1 = vrot.slane %v4931_v37, 2  ;;  %v8665_v14 = vld [vmem:[#allocation12_spill] sm:$0xff] }
 0x2c4   :  { %v1297_v50 = vpop.f32.mrf.mxu2 }
 0x2c5   :  { %v1385_v62 = vadd.f32 %v1297_v50, %v847_v29  ;;  %v3919_v37 = vsel %vm882_vm1, %v3916_v35, %v3918_v1  ;;  %v5191_v35 = vld [vmem:[%s8579_s0 + $0x70] sm:$0x3] }
 0x2c6   :  { %v849_v41 = vpop.f32.mrf.mxu1  ;;  %v1684_v43 = vpop.f32.mrf.mxu3  ;;  %4174 = vmatmul.f32.gmra.mxu0 %v3917_v20  ;;  %v2412_v1 = vrot.slane %v5191_v35, 2 }
 0x2c7   :  { %v1772_v58 = vadd.f32 %v1684_v43, %v1385_v62  ;;  %v850_v34 = vadd.f32 %v849_v41, %v8665_v14  ;;  %v3920_v62 = vrot.slane %v4932_v30, 2  ;;  %v3921_v43 = vrot.slane %v4933_v52, 2  ;;  %v8668_v41 = vld [vmem:[#allocation14_spill] sm:$0xff] }
 0x2c9   :  { %v7256_v48 = vadd.f32 %v2294_v59, %v1772_v58  ;;  %2666 = vmatmul.f32.gmra.mxu1 %v2408_v49  ;;  %3053 = vmatmul.f32.gmra.mxu2 %v4930_v40  ;;  %v3407_v59 = vrot.slane %v4933_v52, 1  ;;  %v8667_v58 = vld [vmem:[#allocation17_spill] sm:$0xff] }
 0x2cb   :  { %8664 = vst [vmem:[#allocation9_spill] sm:$0xff] %v7256_v48  ;;  %3663 = vmatmul.f32.gmra.mxu3 %v3405_v31  ;;  %v2297_v60 = vpop.f32.mrf.mxu0  ;;  %v3408_v2 = vsel %vm222_vm0, %v3406_v7, %v3407_v59  ;;  %v4934_v31 = vld [vmem:[%s8579_s0 + $0x88] sm:$0x3] }
 0x2cc   :  { %v1300_v29 = vpop.f32.mrf.mxu2 }
 0x2cd   :  { %v1386_v20 = vadd.f32 %v1300_v29, %v850_v34  ;;  %v3409_v29 = vrot.slane %v4934_v31, 1 }
 0x2ce   :  { %v852_v50 = vpop.f32.mrf.mxu1  ;;  %v1687_v40 = vpop.f32.mrf.mxu3  ;;  %4177 = vmatmul.f32.gmra.mxu0 %v3919_v37  ;;  %v3922_v37 = vsel %vm882_vm1, %v3920_v62, %v3921_v43  ;;  %v4936_v62 = vld [vmem:[%s8579_s0 + $0x98] sm:$0xff] }
 0x2cf   :  { %v1773_v44 = vadd.f32 %v1687_v40, %v1386_v20  ;;  %v853_v14 = vadd.f32 %v852_v50, %v8668_v41  ;;  %v8669_v40 = vld [vmem:[#allocation15_spill] sm:$0xff]  ;;  %v3410_v48 = vsel %vm222_vm0, %v3407_v59, %v3409_v29  ;;  %v4935_v50 = vld [vmem:[%s8579_s0 + $0x90] sm:$0xff] }
 0x2d0   :  { %v3411_v59 = vrot.slane %v4935_v50, 1 }
 0x2d1   :  { %v7267_v49 = vadd.f32 %v2297_v60, %v1773_v44  ;;  %2669 = vmatmul.f32.gmra.mxu1 %v8667_v58  ;;  %3056 = vmatmul.f32.gmra.mxu2 %v4932_v30  ;;  %v2413_v44 = vsel %vm882_vm1, %v8669_v40, %v2412_v1 }
 0x2d3   :  { %8666 = vst [vmem:[#allocation6_spill] sm:$0xff] %v7267_v49  ;;  %3666 = vmatmul.f32.gmra.mxu3 %v3408_v2  ;;  %v2300_v34 = vpop.f32.mrf.mxu0  ;;  %v3923_v49 = vrot.slane %v4934_v31, 2  ;;  %v8671_v2 = vld [vmem:[#allocation16_spill] sm:$0xff] }
 0x2d4   :  { %v1303_v60 = vpop.f32.mrf.mxu2 }
 0x2d5   :  { %v1387_v7 = vadd.f32 %v1303_v60, %v853_v14  ;;  %v3924_v31 = vsel %vm882_vm1, %v3921_v43, %v3923_v49  ;;  %v5192_v43 = vld [vmem:[%s8579_s0 + $0x88] sm:$0x3] }
 0x2d6   :  { %v855_v20 = vpop.f32.mrf.mxu1  ;;  %v1690_v30 = vpop.f32.mrf.mxu3  ;;  %4180 = vmatmul.f32.gmra.mxu0 %v3922_v37  ;;  %v2417_v49 = vrot.slane %v5192_v43, 2 }
 0x2d7   :  { %v1774_v58 = vadd.f32 %v1690_v30, %v1387_v7  ;;  %v856_v41 = vadd.f32 %v855_v20, %v8671_v2  ;;  %v3925_v7 = vrot.slane %v4935_v50, 2  ;;  %v3926_v30 = vrot.slane %v4936_v62, 2  ;;  %v8674_v20 = vld [vmem:[#allocation18_spill] sm:$0xff] }
 0x2d9   :  { %v7281_v35 = vadd.f32 %v2300_v34, %v1774_v58  ;;  %2672 = vmatmul.f32.gmra.mxu1 %v2413_v44  ;;  %3059 = vmatmul.f32.gmra.mxu2 %v4933_v52  ;;  %v3412_v34 = vrot.slane %v4936_v62, 1  ;;  %v8673_v58 = vld [vmem:[#allocation21_spill] sm:$0xff] }
 0x2db   :  { %8670 = vst [vmem:[#allocation7_spill] sm:$0xff] %v7281_v35  ;;  %3669 = vmatmul.f32.gmra.mxu3 %v3410_v48  ;;  %v2303_v1 = vpop.f32.mrf.mxu0  ;;  %v3413_v40 = vsel %vm222_vm0, %v3411_v59, %v3412_v34  ;;  %v4937_v48 = vld [vmem:[%s8579_s0 + $0xa0] sm:$0x3] }
 0x2dc   :  { %v1306_v14 = vpop.f32.mrf.mxu2 }
 0x2dd   :  { %v1388_v37 = vadd.f32 %v1306_v14, %v856_v41  ;;  %v3414_v14 = vrot.slane %v4937_v48, 1 }
 0x2de   :  { %v858_v60 = vpop.f32.mrf.mxu1  ;;  %v1693_v52 = vpop.f32.mrf.mxu3  ;;  %4183 = vmatmul.f32.gmra.mxu0 %v3924_v31  ;;  %v3927_v31 = vsel %vm882_vm1, %v3925_v7, %v3926_v30  ;;  %v4939_v7 = vld [vmem:[%s8579_s0 + $0xb0] sm:$0xff] }
 0x2df   :  { %v1775_v29 = vadd.f32 %v1693_v52, %v1388_v37  ;;  %v859_v2 = vadd.f32 %v858_v60, %v8674_v20  ;;  %v8675_v52 = vld [vmem:[#allocation19_spill] sm:$0xff]  ;;  %v3415_v35 = vsel %vm222_vm0, %v3412_v34, %v3414_v14  ;;  %v5193_v34 = vld [vmem:[%s8579_s0 + $0xc0] sm:$0xff]  ;;  %v3417_v14 = vrot.slane %v4939_v7, 1 }
 0x2e0   :  { %v4938_v60 = vld [vmem:[%s8579_s0 + $0xa8] sm:$0xff] }
 0x2e1   :  { %v7292_v44 = vadd.f32 %v2303_v1, %v1775_v29  ;;  %2675 = vmatmul.f32.gmra.mxu1 %v8673_v58  ;;  %3062 = vmatmul.f32.gmra.mxu2 %v4935_v50  ;;  %v2418_v29 = vsel %vm882_vm1, %v8675_v52, %v2417_v49 }
 0x2e3   :  { %8672 = vst [vmem:[#allocation8_spill] sm:$0xff] %v7292_v44  ;;  %3672 = vmatmul.f32.gmra.mxu3 %v3413_v40  ;;  %v2306_v41 = vpop.f32.mrf.mxu0  ;;  %v3928_v44 = vrot.slane %v4937_v48, 2  ;;  %v8677_v40 = vld [vmem:[#allocation20_spill] sm:$0xff] }
 0x2e4   :  { %v1309_v1 = vpop.f32.mrf.mxu2 }
 0x2e5   :  { %v1389_v59 = vadd.f32 %v1309_v1, %v859_v2  ;;  %v3929_v48 = vsel %vm882_vm1, %v3926_v30, %v3928_v44  ;;  %v2429_v2 = vrot.slane %v5193_v34, 2  ;;  %v3416_v1 = vrot.slane %v4938_v60, 1 }
 0x2e6   :  { %v861_v37 = vpop.f32.mrf.mxu1  ;;  %v1696_v50 = vpop.f32.mrf.mxu3  ;;  %4186 = vmatmul.f32.gmra.mxu0 %v3927_v31  ;;  %v3930_v44 = vrot.slane %v4938_v60, 2 }
 0x2e7   :  { %v1776_v58 = vadd.f32 %v1696_v50, %v1389_v59  ;;  %v862_v20 = vadd.f32 %v861_v37, %v8677_v40  ;;  %v3931_v50 = vrot.slane %v4939_v7, 2  ;;  %v3418_v52 = vsel %vm222_vm0, %v3416_v1, %v3417_v14  ;;  %v8679_v40 = vld [vmem:[#allocation25_spill] sm:$0xff] }
 0x2e9   :  { %v7306_v43 = vadd.f32 %v2306_v41, %v1776_v58  ;;  %2678 = vmatmul.f32.gmra.mxu1 %v2418_v29  ;;  %3065 = vmatmul.f32.gmra.mxu2 %v4936_v62  ;;  %v7322_v62 = vld [vmem:[%s8579_s0 + $0xc8] sm:$0xff] }
 0x2ea   :  { %v8596_v41 = vrot.slane %v7322_v62, 2 }
 0x2eb   :  { %8676 = vst [vmem:[#allocation13_spill] sm:$0xff] %v7306_v43  ;;  %3675 = vmatmul.f32.gmra.mxu3 %v3415_v35  ;;  %v2309_v49 = vpop.f32.mrf.mxu0 }
 0x2ec   :  { %v1312_v31 = vpop.f32.mrf.mxu2  ;;  %v7329_v29 = vsel %vm882_vm1, %v2429_v2, %v8596_v41  ;;  %v3932_v2 = vsel %vm882_vm1, %v3930_v44, %v3931_v50  ;;  %v8681_v41 = vld [vmem:[#allocation23_spill] sm:$0xff] }
 0x2ed   :  { %v1390_v59 = vadd.f32 %v1312_v31, %v862_v20  ;;  %v4940_v20 = vld [vmem:[%s8579_s0 + $0xb8] sm:$0x3]  ;;  %v8680_v31 = vld [vmem:[#allocation22_spill] sm:$0xff]  ;;  %v4942_v44 = vld [vmem:[%s8579_s0 + $0xc8] sm:$0xff] }
 0x2ee   :  { %v864_v35 = vpop.f32.mrf.mxu1  ;;  %v1699_v37 = vpop.f32.mrf.mxu3  ;;  %4189 = vmatmul.f32.gmra.mxu0 %v3929_v48  ;;  %v5195_v48 = vld [vmem:[%s8579_s0 + $0xa0] sm:$0x3]  ;;  %v3933_v21 = vrot.slane %v4940_v20, 2 }
 0x2ef   :  { %v1777_v30 = vadd.f32 %v1699_v37, %v1390_v59  ;;  %v2422_v34 = vrot.slane %v5195_v48, 2  ;;  %v865_v1 = vadd.f32 %v864_v35, %v8680_v31  ;;  %v3419_v37 = vrot.slane %v4940_v20, 1  ;;  %v4941_v35 = vld [vmem:[%s8579_s0 + $0xc0] sm:$0xff] }
 0x2f0   :  { %v3934_v20 = vsel %vm882_vm1, %v3931_v50, %v3933_v21  ;;  %v3935_v50 = vrot.slane %v4941_v35, 2 }
 0x2f1   :  { %v7331_v58 = vadd.f32 %v2309_v49, %v1777_v30  ;;  %2681 = vmatmul.f32.gmra.mxu1 %v8679_v40  ;;  %3068 = vmatmul.f32.gmra.mxu2 %v4938_v60  ;;  %v3420_v51 = vsel %vm222_vm0, %v3417_v14, %v3419_v37  ;;  %v3936_v37 = vrot.slane %v4942_v44, 2 }
 0x2f3   :  { %8678 = vst [vmem:[#allocation10_spill] sm:$0xff] %v7331_v58  ;;  %3678 = vmatmul.f32.gmra.mxu3 %v3418_v52  ;;  %v2312_v59 = vpop.f32.mrf.mxu0  ;;  %v2423_v58 = vsel %vm882_vm1, %v8681_v41, %v2422_v34  ;;  %v8683_v52 = vld [vmem:[#allocation24_spill] sm:$0xff] }
 0x2f4   :  { %v1315_v49 = vpop.f32.mrf.mxu2 }
 0x2f5   :  { %v1391_v30 = vadd.f32 %v1315_v49, %v865_v1  ;;  %v3421_v1 = vrot.slane %v4941_v35, 1 }
 0x2f6   :  { %v867_v40 = vpop.f32.mrf.mxu1  ;;  %v1702_v60 = vpop.f32.mrf.mxu3  ;;  %4192 = vmatmul.f32.gmra.mxu0 %v3932_v2 }
 0x2f7   :  { %v1778_v43 = vadd.f32 %v1702_v60, %v1391_v30  ;;  %v868_v31 = vadd.f32 %v867_v40, %v8683_v52  ;;  %v8685_v52 = vld [vmem:[#allocation30_spill] sm:$0xff] }
 0x2f9   :  { %v7345_v48 = vadd.f32 %v2312_v59, %v1778_v43  ;;  %2684 = vmatmul.f32.gmra.mxu1 %v2423_v58  ;;  %3071 = vmatmul.f32.gmra.mxu2 %v4939_v7  ;;  %v5196_v43 = vld [vmem:[%s8579_s0 + $0xd8] sm:$0xff]  ;;  %v7361_v7 = vld [vmem:[%s8579_s0 + $0xe0] sm:$0xff]  ;;  %v3422_v59 = vrot.slane %v4942_v44, 1 }
 0x2fa   :  { %v2434_v14 = vrot.slane %v5196_v43, 2  ;;  %v8597_v58 = vrot.slane %v7361_v7, 2 }
 0x2fb   :  { %8682 = vst [vmem:[#allocation11_spill] sm:$0xff] %v7345_v48  ;;  %3681 = vmatmul.f32.gmra.mxu3 %v3420_v51  ;;  %v2315_v41 = vpop.f32.mrf.mxu0  ;;  %v3423_v30 = vsel %vm222_vm0, %v3421_v1, %v3422_v59 }
 0x2fc   :  { %v1318_v34 = vpop.f32.mrf.mxu2  ;;  %v7368_v40 = vsel %vm882_vm1, %v2434_v14, %v8597_v58  ;;  %v3937_v14 = vsel %vm882_vm1, %v3935_v50, %v3936_v37  ;;  %v8687_v58 = vld [vmem:[#allocation27_spill] sm:$0xff]  ;;  %v4945_v50 = vld [vmem:[%s8579_s0 + $0xe0] sm:$0xff] }
 0x2fd   :  { %v1392_v2 = vadd.f32 %v1318_v34, %v868_v31  ;;  %v4943_v31 = vld [vmem:[%s8579_s0 + $0xd0] sm:$0x3]  ;;  %v8686_v34 = vld [vmem:[#allocation26_spill] sm:$0xff] }
 0x2fe   :  { %v870_v51 = vpop.f32.mrf.mxu1  ;;  %v1705_v49 = vpop.f32.mrf.mxu3  ;;  %4195 = vmatmul.f32.gmra.mxu0 %v3934_v20  ;;  %v5198_v20 = vld [vmem:[%s8579_s0 + $0xb8] sm:$0x3]  ;;  %v3938_v25 = vrot.slane %v4943_v31, 2 }
 0x2ff   :  { %v1779_v21 = vadd.f32 %v1705_v49, %v1392_v2  ;;  %v2427_v43 = vrot.slane %v5198_v20, 2  ;;  %v871_v1 = vadd.f32 %v870_v51, %v8686_v34  ;;  %v3424_v49 = vrot.slane %v4943_v31, 1  ;;  %v4944_v51 = vld [vmem:[%s8579_s0 + $0xd8] sm:$0xff] }
 0x300   :  { %v3939_v31 = vsel %vm882_vm1, %v3936_v37, %v3938_v25  ;;  %v3940_v37 = vrot.slane %v4944_v51, 2 }
 0x301   :  { %v7370_v60 = vadd.f32 %v2315_v41, %v1779_v21  ;;  %2687 = vmatmul.f32.gmra.mxu1 %v8685_v52  ;;  %3074 = vmatmul.f32.gmra.mxu2 %v4941_v35  ;;  %v3425_v36 = vsel %vm222_vm0, %v3422_v59, %v3424_v49  ;;  %v3941_v49 = vrot.slane %v4945_v50, 2 }
 0x303   :  { %8684 = vst [vmem:[#allocation12_spill] sm:$0xff] %v7370_v60  ;;  %3684 = vmatmul.f32.gmra.mxu3 %v3423_v30  ;;  %v2318_v2 = vpop.f32.mrf.mxu0  ;;  %v2428_v60 = vsel %vm882_vm1, %v8687_v58, %v2427_v43  ;;  %v8689_v30 = vld [vmem:[#allocation29_spill] sm:$0xff] }
 0x304   :  { %v1321_v41 = vpop.f32.mrf.mxu2 }
 0x305   :  { %v1393_v21 = vadd.f32 %v1321_v41, %v871_v1  ;;  %v3426_v1 = vrot.slane %v4944_v51, 1 }
 0x306   :  { %v873_v52 = vpop.f32.mrf.mxu1  ;;  %v1708_v35 = vpop.f32.mrf.mxu3  ;;  %4198 = vmatmul.f32.gmra.mxu0 %v3937_v14 }
 0x307   :  { %v1780_v48 = vadd.f32 %v1708_v35, %v1393_v21  ;;  %v874_v34 = vadd.f32 %v873_v52, %v8689_v30  ;;  %v4946_v30 = vld [vmem:[%s8579_s0 + $0xe8] sm:$0x3] }
 0x309   :  { %v7384_v20 = vadd.f32 %v2318_v2, %v1780_v48  ;;  %2690 = vmatmul.f32.gmra.mxu1 %v2428_v60  ;;  %3077 = vmatmul.f32.gmra.mxu2 %v4942_v44  ;;  %v5199_v48 = vld [vmem:[%s8579_s0 + $0xf0] sm:$0xff]  ;;  %v7400_v44 = vld [vmem:[%s8579_s0 + $0xf8] sm:$0xff]  ;;  %v3427_v2 = vrot.slane %v4945_v50, 1 }
 0x30a   :  { %v2439_v59 = vrot.slane %v5199_v48, 2  ;;  %v8598_v60 = vrot.slane %v7400_v44, 2  ;;  %v8691_v48 = vld [vmem:[#allocation32_spill] sm:$0xff] }
 0x30b   :  { %8688 = vst [vmem:[#allocation17_spill] sm:$0xff] %v7384_v20  ;;  %3687 = vmatmul.f32.gmra.mxu3 %v3425_v36  ;;  %v2321_v58 = vpop.f32.mrf.mxu0  ;;  %v3428_v21 = vsel %vm222_vm0, %v3426_v1, %v3427_v2  ;;  %v3943_v20 = vrot.slane %v4946_v30, 2 }
 0x30c   :  { %v1324_v43 = vpop.f32.mrf.mxu2  ;;  %v7407_v52 = vsel %vm882_vm1, %v2439_v59, %v8598_v60  ;;  %v3942_v59 = vsel %vm882_vm1, %v3940_v37, %v3941_v49  ;;  %v4948_v37 = vld [vmem:[%s8579_s0 + $0xf8] sm:$0xff] }
 0x30d   :  { %v1394_v14 = vadd.f32 %v1324_v43, %v874_v34  ;;  %v5201_v34 = vld [vmem:[%s8579_s0 + $0xd0] sm:$0x3] }
 0x30e   :  { %v876_v36 = vpop.f32.mrf.mxu1  ;;  %v1711_v41 = vpop.f32.mrf.mxu3  ;;  %4201 = vmatmul.f32.gmra.mxu0 %v3939_v31  ;;  %v2432_v31 = vrot.slane %v5201_v34, 2 }
 0x30f   :  { %v1781_v25 = vadd.f32 %v1711_v41, %v1394_v14  ;;  %v877_v43 = vadd.f32 %v876_v36, %v8691_v48  ;;  %v3429_v14 = vrot.slane %v4946_v30, 1  ;;  %v4947_v36 = vld [vmem:[%s8579_s0 + $0xf0] sm:$0xff]  ;;  %v3944_v30 = vsel %vm882_vm1, %v3941_v49, %v3943_v20 }
 0x310   :  { %v3945_v49 = vrot.slane %v4947_v36, 2 }
 0x311   :  { %v7409_v35 = vadd.f32 %v2321_v58, %v1781_v25  ;;  %2693 = vmatmul.f32.gmra.mxu1 %v7329_v29  ;;  %3080 = vmatmul.f32.gmra.mxu2 %v4944_v51  ;;  %v8692_v25 = vrot.slane %v7322_v62, 2  ;;  %v3430_v34 = vsel %vm222_vm0, %v3427_v2, %v3429_v14  ;;  %v8693_v62 = vld [vmem:[#allocation34_spill] sm:$0xff]  ;;  %v5202_v2 = vld [vmem:[%s8579_s0 + $0x108] sm:$0xff] }
 0x313   :  { %8690 = vst [vmem:[#allocation14_spill] sm:$0xff] %v7409_v35  ;;  %3690 = vmatmul.f32.gmra.mxu3 %v3428_v21  ;;  %v2324_v1 = vpop.f32.mrf.mxu0  ;;  %v2433_v60 = vsel %vm882_vm1, %v8692_v25, %v2432_v31 }
 0x314   :  { %v1327_v58 = vpop.f32.mrf.mxu2 }
 0x315   :  { %v1395_v41 = vadd.f32 %v1327_v58, %v877_v43  ;;  %v3431_v43 = vrot.slane %v4947_v36, 1 }
 0x316   :  { %v879_v29 = vpop.f32.mrf.mxu1  ;;  %v1714_v51 = vpop.f32.mrf.mxu3  ;;  %4204 = vmatmul.f32.gmra.mxu0 %v3942_v59 }
 0x317   :  { %v1782_v35 = vadd.f32 %v1714_v51, %v1395_v41  ;;  %v880_v21 = vadd.f32 %v879_v29, %v8693_v62  ;;  %v3946_v41 = vrot.slane %v4948_v37, 2  ;;  %v5204_v62 = vld [vmem:[%s8579_s0 + $0xe8] sm:$0x3] }
 0x319   :  { %v7424_v19 = vadd.f32 %v2324_v1, %v1782_v35  ;;  %2696 = vmatmul.f32.gmra.mxu1 %v2433_v60  ;;  %3083 = vmatmul.f32.gmra.mxu2 %v4945_v50  ;;  %v2444_v60 = vrot.slane %v5202_v2, 2  ;;  %v7440_v50 = vld [vmem:[%s8579_s0 + $0x110] sm:$0xff]  ;;  %v3432_v1 = vrot.slane %v4948_v37, 1 }
 0x31a   :  { %v8599_v35 = vrot.slane %v7440_v50, 2 }
 0x31b   :  { %3693 = vmatmul.f32.gmra.mxu3 %v3430_v34  ;;  %v2327_v31 = vpop.f32.mrf.mxu0  ;;  %v3433_v29 = vsel %vm222_vm0, %v3431_v43, %v3432_v1  ;;  %v4949_v34 = vld [vmem:[%s8579_s0 + $0x100] sm:$0x3] }
 0x31c   :  { %v1330_v48 = vpop.f32.mrf.mxu2  ;;  %v7447_v51 = vsel %vm882_vm1, %v2444_v60, %v8599_v35  ;;  %v3947_v60 = vsel %vm882_vm1, %v3945_v49, %v3946_v41  ;;  %v3434_v43 = vrot.slane %v4949_v34, 1 }
 0x31d   :  { %v1396_v59 = vadd.f32 %v1330_v48, %v880_v21  ;;  %v2437_v21 = vrot.slane %v5204_v62, 2  ;;  %v7466_v62 = vld [vmem:[%s8580_s2] ss:$0 sm:$0xff] }
 0x31e   :  { %v1717_v58 = vpop.f32.mrf.mxu3  ;;  %v2652_v14 = vpop.f32.mrf.mxu1  ;;  %4207 = vmatmul.f32.gmra.mxu0 %v3944_v30  ;;  %v8695_v30 = vld [vmem:[#allocation35_spill] sm:$0xff] }
 0x31f   :  { %v1783_v20 = vadd.f32 %v1717_v58, %v1396_v59  ;;  %v2844_v2 = vadd.f32 %v2652_v14, %v8695_v30  ;;  %v8696_v58 = vrot.slane %v7361_v7, 2  ;;  %v3948_v14 = vrot.slane %v4949_v34, 2  ;;  %v4950_v30 = vld [vmem:[%s8579_s0 + $0x108] sm:$0xff]  ;;  %v7475_v7 = vld [vmem:[%s8579_s0 + $0x110] sm:$0xff] }
 0x321   :  { %v7449_v25 = vadd.f32 %v2327_v31, %v1783_v20  ;;  %2699 = vmatmul.f32.gmra.mxu1 %v7368_v40  ;;  %3086 = vmatmul.f32.gmra.mxu2 %v4947_v36  ;;  %v2438_v20 = vsel %vm882_vm1, %v8696_v58, %v2437_v21 }
 0x323   :  { %8694 = vst [vmem:[#allocation15_spill] sm:$0xff] %v7449_v25  ;;  %3696 = vmatmul.f32.gmra.mxu3 %v3433_v29  ;;  %v4163_v48 = vpop.f32.mrf.mxu0  ;;  %v3435_v29 = vsel %vm222_vm0, %v3432_v1, %v3434_v43  ;;  %v3949_v1 = vsel %vm882_vm1, %v3946_v41, %v3948_v14  ;;  %v3437_v43 = vrot.slane %v7475_v7, 1  ;;  %v3950_v14 = vrot.slane %v4950_v30, 2 }
 0x324   :  { %v3039_v31 = vpop.f32.mrf.mxu2 }
 0x325   :  { %v3231_v59 = vadd.f32 %v3039_v31, %v2844_v2 }
 0x326   :  { %v2655_v40 = vpop.f32.mrf.mxu1  ;;  %v3649_v36 = vpop.f32.mrf.mxu3  ;;  %4210 = vmatmul.f32.gmra.mxu0 %v3947_v60 }
 0x327   :  { %v3841_v35 = vadd.f32 %v3649_v36, %v3231_v59  ;;  %v2845_v21 = vadd.f32 %v2655_v40, %v6434_v26  ;;  %v3436_v26 = vrot.slane %v4950_v30, 1 }
 0x329   :  { %v4355_v49 = vadd.f32 %v4163_v48, %v3841_v35  ;;  %2702 = vmatmul.f32.gmra.mxu1 %v2438_v20  ;;  %3089 = vmatmul.f32.gmra.mxu2 %v4948_v37  ;;  %v5205_v37 = vld [vmem:[%s8579_s0 + $0x120] sm:$0xff]  ;;  %v7486_v48 = vld [vmem:[%s8579_s0 + $0x128] sm:$0xff] }
 0x32a   :  { %v2449_v35 = vrot.slane %v5205_v37, 2  ;;  %v8600_v60 = vrot.slane %v7486_v48, 2 }
 0x32b   :  { %v4423_v2 = vadd.f32 %v7466_v62, %v4355_v49  ;;  %3699 = vmatmul.f32.gmra.mxu3 %v3435_v29  ;;  %v4166_v34 = vpop.f32.mrf.mxu0  ;;  %v3951_v29 = vrot.slane %v7475_v7, 2  ;;  %v3438_v49 = vsel %vm222_vm0, %v3436_v26, %v3437_v43 }
 0x32c   :  { %v3042_v31 = vpop.f32.mrf.mxu2  ;;  %v7498_v37 = vsel %vm882_vm1, %v2449_v35, %v8600_v60  ;;  %v8697_v60 = vrot.slane %v7400_v44, 2  ;;  %v4953_v44 = vld [vmem:[%s8579_s0 + $0x120] sm:$0xff] }
 0x32d   :  { %vm4487_vm2 = vcmp.gt.f32.partialorder %v4423_v2, 0.0  ;;  %v4551_v59 = vmul.f32 0.1, %v4423_v2  ;;  %v3232_v40 = vadd.f32 %v3042_v31, %v2845_v21 }
 0x32e   :  { %v2658_v41 = vpop.f32.mrf.mxu1  ;;  %v3652_v36 = vpop.f32.mrf.mxu3  ;;  %4213 = vmatmul.f32.gmra.mxu0 %v3949_v1  ;;  %v5207_v1 = vld [vmem:[%s8579_s0 + $0x100] sm:$0x3] }
 0x32f   :  { %v4615_v58 = vsel %vm4487_vm2, %v4423_v2, %v4551_v59  ;;  %v3842_v20 = vadd.f32 %v3652_v36, %v3232_v40  ;;  %v4952_v2 = vld [vmem:[%s8579_s0 + $0x118] sm:$0x3]  ;;  %v2442_v31 = vrot.slane %v5207_v1, 2  ;;  %v2846_v26 = vadd.f32 %v2658_v41, %v6445_v0 }
 0x330   :  { %4679 = vst [vmem:[%s8581_s3] sm:$0xff] %v4615_v58  ;;  %v3953_v41 = vrot.slane %v4952_v2, 2 }
 0x331   :  { %v4356_v21 = vadd.f32 %v4166_v34, %v3842_v20  ;;  %2705 = vmatmul.f32.gmra.mxu1 %v7407_v52  ;;  %3092 = vmatmul.f32.gmra.mxu2 %v4950_v30  ;;  %v3952_v34 = vsel %vm882_vm1, %v3950_v14, %v3951_v29  ;;  %v3439_v52 = vrot.slane %v4952_v2, 1  ;;  %v2443_v25 = vsel %vm882_vm1, %v8697_v60, %v2442_v31  ;;  %v4954_v60 = vld [vmem:[%s8579_s0 + $0x128] sm:$0xff] }
 0x333   :  { %v4424_v59 = vadd.f32 %v7466_v62, %v4356_v21  ;;  %3702 = vmatmul.f32.gmra.mxu3 %v3438_v49  ;;  %v4169_v35 = vpop.f32.mrf.mxu0  ;;  %v3440_v14 = vsel %vm222_vm0, %v3437_v43, %v3439_v52  ;;  %v3954_v43 = vsel %vm882_vm1, %v3951_v29, %v3953_v41 }
 0x334   :  { %v3045_v40 = vpop.f32.mrf.mxu2 }
 0x335   :  { %vm4488_vm3 = vcmp.gt.f32.partialorder %v4424_v59, 0.0  ;;  %v4552_v30 = vmul.f32 0.1, %v4424_v59  ;;  %v3233_v36 = vadd.f32 %v3045_v40, %v2846_v26  ;;  %v7533_v26 = vld [vmem:[%s8579_s0 + $0x140] sm:$0xff] }
 0x336   :  { %v2661_v58 = vpop.f32.mrf.mxu1  ;;  %v3655_v20 = vpop.f32.mrf.mxu3  ;;  %4216 = vmatmul.f32.gmra.mxu0 %v3952_v34  ;;  %v3442_v34 = vrot.slane %v4954_v60, 1 }
 0x337   :  { %v4616_v1 = vsel %vm4488_vm3, %v4424_v59, %v4552_v30  ;;  %v3843_v0 = vadd.f32 %v3655_v20, %v3233_v36  ;;  %v2847_v21 = vadd.f32 %v2661_v58, %v6462_v55  ;;  %v2455_v59 = vrot.slane %v7533_v26, 2  ;;  %v4963_v26 = vld [vmem:[%s8579_s0 + $0x170] sm:$0xff] }
 0x338   :  { %4680 = vst [vmem:[%s8581_s3 + $0x8] sm:$0xff] %v4616_v1  ;;  %v3441_v55 = vrot.slane %v4953_v44, 1  ;;  %v3955_v20 = vrot.slane %v4953_v44, 2  ;;  %v3956_v1 = vrot.slane %v4954_v60, 2 }
 0x339   :  { %v4357_v49 = vadd.f32 %v4169_v35, %v3843_v0  ;;  %2708 = vmatmul.f32.gmra.mxu1 %v2443_v25  ;;  %3095 = vmatmul.f32.gmra.mxu2 %v7475_v7  ;;  %v5208_v25 = vld [vmem:[%s8579_s0 + $0x138] sm:$0xff] }
 0x33a   :  { %v2454_v7 = vrot.slane %v5208_v25, 2  ;;  %v3443_v0 = vsel %vm222_vm0, %v3441_v55, %v3442_v34 }
 0x33b   :  { %v4425_v2 = vadd.f32 %v7466_v62, %v4357_v49  ;;  %3705 = vmatmul.f32.gmra.mxu3 %v3440_v14  ;;  %v4172_v31 = vpop.f32.mrf.mxu0  ;;  %v4955_v49 = vld [vmem:[%s8579_s0 + $0x130] sm:$0x3] }
 0x33c   :  { %v3048_v35 = vpop.f32.mrf.mxu2  ;;  %v7543_v41 = vsel %vm882_vm1, %v2454_v7, %v2455_v59 }
 0x33d   :  { %vm4489_vm4 = vcmp.gt.f32.partialorder %v4425_v2, 0.0  ;;  %v4553_v40 = vmul.f32 0.1, %v4425_v2  ;;  %v3234_v52 = vadd.f32 %v3048_v35, %v2847_v21  ;;  %v5210_v21 = vld [vmem:[%s8579_s0 + $0x118] sm:$0x3] }
 0x33e   :  { %v2664_v30 = vpop.f32.mrf.mxu1  ;;  %v3658_v29 = vpop.f32.mrf.mxu3  ;;  %4219 = vmatmul.f32.gmra.mxu0 %v3954_v43 }
 0x33f   :  { %v4617_v36 = vsel %vm4489_vm4, %v4425_v2, %v4553_v40  ;;  %v3844_v58 = vadd.f32 %v3658_v29, %v3234_v52  ;;  %v2447_v2 = vrot.slane %v5210_v21, 2  ;;  %v2848_v43 = vadd.f32 %v2664_v30, %v6482_v22 }
 0x340   :  { %4681 = vst [vmem:[%s8581_s3 + $0x10] sm:$0xff] %v4617_v36  ;;  %v8698_v29 = vrot.slane %v7440_v50, 2  ;;  %v3958_v30 = vrot.slane %v4955_v49, 2  ;;  %v4957_v50 = vld [vmem:[%s8579_s0 + $0x140] sm:$0xff] }
 0x341   :  { %v4358_v14 = vadd.f32 %v4172_v31, %v3844_v58  ;;  %2711 = vmatmul.f32.gmra.mxu1 %v7447_v51  ;;  %3098 = vmatmul.f32.gmra.mxu2 %v4953_v44  ;;  %v3957_v31 = vsel %vm882_vm1, %v3955_v20, %v3956_v1  ;;  %v3444_v51 = vrot.slane %v4955_v49, 1 }
 0x342   :  { %v2448_v36 = vsel %vm882_vm1, %v8698_v29, %v2447_v2 }
 0x343   :  { %v4426_v25 = vadd.f32 %v7466_v62, %v4358_v14  ;;  %3708 = vmatmul.f32.gmra.mxu3 %v3443_v0  ;;  %v4175_v7 = vpop.f32.mrf.mxu0  ;;  %v3445_v20 = vsel %vm222_vm0, %v3442_v34, %v3444_v51  ;;  %v4956_v14 = vld [vmem:[%s8579_s0 + $0x138] sm:$0xff] }
 0x344   :  { %v3051_v35 = vpop.f32.mrf.mxu2  ;;  %v3960_v29 = vrot.slane %v4956_v14, 2 }
 0x345   :  { %vm4490_vm5 = vcmp.gt.f32.partialorder %v4426_v25, 0.0  ;;  %v4554_v44 = vmul.f32 0.1, %v4426_v25  ;;  %v3235_v55 = vadd.f32 %v3051_v35, %v2848_v43  ;;  %v3959_v43 = vsel %vm882_vm1, %v3956_v1, %v3958_v30 }
 0x346   :  { %v2667_v40 = vpop.f32.mrf.mxu1  ;;  %v3661_v52 = vpop.f32.mrf.mxu3  ;;  %4222 = vmatmul.f32.gmra.mxu0 %v3957_v31  ;;  %v3447_v35 = vrot.slane %v4957_v50, 1 }
 0x347   :  { %v4618_v58 = vsel %vm4490_vm5, %v4426_v25, %v4554_v44  ;;  %v3845_v22 = vadd.f32 %v3661_v52, %v3235_v55  ;;  %v2849_v21 = vadd.f32 %v2667_v40, %v6502_v8  ;;  %v7577_v25 = vld [vmem:[%s8579_s0 + $0x158] sm:$0xff]  ;;  %v3446_v8 = vrot.slane %v4956_v14, 1 }
 0x348   :  { %4682 = vst [vmem:[%s8581_s3 + $0x18] sm:$0xff] %v4618_v58 }
 0x349   :  { %v4359_v0 = vadd.f32 %v4175_v7, %v3845_v22  ;;  %2714 = vmatmul.f32.gmra.mxu1 %v2448_v36  ;;  %3101 = vmatmul.f32.gmra.mxu2 %v4954_v60  ;;  %v5211_v60 = vld [vmem:[%s8579_s0 + $0x150] sm:$0xff]  ;;  %v2460_v7 = vrot.slane %v7577_v25, 2  ;;  %v3961_v36 = vrot.slane %v4957_v50, 2  ;;  %v3448_v58 = vsel %vm222_vm0, %v3446_v8, %v3447_v35  ;;  %v4966_v25 = vld [vmem:[%s8579_s0 + $0x188] sm:$0xff] }
 0x34a   :  { %v2459_v34 = vrot.slane %v5211_v60, 2 }
 0x34b   :  { %v4427_v49 = vadd.f32 %v7466_v62, %v4359_v0  ;;  %3711 = vmatmul.f32.gmra.mxu3 %v3445_v20  ;;  %v4178_v2 = vpop.f32.mrf.mxu0  ;;  %v4958_v20 = vld [vmem:[%s8579_s0 + $0x148] sm:$0x3]  ;;  %v5213_v0 = vld [vmem:[%s8579_s0 + $0x130] sm:$0x3] }
 0x34c   :  { %v3054_v31 = vpop.f32.mrf.mxu2  ;;  %v7587_v22 = vsel %vm882_vm1, %v2459_v34, %v2460_v7 }
 0x34d   :  { %vm4491_vm6 = vcmp.gt.f32.partialorder %v4427_v49, 0.0  ;;  %v4555_v51 = vmul.f32 0.1, %v4427_v49  ;;  %v3236_v44 = vadd.f32 %v3054_v31, %v2849_v21  ;;  %v2452_v21 = vrot.slane %v5213_v0, 2 }
 0x34e   :  { %v2670_v55 = vpop.f32.mrf.mxu1  ;;  %v3664_v1 = vpop.f32.mrf.mxu3  ;;  %4225 = vmatmul.f32.gmra.mxu0 %v3959_v43 }
 0x34f   :  { %v4619_v40 = vsel %vm4491_vm6, %v4427_v49, %v4555_v51  ;;  %v3846_v52 = vadd.f32 %v3664_v1, %v3236_v44  ;;  %v2850_v49 = vadd.f32 %v2670_v55, %v6513_v24  ;;  %v8699_v44 = vrot.slane %v7486_v48, 2  ;;  %v4960_v48 = vld [vmem:[%s8579_s0 + $0x158] sm:$0xff] }
 0x350   :  { %4683 = vst [vmem:[%s8581_s3 + $0x20] sm:$0xff] %v4619_v40  ;;  %v3963_v55 = vrot.slane %v4958_v20, 2 }
 0x351   :  { %v4360_v30 = vadd.f32 %v4178_v2, %v3846_v52  ;;  %2717 = vmatmul.f32.gmra.mxu1 %v7498_v37  ;;  %3104 = vmatmul.f32.gmra.mxu2 %v4956_v14  ;;  %v3962_v2 = vsel %vm882_vm1, %v3960_v29, %v3961_v36  ;;  %v3449_v37 = vrot.slane %v4958_v20, 1  ;;  %v2453_v1 = vsel %vm882_vm1, %v8699_v44, %v2452_v21 }
 0x352   :  { %v3964_v21 = vsel %vm882_vm1, %v3961_v36, %v3963_v55  ;;  %v3966_v44 = vrot.slane %v4960_v48, 2  ;;  %v4961_v55 = vld [vmem:[%s8579_s0 + $0x160] sm:$0x3] }
 0x353   :  { %v4428_v43 = vadd.f32 %v7466_v62, %v4360_v30  ;;  %3714 = vmatmul.f32.gmra.mxu3 %v3448_v58  ;;  %v4181_v60 = vpop.f32.mrf.mxu0  ;;  %v3450_v52 = vsel %vm222_vm0, %v3447_v35, %v3449_v37  ;;  %v4959_v58 = vld [vmem:[%s8579_s0 + $0x150] sm:$0xff] }
 0x354   :  { %v3057_v34 = vpop.f32.mrf.mxu2 }
 0x355   :  { %vm4492_vm7 = vcmp.gt.f32.partialorder %v4428_v43, 0.0  ;;  %v4556_v14 = vmul.f32 0.1, %v4428_v43  ;;  %v3237_v31 = vadd.f32 %v3057_v34, %v2850_v49  ;;  %v7621_v49 = vld [vmem:[%s8579_s0 + $0x170] sm:$0xff] }
 0x356   :  { %v2673_v8 = vpop.f32.mrf.mxu1  ;;  %v3667_v51 = vpop.f32.mrf.mxu3  ;;  %4228 = vmatmul.f32.gmra.mxu0 %v3962_v2  ;;  %v3452_v2 = vrot.slane %v4960_v48, 1 }
 0x357   :  { %v4620_v40 = vsel %vm4492_vm7, %v4428_v43, %v4556_v14  ;;  %v3847_v24 = vadd.f32 %v3667_v51, %v3237_v31  ;;  %v2851_v30 = vadd.f32 %v2673_v8, %v6530_v57  ;;  %v2465_v43 = vrot.slane %v7621_v49, 2  ;;  %v4969_v49 = vld [vmem:[%s8579_s0 + $0x1a0] sm:$0xff] }
 0x358   :  { %4684 = vst [vmem:[%s8581_s3 + $0x28] sm:$0xff] %v4620_v40  ;;  %v3451_v57 = vrot.slane %v4959_v58, 1  ;;  %v3965_v51 = vrot.slane %v4959_v58, 2 }
 0x359   :  { %v4361_v29 = vadd.f32 %v4181_v60, %v3847_v24  ;;  %2720 = vmatmul.f32.gmra.mxu1 %v2453_v1  ;;  %3107 = vmatmul.f32.gmra.mxu2 %v4957_v50  ;;  %v5214_v50 = vld [vmem:[%s8579_s0 + $0x168] sm:$0xff] }
 0x35a   :  { %v2464_v35 = vrot.slane %v5214_v50, 2  ;;  %v3453_v1 = vsel %vm222_vm0, %v3451_v57, %v3452_v2 }
 0x35b   :  { %v4429_v20 = vadd.f32 %v7466_v62, %v4361_v29  ;;  %3717 = vmatmul.f32.gmra.mxu3 %v3450_v52  ;;  %v4184_v0 = vpop.f32.mrf.mxu0  ;;  %v5216_v52 = vld [vmem:[%s8579_s0 + $0x148] sm:$0x3] }
 0x35c   :  { %v3060_v60 = vpop.f32.mrf.mxu2  ;;  %v7631_v40 = vsel %vm882_vm1, %v2464_v35, %v2465_v43  ;;  %v2457_v29 = vrot.slane %v5216_v52, 2 }
 0x35d   :  { %vm4493_vm8 = vcmp.gt.f32.partialorder %v4429_v20, 0.0  ;;  %v4557_v34 = vmul.f32 0.1, %v4429_v20  ;;  %v3238_v37 = vadd.f32 %v3060_v60, %v2851_v30 }
 0x35e   :  { %v2676_v14 = vpop.f32.mrf.mxu1  ;;  %v3670_v36 = vpop.f32.mrf.mxu3  ;;  %4231 = vmatmul.f32.gmra.mxu0 %v3964_v21 }
 0x35f   :  { %v4621_v31 = vsel %vm4493_vm8, %v4429_v20, %v4557_v34  ;;  %v3848_v8 = vadd.f32 %v3670_v36, %v3238_v37  ;;  %v2852_v30 = vadd.f32 %v2676_v14, %v6550_v38  ;;  %v2458_v34 = vsel %vm882_vm1, %v2455_v59, %v2457_v29 }
 0x360   :  { %4685 = vst [vmem:[%s8581_s3 + $0x30] sm:$0xff] %v4621_v31  ;;  %v3968_v14 = vrot.slane %v4961_v55, 2 }
 0x361   :  { %v4362_v24 = vadd.f32 %v4184_v0, %v3848_v8  ;;  %2723 = vmatmul.f32.gmra.mxu1 %v7543_v41  ;;  %3110 = vmatmul.f32.gmra.mxu2 %v4959_v58  ;;  %v3967_v0 = vsel %vm882_vm1, %v3965_v51, %v3966_v44  ;;  %v3454_v41 = vrot.slane %v4961_v55, 1  ;;  %v4962_v8 = vld [vmem:[%s8579_s0 + $0x168] sm:$0xff] }
 0x362   :  { %v7665_v55 = vld [vmem:[%s8579_s0 + $0x188] sm:$0xff] }
 0x363   :  { %v4430_v20 = vadd.f32 %v7466_v62, %v4362_v24  ;;  %3720 = vmatmul.f32.gmra.mxu3 %v3453_v1  ;;  %v4187_v21 = vpop.f32.mrf.mxu0  ;;  %v3455_v36 = vsel %vm222_vm0, %v3452_v2, %v3454_v41  ;;  %v3969_v24 = vsel %vm882_vm1, %v3966_v44, %v3968_v14  ;;  %v2470_v52 = vrot.slane %v7665_v55, 2  ;;  %v4972_v55 = vld [vmem:[%s8579_s0 + $0x1e8] sm:$0xff] }
 0x364   :  { %v3063_v50 = vpop.f32.mrf.mxu2 }
 0x365   :  { %vm4494_vm9 = vcmp.gt.f32.partialorder %v4430_v20, 0.0  ;;  %v4558_v58 = vmul.f32 0.1, %v4430_v20  ;;  %v3239_v35 = vadd.f32 %v3063_v50, %v2852_v30  ;;  %v3457_v30 = vrot.slane %v4963_v26, 1 }
 0x366   :  { %v2679_v60 = vpop.f32.mrf.mxu1  ;;  %v3673_v57 = vpop.f32.mrf.mxu3  ;;  %4234 = vmatmul.f32.gmra.mxu0 %v3967_v0 }
 0x367   :  { %v4622_v37 = vsel %vm4494_vm9, %v4430_v20, %v4558_v58  ;;  %v3849_v38 = vadd.f32 %v3673_v57, %v3239_v35  ;;  %v2853_v59 = vadd.f32 %v2679_v60, %v6570_v42  ;;  %v3456_v42 = vrot.slane %v4962_v8, 1 }
 0x368   :  { %4686 = vst [vmem:[%s8581_s3 + $0x38] sm:$0xff] %v4622_v37  ;;  %v3970_v58 = vrot.slane %v4962_v8, 2  ;;  %v3971_v35 = vrot.slane %v4963_v26, 2  ;;  %v4964_v37 = vld [vmem:[%s8579_s0 + $0x178] sm:$0x3] }
 0x369   :  { %v4363_v31 = vadd.f32 %v4187_v21, %v3849_v38  ;;  %2726 = vmatmul.f32.gmra.mxu1 %v2458_v34  ;;  %3113 = vmatmul.f32.gmra.mxu2 %v4960_v48  ;;  %v5217_v48 = vld [vmem:[%s8579_s0 + $0x180] sm:$0xff]  ;;  %v3458_v60 = vsel %vm222_vm0, %v3456_v42, %v3457_v30 }
 0x36a   :  { %v2469_v2 = vrot.slane %v5217_v48, 2  ;;  %v5219_v38 = vld [vmem:[%s8579_s0 + $0x160] sm:$0x3] }
 0x36b   :  { %v4431_v51 = vadd.f32 %v7466_v62, %v4363_v31  ;;  %3723 = vmatmul.f32.gmra.mxu3 %v3455_v36  ;;  %v4190_v1 = vpop.f32.mrf.mxu0  ;;  %v2462_v14 = vrot.slane %v5219_v38, 2  ;;  %v3462_v38 = vrot.slane %v4966_v25, 1 }
 0x36c   :  { %v3066_v29 = vpop.f32.mrf.mxu2  ;;  %v7675_v57 = vsel %vm882_vm1, %v2469_v2, %v2470_v52 }
 0x36d   :  { %vm4495_vm10 = vcmp.gt.f32.partialorder %v4431_v51, 0.0  ;;  %v4559_v20 = vmul.f32 0.1, %v4431_v51  ;;  %v3240_v21 = vadd.f32 %v3066_v29, %v2853_v59  ;;  %v2463_v29 = vsel %vm882_vm1, %v2460_v7, %v2462_v14 }
 0x36e   :  { %v2682_v0 = vpop.f32.mrf.mxu1  ;;  %v3676_v44 = vpop.f32.mrf.mxu3  ;;  %4237 = vmatmul.f32.gmra.mxu0 %v3969_v24 }
 0x36f   :  { %v4623_v50 = vsel %vm4495_vm10, %v4431_v51, %v4559_v20  ;;  %v3850_v41 = vadd.f32 %v3676_v44, %v3240_v21  ;;  %v2854_v36 = vadd.f32 %v2682_v0, %v6581_v17  ;;  %v3972_v51 = vsel %vm882_vm1, %v3970_v58, %v3971_v35  ;;  %v4965_v44 = vld [vmem:[%s8579_s0 + $0x180] sm:$0xff] }
 0x370   :  { %4687 = vst [vmem:[%s8581_s3 + $0x40] sm:$0xff] %v4623_v50  ;;  %v3973_v20 = vrot.slane %v4964_v37, 2 }
 0x371   :  { %v4364_v34 = vadd.f32 %v4190_v1, %v3850_v41  ;;  %2729 = vmatmul.f32.gmra.mxu1 %v7587_v22  ;;  %3116 = vmatmul.f32.gmra.mxu2 %v4962_v8  ;;  %v3459_v22 = vrot.slane %v4964_v37, 1 }
 0x372   :  { %v3974_v58 = vsel %vm882_vm1, %v3971_v35, %v3973_v20 }
 0x373   :  { %v4432_v31 = vadd.f32 %v7466_v62, %v4364_v34  ;;  %3726 = vmatmul.f32.gmra.mxu3 %v3458_v60  ;;  %v4193_v59 = vpop.f32.mrf.mxu0  ;;  %v3460_v21 = vsel %vm222_vm0, %v3457_v30, %v3459_v22  ;;  %v7709_v60 = vld [vmem:[%s8579_s0 + $0x1d0] sm:$0xff]  ;;  %v3976_v22 = vrot.slane %v4966_v25, 2 }
 0x374   :  { %v3069_v1 = vpop.f32.mrf.mxu2  ;;  %v2475_v34 = vrot.slane %v7709_v60, 2  ;;  %v4975_v60 = vld [vmem:[%s8579_s0 + $0x200] sm:$0xff] }
 0x375   :  { %vm4496_vm11 = vcmp.gt.f32.partialorder %v4432_v31, 0.0  ;;  %v4560_v8 = vmul.f32 0.1, %v4432_v31  ;;  %v3241_v24 = vadd.f32 %v3069_v1, %v2854_v36  ;;  %v3975_v1 = vrot.slane %v4965_v44, 2 }
 0x376   :  { %v2685_v48 = vpop.f32.mrf.mxu1  ;;  %v3679_v2 = vpop.f32.mrf.mxu3  ;;  %4240 = vmatmul.f32.gmra.mxu0 %v3972_v51 }
 0x377   :  { %v4624_v42 = vsel %vm4496_vm11, %v4432_v31, %v4560_v8  ;;  %v3851_v17 = vadd.f32 %v3679_v2, %v3241_v24  ;;  %v2855_v7 = vadd.f32 %v2685_v48, %v6598_v15  ;;  %v3461_v15 = vrot.slane %v4965_v44, 1  ;;  %v4967_v2 = vld [vmem:[%s8579_s0 + $0x190] sm:$0x3] }
 0x378   :  { %4688 = vst [vmem:[%s8581_s3 + $0x48] sm:$0xff] %v4624_v42 }
 0x379   :  { %v4365_v0 = vadd.f32 %v4193_v59, %v3851_v17  ;;  %2732 = vmatmul.f32.gmra.mxu1 %v2463_v29  ;;  %3119 = vmatmul.f32.gmra.mxu2 %v4963_v26  ;;  %v5220_v26 = vld [vmem:[%s8579_s0 + $0x1c8] sm:$0xff]  ;;  %v3463_v8 = vsel %vm222_vm0, %v3461_v15, %v3462_v38  ;;  %v5222_v29 = vld [vmem:[%s8579_s0 + $0x178] sm:$0x3] }
 0x37a   :  { %v2474_v30 = vrot.slane %v5220_v26, 2  ;;  %v2467_v42 = vrot.slane %v5222_v29, 2 }
 0x37b   :  { %v4433_v50 = vadd.f32 %v7466_v62, %v4365_v0  ;;  %3729 = vmatmul.f32.gmra.mxu3 %v3460_v21  ;;  %v4196_v41 = vpop.f32.mrf.mxu0  ;;  %v3977_v0 = vsel %vm882_vm1, %v3975_v1, %v3976_v22 }
 0x37c   :  { %v3072_v37 = vpop.f32.mrf.mxu2  ;;  %v7719_v24 = vsel %vm882_vm1, %v2474_v30, %v2475_v34  ;;  %v2468_v26 = vsel %vm882_vm1, %v2465_v43, %v2467_v42 }
 0x37d   :  { %vm4497_vm12 = vcmp.gt.f32.partialorder %v4433_v50, 0.0  ;;  %v4561_v14 = vmul.f32 0.1, %v4433_v50  ;;  %v3242_v36 = vadd.f32 %v3072_v37, %v2855_v7  ;;  %v3978_v37 = vrot.slane %v4967_v2, 2 }
 0x37e   :  { %v2688_v31 = vpop.f32.mrf.mxu1  ;;  %v3682_v35 = vpop.f32.mrf.mxu3  ;;  %4243 = vmatmul.f32.gmra.mxu0 %v3974_v58 }
 0x37f   :  { %v4625_v59 = vsel %vm4497_vm12, %v4433_v50, %v4561_v14  ;;  %v3852_v51 = vadd.f32 %v3682_v35, %v3242_v36  ;;  %v2856_v17 = vadd.f32 %v2688_v31, %v6618_v61  ;;  %v4968_v36 = vld [vmem:[%s8579_s0 + $0x198] sm:$0xff] }
 0x380   :  { %4689 = vst [vmem:[%s8581_s3 + $0x50] sm:$0xff] %v4625_v59  ;;  %v3979_v59 = vsel %vm882_vm1, %v3976_v22, %v3978_v37 }
 0x381   :  { %v4366_v48 = vadd.f32 %v4196_v41, %v3852_v51  ;;  %2735 = vmatmul.f32.gmra.mxu1 %v7631_v40  ;;  %3122 = vmatmul.f32.gmra.mxu2 %v4965_v44  ;;  %v3464_v40 = vrot.slane %v4967_v2, 1  ;;  %v7753_v51 = vld [vmem:[%s8579_s0 + $0x1e8] sm:$0xff] }
 0x382   :  { %v2480_v1 = vrot.slane %v7753_v51, 2  ;;  %v7876_v51 = vld [vmem:[%s8579_s0 + $0x218] sm:$0xff] }
 0x383   :  { %v4434_v20 = vadd.f32 %v7466_v62, %v4366_v48  ;;  %3732 = vmatmul.f32.gmra.mxu3 %v3463_v8  ;;  %v4199_v21 = vpop.f32.mrf.mxu0  ;;  %v3465_v15 = vsel %vm222_vm0, %v3462_v38, %v3464_v40  ;;  %v3467_v48 = vrot.slane %v4969_v49, 1 }
 0x384   :  { %v3075_v7 = vpop.f32.mrf.mxu2 }
 0x385   :  { %vm4498_vm13 = vcmp.gt.f32.partialorder %v4434_v20, 0.0  ;;  %v4562_v44 = vmul.f32 0.1, %v4434_v20  ;;  %v3243_v50 = vadd.f32 %v3075_v7, %v2856_v17 }
 0x386   :  { %v2691_v41 = vpop.f32.mrf.mxu1  ;;  %v3685_v58 = vpop.f32.mrf.mxu3  ;;  %4246 = vmatmul.f32.gmra.mxu0 %v3977_v0  ;;  %v3981_v0 = vrot.slane %v4969_v49, 2 }
 0x387   :  { %v4626_v30 = vsel %vm4498_vm13, %v4434_v20, %v4562_v44  ;;  %v3853_v61 = vadd.f32 %v3685_v58, %v3243_v50  ;;  %v2857_v43 = vadd.f32 %v2691_v41, %v6638_v47  ;;  %v3466_v47 = vrot.slane %v4968_v36, 1  ;;  %v4970_v50 = vld [vmem:[%s8579_s0 + $0x1a8] sm:$0x3]  ;;  %v5225_v41 = vld [vmem:[%s8579_s0 + $0x190] sm:$0x3] }
 0x388   :  { %4690 = vst [vmem:[%s8581_s3 + $0x58] sm:$0xff] %v4626_v30  ;;  %v2472_v58 = vrot.slane %v5225_v41, 2 }
 0x389   :  { %v4367_v14 = vadd.f32 %v4199_v21, %v3853_v61  ;;  %2738 = vmatmul.f32.gmra.mxu1 %v2468_v26  ;;  %3125 = vmatmul.f32.gmra.mxu2 %v4966_v25  ;;  %v5223_v25 = vld [vmem:[%s8579_s0 + $0x1e0] sm:$0xff]  ;;  %v3980_v21 = vrot.slane %v4968_v36, 2  ;;  %v3468_v7 = vsel %vm222_vm0, %v3466_v47, %v3467_v48 }
 0x38a   :  { %v2479_v38 = vrot.slane %v5223_v25, 2  ;;  %v3983_v25 = vrot.slane %v4970_v50, 2  ;;  %v4971_v47 = vld [vmem:[%s8579_s0 + $0x1e0] sm:$0xff] }
 0x38b   :  { %v4435_v31 = vadd.f32 %v7466_v62, %v4367_v14  ;;  %3735 = vmatmul.f32.gmra.mxu3 %v3465_v15  ;;  %v4202_v35 = vpop.f32.mrf.mxu0  ;;  %v3982_v37 = vsel %vm882_vm1, %v3980_v21, %v3981_v0  ;;  %v3472_v21 = vrot.slane %v4972_v55, 1 }
 0x38c   :  { %v3078_v8 = vpop.f32.mrf.mxu2  ;;  %v7763_v40 = vsel %vm882_vm1, %v2479_v38, %v2480_v1 }
 0x38d   :  { %vm4499_vm14 = vcmp.gt.f32.partialorder %v4435_v31, 0.0  ;;  %v4563_v2 = vmul.f32 0.1, %v4435_v31  ;;  %v3244_v29 = vadd.f32 %v3078_v8, %v2857_v43 }
 0x38e   :  { %v2694_v42 = vpop.f32.mrf.mxu1  ;;  %v3688_v22 = vpop.f32.mrf.mxu3  ;;  %4249 = vmatmul.f32.gmra.mxu0 %v3979_v59 }
 0x38f   :  { %v4627_v17 = vsel %vm4499_vm14, %v4435_v31, %v4563_v2  ;;  %v3854_v20 = vadd.f32 %v3688_v22, %v3244_v29  ;;  %v2858_v26 = vadd.f32 %v2694_v42, %v6649_v27  ;;  %v3984_v42 = vsel %vm882_vm1, %v3981_v0, %v3983_v25  ;;  %v7797_v22 = vld [vmem:[%s8579_s0 + $0x200] sm:$0xff] }
 0x390   :  { %4691 = vst [vmem:[%s8581_s3 + $0x60] sm:$0xff] %v4627_v17  ;;  %v2485_v17 = vrot.slane %v7797_v22, 2  ;;  %v4980_v22 = vld [vmem:[%s8579_s0 + $0x228] sm:$0xff] }
 0x391   :  { %v4368_v44 = vadd.f32 %v4202_v35, %v3854_v20  ;;  %2741 = vmatmul.f32.gmra.mxu1 %v7675_v57  ;;  %3128 = vmatmul.f32.gmra.mxu2 %v4968_v36  ;;  %v3469_v57 = vrot.slane %v4970_v50, 1  ;;  %v2473_v35 = vsel %vm882_vm1, %v2470_v52, %v2472_v58 }
 0x393   :  { %v4436_v30 = vadd.f32 %v7466_v62, %v4368_v44  ;;  %3738 = vmatmul.f32.gmra.mxu3 %v3468_v7  ;;  %v4205_v61 = vpop.f32.mrf.mxu0  ;;  %v3470_v38 = vsel %vm222_vm0, %v3467_v48, %v3469_v57  ;;  %v4973_v57 = vld [vmem:[%s8579_s0 + $0x1f0] sm:$0x3] }
 0x394   :  { %v3081_v15 = vpop.f32.mrf.mxu2 }
 0x395   :  { %vm4500_vm15 = vcmp.gt.f32.partialorder %v4436_v30, 0.0  ;;  %v4564_v14 = vmul.f32 0.1, %v4436_v30  ;;  %v3245_v36 = vadd.f32 %v3081_v15, %v2858_v26  ;;  %v3985_v26 = vrot.slane %v4971_v47, 2 }
 0x396   :  { %v2697_v43 = vpop.f32.mrf.mxu1  ;;  %v3691_v31 = vpop.f32.mrf.mxu3  ;;  %4252 = vmatmul.f32.gmra.mxu0 %v3982_v37 }
 0x397   :  { %v4628_v59 = vsel %vm4500_vm15, %v4436_v30, %v4564_v14  ;;  %v3855_v27 = vadd.f32 %v3691_v31, %v3245_v36  ;;  %v2859_v52 = vadd.f32 %v2697_v43, %v6666_v9  ;;  %v3471_v9 = vrot.slane %v4971_v47, 1  ;;  %v5228_v14 = vld [vmem:[%s8579_s0 + $0x1d8] sm:$0x3] }
 0x398   :  { %4692 = vst [vmem:[%s8581_s3 + $0x68] sm:$0xff] %v4628_v59  ;;  %v3986_v30 = vrot.slane %v4972_v55, 2  ;;  %v2477_v36 = vrot.slane %v5228_v14, 2 }
 0x399   :  { %v4369_v8 = vadd.f32 %v4205_v61, %v3855_v27  ;;  %2744 = vmatmul.f32.gmra.mxu1 %v2473_v35  ;;  %3131 = vmatmul.f32.gmra.mxu2 %v4969_v49  ;;  %v5226_v49 = vld [vmem:[%s8579_s0 + $0x1f8] sm:$0xff]  ;;  %v3473_v61 = vsel %vm222_vm0, %v3471_v9, %v3472_v21 }
 0x39a   :  { %v2484_v48 = vrot.slane %v5226_v49, 2  ;;  %v3987_v59 = vsel %vm882_vm1, %v3985_v26, %v3986_v30 }
 0x39b   :  { %v4437_v2 = vadd.f32 %v7466_v62, %v4369_v8  ;;  %3741 = vmatmul.f32.gmra.mxu3 %v3470_v38  ;;  %v4208_v29 = vpop.f32.mrf.mxu0 }
 0x39c   :  { %v3084_v20 = vpop.f32.mrf.mxu2  ;;  %v7807_v37 = vsel %vm882_vm1, %v2484_v48, %v2485_v17  ;;  %v4974_v48 = vld [vmem:[%s8579_s0 + $0x1f8] sm:$0xff] }
 0x39d   :  { %vm4501_vm2 = vcmp.gt.f32.partialorder %v4437_v2, 0.0  ;;  %v4565_v7 = vmul.f32 0.1, %v4437_v2  ;;  %v3246_v44 = vadd.f32 %v3084_v20, %v2859_v52  ;;  %v2478_v52 = vsel %vm882_vm1, %v2475_v34, %v2477_v36 }
 0x39e   :  { %v2700_v50 = vpop.f32.mrf.mxu1  ;;  %v3694_v0 = vpop.f32.mrf.mxu3  ;;  %4255 = vmatmul.f32.gmra.mxu0 %v3984_v42  ;;  %v3990_v14 = vrot.slane %v4974_v48, 2  ;;  %v3991_v36 = vrot.slane %v4975_v60, 2 }
 0x39f   :  { %v4629_v41 = vsel %vm4501_vm2, %v4437_v2, %v4565_v7  ;;  %v3856_v58 = vadd.f32 %v3694_v0, %v3246_v44  ;;  %v2860_v43 = vadd.f32 %v2700_v50, %v6686_v5  ;;  %v7841_v44 = vld [vmem:[%s8579_s0 + $0x218] sm:$0xff] }
 0x3a0   :  { %4693 = vst [vmem:[%s8581_s3 + $0x70] sm:$0xff] %v4629_v41  ;;  %v2490_v50 = vrot.slane %v7841_v44, 2  ;;  %v3477_v41 = vrot.slane %v4975_v60, 1  ;;  %v4983_v44 = vld [vmem:[%s8579_s0 + $0x240] sm:$0xff] }
 0x3a1   :  { %v4370_v15 = vadd.f32 %v4208_v29, %v3856_v58  ;;  %2747 = vmatmul.f32.gmra.mxu1 %v7719_v24  ;;  %3134 = vmatmul.f32.gmra.mxu2 %v4971_v47  ;;  %v3474_v24 = vrot.slane %v4973_v57, 1  ;;  %v3988_v29 = vrot.slane %v4973_v57, 2 }
 0x3a3   :  { %v4438_v31 = vadd.f32 %v7466_v62, %v4370_v15  ;;  %3744 = vmatmul.f32.gmra.mxu3 %v3473_v61  ;;  %v4211_v35 = vpop.f32.mrf.mxu0  ;;  %v3475_v42 = vsel %vm222_vm0, %v3472_v21, %v3474_v24  ;;  %v3989_v7 = vsel %vm882_vm1, %v3986_v30, %v3988_v29 }
 0x3a4   :  { %v3087_v27 = vpop.f32.mrf.mxu2 }
 0x3a5   :  { %vm4502_vm3 = vcmp.gt.f32.partialorder %v4438_v31, 0.0  ;;  %v4566_v25 = vmul.f32 0.1, %v4438_v31  ;;  %v3247_v38 = vadd.f32 %v3087_v27, %v2860_v43  ;;  %v5231_v27 = vld [vmem:[%s8579_s0 + $0x1f0] sm:$0x3] }
 0x3a6   :  { %v2703_v8 = vpop.f32.mrf.mxu1  ;;  %v3697_v47 = vpop.f32.mrf.mxu3  ;;  %4258 = vmatmul.f32.gmra.mxu0 %v3987_v59  ;;  %v4976_v59 = vld [vmem:[%s8579_s0 + $0x208] sm:$0x3]  ;;  %v2482_v24 = vrot.slane %v5231_v27, 2 }
 0x3a7   :  { %v4630_v2 = vsel %vm4502_vm3, %v4438_v31, %v4566_v25  ;;  %v3857_v5 = vadd.f32 %v3697_v47, %v3247_v38  ;;  %v2861_v34 = vadd.f32 %v2703_v8, %v6706_v32  ;;  %v3476_v32 = vrot.slane %v4974_v48, 1 }
 0x3a8   :  { %4694 = vst [vmem:[%s8581_s3 + $0x78] sm:$0xff] %v4630_v2  ;;  %v3992_v47 = vsel %vm882_vm1, %v3990_v14, %v3991_v36 }
 0x3a9   :  { %v4371_v49 = vadd.f32 %v4211_v35, %v3857_v5  ;;  %2750 = vmatmul.f32.gmra.mxu1 %v2478_v52  ;;  %3137 = vmatmul.f32.gmra.mxu2 %v4972_v55  ;;  %v5229_v55 = vld [vmem:[%s8579_s0 + $0x210] sm:$0xff]  ;;  %v3478_v43 = vsel %vm222_vm0, %v3476_v32, %v3477_v41 }
 0x3aa   :  { %v2489_v21 = vrot.slane %v5229_v55, 2 }
 0x3ab   :  { %v4439_v20 = vadd.f32 %v7466_v62, %v4371_v49  ;;  %3747 = vmatmul.f32.gmra.mxu3 %v3475_v42  ;;  %v4214_v9 = vpop.f32.mrf.mxu0  ;;  %v2483_v49 = vsel %vm882_vm1, %v2480_v1, %v2482_v24 }
 0x3ac   :  { %v3090_v0 = vpop.f32.mrf.mxu2  ;;  %v7851_v31 = vsel %vm882_vm1, %v2489_v21, %v2490_v50 }
 0x3ad   :  { %vm4503_vm4 = vcmp.gt.f32.partialorder %v4439_v20, 0.0  ;;  %v4567_v58 = vmul.f32 0.1, %v4439_v20  ;;  %v3248_v26 = vadd.f32 %v3090_v0, %v2861_v34  ;;  %v3993_v34 = vrot.slane %v4976_v59, 2 }
 0x3ae   :  { %v2706_v61 = vpop.f32.mrf.mxu1  ;;  %v3700_v30 = vpop.f32.mrf.mxu3  ;;  %4261 = vmatmul.f32.gmra.mxu0 %v3989_v7  ;;  %v4977_v7 = vld [vmem:[%s8579_s0 + $0x210] sm:$0xff] }
 0x3af   :  { %v4631_v15 = vsel %vm4503_vm4, %v4439_v20, %v4567_v58  ;;  %v3858_v57 = vadd.f32 %v3700_v30, %v3248_v26  ;;  %v2862_v25 = vadd.f32 %v2706_v61, %v6717_v45  ;;  %v3994_v0 = vsel %vm882_vm1, %v3991_v36, %v3993_v34 }
 0x3b0   :  { %4695 = vst [vmem:[%s8581_s3 + $0x80] sm:$0xff] %v4631_v15  ;;  %v3482_v61 = vrot.slane %v7876_v51, 1 }
 0x3b1   :  { %v4372_v35 = vadd.f32 %v4214_v9, %v3858_v57  ;;  %2753 = vmatmul.f32.gmra.mxu1 %v7763_v40  ;;  %3140 = vmatmul.f32.gmra.mxu2 %v4974_v48  ;;  %v3479_v40 = vrot.slane %v4976_v59, 1  ;;  %v3996_v59 = vrot.slane %v7876_v51, 2 }
 0x3b3   :  { %v4440_v38 = vadd.f32 %v7466_v62, %v4372_v35  ;;  %3750 = vmatmul.f32.gmra.mxu3 %v3478_v43  ;;  %v4217_v8 = vpop.f32.mrf.mxu0  ;;  %v3480_v20 = vsel %vm222_vm0, %v3477_v41, %v3479_v40  ;;  %v7887_v41 = vld [vmem:[%s8579_s0 + $0x230] sm:$0xff]  ;;  %v3995_v35 = vrot.slane %v4977_v7, 2 }
 0x3b4   :  { %v3093_v52 = vpop.f32.mrf.mxu2  ;;  %v2495_v58 = vrot.slane %v7887_v41, 2  ;;  %v4987_v41 = vld [vmem:[%s8579_s0 + $0x260] sm:$0xff] }
 0x3b5   :  { %vm4504_vm5 = vcmp.gt.f32.partialorder %v4440_v38, 0.0  ;;  %v4568_v2 = vmul.f32 0.1, %v4440_v38  ;;  %v3249_v5 = vadd.f32 %v3093_v52, %v2862_v25 }
 0x3b6   :  { %v2709_v29 = vpop.f32.mrf.mxu1  ;;  %v3703_v42 = vpop.f32.mrf.mxu3  ;;  %4264 = vmatmul.f32.gmra.mxu0 %v3992_v47 }
 0x3b7   :  { %v4632_v48 = vsel %vm4504_vm5, %v4440_v38, %v4568_v2  ;;  %v3859_v45 = vadd.f32 %v3703_v42, %v3249_v5  ;;  %v2863_v1 = vadd.f32 %v2709_v29, %v6734_v39  ;;  %v3481_v39 = vrot.slane %v4977_v7, 1  ;;  %v4979_v38 = vld [vmem:[%s8579_s0 + $0x220] sm:$0x3] }
 0x3b8   :  { %4696 = vst [vmem:[%s8581_s3 + $0x88] sm:$0xff] %v4632_v48  ;;  %v3997_v5 = vsel %vm882_vm1, %v3995_v35, %v3996_v59 }
 0x3b9   :  { %v4373_v9 = vadd.f32 %v4217_v8, %v3859_v45  ;;  %2756 = vmatmul.f32.gmra.mxu1 %v2483_v49  ;;  %3143 = vmatmul.f32.gmra.mxu2 %v4975_v60  ;;  %v5232_v60 = vld [vmem:[%s8579_s0 + $0x228] sm:$0xff]  ;;  %v3483_v27 = vsel %vm222_vm0, %v3481_v39, %v3482_v61 }
 0x3ba   :  { %v2494_v32 = vrot.slane %v5232_v60, 2  ;;  %v5234_v8 = vld [vmem:[%s8579_s0 + $0x208] sm:$0x3]  ;;  %v5236_v60 = vld [vmem:[%s8579_s0 + $0x240] sm:$0xff] }
 0x3bb   :  { %v4441_v55 = vadd.f32 %v7466_v62, %v4373_v9  ;;  %3753 = vmatmul.f32.gmra.mxu3 %v3480_v20  ;;  %v4220_v21 = vpop.f32.mrf.mxu0  ;;  %v2487_v47 = vrot.slane %v5234_v8, 2  ;;  %v3998_v9 = vrot.slane %v4979_v38, 2 }
 0x3bc   :  { %v3096_v26 = vpop.f32.mrf.mxu2  ;;  %v7899_v24 = vsel %vm882_vm1, %v2494_v32, %v2495_v58  ;;  %v2499_v32 = vrot.slane %v5236_v60, 2  ;;  %v7988_v60 = vld [vmem:[%s8579_s0 + $0x260] sm:$0xff] }
 0x3bd   :  { %vm4505_vm6 = vcmp.gt.f32.partialorder %v4441_v55, 0.0  ;;  %v4569_v30 = vmul.f32 0.1, %v4441_v55  ;;  %v3250_v15 = vadd.f32 %v3096_v26, %v2863_v1  ;;  %v2488_v34 = vsel %vm882_vm1, %v2485_v17, %v2487_v47  ;;  %v7925_v17 = vld [vmem:[%s8579_s0 + $0x230] sm:$0xff]  ;;  %v4982_v47 = vld [vmem:[%s8579_s0 + $0x238] sm:$0x3] }
 0x3be   :  { %v2712_v57 = vpop.f32.mrf.mxu1  ;;  %v3706_v14 = vpop.f32.mrf.mxu3  ;;  %4267 = vmatmul.f32.gmra.mxu0 %v3994_v0  ;;  %v3999_v0 = vsel %vm882_vm1, %v3996_v59, %v3998_v9  ;;  %v4000_v59 = vrot.slane %v4980_v22, 2  ;;  %v4003_v9 = vrot.slane %v4982_v47, 2 }
 0x3bf   :  { %v4633_v36 = vsel %vm4505_vm6, %v4441_v55, %v4569_v30  ;;  %v3860_v43 = vadd.f32 %v3706_v14, %v3250_v15  ;;  %v2864_v52 = vadd.f32 %v2712_v57, %v6754_v46  ;;  %v7931_v55 = vld [vmem:[%s8580_s2] ss:$0 sm:$0xff]  ;;  %v3487_v30 = vrot.slane %v7925_v17, 1 }
 0x3c0   :  { %4697 = vst [vmem:[%s8581_s3 + $0x90] sm:$0xff] %v4633_v36 }
 0x3c1   :  { %v4374_v25 = vadd.f32 %v4220_v21, %v3860_v43  ;;  %2759 = vmatmul.f32.gmra.mxu1 %v7807_v37  ;;  %3146 = vmatmul.f32.gmra.mxu2 %v4977_v7  ;;  %v3484_v37 = vrot.slane %v4979_v38, 1 }
 0x3c3   :  { %v4442_v40 = vadd.f32 %v7466_v62, %v4374_v25  ;;  %3756 = vmatmul.f32.gmra.mxu3 %v3483_v27  ;;  %v4223_v2 = vpop.f32.mrf.mxu0  ;;  %v3485_v62 = vsel %vm222_vm0, %v3482_v61, %v3484_v37  ;;  %v3486_v61 = vrot.slane %v4980_v22, 1  ;;  %v4001_v27 = vrot.slane %v7925_v17, 2 }
 0x3c4   :  { %v3099_v29 = vpop.f32.mrf.mxu2 }
 0x3c5   :  { %vm4506_vm7 = vcmp.gt.f32.partialorder %v4442_v40, 0.0  ;;  %v4570_v42 = vmul.f32 0.1, %v4442_v40  ;;  %v3251_v49 = vadd.f32 %v3099_v29, %v2864_v52  ;;  %v3488_v25 = vsel %vm222_vm0, %v3486_v61, %v3487_v30  ;;  %v5238_v52 = vld [vmem:[%s8579_s0 + $0x220] sm:$0x3] }
 0x3c6   :  { %v2715_v48 = vpop.f32.mrf.mxu1  ;;  %v3709_v45 = vpop.f32.mrf.mxu3  ;;  %4270 = vmatmul.f32.gmra.mxu0 %v3997_v5  ;;  %v4002_v37 = vsel %vm882_vm1, %v4000_v59, %v4001_v27 }
 0x3c7   :  { %v4634_v20 = vsel %vm4506_vm7, %v4442_v40, %v4570_v42  ;;  %v3861_v46 = vadd.f32 %v3709_v45, %v3251_v49  ;;  %v2865_v1 = vadd.f32 %v2715_v48, %v6774_v13  ;;  %v7941_v13 = vld [vmem:[%s8579_s0 + $0x248] sm:$0xff]  ;;  %v2492_v40 = vrot.slane %v5238_v52, 2  ;;  %v5241_v52 = vld [vmem:[%s8579_s0 + $0x238] sm:$0x3] }
 0x3c8   :  { %4698 = vst [vmem:[%s8581_s3 + $0x98] sm:$0xff] %v4634_v20  ;;  %v2500_v26 = vrot.slane %v7941_v13, 2  ;;  %v4990_v13 = vld [vmem:[%s8579_s0 + $0x278] sm:$0xff] }
 0x3c9   :  { %v4375_v7 = vadd.f32 %v4223_v2, %v3861_v46  ;;  %2762 = vmatmul.f32.gmra.mxu1 %v2488_v34  ;;  %3149 = vmatmul.f32.gmra.mxu2 %v7876_v51  ;;  %v2493_v20 = vsel %vm882_vm1, %v2490_v50, %v2492_v40  ;;  %v4984_v50 = vld [vmem:[%s8579_s0 + $0x248] sm:$0xff]  ;;  %v2497_v40 = vrot.slane %v5241_v52, 2 }
 0x3ca   :  { %v7953_v38 = vsel %vm882_vm1, %v2499_v32, %v2500_v26  ;;  %v2505_v32 = vrot.slane %v7988_v60, 2  ;;  %v3492_v61 = vrot.slane %v4984_v50, 1  ;;  %v4006_v59 = vrot.slane %v4984_v50, 2  ;;  %v4993_v60 = vld [vmem:[%s8579_s0 + $0x290] sm:$0xff] }
 0x3cb   :  { %v4443_v21 = vadd.f32 %v7931_v55, %v4375_v7  ;;  %3759 = vmatmul.f32.gmra.mxu3 %v3485_v62  ;;  %v4226_v51 = vpop.f32.mrf.mxu0 }
 0x3cc   :  { %v3102_v39 = vpop.f32.mrf.mxu2 }
 0x3cd   :  { %vm4507_vm8 = vcmp.gt.f32.partialorder %v4443_v21, 0.0  ;;  %v4571_v15 = vmul.f32 0.1, %v4443_v21  ;;  %v3252_v57 = vadd.f32 %v3102_v39, %v2865_v1 }
 0x3ce   :  { %v2718_v14 = vpop.f32.mrf.mxu1  ;;  %v3712_v36 = vpop.f32.mrf.mxu3  ;;  %4273 = vmatmul.f32.gmra.mxu0 %v3999_v0 }
 0x3cf   :  { %v4635_v43 = vsel %vm4507_vm8, %v4443_v21, %v4571_v15  ;;  %v3862_v35 = vadd.f32 %v3712_v36, %v3252_v57  ;;  %v2866_v2 = vadd.f32 %v2718_v14, %v6785_v23 }
 0x3d0   :  { %4699 = vst [vmem:[%s8581_s3 + $0xa0] sm:$0xff] %v4635_v43 }
 0x3d1   :  { %v4376_v8 = vadd.f32 %v4226_v51, %v3862_v35  ;;  %2765 = vmatmul.f32.gmra.mxu1 %v7851_v31  ;;  %3152 = vmatmul.f32.gmra.mxu2 %v4980_v22  ;;  %v3489_v31 = vrot.slane %v4982_v47, 1  ;;  %v4004_v51 = vsel %vm882_vm1, %v4001_v27, %v4003_v9  ;;  %v4005_v35 = vrot.slane %v4983_v44, 2  ;;  %v4985_v47 = vld [vmem:[%s8579_s0 + $0x250] sm:$0x3] }
 0x3d3   :  { %v4444_v5 = vadd.f32 %v7931_v55, %v4376_v8  ;;  %3762 = vmatmul.f32.gmra.mxu3 %v3488_v25  ;;  %v4229_v29 = vpop.f32.mrf.mxu0  ;;  %v3490_v62 = vsel %vm222_vm0, %v3487_v30, %v3489_v31 }
 0x3d4   :  { %v3105_v42 = vpop.f32.mrf.mxu2 }
 0x3d5   :  { %vm4508_vm9 = vcmp.gt.f32.partialorder %v4444_v5, 0.0  ;;  %v4572_v49 = vmul.f32 0.1, %v4444_v5  ;;  %v3253_v48 = vadd.f32 %v3105_v42, %v2866_v2 }
 0x3d6   :  { %v2721_v45 = vpop.f32.mrf.mxu1  ;;  %v3715_v34 = vpop.f32.mrf.mxu3  ;;  %4276 = vmatmul.f32.gmra.mxu0 %v4002_v37  ;;  %v4007_v37 = vsel %vm882_vm1, %v4005_v35, %v4006_v59 }
 0x3d7   :  { %v4636_v46 = vsel %vm4508_vm9, %v4444_v5, %v4572_v49  ;;  %v3863_v23 = vadd.f32 %v3715_v34, %v3253_v48  ;;  %v2867_v22 = vadd.f32 %v2721_v45, %v6802_v3  ;;  %v3491_v3 = vrot.slane %v4983_v44, 1 }
 0x3d8   :  { %4700 = vst [vmem:[%s8581_s3 + $0xa8] sm:$0xff] %v4636_v46  ;;  %v2498_v34 = vsel %vm882_vm1, %v2495_v58, %v2497_v40  ;;  %v4008_v46 = vrot.slane %v4985_v47, 2 }
 0x3d9   :  { %v4377_v7 = vadd.f32 %v4229_v29, %v3863_v23  ;;  %2768 = vmatmul.f32.gmra.mxu1 %v2493_v20  ;;  %3155 = vmatmul.f32.gmra.mxu2 %v7925_v17  ;;  %v5239_v17 = vld [vmem:[%s8579_s0 + $0x258] sm:$0xff]  ;;  %v3493_v27 = vsel %vm222_vm0, %v3491_v3, %v3492_v61 }
 0x3da   :  { %v2504_v0 = vrot.slane %v5239_v17, 2 }
 0x3db   :  { %v4445_v1 = vadd.f32 %v7931_v55, %v4377_v7  ;;  %3765 = vmatmul.f32.gmra.mxu3 %v3490_v62  ;;  %v4232_v21 = vpop.f32.mrf.mxu0  ;;  %v4986_v62 = vld [vmem:[%s8579_s0 + $0x258] sm:$0xff] }
 0x3dc   :  { %v3108_v39 = vpop.f32.mrf.mxu2  ;;  %v7998_v25 = vsel %vm882_vm1, %v2504_v0, %v2505_v32  ;;  %v3497_v0 = vrot.slane %v4987_v41, 1 }
 0x3dd   :  { %vm4509_vm10 = vcmp.gt.f32.partialorder %v4445_v1, 0.0  ;;  %v4573_v30 = vmul.f32 0.1, %v4445_v1  ;;  %v3254_v15 = vadd.f32 %v3108_v39, %v2867_v22  ;;  %v4009_v22 = vsel %vm882_vm1, %v4006_v59, %v4008_v46 }
 0x3de   :  { %v2724_v57 = vpop.f32.mrf.mxu1  ;;  %v3718_v14 = vpop.f32.mrf.mxu3  ;;  %4279 = vmatmul.f32.gmra.mxu0 %v4004_v51 }
 0x3df   :  { %v4637_v36 = vsel %vm4509_vm10, %v4445_v1, %v4573_v30  ;;  %v3864_v43 = vadd.f32 %v3718_v14, %v3254_v15  ;;  %v2868_v2 = vadd.f32 %v2724_v57, %v6822_v12  ;;  %v4010_v14 = vrot.slane %v4986_v62, 2 }
 0x3e0   :  { %4701 = vst [vmem:[%s8581_s3 + $0xb0] sm:$0xff] %v4637_v36  ;;  %v4011_v36 = vrot.slane %v4987_v41, 2 }
 0x3e1   :  { %v4378_v8 = vadd.f32 %v4232_v21, %v3864_v43  ;;  %2771 = vmatmul.f32.gmra.mxu1 %v7899_v24  ;;  %3158 = vmatmul.f32.gmra.mxu2 %v4983_v44  ;;  %v3494_v24 = vrot.slane %v4985_v47, 1  ;;  %v8032_v21 = vld [vmem:[%s8579_s0 + $0x278] sm:$0xff] }
 0x3e2   :  { %v2510_v51 = vrot.slane %v8032_v21, 2  ;;  %v4996_v21 = vld [vmem:[%s8579_s0 + $0x2a8] sm:$0xff] }
 0x3e3   :  { %v4446_v5 = vadd.f32 %v7931_v55, %v4378_v8  ;;  %3768 = vmatmul.f32.gmra.mxu3 %v3493_v27  ;;  %v4235_v29 = vpop.f32.mrf.mxu0  ;;  %v3495_v23 = vsel %vm222_vm0, %v3492_v61, %v3494_v24  ;;  %v4988_v27 = vld [vmem:[%s8579_s0 + $0x268] sm:$0x3]  ;;  %v5244_v8 = vld [vmem:[%s8579_s0 + $0x250] sm:$0x3] }
 0x3e4   :  { %v3111_v42 = vpop.f32.mrf.mxu2  ;;  %v2502_v47 = vrot.slane %v5244_v8, 2 }
 0x3e5   :  { %vm4510_vm11 = vcmp.gt.f32.partialorder %v4446_v5, 0.0  ;;  %v4574_v31 = vmul.f32 0.1, %v4446_v5  ;;  %v3255_v49 = vadd.f32 %v3111_v42, %v2868_v2 }
 0x3e6   :  { %v2727_v48 = vpop.f32.mrf.mxu1  ;;  %v3721_v45 = vpop.f32.mrf.mxu3  ;;  %4282 = vmatmul.f32.gmra.mxu0 %v4007_v37 }
 0x3e7   :  { %v4638_v20 = vsel %vm4510_vm11, %v4446_v5, %v4574_v31  ;;  %v3865_v12 = vadd.f32 %v3721_v45, %v3255_v49  ;;  %v2869_v58 = vadd.f32 %v2727_v48, %v6842_v54  ;;  %v3496_v54 = vrot.slane %v4986_v62, 1 }
 0x3e8   :  { %4702 = vst [vmem:[%s8581_s3 + $0xb8] sm:$0xff] %v4638_v20  ;;  %v4012_v5 = vsel %vm882_vm1, %v4010_v14, %v4011_v36  ;;  %v2503_v49 = vsel %vm882_vm1, %v2500_v26, %v2502_v47  ;;  %v4013_v45 = vrot.slane %v4988_v27, 2  ;;  %v4991_v14 = vld [vmem:[%s8579_s0 + $0x280] sm:$0x3] }
 0x3e9   :  { %v4379_v9 = vadd.f32 %v4235_v29, %v3865_v12  ;;  %2774 = vmatmul.f32.gmra.mxu1 %v2498_v34  ;;  %3161 = vmatmul.f32.gmra.mxu2 %v4984_v50  ;;  %v5242_v50 = vld [vmem:[%s8579_s0 + $0x270] sm:$0xff]  ;;  %v3498_v43 = vsel %vm222_vm0, %v3496_v54, %v3497_v0 }
 0x3ea   :  { %v2509_v1 = vrot.slane %v5242_v50, 2  ;;  %v4989_v12 = vld [vmem:[%s8579_s0 + $0x270] sm:$0xff] }
 0x3eb   :  { %v4447_v7 = vadd.f32 %v7931_v55, %v4379_v9  ;;  %3771 = vmatmul.f32.gmra.mxu3 %v3495_v23  ;;  %v4238_v44 = vpop.f32.mrf.mxu0  ;;  %v4014_v9 = vsel %vm882_vm1, %v4011_v36, %v4013_v45  ;;  %v5247_v36 = vld [vmem:[%s8579_s0 + $0x268] sm:$0x3] }
 0x3ec   :  { %v3114_v17 = vpop.f32.mrf.mxu2  ;;  %v8042_v35 = vsel %vm882_vm1, %v2509_v1, %v2510_v51 }
 0x3ed   :  { %vm4511_vm12 = vcmp.gt.f32.partialorder %v4447_v7, 0.0  ;;  %v4575_v39 = vmul.f32 0.1, %v4447_v7  ;;  %v3256_v3 = vadd.f32 %v3114_v17, %v2869_v58  ;;  %v8076_v58 = vld [vmem:[%s8579_s0 + $0x290] sm:$0xff] }
 0x3ee   :  { %v2730_v61 = vpop.f32.mrf.mxu1  ;;  %v3724_v30 = vpop.f32.mrf.mxu3  ;;  %4285 = vmatmul.f32.gmra.mxu0 %v4009_v22  ;;  %v3502_v22 = vrot.slane %v4990_v13, 1 }
 0x3ef   :  { %v4639_v15 = vsel %vm4511_vm12, %v4447_v7, %v4575_v39  ;;  %v3866_v57 = vadd.f32 %v3724_v30, %v3256_v3  ;;  %v2870_v52 = vadd.f32 %v2730_v61, %v6853_v10  ;;  %v2515_v7 = vrot.slane %v8076_v58, 2  ;;  %v4999_v58 = vld [vmem:[%s8579_s0 + $0x2c0] sm:$0xff] }
 0x3f0   :  { %4703 = vst [vmem:[%s8581_s3 + $0xc0] sm:$0xff] %v4639_v15  ;;  %v4015_v3 = vrot.slane %v4989_v12, 2  ;;  %v4016_v61 = vrot.slane %v4990_v13, 2 }
 0x3f1   :  { %v4380_v59 = vadd.f32 %v4238_v44, %v3866_v57  ;;  %2777 = vmatmul.f32.gmra.mxu1 %v7953_v38  ;;  %3164 = vmatmul.f32.gmra.mxu2 %v4986_v62  ;;  %v3499_v38 = vrot.slane %v4988_v27, 1  ;;  %v5245_v62 = vld [vmem:[%s8579_s0 + $0x288] sm:$0xff] }
 0x3f2   :  { %v4017_v47 = vsel %vm882_vm1, %v4015_v3, %v4016_v61 }
 0x3f3   :  { %v4448_v40 = vadd.f32 %v7931_v55, %v4380_v59  ;;  %3774 = vmatmul.f32.gmra.mxu3 %v3498_v43  ;;  %v4241_v2 = vpop.f32.mrf.mxu0  ;;  %v3500_v34 = vsel %vm222_vm0, %v3497_v0, %v3499_v38  ;;  %v2507_v43 = vrot.slane %v5247_v36, 2 }
 0x3f4   :  { %v3117_v29 = vpop.f32.mrf.mxu2 }
 0x3f5   :  { %vm4512_vm13 = vcmp.gt.f32.partialorder %v4448_v40, 0.0  ;;  %v4576_v37 = vmul.f32 0.1, %v4448_v40  ;;  %v3257_v42 = vadd.f32 %v3117_v29, %v2870_v52  ;;  %v2508_v38 = vsel %vm882_vm1, %v2505_v32, %v2507_v43 }
 0x3f6   :  { %v2733_v24 = vpop.f32.mrf.mxu1  ;;  %v3727_v31 = vpop.f32.mrf.mxu3  ;;  %4288 = vmatmul.f32.gmra.mxu0 %v4012_v5 }
 0x3f7   :  { %v4640_v48 = vsel %vm4512_vm13, %v4448_v40, %v4576_v37  ;;  %v3867_v10 = vadd.f32 %v3727_v31, %v3257_v42  ;;  %v2871_v26 = vadd.f32 %v2733_v24, %v6870_v6  ;;  %v3501_v6 = vrot.slane %v4989_v12, 1 }
 0x3f8   :  { %4704 = vst [vmem:[%s8581_s3 + $0xc8] sm:$0xff] %v4640_v48  ;;  %v4018_v42 = vrot.slane %v4991_v14, 2 }
 0x3f9   :  { %v4381_v20 = vadd.f32 %v4241_v2, %v3867_v10  ;;  %2780 = vmatmul.f32.gmra.mxu1 %v2503_v49  ;;  %3167 = vmatmul.f32.gmra.mxu2 %v4987_v41  ;;  %v2514_v41 = vrot.slane %v5245_v62, 2  ;;  %v3503_v30 = vsel %vm222_vm0, %v3501_v6, %v3502_v22  ;;  %v4992_v49 = vld [vmem:[%s8579_s0 + $0x288] sm:$0xff] }
 0x3fa   :  { %v4019_v45 = vsel %vm882_vm1, %v4016_v61, %v4018_v42 }
 0x3fb   :  { %v4449_v46 = vadd.f32 %v7931_v55, %v4381_v20  ;;  %3777 = vmatmul.f32.gmra.mxu3 %v3500_v34  ;;  %v4244_v23 = vpop.f32.mrf.mxu0  ;;  %v8086_v15 = vsel %vm882_vm1, %v2514_v41, %v2515_v7  ;;  %v5248_v34 = vld [vmem:[%s8579_s0 + $0x2a0] sm:$0xff] }
 0x3fc   :  { %v3120_v44 = vpop.f32.mrf.mxu2  ;;  %v2519_v20 = vrot.slane %v5248_v34, 2 }
 0x3fd   :  { %vm4513_vm14 = vcmp.gt.f32.partialorder %v4449_v46, 0.0  ;;  %v4577_v50 = vmul.f32 0.1, %v4449_v46  ;;  %v3258_v1 = vadd.f32 %v3120_v44, %v2871_v26 }
 0x3fe   :  { %v2736_v17 = vpop.f32.mrf.mxu1  ;;  %v3730_v54 = vpop.f32.mrf.mxu3  ;;  %4291 = vmatmul.f32.gmra.mxu0 %v4014_v9 }
 0x3ff   :  { %v4641_v0 = vsel %vm4513_vm14, %v4449_v46, %v4577_v50  ;;  %v3868_v39 = vadd.f32 %v3730_v54, %v3258_v1  ;;  %v2872_v59 = vadd.f32 %v2736_v17, %v6890_v28  ;;  %v3507_v46 = vrot.slane %v4993_v60, 1 }
 0x400   :  { %4705 = vst [vmem:[%s8581_s3 + $0xd0] sm:$0xff] %v4641_v0  ;;  %v4021_v50 = vrot.slane %v4993_v60, 2  ;;  %v4994_v0 = vld [vmem:[%s8579_s0 + $0x298] sm:$0x3] }
 0x401   :  { %v4382_v57 = vadd.f32 %v4244_v23, %v3868_v39  ;;  %2783 = vmatmul.f32.gmra.mxu1 %v7998_v25  ;;  %3170 = vmatmul.f32.gmra.mxu2 %v4989_v12  ;;  %v3504_v25 = vrot.slane %v4991_v14, 1  ;;  %v8120_v12 = vld [vmem:[%s8579_s0 + $0x2a8] sm:$0xff]  ;;  %v5250_v39 = vld [vmem:[%s8579_s0 + $0x280] sm:$0x3] }
 0x402   :  { %v2512_v3 = vrot.slane %v5250_v39, 2 }
 0x403   :  { %v4450_v27 = vadd.f32 %v7931_v55, %v4382_v57  ;;  %3780 = vmatmul.f32.gmra.mxu3 %v3503_v30  ;;  %v4247_v8 = vpop.f32.mrf.mxu0  ;;  %v3505_v24 = vsel %vm222_vm0, %v3502_v22, %v3504_v25  ;;  %v4020_v22 = vrot.slane %v4992_v49, 2  ;;  %v4023_v25 = vrot.slane %v4994_v0, 2 }
 0x404   :  { %v3123_v52 = vpop.f32.mrf.mxu2 }
 0x405   :  { %vm4514_vm15 = vcmp.gt.f32.partialorder %v4450_v27, 0.0  ;;  %v4578_v40 = vmul.f32 0.1, %v4450_v27  ;;  %v3259_v2 = vadd.f32 %v3123_v52, %v2872_v59  ;;  %v4022_v14 = vsel %vm882_vm1, %v4020_v22, %v4021_v50 }
 0x406   :  { %v2739_v5 = vpop.f32.mrf.mxu1  ;;  %v3733_v29 = vpop.f32.mrf.mxu3  ;;  %4294 = vmatmul.f32.gmra.mxu0 %v4017_v47  ;;  %v2513_v47 = vsel %vm882_vm1, %v2510_v51, %v2512_v3 }
 0x407   :  { %v4642_v37 = vsel %vm4514_vm15, %v4450_v27, %v4578_v40  ;;  %v3869_v28 = vadd.f32 %v3733_v29, %v3259_v2  ;;  %v2873_v32 = vadd.f32 %v2739_v5, %v6910_v11  ;;  %v3506_v11 = vrot.slane %v4992_v49, 1  ;;  %v4995_v5 = vld [vmem:[%s8579_s0 + $0x2a0] sm:$0xff] }
 0x408   :  { %4706 = vst [vmem:[%s8581_s3 + $0xd8] sm:$0xff] %v4642_v37  ;;  %v4024_v37 = vsel %vm882_vm1, %v4021_v50, %v4023_v25 }
 0x409   :  { %v4383_v31 = vadd.f32 %v4247_v8, %v3869_v28  ;;  %2786 = vmatmul.f32.gmra.mxu1 %v2508_v38  ;;  %3173 = vmatmul.f32.gmra.mxu2 %v4990_v13  ;;  %v2520_v13 = vrot.slane %v8120_v12, 2  ;;  %v3508_v1 = vsel %vm222_vm0, %v3506_v11, %v3507_v46  ;;  %v5251_v28 = vld [vmem:[%s8579_s0 + $0x2b8] sm:$0xff]  ;;  %v4026_v11 = vrot.slane %v4996_v21, 2 }
 0x40a   :  { %v2524_v42 = vrot.slane %v5251_v28, 2  ;;  %v5002_v12 = vld [vmem:[%s8579_s0 + $0x2d8] sm:$0xff] }
 0x40b   :  { %v4451_v48 = vadd.f32 %v7931_v55, %v4383_v31  ;;  %3783 = vmatmul.f32.gmra.mxu3 %v3505_v24  ;;  %v4250_v10 = vpop.f32.mrf.mxu0  ;;  %v8130_v17 = vsel %vm882_vm1, %v2519_v20, %v2520_v13  ;;  %v8164_v24 = vld [vmem:[%s8579_s0 + $0x2c0] sm:$0xff] }
 0x40c   :  { %v3126_v26 = vpop.f32.mrf.mxu2  ;;  %v2525_v31 = vrot.slane %v8164_v24, 2  ;;  %v5005_v24 = vld [vmem:[%s8579_s0 + $0x2f0] sm:$0xff] }
 0x40d   :  { %vm4515_vm2 = vcmp.gt.f32.partialorder %v4451_v48, 0.0  ;;  %v4579_v23 = vmul.f32 0.1, %v4451_v48  ;;  %v3260_v9 = vadd.f32 %v3126_v26, %v2873_v32  ;;  %v4025_v26 = vrot.slane %v4995_v5, 2 }
 0x40e   :  { %v2742_v62 = vpop.f32.mrf.mxu1  ;;  %v3736_v41 = vpop.f32.mrf.mxu3  ;;  %4297 = vmatmul.f32.gmra.mxu0 %v4019_v45 }
 0x40f   :  { %v4643_v44 = vsel %vm4515_vm2, %v4451_v48, %v4579_v23  ;;  %v3870_v6 = vadd.f32 %v3736_v41, %v3260_v9  ;;  %v2874_v61 = vadd.f32 %v2742_v62, %v6921_v16  ;;  %v8174_v23 = vsel %vm882_vm1, %v2524_v42, %v2525_v31  ;;  %v4997_v62 = vld [vmem:[%s8579_s0 + $0x2b0] sm:$0x3]  ;;  %v5253_v41 = vld [vmem:[%s8579_s0 + $0x298] sm:$0x3] }
 0x410   :  { %4707 = vst [vmem:[%s8581_s3 + $0xe0] sm:$0xff] %v4643_v44  ;;  %v2517_v44 = vrot.slane %v5253_v41, 2  ;;  %v4031_v42 = vrot.slane %v4999_v58, 2 }
 0x411   :  { %v4384_v54 = vadd.f32 %v4250_v10, %v3870_v6  ;;  %2789 = vmatmul.f32.gmra.mxu1 %v8042_v35  ;;  %3176 = vmatmul.f32.gmra.mxu2 %v4992_v49  ;;  %v3509_v35 = vrot.slane %v4994_v0, 1 }
 0x413   :  { %v4452_v30 = vadd.f32 %v7931_v55, %v4384_v54  ;;  %3786 = vmatmul.f32.gmra.mxu3 %v3508_v1  ;;  %v4253_v57 = vpop.f32.mrf.mxu0  ;;  %v3510_v40 = vsel %vm222_vm0, %v3507_v46, %v3509_v35  ;;  %v4027_v1 = vsel %vm882_vm1, %v4025_v26, %v4026_v11 }
 0x414   :  { %v3129_v36 = vpop.f32.mrf.mxu2 }
 0x415   :  { %vm4516_vm3 = vcmp.gt.f32.partialorder %v4452_v30, 0.0  ;;  %v4580_v43 = vmul.f32 0.1, %v4452_v30  ;;  %v3261_v59 = vadd.f32 %v3129_v36, %v2874_v61 }
 0x416   :  { %v2745_v27 = vpop.f32.mrf.mxu1  ;;  %v3739_v8 = vpop.f32.mrf.mxu3  ;;  %4300 = vmatmul.f32.gmra.mxu0 %v4022_v14  ;;  %v4028_v14 = vrot.slane %v4997_v62, 2 }
 0x417   :  { %v4644_v52 = vsel %vm4516_vm3, %v4452_v30, %v4580_v43  ;;  %v3871_v16 = vadd.f32 %v3739_v8, %v3261_v59  ;;  %v2875_v51 = vadd.f32 %v2745_v27, %v6938_v4  ;;  %v3511_v4 = vrot.slane %v4995_v5, 1  ;;  %v4998_v43 = vld [vmem:[%s8579_s0 + $0x2b8] sm:$0xff] }
 0x418   :  { %4708 = vst [vmem:[%s8581_s3 + $0xe8] sm:$0xff] %v4644_v52  ;;  %v2518_v30 = vsel %vm882_vm1, %v2515_v7, %v2517_v44  ;;  %v4029_v8 = vsel %vm882_vm1, %v4026_v11, %v4028_v14  ;;  %v4030_v28 = vrot.slane %v4998_v43, 2  ;;  %v3522_v14 = vrot.slane %v5002_v12, 1 }
 0x419   :  { %v4385_v2 = vadd.f32 %v4253_v57, %v3871_v16  ;;  %2792 = vmatmul.f32.gmra.mxu1 %v2513_v47  ;;  %3179 = vmatmul.f32.gmra.mxu2 %v4993_v60  ;;  %v3512_v60 = vrot.slane %v4996_v21, 1  ;;  %v5254_v47 = vld [vmem:[%s8579_s0 + $0x2d0] sm:$0xff]  ;;  %v8208_v16 = vld [vmem:[%s8579_s0 + $0x2d8] sm:$0xff] }
 0x41a   :  { %v2529_v52 = vrot.slane %v5254_v47, 2  ;;  %v2530_v25 = vrot.slane %v8208_v16, 2  ;;  %v4032_v26 = vsel %vm882_vm1, %v4030_v28, %v4031_v42  ;;  %v8331_v16 = vld [vmem:[%s8579_s0 + $0x308] sm:$0xff] }
 0x41b   :  { %v4453_v29 = vadd.f32 %v7931_v55, %v4385_v2  ;;  %3789 = vmatmul.f32.gmra.mxu3 %v3510_v40  ;;  %v4256_v38 = vpop.f32.mrf.mxu0  ;;  %v3513_v46 = vsel %vm222_vm0, %v3511_v4, %v3512_v60  ;;  %v3517_v2 = vrot.slane %v4999_v58, 1 }
 0x41c   :  { %v3132_v49 = vpop.f32.mrf.mxu2  ;;  %v8218_v4 = vsel %vm882_vm1, %v2529_v52, %v2530_v25 }
 0x41d   :  { %vm4517_vm4 = vcmp.gt.f32.partialorder %v4453_v29, 0.0  ;;  %v4581_v32 = vmul.f32 0.1, %v4453_v29  ;;  %v3262_v48 = vadd.f32 %v3132_v49, %v2875_v51 }
 0x41e   :  { %v2748_v10 = vpop.f32.mrf.mxu1  ;;  %v3742_v45 = vpop.f32.mrf.mxu3  ;;  %4303 = vmatmul.f32.gmra.mxu0 %v4024_v37 }
 0x41f   :  { %v4645_v34 = vsel %vm4517_vm4, %v4453_v29, %v4581_v32  ;;  %v3872_v20 = vadd.f32 %v3742_v45, %v3262_v48  ;;  %v2876_v6 = vadd.f32 %v2748_v10, %v6958_v63  ;;  %v5000_v32 = vld [vmem:[%s8579_s0 + $0x2c8] sm:$0x3]  ;;  %v5256_v48 = vld [vmem:[%s8579_s0 + $0x2b0] sm:$0x3] }
 0x420   :  { %4709 = vst [vmem:[%s8581_s3 + $0xf0] sm:$0xff] %v4645_v34  ;;  %v2522_v10 = vrot.slane %v5256_v48, 2 }
 0x421   :  { %v4386_v9 = vadd.f32 %v4256_v38, %v3872_v20  ;;  %2795 = vmatmul.f32.gmra.mxu1 %v8086_v15  ;;  %3182 = vmatmul.f32.gmra.mxu2 %v4995_v5  ;;  %v3514_v15 = vrot.slane %v4997_v62, 1 }
 0x422   :  { %v2523_v44 = vsel %vm882_vm1, %v2520_v13, %v2522_v10 }
 0x423   :  { %v4454_v22 = vadd.f32 %v7931_v55, %v4386_v9  ;;  %3792 = vmatmul.f32.gmra.mxu3 %v3513_v46  ;;  %v4259_v50 = vpop.f32.mrf.mxu0  ;;  %v3515_v36 = vsel %vm222_vm0, %v3512_v60, %v3514_v15 }
 0x424   :  { %v3135_v54 = vpop.f32.mrf.mxu2 }
 0x425   :  { %vm4518_vm5 = vcmp.gt.f32.partialorder %v4454_v22, 0.0  ;;  %v4582_v0 = vmul.f32 0.1, %v4454_v22  ;;  %v3263_v39 = vadd.f32 %v3135_v54, %v2876_v6  ;;  %v5001_v54 = vld [vmem:[%s8579_s0 + $0x2d0] sm:$0xff] }
 0x426   :  { %v2751_v3 = vpop.f32.mrf.mxu1  ;;  %v3745_v61 = vpop.f32.mrf.mxu3  ;;  %4306 = vmatmul.f32.gmra.mxu0 %v4027_v1 }
 0x427   :  { %v4646_v57 = vsel %vm4518_vm5, %v4454_v22, %v4582_v0  ;;  %v3873_v63 = vadd.f32 %v3745_v61, %v3263_v39  ;;  %v2877_v7 = vadd.f32 %v2751_v3, %v6978_v56  ;;  %v3516_v56 = vrot.slane %v4998_v43, 1  ;;  %v5257_v3 = vld [vmem:[%s8579_s0 + $0x2e8] sm:$0xff] }
 0x428   :  { %4710 = vst [vmem:[%s8581_s3 + $0xf8] sm:$0xff] %v4646_v57  ;;  %v4033_v22 = vrot.slane %v5000_v32, 2  ;;  %v2534_v61 = vrot.slane %v5257_v3, 2 }
 0x429   :  { %v4387_v35 = vadd.f32 %v4259_v50, %v3873_v63  ;;  %2798 = vmatmul.f32.gmra.mxu1 %v2518_v30  ;;  %3185 = vmatmul.f32.gmra.mxu2 %v4996_v21  ;;  %v3518_v49 = vsel %vm222_vm0, %v3516_v56, %v3517_v2  ;;  %v8252_v30 = vld [vmem:[%s8579_s0 + $0x2f0] sm:$0xff]  ;;  %v5003_v56 = vld [vmem:[%s8579_s0 + $0x2e0] sm:$0x3] }
 0x42a   :  { %v4034_v39 = vsel %vm882_vm1, %v4031_v42, %v4033_v22  ;;  %v2535_v57 = vrot.slane %v8252_v30, 2  ;;  %v4038_v10 = vrot.slane %v5003_v56, 2  ;;  %v3527_v22 = vrot.slane %v5005_v24, 1  ;;  %v5010_v30 = vld [vmem:[%s8579_s0 + $0x318] sm:$0xff] }
 0x42b   :  { %v4455_v59 = vadd.f32 %v7931_v55, %v4387_v35  ;;  %3795 = vmatmul.f32.gmra.mxu3 %v3515_v36  ;;  %v4262_v27 = vpop.f32.mrf.mxu0 }
 0x42c   :  { %v3138_v40 = vpop.f32.mrf.mxu2  ;;  %v8262_v52 = vsel %vm882_vm1, %v2534_v61, %v2535_v57 }
 0x42d   :  { %vm4519_vm6 = vcmp.gt.f32.partialorder %v4455_v59, 0.0  ;;  %v4583_v5 = vmul.f32 0.1, %v4455_v59  ;;  %v3264_v21 = vadd.f32 %v3138_v40, %v2877_v7 }
 0x42e   :  { %v2754_v51 = vpop.f32.mrf.mxu1  ;;  %v3748_v29 = vpop.f32.mrf.mxu3  ;;  %4309 = vmatmul.f32.gmra.mxu0 %v4029_v8  ;;  %v4036_v8 = vrot.slane %v5002_v12, 2 }
 0x42f   :  { %v4647_v38 = vsel %vm4519_vm6, %v4455_v59, %v4583_v5  ;;  %v3874_v37 = vadd.f32 %v3748_v29, %v3264_v21  ;;  %v2878_v45 = vadd.f32 %v2754_v51, %v6989_v53 }
 0x430   :  { %4711 = vst [vmem:[%s8581_s3 + $0x100] sm:$0xff] %v4647_v38 }
 0x431   :  { %v4388_v60 = vadd.f32 %v4262_v27, %v3874_v37  ;;  %2801 = vmatmul.f32.gmra.mxu1 %v8130_v17  ;;  %3188 = vmatmul.f32.gmra.mxu2 %v4998_v43  ;;  %v3519_v17 = vrot.slane %v5000_v32, 1  ;;  %v4035_v27 = vrot.slane %v5001_v54, 2 }
 0x433   :  { %v4456_v34 = vadd.f32 %v7931_v55, %v4388_v60  ;;  %3798 = vmatmul.f32.gmra.mxu3 %v3518_v49  ;;  %v4265_v20 = vpop.f32.mrf.mxu0  ;;  %v3520_v50 = vsel %vm222_vm0, %v3517_v2, %v3519_v17  ;;  %v5259_v2 = vld [vmem:[%s8579_s0 + $0x2c8] sm:$0x3]  ;;  %v4037_v38 = vsel %vm882_vm1, %v4035_v27, %v4036_v8 }
 0x434   :  { %v3141_v11 = vpop.f32.mrf.mxu2  ;;  %v2527_v5 = vrot.slane %v5259_v2, 2 }
 0x435   :  { %vm4520_vm7 = vcmp.gt.f32.partialorder %v4456_v34, 0.0  ;;  %v4584_v46 = vmul.f32 0.1, %v4456_v34  ;;  %v3265_v9 = vadd.f32 %v3141_v11, %v2878_v45 }
 0x436   :  { %v2757_v62 = vpop.f32.mrf.mxu1  ;;  %v3751_v41 = vpop.f32.mrf.mxu3  ;;  %4312 = vmatmul.f32.gmra.mxu0 %v4032_v26  ;;  %v2528_v32 = vsel %vm882_vm1, %v2525_v31, %v2527_v5  ;;  %v8700_v31 = vld [vmem:[#allocation36_spill] sm:$0xff] }
 0x437   :  { %v4648_v6 = vsel %vm4520_vm7, %v4456_v34, %v4584_v46  ;;  %v3875_v53 = vadd.f32 %v3751_v41, %v3265_v9  ;;  %v2879_v13 = vadd.f32 %v2757_v62, %v7006_v18  ;;  %v3521_v18 = vrot.slane %v5001_v54, 1  ;;  %v5260_v9 = vld [vmem:[%s8579_s0 + $0x300] sm:$0xff]  ;;  %v8296_v41 = vld [vmem:[%s8579_s0 + $0x308] sm:$0xff] }
 0x438   :  { %4712 = vst [vmem:[%s8581_s3 + $0x108] sm:$0xff] %v4648_v6  ;;  %v4039_v46 = vsel %vm882_vm1, %v4036_v8, %v4038_v10  ;;  %v2539_v62 = vrot.slane %v5260_v9, 2  ;;  %v4046_v9 = vrot.slane %v8331_v16, 2 }
 0x439   :  { %v4389_v1 = vadd.f32 %v4265_v20, %v3875_v53  ;;  %2804 = vmatmul.f32.gmra.mxu1 %v2523_v44  ;;  %3191 = vmatmul.f32.gmra.mxu2 %v4999_v58  ;;  %v3523_v47 = vsel %vm222_vm0, %v3521_v18, %v3522_v14  ;;  %v5004_v20 = vld [vmem:[%s8579_s0 + $0x2e8] sm:$0xff]  ;;  %v2540_v44 = vrot.slane %v8296_v41, 2  ;;  %v5006_v18 = vld [vmem:[%s8579_s0 + $0x2f8] sm:$0x3]  ;;  %v5013_v41 = vld [vmem:[%s8579_s0 + $0x330] sm:$0xff] }
 0x43a   :  { %v3526_v53 = vrot.slane %v5004_v20, 1 }
 0x43b   :  { %v4457_v15 = vadd.f32 %v7931_v55, %v4389_v1  ;;  %3801 = vmatmul.f32.gmra.mxu3 %v3520_v50  ;;  %v4268_v0 = vpop.f32.mrf.mxu0  ;;  %v8306_v61 = vsel %vm882_vm1, %v2539_v62, %v2540_v44 }
 0x43c   :  { %v3144_v63 = vpop.f32.mrf.mxu2  ;;  %v3528_v3 = vsel %vm222_vm0, %v3526_v53, %v3527_v22 }
 0x43d   :  { %vm4521_vm8 = vcmp.gt.f32.partialorder %v4457_v15, 0.0  ;;  %v4585_v36 = vmul.f32 0.1, %v4457_v15  ;;  %v3266_v35 = vadd.f32 %v3144_v63, %v2879_v13 }
 0x43e   :  { %v2760_v43 = vpop.f32.mrf.mxu1  ;;  %v3754_v58 = vpop.f32.mrf.mxu3  ;;  %4315 = vmatmul.f32.gmra.mxu0 %v4034_v39  ;;  %v4041_v39 = vrot.slane %v5005_v24, 2 }
 0x43f   :  { %v4649_v7 = vsel %vm4521_vm8, %v4457_v15, %v4585_v36  ;;  %v3876_v59 = vadd.f32 %v3754_v58, %v3266_v35  ;;  %v2880_v21 = vadd.f32 %v2760_v43, %v7026_v33  ;;  %v8701_v35 = vld [vmem:[#allocation37_spill] sm:$0xff] }
 0x440   :  { %4713 = vst [vmem:[%s8581_s3 + $0x110] sm:$0xff] %v4649_v7 }
 0x441   :  { %v4390_v40 = vadd.f32 %v4268_v0, %v3876_v59  ;;  %2807 = vmatmul.f32.gmra.mxu1 %v8174_v23  ;;  %3194 = vmatmul.f32.gmra.mxu2 %v5001_v54  ;;  %v3524_v23 = vrot.slane %v5003_v56, 1  ;;  %v4040_v0 = vrot.slane %v5004_v20, 2 }
 0x443   :  { %v4458_v51 = vadd.f32 %v7931_v55, %v4390_v40  ;;  %3804 = vmatmul.f32.gmra.mxu3 %v3523_v47  ;;  %v4271_v29 = vpop.f32.mrf.mxu0  ;;  %v3525_v45 = vsel %vm222_vm0, %v3522_v14, %v3524_v23  ;;  %v5262_v14 = vld [vmem:[%s8579_s0 + $0x2e0] sm:$0x3]  ;;  %v4042_v59 = vsel %vm882_vm1, %v4040_v0, %v4041_v39 }
 0x444   :  { %v3147_v37 = vpop.f32.mrf.mxu2  ;;  %v2532_v36 = vrot.slane %v5262_v14, 2 }
 0x445   :  { %vm4522_vm9 = vcmp.gt.f32.partialorder %v4458_v51, 0.0  ;;  %v4586_v28 = vmul.f32 0.1, %v4458_v51  ;;  %v3267_v42 = vadd.f32 %v3147_v37, %v2880_v21  ;;  %v5007_v37 = vld [vmem:[%s8579_s0 + $0x300] sm:$0xff] }
 0x446   :  { %v2763_v49 = vpop.f32.mrf.mxu1  ;;  %v3757_v60 = vpop.f32.mrf.mxu3  ;;  %4318 = vmatmul.f32.gmra.mxu0 %v4037_v38  ;;  %v2533_v2 = vsel %vm882_vm1, %v2530_v25, %v2532_v36  ;;  %v8702_v25 = vld [vmem:[#allocation38_spill] sm:$0xff] }
 0x447   :  { %v4650_v48 = vsel %vm4522_vm9, %v4458_v51, %v4586_v28  ;;  %v3877_v33 = vadd.f32 %v3757_v60, %v3267_v42  ;;  %v2881_v26 = vadd.f32 %v2763_v49, %v8700_v31  ;;  %v4043_v51 = vrot.slane %v5006_v18, 2  ;;  %v5263_v60 = vld [vmem:[%s8579_s0 + $0x318] sm:$0xff] }
 0x448   :  { %4714 = vst [vmem:[%s8581_s3 + $0x118] sm:$0xff] %v4650_v48  ;;  %v8342_v48 = vld [vmem:[%s8579_s0 + $0x320] sm:$0xff] }
 0x449   :  { %v4391_v34 = vadd.f32 %v4271_v29, %v3877_v33  ;;  %2810 = vmatmul.f32.gmra.mxu1 %v2528_v32  ;;  %3197 = vmatmul.f32.gmra.mxu2 %v5002_v12  ;;  %v4044_v49 = vsel %vm882_vm1, %v4041_v39, %v4043_v51  ;;  %v2544_v32 = vrot.slane %v5263_v60, 2  ;;  %v2545_v33 = vrot.slane %v8342_v48, 2  ;;  %v5017_v48 = vld [vmem:[%s8579_s0 + $0x350] sm:$0xff] }
 0x44b   :  { %v4459_v11 = vadd.f32 %v7931_v55, %v4391_v34  ;;  %3807 = vmatmul.f32.gmra.mxu3 %v3525_v45  ;;  %v4274_v17 = vpop.f32.mrf.mxu0  ;;  %v3531_v45 = vrot.slane %v5007_v37, 1  ;;  %v3532_v34 = vrot.slane %v8331_v16, 1 }
 0x44c   :  { %v3150_v6 = vpop.f32.mrf.mxu2 }
 0x44d   :  { %vm4523_vm10 = vcmp.gt.f32.partialorder %v4459_v11, 0.0  ;;  %v4587_v50 = vmul.f32 0.1, %v4459_v11  ;;  %v3268_v1 = vadd.f32 %v3150_v6, %v2881_v26  ;;  %v3533_v62 = vsel %vm222_vm0, %v3531_v45, %v3532_v34 }
 0x44e   :  { %v2766_v54 = vpop.f32.mrf.mxu1  ;;  %v3760_v12 = vpop.f32.mrf.mxu3  ;;  %4321 = vmatmul.f32.gmra.mxu0 %v4039_v46  ;;  %v4045_v46 = vrot.slane %v5007_v37, 2  ;;  %v8354_v6 = vsel %vm882_vm1, %v2544_v32, %v2545_v33 }
 0x44f   :  { %v4651_v13 = vsel %vm4523_vm10, %v4459_v11, %v4587_v50  ;;  %v3878_v15 = vadd.f32 %v3760_v12, %v3268_v1  ;;  %v2882_v43 = vadd.f32 %v2766_v54, %v8701_v35  ;;  %v5265_v50 = vld [vmem:[%s8579_s0 + $0x2f8] sm:$0x3]  ;;  %v8703_v54 = vld [vmem:[#allocation39_spill] sm:$0xff] }
 0x450   :  { %4715 = vst [vmem:[%s8581_s3 + $0x120] sm:$0xff] %v4651_v13  ;;  %v2537_v1 = vrot.slane %v5265_v50, 2  ;;  %v4047_v0 = vsel %vm882_vm1, %v4045_v46, %v4046_v9 }
 0x451   :  { %v4392_v63 = vadd.f32 %v4274_v17, %v3878_v15  ;;  %2813 = vmatmul.f32.gmra.mxu1 %v8218_v4  ;;  %3200 = vmatmul.f32.gmra.mxu2 %v5004_v20  ;;  %v3529_v4 = vrot.slane %v5006_v18, 1 }
 0x452   :  { %v2538_v36 = vsel %vm882_vm1, %v2535_v57, %v2537_v1  ;;  %v8380_v57 = vld [vmem:[%s8579_s0 + $0x320] sm:$0xff] }
 0x453   :  { %v4460_v58 = vadd.f32 %v7931_v55, %v4392_v63  ;;  %3810 = vmatmul.f32.gmra.mxu3 %v3528_v3  ;;  %v4277_v7 = vpop.f32.mrf.mxu0  ;;  %v3530_v29 = vsel %vm222_vm0, %v3527_v22, %v3529_v4  ;;  %v5009_v22 = vld [vmem:[%s8579_s0 + $0x310] sm:$0x3]  ;;  %v8386_v4 = vld [vmem:[%s8580_s2] ss:$0 sm:$0xff]  ;;  %v4051_v60 = vrot.slane %v8380_v57, 2 }
 0x454   :  { %v3153_v27 = vpop.f32.mrf.mxu2 }
 0x455   :  { %vm4524_vm11 = vcmp.gt.f32.partialorder %v4460_v58, 0.0  ;;  %v4588_v8 = vmul.f32 0.1, %v4460_v58  ;;  %v3269_v47 = vadd.f32 %v3153_v27, %v2882_v43 }
 0x456   :  { %v2769_v40 = vpop.f32.mrf.mxu1  ;;  %v3763_v56 = vpop.f32.mrf.mxu3  ;;  %4324 = vmatmul.f32.gmra.mxu0 %v4042_v59  ;;  %v8704_v59 = vld [vmem:[#allocation40_spill] sm:$0xff] }
 0x457   :  { %v4652_v5 = vsel %vm4524_vm11, %v4460_v58, %v4588_v8  ;;  %v3879_v21 = vadd.f32 %v3763_v56, %v3269_v47  ;;  %v2883_v23 = vadd.f32 %v2769_v40, %v8702_v25  ;;  %v4048_v58 = vrot.slane %v5009_v22, 2  ;;  %v5267_v56 = vld [vmem:[%s8579_s0 + $0x330] sm:$0xff] }
 0x458   :  { %4716 = vst [vmem:[%s8581_s3 + $0x128] sm:$0xff] %v4652_v5  ;;  %v8396_v5 = vld [vmem:[%s8579_s0 + $0x338] sm:$0xff] }
 0x459   :  { %v4393_v38 = vadd.f32 %v4277_v7, %v3879_v21  ;;  %2816 = vmatmul.f32.gmra.mxu1 %v2533_v2  ;;  %3203 = vmatmul.f32.gmra.mxu2 %v5005_v24  ;;  %v4049_v40 = vsel %vm882_vm1, %v4046_v9, %v4048_v58  ;;  %v2549_v2 = vrot.slane %v5267_v56, 2  ;;  %v2550_v21 = vrot.slane %v8396_v5, 2  ;;  %v5270_v56 = vld [vmem:[%s8579_s0 + $0x328] sm:$0x3] }
 0x45b   :  { %v4461_v28 = vadd.f32 %v7931_v55, %v4393_v38  ;;  %3813 = vmatmul.f32.gmra.mxu3 %v3530_v29  ;;  %v4280_v42 = vpop.f32.mrf.mxu0  ;;  %v3536_v29 = vrot.slane %v5010_v30, 1  ;;  %v3537_v38 = vrot.slane %v8380_v57, 1 }
 0x45c   :  { %v3156_v10 = vpop.f32.mrf.mxu2 }
 0x45d   :  { %vm4525_vm12 = vcmp.gt.f32.partialorder %v4461_v28, 0.0  ;;  %v4589_v20 = vmul.f32 0.1, %v4461_v28  ;;  %v3270_v24 = vadd.f32 %v3156_v10, %v2883_v23  ;;  %v3538_v32 = vsel %vm222_vm0, %v3536_v29, %v3537_v38 }
 0x45e   :  { %v2772_v31 = vpop.f32.mrf.mxu1  ;;  %v3766_v26 = vpop.f32.mrf.mxu3  ;;  %4327 = vmatmul.f32.gmra.mxu0 %v4044_v49  ;;  %v4050_v49 = vrot.slane %v5010_v30, 2  ;;  %v8408_v10 = vsel %vm882_vm1, %v2549_v2, %v2550_v21  ;;  %v2547_v2 = vrot.slane %v5270_v56, 2 }
 0x45f   :  { %v4653_v11 = vsel %vm4525_vm12, %v4461_v28, %v4589_v20  ;;  %v3880_v17 = vadd.f32 %v3766_v26, %v3270_v24  ;;  %v2884_v12 = vadd.f32 %v2772_v31, %v8703_v54  ;;  %v5269_v20 = vld [vmem:[%s8579_s0 + $0x310] sm:$0x3]  ;;  %v8705_v31 = vld [vmem:[#allocation41_spill] sm:$0xff] }
 0x460   :  { %4717 = vst [vmem:[%s8581_s3 + $0x130] sm:$0xff] %v4653_v11  ;;  %v2542_v24 = vrot.slane %v5269_v20, 2  ;;  %v4052_v46 = vsel %vm882_vm1, %v4050_v49, %v4051_v60 }
 0x461   :  { %v4394_v53 = vadd.f32 %v4280_v42, %v3880_v17  ;;  %2819 = vmatmul.f32.gmra.mxu1 %v8262_v52  ;;  %3206 = vmatmul.f32.gmra.mxu2 %v5007_v37  ;;  %v3534_v52 = vrot.slane %v5009_v22, 1 }
 0x462   :  { %v2543_v1 = vsel %vm882_vm1, %v2540_v44, %v2542_v24  ;;  %v5014_v44 = vld [vmem:[%s8579_s0 + $0x338] sm:$0xff] }
 0x463   :  { %v4462_v13 = vadd.f32 %v7931_v55, %v4394_v53  ;;  %3816 = vmatmul.f32.gmra.mxu3 %v3533_v62  ;;  %v4283_v15 = vpop.f32.mrf.mxu0  ;;  %v3535_v55 = vsel %vm222_vm0, %v3532_v34, %v3534_v52  ;;  %v5012_v34 = vld [vmem:[%s8579_s0 + $0x328] sm:$0x3] }
 0x464   :  { %v3159_v39 = vpop.f32.mrf.mxu2 }
 0x465   :  { %vm4526_vm13 = vcmp.gt.f32.partialorder %v4462_v13, 0.0  ;;  %v4590_v3 = vmul.f32 0.1, %v4462_v13  ;;  %v3271_v63 = vadd.f32 %v3159_v39, %v2884_v12  ;;  %v8706_v39 = vld [vmem:[#allocation42_spill] sm:$0xff] }
 0x466   :  { %v2775_v18 = vpop.f32.mrf.mxu1  ;;  %v3769_v14 = vpop.f32.mrf.mxu3  ;;  %4330 = vmatmul.f32.gmra.mxu0 %v4047_v0 }
 0x467   :  { %v4654_v35 = vsel %vm4526_vm13, %v4462_v13, %v4590_v3  ;;  %v3881_v43 = vadd.f32 %v3769_v14, %v3271_v63  ;;  %v2885_v27 = vadd.f32 %v2775_v18, %v8704_v59  ;;  %v4053_v13 = vrot.slane %v5012_v34, 2 }
 0x468   :  { %4718 = vst [vmem:[%s8581_s3 + $0x138] sm:$0xff] %v4654_v35  ;;  %v3542_v35 = vrot.slane %v5014_v44, 1  ;;  %v4055_v59 = vrot.slane %v5013_v41, 2 }
 0x469   :  { %v4395_v7 = vadd.f32 %v4283_v15, %v3881_v43  ;;  %2822 = vmatmul.f32.gmra.mxu1 %v2538_v36  ;;  %3209 = vmatmul.f32.gmra.mxu2 %v8331_v16  ;;  %v4054_v18 = vsel %vm882_vm1, %v4051_v60, %v4053_v13  ;;  %v3541_v36 = vrot.slane %v5013_v41, 1  ;;  %v2548_v60 = vsel %vm882_vm1, %v2545_v33, %v2547_v2  ;;  %v8708_v33 = vld [vmem:[#allocation28_spill] sm:$0xff] }
 0x46b   :  { %v4463_v8 = vadd.f32 %v8386_v4, %v4395_v7  ;;  %3819 = vmatmul.f32.gmra.mxu3 %v3535_v55  ;;  %v4286_v47 = vpop.f32.mrf.mxu0 }
 0x46c   :  { %v3162_v51 = vpop.f32.mrf.mxu2 }
 0x46d   :  { %vm4527_vm14 = vcmp.gt.f32.partialorder %v4463_v8, 0.0  ;;  %v4591_v37 = vmul.f32 0.1, %v4463_v8  ;;  %v3272_v16 = vadd.f32 %v3162_v51, %v2885_v27  ;;  %v4056_v27 = vrot.slane %v5014_v44, 2  ;;  %v8707_v51 = vld [vmem:[#allocation43_spill] sm:$0xff] }
 0x46e   :  { %v2778_v25 = vpop.f32.mrf.mxu1  ;;  %v3772_v23 = vpop.f32.mrf.mxu3  ;;  %4333 = vmatmul.f32.gmra.mxu0 %v4049_v40  ;;  %v5015_v40 = vld [vmem:[%s8579_s0 + $0x340] sm:$0x3] }
 0x46f   :  { %v4655_v28 = vsel %vm4527_vm14, %v4463_v8, %v4591_v37  ;;  %v3882_v42 = vadd.f32 %v3772_v23, %v3272_v16  ;;  %v2886_v26 = vadd.f32 %v2778_v25, %v8705_v31  ;;  %v3543_v8 = vsel %vm222_vm0, %v3541_v36, %v3542_v35  ;;  %v5016_v31 = vld [vmem:[%s8579_s0 + $0x348] sm:$0xff] }
 0x470   :  { %4719 = vst [vmem:[%s8581_s3 + $0x140] sm:$0xff] %v4655_v28  ;;  %v4057_v16 = vsel %vm882_vm1, %v4055_v59, %v4056_v27  ;;  %v4060_v13 = vrot.slane %v5016_v31, 2 }
 0x471   :  { %v4396_v45 = vadd.f32 %v4286_v47, %v3882_v42  ;;  %2825 = vmatmul.f32.gmra.mxu1 %v8306_v61  ;;  %3212 = vmatmul.f32.gmra.mxu2 %v5010_v30  ;;  %v3539_v61 = vrot.slane %v5012_v34, 1  ;;  %v4058_v34 = vrot.slane %v5015_v40, 2 }
 0x473   :  { %v4464_v11 = vadd.f32 %v8386_v4, %v4396_v45  ;;  %3822 = vmatmul.f32.gmra.mxu3 %v3538_v32  ;;  %v4289_v17 = vpop.f32.mrf.mxu0  ;;  %v3540_v15 = vsel %vm222_vm0, %v3537_v38, %v3539_v61  ;;  %v3546_v61 = vrot.slane %v5016_v31, 1 }
 0x474   :  { %v3165_v9 = vpop.f32.mrf.mxu2 }
 0x475   :  { %vm4528_vm15 = vcmp.gt.f32.partialorder %v4464_v11, 0.0  ;;  %v4592_v62 = vmul.f32 0.1, %v4464_v11  ;;  %v3273_v53 = vadd.f32 %v3165_v9, %v2886_v26 }
 0x476   :  { %v2781_v22 = vpop.f32.mrf.mxu1  ;;  %v3775_v50 = vpop.f32.mrf.mxu3  ;;  %4336 = vmatmul.f32.gmra.mxu0 %v4052_v46  ;;  %v4059_v46 = vsel %vm882_vm1, %v4056_v27, %v4058_v34 }
 0x477   :  { %v4656_v54 = vsel %vm4528_vm15, %v4464_v11, %v4592_v62  ;;  %v3883_v12 = vadd.f32 %v3775_v50, %v3273_v53  ;;  %v2887_v52 = vadd.f32 %v2781_v22, %v8706_v39  ;;  %v3547_v62 = vrot.slane %v5017_v48, 1  ;;  %v5271_v39 = vld [vmem:[%s8579_s0 + $0x340] sm:$0x3] }
 0x478   :  { %4720 = vst [vmem:[%s8581_s3 + $0x148] sm:$0xff] %v4656_v54 }
 0x479   :  { %v4397_v0 = vadd.f32 %v4289_v17, %v3883_v12  ;;  %2828 = vmatmul.f32.gmra.mxu1 %v2543_v1  ;;  %3215 = vmatmul.f32.gmra.mxu2 %v8380_v57 }
 0x47b   :  { %v4465_v3 = vadd.f32 %v8386_v4, %v4397_v0  ;;  %3825 = vmatmul.f32.gmra.mxu3 %v3540_v15  ;;  %v4292_v63 = vpop.f32.mrf.mxu0  ;;  %v4061_v15 = vrot.slane %v5017_v48, 2  ;;  %v3548_v0 = vsel %vm222_vm0, %v3546_v61, %v3547_v62 }
 0x47c   :  { %v3168_v14 = vpop.f32.mrf.mxu2 }
 0x47d   :  { %vm4529_vm2 = vcmp.gt.f32.partialorder %v4465_v3, 0.0  ;;  %v4593_v43 = vmul.f32 0.1, %v4465_v3  ;;  %v3274_v58 = vadd.f32 %v3168_v14, %v2887_v52  ;;  %v2552_v52 = vrot.slane %v5271_v39, 2 }
 0x47e   :  { %v2784_v55 = vpop.f32.mrf.mxu1  ;;  %v3778_v7 = vpop.f32.mrf.mxu3  ;;  %4339 = vmatmul.f32.gmra.mxu0 %v4054_v18  ;;  %v4062_v36 = vsel %vm882_vm1, %v4060_v13, %v4061_v15 }
 0x47f   :  { %v4657_v30 = vsel %vm4529_vm2, %v4465_v3, %v4593_v43  ;;  %v3884_v57 = vadd.f32 %v3778_v7, %v3274_v58  ;;  %v2888_v29 = vadd.f32 %v2784_v55, %v8707_v51  ;;  %v8709_v3 = vld [vmem:[#allocation31_spill] sm:$0xff] }
 0x480   :  { %4721 = vst [vmem:[%s8581_s3 + $0x150] sm:$0xff] %v4657_v30  ;;  %v2553_v30 = vsel %vm882_vm1, %v2550_v21, %v2552_v52 }
 0x481   :  { %v4398_v47 = vadd.f32 %v4292_v63, %v3884_v57  ;;  %2831 = vmatmul.f32.gmra.mxu1 %v8354_v6  ;;  %3218 = vmatmul.f32.gmra.mxu2 %v5013_v41  ;;  %v3544_v6 = vrot.slane %v5015_v40, 1  ;;  %v8710_v40 = vld [vmem:[#allocation33_spill] sm:$0xff] }
 0x483   :  { %v4466_v38 = vadd.f32 %v8386_v4, %v4398_v47  ;;  %3828 = vmatmul.f32.gmra.mxu3 %v3543_v8  ;;  %v4295_v37 = vpop.f32.mrf.mxu0  ;;  %v3545_v20 = vsel %vm222_vm0, %v3542_v35, %v3544_v6 }
 0x484   :  { %v3171_v25 = vpop.f32.mrf.mxu2 }
 0x485   :  { %vm4530_vm3 = vcmp.gt.f32.partialorder %v4466_v38, 0.0  ;;  %v4594_v23 = vmul.f32 0.1, %v4466_v38  ;;  %v3275_v28 = vadd.f32 %v3171_v25, %v2888_v29 }
 0x486   :  { %v2787_v42 = vpop.f32.mrf.mxu1  ;;  %v3781_v49 = vpop.f32.mrf.mxu3  ;;  %4342 = vmatmul.f32.gmra.mxu0 %v4057_v16 }
 0x487   :  { %v4658_v32 = vsel %vm4530_vm3, %v4466_v38, %v4594_v23  ;;  %v3885_v45 = vadd.f32 %v3781_v49, %v3275_v28  ;;  %v2889_v26 = vadd.f32 %v2787_v42, %v8708_v33  ;;  %v8711_v28 = vld [vmem:[#allocation5_spill] sm:$0xff] }
 0x488   :  { %4722 = vst [vmem:[%s8581_s3 + $0x158] sm:$0xff] %v4658_v32 }
 0x489   :  { %v4399_v24 = vadd.f32 %v4295_v37, %v3885_v45  ;;  %2834 = vmatmul.f32.gmra.mxu1 %v2548_v60  ;;  %3221 = vmatmul.f32.gmra.mxu2 %v5014_v44  ;;  %v5018_v44 = vld [vmem:[%s8579_s0 + $0x358] sm:$0x3] }
 0x48a   :  { %v4063_v27 = vrot.slane %v5018_v44, 2 }
 0x48b   :  { %v4467_v11 = vadd.f32 %v8386_v4, %v4399_v24  ;;  %3831 = vmatmul.f32.gmra.mxu3 %v3545_v20  ;;  %v4298_v17 = vpop.f32.mrf.mxu0 }
 0x48c   :  { %v3174_v9 = vpop.f32.mrf.mxu2  ;;  %v4064_v21 = vsel %vm882_vm1, %v4061_v15, %v4063_v27 }
 0x48d   :  { %vm4531_vm4 = vcmp.gt.f32.partialorder %v4467_v11, 0.0  ;;  %v4595_v53 = vmul.f32 0.1, %v4467_v11  ;;  %v3276_v22 = vadd.f32 %v3174_v9, %v2889_v26  ;;  %v8712_v26 = vld [vmem:[#allocation2_spill] sm:$0xff] }
 0x48e   :  { %v2790_v50 = vpop.f32.mrf.mxu1  ;;  %v3784_v1 = vpop.f32.mrf.mxu3  ;;  %4345 = vmatmul.f32.gmra.mxu0 %v4059_v46 }
 0x48f   :  { %v4659_v54 = vsel %vm4531_vm4, %v4467_v11, %v4595_v53  ;;  %v3886_v12 = vadd.f32 %v3784_v1, %v3276_v22  ;;  %v2890_v63 = vadd.f32 %v2790_v50, %v8709_v3 }
 0x490   :  { %4723 = vst [vmem:[%s8581_s3 + $0x160] sm:$0xff] %v4659_v54 }
 0x491   :  { %v4400_v41 = vadd.f32 %v4298_v17, %v3886_v12  ;;  %2837 = vmatmul.f32.gmra.mxu1 %v8408_v10  ;;  %3224 = vmatmul.f32.gmra.mxu2 %v5016_v31  ;;  %v3549_v10 = vrot.slane %v5018_v44, 1  ;;  %v8713_v12 = vld [vmem:[#allocation3_spill] sm:$0xff] }
 0x493   :  { %v4468_v18 = vadd.f32 %v8386_v4, %v4400_v41  ;;  %3834 = vmatmul.f32.gmra.mxu3 %v3548_v0  ;;  %v4301_v14 = vpop.f32.mrf.mxu0  ;;  %v3550_v8 = vsel %vm222_vm0, %v3547_v62, %v3549_v10 }
 0x494   :  { %v3177_v35 = vpop.f32.mrf.mxu2 }
 0x495   :  { %vm4532_vm5 = vcmp.gt.f32.partialorder %v4468_v18, 0.0  ;;  %v4596_v43 = vmul.f32 0.1, %v4468_v18  ;;  %v3277_v58 = vadd.f32 %v3177_v35, %v2890_v63 }
 0x496   :  { %v2793_v55 = vpop.f32.mrf.mxu1  ;;  %v3787_v7 = vpop.f32.mrf.mxu3  ;;  %4348 = vmatmul.f32.gmra.mxu0 %v4062_v36  ;;  %v8714_v36 = vld [vmem:[#allocation4_spill] sm:$0xff] }
 0x497   :  { %v4660_v57 = vsel %vm4532_vm5, %v4468_v18, %v4596_v43  ;;  %v3887_v59 = vadd.f32 %v3787_v7, %v3277_v58  ;;  %v2891_v56 = vadd.f32 %v2793_v55, %v8710_v40 }
 0x498   :  { %4724 = vst [vmem:[%s8581_s3 + $0x168] sm:$0xff] %v4660_v57 }
 0x499   :  { %v4401_v47 = vadd.f32 %v4301_v14, %v3887_v59  ;;  %2840 = vmatmul.f32.gmra.mxu1 %v2553_v30  ;;  %3227 = vmatmul.f32.gmra.mxu2 %v5017_v48 }
 0x49b   :  { %v4469_v2 = vadd.f32 %v8386_v4, %v4401_v47  ;;  %3837 = vmatmul.f32.gmra.mxu3 %v3550_v8  ;;  %v4304_v5 = vpop.f32.mrf.mxu0  ;;  %v8715_v47 = vld [vmem:[#allocation9_spill] sm:$0xff] }
 0x49c   :  { %v3180_v51 = vpop.f32.mrf.mxu2 }
 0x49d   :  { %vm4533_vm6 = vcmp.gt.f32.partialorder %v4469_v2, 0.0  ;;  %v4597_v29 = vmul.f32 0.1, %v4469_v2  ;;  %v3278_v38 = vadd.f32 %v3180_v51, %v2891_v56 }
 0x49e   :  { %v2796_v37 = vpop.f32.mrf.mxu1  ;;  %v3790_v16 = vpop.f32.mrf.mxu3  ;;  %4351 = vmatmul.f32.gmra.mxu0 %v4064_v21 }
 0x49f   :  { %v4661_v25 = vsel %vm4533_vm6, %v4469_v2, %v4597_v29  ;;  %v3888_v6 = vadd.f32 %v3790_v16, %v3278_v38  ;;  %v2892_v42 = vadd.f32 %v2796_v37, %v8711_v28 }
 0x4a0   :  { %4725 = vst [vmem:[%s8581_s3 + $0x170] sm:$0xff] %v4661_v25 }
 0x4a1   :  { %v4402_v23 = vadd.f32 %v4304_v5, %v3888_v6  ;;  %v8716_v6 = vld [vmem:[#allocation6_spill] sm:$0xff] }
 0x4a3   :  { %v4470_v49 = vadd.f32 %v8386_v4, %v4402_v23  ;;  %v4307_v60 = vpop.f32.mrf.mxu0 }
 0x4a4   :  { %v3183_v32 = vpop.f32.mrf.mxu2 }
 0x4a5   :  { %vm4534_vm0 = vcmp.gt.f32.partialorder %v4470_v49, 0.0  ;;  %v4598_v45 = vmul.f32 0.1, %v4470_v49  ;;  %v3279_v34 = vadd.f32 %v3183_v32, %v2892_v42 }
 0x4a6   :  { %v2799_v20 = vpop.f32.mrf.mxu1  ;;  %v3793_v24 = vpop.f32.mrf.mxu3 }
 0x4a7   :  { %v4662_v31 = vsel %vm4534_vm0, %v4470_v49, %v4598_v45  ;;  %v3889_v48 = vadd.f32 %v3793_v24, %v3279_v34  ;;  %v2893_v11 = vadd.f32 %v2799_v20, %v8712_v26 }
 0x4a8   :  { %4726 = vst [vmem:[%s8581_s3 + $0x178] sm:$0xff] %v4662_v31 }
 0x4a9   :  { %v4403_v33 = vadd.f32 %v4307_v60, %v3889_v48  ;;  %v8717_v48 = vld [vmem:[#allocation7_spill] sm:$0xff] }
 0x4ab   :  { %v4471_v17 = vadd.f32 %v8386_v4, %v4403_v33  ;;  %v4310_v46 = vpop.f32.mrf.mxu0 }
 0x4ac   :  { %v3186_v9 = vpop.f32.mrf.mxu2 }
 0x4ad   :  { %vm4535_vm1 = vcmp.gt.f32.partialorder %v4471_v17, 0.0  ;;  %v4599_v61 = vmul.f32 0.1, %v4471_v17  ;;  %v3280_v62 = vadd.f32 %v3186_v9, %v2893_v11 }
 0x4ae   :  { %v2802_v53 = vpop.f32.mrf.mxu1  ;;  %v3796_v22 = vpop.f32.mrf.mxu3 }
 0x4af   :  { %v4663_v50 = vsel %vm4535_vm1, %v4471_v17, %v4599_v61  ;;  %v3890_v1 = vadd.f32 %v3796_v22, %v3280_v62  ;;  %v2894_v13 = vadd.f32 %v2802_v53, %v8713_v12 }
 0x4b0   :  { %4727 = vst [vmem:[%s8581_s3 + $0x180] sm:$0xff] %v4663_v50 }
 0x4b1   :  { %v4404_v54 = vadd.f32 %v4310_v46, %v3890_v1  ;;  %v8718_v1 = vld [vmem:[#allocation8_spill] sm:$0xff] }
 0x4b3   :  { %v4472_v15 = vadd.f32 %v8386_v4, %v4404_v54  ;;  %v4313_v0 = vpop.f32.mrf.mxu0 }
 0x4b4   :  { %v3189_v41 = vpop.f32.mrf.mxu2 }
 0x4b5   :  { %vm4536_vm7 = vcmp.gt.f32.partialorder %v4472_v15, 0.0  ;;  %v4600_v44 = vmul.f32 0.1, %v4472_v15  ;;  %v3281_v39 = vadd.f32 %v3189_v41, %v2894_v13 }
 0x4b6   :  { %v2805_v52 = vpop.f32.mrf.mxu1  ;;  %v3799_v3 = vpop.f32.mrf.mxu3 }
 0x4b7   :  { %v4664_v63 = vsel %vm4536_vm7, %v4472_v15, %v4600_v44  ;;  %v3891_v18 = vadd.f32 %v3799_v3, %v3281_v39  ;;  %v2895_v35 = vadd.f32 %v2805_v52, %v8714_v36 }
 0x4b8   :  { %4728 = vst [vmem:[%s8581_s3 + $0x188] sm:$0xff] %v4664_v63 }
 0x4b9   :  { %v4405_v14 = vadd.f32 %v4313_v0, %v3891_v18  ;;  %v8719_v18 = vld [vmem:[#allocation13_spill] sm:$0xff] }
 0x4bb   :  { %v4473_v10 = vadd.f32 %v8386_v4, %v4405_v14  ;;  %v4316_v43 = vpop.f32.mrf.mxu0 }
 0x4bc   :  { %v3192_v58 = vpop.f32.mrf.mxu2 }
 0x4bd   :  { %vm4537_vm8 = vcmp.gt.f32.partialorder %v4473_v10, 0.0  ;;  %v4601_v55 = vmul.f32 0.1, %v4473_v10  ;;  %v3282_v7 = vadd.f32 %v3192_v58, %v2895_v35 }
 0x4be   :  { %v2808_v30 = vpop.f32.mrf.mxu1  ;;  %v3802_v57 = vpop.f32.mrf.mxu3 }
 0x4bf   :  { %v4665_v59 = vsel %vm4537_vm8, %v4473_v10, %v4601_v55  ;;  %v3892_v27 = vadd.f32 %v3802_v57, %v3282_v7  ;;  %v2896_v40 = vadd.f32 %v2808_v30, %v8715_v47 }
 0x4c0   :  { %4729 = vst [vmem:[%s8581_s3 + $0x190] sm:$0xff] %v4665_v59 }
 0x4c1   :  { %v4406_v8 = vadd.f32 %v4316_v43, %v3892_v27  ;;  %v8720_v27 = vld [vmem:[#allocation10_spill] sm:$0xff] }
 0x4c3   :  { %v4474_v56 = vadd.f32 %v8386_v4, %v4406_v8  ;;  %v4319_v2 = vpop.f32.mrf.mxu0 }
 0x4c4   :  { %v3195_v5 = vpop.f32.mrf.mxu2 }
 0x4c5   :  { %vm4538_vm9 = vcmp.gt.f32.partialorder %v4474_v56, 0.0  ;;  %v4602_v21 = vmul.f32 0.1, %v4474_v56  ;;  %v3283_v51 = vadd.f32 %v3195_v5, %v2896_v40 }
 0x4c6   :  { %v2811_v29 = vpop.f32.mrf.mxu1  ;;  %v3805_v38 = vpop.f32.mrf.mxu3 }
 0x4c7   :  { %v4666_v37 = vsel %vm4538_vm9, %v4474_v56, %v4602_v21  ;;  %v3893_v16 = vadd.f32 %v3805_v38, %v3283_v51  ;;  %v2897_v23 = vadd.f32 %v2811_v29, %v8716_v6 }
 0x4c8   :  { %4730 = vst [vmem:[%s8581_s3 + $0x198] sm:$0xff] %v4666_v37 }
 0x4c9   :  { %v4407_v25 = vadd.f32 %v4319_v2, %v3893_v16  ;;  %v8721_v16 = vld [vmem:[#allocation11_spill] sm:$0xff] }
 0x4cb   :  { %v4475_v28 = vadd.f32 %v8386_v4, %v4407_v25  ;;  %v4322_v42 = vpop.f32.mrf.mxu0 }
 0x4cc   :  { %v3198_v49 = vpop.f32.mrf.mxu2 }
 0x4cd   :  { %vm4539_vm10 = vcmp.gt.f32.partialorder %v4475_v28, 0.0  ;;  %v4603_v60 = vmul.f32 0.1, %v4475_v28  ;;  %v3284_v32 = vadd.f32 %v3198_v49, %v2897_v23 }
 0x4ce   :  { %v2814_v45 = vpop.f32.mrf.mxu1  ;;  %v3808_v34 = vpop.f32.mrf.mxu3 }
 0x4cf   :  { %v4667_v20 = vsel %vm4539_vm10, %v4475_v28, %v4603_v60  ;;  %v3894_v24 = vadd.f32 %v3808_v34, %v3284_v32  ;;  %v2898_v33 = vadd.f32 %v2814_v45, %v8717_v48 }
 0x4d0   :  { %4731 = vst [vmem:[%s8581_s3 + $0x1a0] sm:$0xff] %v4667_v20 }
 0x4d1   :  { %v4408_v31 = vadd.f32 %v4322_v42, %v3894_v24  ;;  %v8722_v24 = vld [vmem:[#allocation12_spill] sm:$0xff] }
 0x4d3   :  { %v4476_v26 = vadd.f32 %v8386_v4, %v4408_v31  ;;  %v4325_v11 = vpop.f32.mrf.mxu0 }
 0x4d4   :  { %v3201_v17 = vpop.f32.mrf.mxu2 }
 0x4d5   :  { %vm4540_vm11 = vcmp.gt.f32.partialorder %v4476_v26, 0.0  ;;  %v4604_v46 = vmul.f32 0.1, %v4476_v26  ;;  %v3285_v9 = vadd.f32 %v3201_v17, %v2898_v33 }
 0x4d6   :  { %v2817_v61 = vpop.f32.mrf.mxu1  ;;  %v3811_v62 = vpop.f32.mrf.mxu3 }
 0x4d7   :  { %v4668_v53 = vsel %vm4540_vm11, %v4476_v26, %v4604_v46  ;;  %v3895_v22 = vadd.f32 %v3811_v62, %v3285_v9  ;;  %v2899_v54 = vadd.f32 %v2817_v61, %v8718_v1 }
 0x4d8   :  { %4732 = vst [vmem:[%s8581_s3 + $0x1a8] sm:$0xff] %v4668_v53 }
 0x4d9   :  { %v4409_v50 = vadd.f32 %v4325_v11, %v3895_v22  ;;  %v8723_v22 = vld [vmem:[#allocation17_spill] sm:$0xff] }
 0x4db   :  { %v4477_v12 = vadd.f32 %v8386_v4, %v4409_v50  ;;  %v4328_v13 = vpop.f32.mrf.mxu0 }
 0x4dc   :  { %v3204_v15 = vpop.f32.mrf.mxu2 }
 0x4dd   :  { %vm4541_vm12 = vcmp.gt.f32.partialorder %v4477_v12, 0.0  ;;  %v4605_v0 = vmul.f32 0.1, %v4477_v12  ;;  %v3286_v41 = vadd.f32 %v3204_v15, %v2899_v54 }
 0x4de   :  { %v2820_v44 = vpop.f32.mrf.mxu1  ;;  %v3814_v39 = vpop.f32.mrf.mxu3 }
 0x4df   :  { %v4669_v52 = vsel %vm4541_vm12, %v4477_v12, %v4605_v0  ;;  %v3896_v3 = vadd.f32 %v3814_v39, %v3286_v41  ;;  %v2900_v14 = vadd.f32 %v2820_v44, %v8719_v18 }
 0x4e0   :  { %4733 = vst [vmem:[%s8581_s3 + $0x1b0] sm:$0xff] %v4669_v52 }
 0x4e1   :  { %v4410_v63 = vadd.f32 %v4328_v13, %v3896_v3  ;;  %v8724_v3 = vld [vmem:[#allocation14_spill] sm:$0xff] }
 0x4e3   :  { %v4478_v36 = vadd.f32 %v8386_v4, %v4410_v63  ;;  %v4331_v35 = vpop.f32.mrf.mxu0 }
 0x4e4   :  { %v3207_v10 = vpop.f32.mrf.mxu2 }
 0x4e5   :  { %vm4542_vm13 = vcmp.gt.f32.partialorder %v4478_v36, 0.0  ;;  %v4606_v43 = vmul.f32 0.1, %v4478_v36  ;;  %v3287_v58 = vadd.f32 %v3207_v10, %v2900_v14 }
 0x4e6   :  { %v2823_v55 = vpop.f32.mrf.mxu1  ;;  %v3817_v7 = vpop.f32.mrf.mxu3 }
 0x4e7   :  { %v4670_v30 = vsel %vm4542_vm13, %v4478_v36, %v4606_v43  ;;  %v3897_v57 = vadd.f32 %v3817_v7, %v3287_v58  ;;  %v2901_v8 = vadd.f32 %v2823_v55, %v8720_v27 }
 0x4e8   :  { %4734 = vst [vmem:[%s8581_s3 + $0x1b8] sm:$0xff] %v4670_v30 }
 0x4e9   :  { %v4411_v59 = vadd.f32 %v4331_v35, %v3897_v57 }
 0x4eb   :  { %v4479_v47 = vadd.f32 %v8386_v4, %v4411_v59  ;;  %v4334_v40 = vpop.f32.mrf.mxu0 }
 0x4ec   :  { %v3210_v56 = vpop.f32.mrf.mxu2 }
 0x4ed   :  { %vm4543_vm14 = vcmp.gt.f32.partialorder %v4479_v47, 0.0  ;;  %v4607_v2 = vmul.f32 0.1, %v4479_v47  ;;  %v3288_v5 = vadd.f32 %v3210_v56, %v2901_v8 }
 0x4ee   :  { %v2826_v21 = vpop.f32.mrf.mxu1  ;;  %v3820_v51 = vpop.f32.mrf.mxu3 }
 0x4ef   :  { %v4671_v29 = vsel %vm4543_vm14, %v4479_v47, %v4607_v2  ;;  %v3898_v38 = vadd.f32 %v3820_v51, %v3288_v5  ;;  %v2902_v25 = vadd.f32 %v2826_v21, %v8721_v16 }
 0x4f0   :  { %4735 = vst [vmem:[%s8581_s3 + $0x1c0] sm:$0xff] %v4671_v29  ;;  %v8725_v29 = vld [vmem:[#allocation15_spill] sm:$0xff] }
 0x4f1   :  { %v4412_v37 = vadd.f32 %v4334_v40, %v3898_v38 }
 0x4f3   :  { %v4480_v6 = vadd.f32 %v8386_v4, %v4412_v37  ;;  %v4337_v23 = vpop.f32.mrf.mxu0 }
 0x4f4   :  { %v3213_v28 = vpop.f32.mrf.mxu2 }
 0x4f5   :  { %vm4544_vm15 = vcmp.gt.f32.partialorder %v4480_v6, 0.0  ;;  %v4608_v42 = vmul.f32 0.1, %v4480_v6  ;;  %v3289_v49 = vadd.f32 %v3213_v28, %v2902_v25 }
 0x4f6   :  { %v2829_v60 = vpop.f32.mrf.mxu1  ;;  %v3823_v32 = vpop.f32.mrf.mxu3 }
 0x4f7   :  { %v4672_v45 = vsel %vm4544_vm15, %v4480_v6, %v4608_v42  ;;  %v3899_v34 = vadd.f32 %v3823_v32, %v3289_v49  ;;  %v2903_v31 = vadd.f32 %v2829_v60, %v8722_v24 }
 0x4f8   :  { %4736 = vst [vmem:[%s8581_s3 + $0x1c8] sm:$0xff] %v4672_v45 }
 0x4f9   :  { %v4413_v20 = vadd.f32 %v4337_v23, %v3899_v34 }
 0x4fb   :  { %v4481_v48 = vadd.f32 %v8386_v4, %v4413_v20  ;;  %v4340_v33 = vpop.f32.mrf.mxu0 }
 0x4fc   :  { %v3216_v26 = vpop.f32.mrf.mxu2 }
 0x4fd   :  { %vm4545_vm2 = vcmp.gt.f32.partialorder %v4481_v48, 0.0  ;;  %v4609_v11 = vmul.f32 0.1, %v4481_v48  ;;  %v3290_v17 = vadd.f32 %v3216_v26, %v2903_v31 }
 0x4fe   :  { %v2832_v46 = vpop.f32.mrf.mxu1  ;;  %v3826_v9 = vpop.f32.mrf.mxu3 }
 0x4ff   :  { %v4673_v61 = vsel %vm4545_vm2, %v4481_v48, %v4609_v11  ;;  %v3900_v62 = vadd.f32 %v3826_v9, %v3290_v17  ;;  %v2904_v50 = vadd.f32 %v2832_v46, %v8723_v22 }
 0x500   :  { %4737 = vst [vmem:[%s8581_s3 + $0x1d0] sm:$0xff] %v4673_v61 }
 0x501   :  { %v4414_v53 = vadd.f32 %v4340_v33, %v3900_v62 }
 0x503   :  { %v4482_v1 = vadd.f32 %v8386_v4, %v4414_v53  ;;  %v4343_v54 = vpop.f32.mrf.mxu0 }
 0x504   :  { %v3219_v12 = vpop.f32.mrf.mxu2 }
 0x505   :  { %vm4546_vm3 = vcmp.gt.f32.partialorder %v4482_v1, 0.0  ;;  %v4610_v13 = vmul.f32 0.1, %v4482_v1  ;;  %v3291_v15 = vadd.f32 %v3219_v12, %v2904_v50 }
 0x506   :  { %v2835_v0 = vpop.f32.mrf.mxu1  ;;  %v3829_v41 = vpop.f32.mrf.mxu3 }
 0x507   :  { %v4674_v44 = vsel %vm4546_vm3, %v4482_v1, %v4610_v13  ;;  %v3901_v39 = vadd.f32 %v3829_v41, %v3291_v15  ;;  %v2905_v63 = vadd.f32 %v2835_v0, %v8724_v3 }
 0x508   :  { %4738 = vst [vmem:[%s8581_s3 + $0x1d8] sm:$0xff] %v4674_v44 }
 0x509   :  { %v4415_v52 = vadd.f32 %v4343_v54, %v3901_v39 }
 0x50b   :  { %v4483_v18 = vadd.f32 %v8386_v4, %v4415_v52  ;;  %v4346_v14 = vpop.f32.mrf.mxu0 }
 0x50c   :  { %v3222_v36 = vpop.f32.mrf.mxu2 }
 0x50d   :  { %vm4547_vm4 = vcmp.gt.f32.partialorder %v4483_v18, 0.0  ;;  %v4611_v35 = vmul.f32 0.1, %v4483_v18  ;;  %v3292_v10 = vadd.f32 %v3222_v36, %v2905_v63 }
 0x50e   :  { %v2838_v43 = vpop.f32.mrf.mxu1  ;;  %v3832_v58 = vpop.f32.mrf.mxu3 }
 0x50f   :  { %v4675_v55 = vsel %vm4547_vm4, %v4483_v18, %v4611_v35  ;;  %v3902_v7 = vadd.f32 %v3832_v58, %v3292_v10  ;;  %v2906_v57 = vadd.f32 %v2838_v43, %v7424_v19 }
 0x510   :  { %4739 = vst [vmem:[%s8581_s3 + $0x1e0] sm:$0xff] %v4675_v55 }
 0x511   :  { %v4416_v30 = vadd.f32 %v4346_v14, %v3902_v7 }
 0x513   :  { %v4484_v59 = vadd.f32 %v8386_v4, %v4416_v30  ;;  %v4349_v8 = vpop.f32.mrf.mxu0 }
 0x514   :  { %v3225_v27 = vpop.f32.mrf.mxu2 }
 0x515   :  { %vm4548_vm5 = vcmp.gt.f32.partialorder %v4484_v59, 0.0  ;;  %v4612_v47 = vmul.f32 0.1, %v4484_v59  ;;  %v3293_v40 = vadd.f32 %v3225_v27, %v2906_v57 }
 0x516   :  { %v3835_v56 = vpop.f32.mrf.mxu3  ;;  %v2841_v21 = vpop.f32.mrf.mxu1 }
 0x517   :  { %v4676_v2 = vsel %vm4548_vm5, %v4484_v59, %v4612_v47  ;;  %v3903_v5 = vadd.f32 %v3835_v56, %v3293_v40  ;;  %v2907_v38 = vadd.f32 %v2841_v21, %v8725_v29 }
 0x518   :  { %4740 = vst [vmem:[%s8581_s3 + $0x1e8] sm:$0xff] %v4676_v2 }
 0x519   :  { %v4417_v51 = vadd.f32 %v4349_v8, %v3903_v5 }
 0x51b   :  { %v4485_v19 = vadd.f32 %v8386_v4, %v4417_v51  ;;  %v4352_v23 = vpop.f32.mrf.mxu0 }
 0x51c   :  { %v3228_v37 = vpop.f32.mrf.mxu2 }
 0x51d   :  { %vm4549_vm6 = vcmp.gt.f32.partialorder %v4485_v19, 0.0  ;;  %v4613_v16 = vmul.f32 0.1, %v4485_v19  ;;  %v3294_v25 = vadd.f32 %v3228_v37, %v2907_v38 }
 0x51e   :  { %v3838_v6 = vpop.f32.mrf.mxu3 }
 0x51f   :  { %v4677_v28 = vsel %vm4549_vm6, %v4485_v19, %v4613_v16  ;;  %v3904_v42 = vadd.f32 %v3838_v6, %v3294_v25 }
 0x520   :  { %4741 = vst [vmem:[%s8581_s3 + $0x1f0] sm:$0xff] %v4677_v28 }
 0x521   :  { %v4418_v49 = vadd.f32 %v4352_v23, %v3904_v42 }
 0x523   :  { %v4486_v60 = vadd.f32 %v8386_v4, %v4418_v49 }
 0x525   :  { %vm4550_vm0 = vcmp.gt.f32.partialorder %v4486_v60, 0.0  ;;  %v4614_v32 = vmul.f32 0.1, %v4486_v60 }
 0x527   :  { %v4678_v45 = vsel %vm4550_vm0, %v4486_v60, %v4614_v32 }
 0x528   :  { %4742 = vst [vmem:[%s8581_s3 + $0x1f8] sm:$0xff] %v4678_v45 }

</bundles_post_ra>
